<compile_context>
chip_gen: v6e
topology: v6e:2x2x1
jax: 0.10.0
libtpu: 0.0.40
codegen_flags: <defaults>
</compile_context>

<pallas_src>
import math
from functools import partial

import numpy as np
import jax
import jax.numpy as jnp
from jax.experimental import pallas as pl
from jax.experimental.pallas import tpu as pltpu


# bf16 operands & inter-kernel streams (native MXU path on v5e/v6e/v7x);
# matmul accumulation stays f32 via preferred_element_type.
MATMUL_DTYPE = jnp.bfloat16
LN_EPS = 1e-5


# ----------------------------------------------------------------------------
# Pure-python / numpy helpers (mirror the PyTorch reference exactly)
# ----------------------------------------------------------------------------
def get_window_size(x_size, window_size, shift_size=None):
    uws = list(window_size)
    if shift_size is not None:
        uss = list(shift_size)
    for i in range(len(x_size)):
        if x_size[i] <= window_size[i]:
            uws[i] = x_size[i]
            if shift_size is not None:
                uss[i] = 0
    if shift_size is None:
        return tuple(uws)
    return tuple(uws), tuple(uss)


def window_partition(x, ws):
    B, D, H, W, C = x.shape
    x = x.reshape(B, D // ws[0], ws[0], H // ws[1], ws[1], W // ws[2], ws[2], C)
    return x.transpose(0, 1, 3, 5, 2, 4, 6, 7).reshape(-1, ws[0] * ws[1] * ws[2], C)


def window_reverse(windows, ws, B, D, H, W):
    x = windows.reshape(B, D // ws[0], H // ws[1], W // ws[2], ws[0], ws[1], ws[2], -1)
    return x.transpose(0, 1, 4, 2, 5, 3, 6, 7).reshape(B, D, H, W, -1)


def _window_partition_np(x, ws):
    B, D, H, W, C = x.shape
    x = x.reshape(B, D // ws[0], ws[0], H // ws[1], ws[1], W // ws[2], ws[2], C)
    return x.transpose(0, 1, 3, 5, 2, 4, 6, 7).reshape(-1, ws[0] * ws[1] * ws[2], C)


def compute_mask_np(D, H, W, ws, ss):
    img_mask = np.zeros((1, D, H, W, 1), np.float32)
    cnt = 0
    for d in (slice(-ws[0]), slice(-ws[0], -ss[0]), slice(-ss[0], None)):
        for h in (slice(-ws[1]), slice(-ws[1], -ss[1]), slice(-ss[1], None)):
            for w in (slice(-ws[2]), slice(-ws[2], -ss[2]), slice(-ss[2], None)):
                img_mask[:, d, h, w, :] = cnt
                cnt += 1
    mw = _window_partition_np(img_mask, ws).squeeze(-1)           # (nW, N)
    attn_mask = mw[:, None, :] - mw[:, :, None]                   # (nW, N, N)
    return np.where(attn_mask != 0, -100.0, 0.0).astype(np.float32)


def relative_position_index_np(ws):
    wd, wh, ww = ws
    coords = np.stack(np.meshgrid(np.arange(wd), np.arange(wh), np.arange(ww),
                                  indexing="ij"))
    cf = coords.reshape(3, -1)
    rel = (cf[:, :, None] - cf[:, None, :]).transpose(1, 2, 0).astype(np.int64)
    rel[:, :, 0] += wd - 1
    rel[:, :, 1] += wh - 1
    rel[:, :, 2] += ww - 1
    rel[:, :, 0] *= (2 * wh - 1) * (2 * ww - 1)
    rel[:, :, 1] *= (2 * ww - 1)
    return rel.sum(-1)                                            # (N, N)


# ----------------------------------------------------------------------------
# Tiling / compiler-params helpers
# ----------------------------------------------------------------------------
_VMEM_LIMIT_CACHE = [False, None]


def _vmem_limit_bytes():
    """Raise the scoped-VMEM limit from the queried chip capacity (v5e/v6e
    default to 16/32 MiB scoped); fall back to the default if the query is
    unavailable."""
    if not _VMEM_LIMIT_CACHE[0]:
        _VMEM_LIMIT_CACHE[0] = True
        try:
            cap = pltpu.get_tpu_info().vmem_capacity_bytes
            _VMEM_LIMIT_CACHE[1] = int(cap) * 3 // 4
        except Exception:
            _VMEM_LIMIT_CACHE[1] = None
    return _VMEM_LIMIT_CACHE[1]


def _cparams():
    return pltpu.CompilerParams(dimension_semantics=("parallel",),
                                vmem_limit_bytes=_vmem_limit_bytes())


def _row_tile(M, max_tile=1024):
    """Row tile for the flat (M, C) kernels.  Guarantee >=2 grid steps (so
    v7x's two TensorCores both get work), prefer >=4 steps (DMA/compute
    overlap), and keep tiles >=128 rows where possible for HBM efficiency.
    Cap at 1024 rows so double-buffered activation streams stay well inside
    v7x's 64 MiB VMEM at real Swin widths."""
    if M <= 16:
        return M
    cands = [t for t in (1024, 512, 256, 128, 64, 32, 16, 8)
             if t <= max_tile and M % t == 0]
    if not cands:
        return M
    for t in cands:
        if M // t >= 4 and t >= 128:
            return t
    for t in cands:
        if M // t >= 2:
            return t
    return cands[-1]


def _choose_window_block(Bn, nW, N, C, itemsize, max_bytes=2 << 20):
    """Windows per grid step for the attention kernel.  Must divide nW (mask
    periodicity -> cheap modulo index_map).  Prefer >=4 grid steps so the
    BlockSpec double-buffering actually overlaps DMA with compute, accept >=2
    (v7x two TCs), else 1."""
    divs = sorted((d for d in range(1, nW + 1) if nW % d == 0), reverse=True)
    per_win = N * 4 * C * itemsize + 2 * N * N * 4   # qkv + out streams, bias/mask
    for min_steps in (4, 2, 1):
        for d in divs:
            if Bn // d >= min_steps and d * per_win <= max_bytes:
                return d
    return 1


def _gelu_erf(x):
    """Exact-style GELU: 0.5*x*(1+erf(x/sqrt(2))) with erf evaluated via the
    Abramowitz & Stegun 7.1.26 polynomial (|err| < 1.5e-7).  Uses only ops
    (exp/div/where) guaranteed to lower in Mosaic."""
    z = x * (1.0 / math.sqrt(2.0))
    a = jnp.abs(z)
    t = 1.0 / (1.0 + 0.3275911 * a)
    poly = t * (0.254829592 + t * (-0.284496736 + t * (1.421413741
                + t * (-1.453152027 + t * 1.061405429))))
    erf_abs = 1.0 - poly * jnp.exp(-a * a)
    erf = jnp.where(z >= 0.0, erf_abs, -erf_abs)
    return 0.5 * x * (1.0 + erf)


# ----------------------------------------------------------------------------
# Kernel A: fused LayerNorm1 + QKV projection
# ----------------------------------------------------------------------------
def _ln_qkv_kernel(x_ref, g_ref, b_ref, w_ref, o_ref, *, eps):
    x = x_ref[...].astype(jnp.float32)
    mu = jnp.mean(x, axis=-1, keepdims=True)
    xc = x - mu
    var = jnp.mean(xc * xc, axis=-1, keepdims=True)
    xn = xc * jax.lax.rsqrt(var + eps) * g_ref[...] + b_ref[...]
    o_ref[...] = jnp.dot(xn.astype(MATMUL_DTYPE), w_ref[...],
                         preferred_element_type=jnp.float32).astype(o_ref.dtype)


def ln_qkv(x2d, gamma, beta, wqkv, eps=LN_EPS):
    M, C = x2d.shape
    C3 = wqkv.shape[1]
    tm = _row_tile(M)
    assert M % tm == 0, f"row tile {tm} must divide M={M}"
    return pl.pallas_call(
        partial(_ln_qkv_kernel, eps=eps),
        out_shape=jax.ShapeDtypeStruct((M, C3), MATMUL_DTYPE),
        grid=(M // tm,),
        in_specs=[
            pl.BlockSpec((tm, C), lambda i: (i, 0)),
            pl.BlockSpec((1, C), lambda i: (0, 0)),
            pl.BlockSpec((1, C), lambda i: (0, 0)),
            pl.BlockSpec((C, C3), lambda i: (0, 0)),
        ],
        out_specs=pl.BlockSpec((tm, C3), lambda i: (i, 0)),
        compiler_params=_cparams(),
    )(x2d, gamma.reshape(1, C), beta.reshape(1, C), wqkv.astype(MATMUL_DTYPE))


# ----------------------------------------------------------------------------
# Kernel B: per-window attention (scores + bias(+mask) + softmax + PV)
# ----------------------------------------------------------------------------
def _attn_core_kernel(*refs, num_heads, scale, with_mask, dim):
    if with_mask:
        qkv_ref, bias_ref, mask_ref, o_ref = refs
    else:
        qkv_ref, bias_ref, o_ref = refs
        mask_ref = None
    C = dim
    hd = C // num_heads
    qkv = qkv_ref[...]                                   # (Gw, N, 3C) bf16
    bias = bias_ref[...].astype(jnp.float32)             # (nH, N, N)
    if with_mask:
        mask = mask_ref[...].astype(jnp.float32)         # (Gw, N, N)
    outs = []
    # Static (unrolled) loop over heads: head split happens here via static
    # slices of the lane-dense qkv block, never in HBM.
    for h in range(num_heads):
        qh = qkv[:, :, h * hd:(h + 1) * hd]
        kh = qkv[:, :, C + h * hd:C + (h + 1) * hd]
        vh = qkv[:, :, 2 * C + h * hd:2 * C + (h + 1) * hd]
        s = jnp.einsum('gqd,gkd->gqk', qh, kh,
                       preferred_element_type=jnp.float32) * scale
        s = s + bias[h]
        if with_mask:
            s = s + mask
        s = s - jnp.max(s, axis=-1, keepdims=True)
        p = jnp.exp(s)
        p = p / jnp.sum(p, axis=-1, keepdims=True)       # exact divide (numerics)
        outs.append(jnp.einsum('gqk,gkd->gqd', p.astype(vh.dtype), vh,
                               preferred_element_type=jnp.float32))
    # Recombine heads inside the kernel -> one full-width (Gw, N, C) store.
    o_ref[...] = jnp.concatenate(outs, axis=-1).astype(o_ref.dtype)


def window_attention(qkv_w, rel_bias, mask, *, num_heads, scale, nW):
    """qkv_w: (Bn, N, 3C) ordered (batch, window).  rel_bias: (nH, N, N).
    mask: (nW, N, N) or None (no shift)."""
    Bn, N, C3 = qkv_w.shape
    C = C3 // 3
    with_mask = mask is not None
    Gw = _choose_window_block(Bn, nW, N, C, jnp.dtype(qkv_w.dtype).itemsize)
    assert Bn % Gw == 0 and nW % Gw == 0
    nblk_mask = nW // Gw

    in_specs = [
        pl.BlockSpec((Gw, N, C3), lambda g: (g, 0, 0)),
        pl.BlockSpec((num_heads, N, N), lambda g: (0, 0, 0)),
    ]
    inputs = [qkv_w, rel_bias]
    if with_mask:
        in_specs.append(pl.BlockSpec((Gw, N, N), lambda g: (g % nblk_mask, 0, 0)))
        inputs.append(mask)

    return pl.pallas_call(
        partial(_attn_core_kernel, num_heads=num_heads, scale=scale,
                with_mask=with_mask, dim=C),
        out_shape=jax.ShapeDtypeStruct((Bn, N, C), MATMUL_DTYPE),
        grid=(Bn // Gw,),
        in_specs=in_specs,
        out_specs=pl.BlockSpec((Gw, N, C), lambda g: (g, 0, 0)),
        compiler_params=_cparams(),
    )(*inputs)


# ----------------------------------------------------------------------------
# Kernel C: fused output projection + residual + LayerNorm2 + MLP + residual
# ----------------------------------------------------------------------------
def _proj_mlp_kernel(attn_ref, x_ref, wp_ref, bp_ref, g2_ref, b2_ref,
                     w1_ref, b1_ref, w2_ref, b2m_ref, o_ref, *, eps):
    a = attn_ref[...].astype(MATMUL_DTYPE)
    y = (x_ref[...].astype(jnp.float32)
         + jnp.dot(a, wp_ref[...], preferred_element_type=jnp.float32)
         + bp_ref[...])
    mu = jnp.mean(y, axis=-1, keepdims=True)
    yc = y - mu
    var = jnp.mean(yc * yc, axis=-1, keepdims=True)
    yn = yc * jax.lax.rsqrt(var + eps) * g2_ref[...] + b2_ref[...]
    h = jnp.dot(yn.astype(MATMUL_DTYPE), w1_ref[...],
                preferred_element_type=jnp.float32) + b1_ref[...]
    h = _gelu_erf(h)
    o_ref[...] = (y + jnp.dot(h.astype(MATMUL_DTYPE), w2_ref[...],
                              preferred_element_type=jnp.float32)
                  + b2m_ref[...]).astype(o_ref.dtype)


def proj_mlp(attn2d, x2d, wproj, bproj, g2, b2, w1, b1m, w2, b2m, eps=LN_EPS):
    M, C = x2d.shape
    Hd = w1.shape[1]
    tm = _row_tile(M)
    assert M % tm == 0, f"row tile {tm} must divide M={M}"
    # TODO(synk): for large C on v7x, mark wp/w1/w2 specs pipeline_mode=
    # pl.Buffered(1) and loop the MLP over hidden-dim chunks to stay in 64 MiB.
    return pl.pallas_call(
        partial(_proj_mlp_kernel, eps=eps),
        out_shape=jax.ShapeDtypeStruct((M, C), jnp.float32),
        grid=(M // tm,),
        in_specs=[
            pl.BlockSpec((tm, C), lambda i: (i, 0)),
            pl.BlockSpec((tm, C), lambda i: (i, 0)),
            pl.BlockSpec((C, C), lambda i: (0, 0)),
            pl.BlockSpec((1, C), lambda i: (0, 0)),
            pl.BlockSpec((1, C), lambda i: (0, 0)),
            pl.BlockSpec((1, C), lambda i: (0, 0)),
            pl.BlockSpec((C, Hd), lambda i: (0, 0)),
            pl.BlockSpec((1, Hd), lambda i: (0, 0)),
            pl.BlockSpec((Hd, C), lambda i: (0, 0)),
            pl.BlockSpec((1, C), lambda i: (0, 0)),
        ],
        out_specs=pl.BlockSpec((tm, C), lambda i: (i, 0)),
        compiler_params=_cparams(),
    )(attn2d, x2d, wproj.astype(MATMUL_DTYPE), bproj.reshape(1, C),
      g2.reshape(1, C), b2.reshape(1, C), w1.astype(MATMUL_DTYPE),
      b1m.reshape(1, Hd), w2.astype(MATMUL_DTYPE), b2m.reshape(1, C))


# ----------------------------------------------------------------------------
# Swin block / BasicLayer forward (glue in plain JAX, jit-compiled)
# ----------------------------------------------------------------------------
def swin_block_forward(x, p, window_size, shift_size, attn_mask, rpi_flat,
                       num_heads):
    B, D, H, W, C = x.shape
    ws, ss = get_window_size((D, H, W), window_size, shift_size)
    N = ws[0] * ws[1] * ws[2]
    nH = num_heads
    hd = C // nH
    scale = hd ** (-0.5)
    M = B * D * H * W
    x2d = x.reshape(M, C)

    # The "LN1+QKV before pad/shift/window-partition" reorder is only valid
    # because qkv_bias=False (padded rows project to exactly zero).
    assert "bqkv" not in p, "qkv_bias=True is not supported by this fused ordering"

    # Fused LayerNorm1 + QKV on all rows at once (bf16 stream out).
    qkv2d = ln_qkv(x2d, p["g1"], p["b1"], p["wqkv"])              # (M, 3C) bf16

    # pad to multiple of window size, then shift + window partition
    pad_d1 = (ws[0] - D % ws[0]) % ws[0]
    pad_b = (ws[1] - H % ws[1]) % ws[1]
    pad_r = (ws[2] - W % ws[2]) % ws[2]
    qkv5 = qkv2d.reshape(B, D, H, W, 3 * C)
    qkv5 = jnp.pad(qkv5, ((0, 0), (0, pad_d1), (0, pad_b), (0, pad_r), (0, 0)))
    _, Dp, Hp, Wp, _ = qkv5.shape
    shifted = any(i > 0 for i in ss)
    if shifted:
        qkv5 = jnp.roll(qkv5, shift=(-ss[0], -ss[1], -ss[2]), axis=(1, 2, 3))
    qkv_w = window_partition(qkv5, ws)                            # (Bn, N, 3C)
    Bn = qkv_w.shape[0]
    nW = Bn // B

    # Relative position bias gather (tiny, XLA side).
    rel_bias = jnp.take(p["rpb_table"], rpi_flat, axis=0)         # (N*N, nH)
    rel_bias = rel_bias.reshape(N, N, nH).transpose(2, 0, 1)      # (nH, N, N)

    attn_w = window_attention(qkv_w, rel_bias,
                              attn_mask if shifted else None,
                              num_heads=nH, scale=scale, nW=nW)   # (Bn, N, C) bf16

    # reverse windows, unshift, crop (heads already recombined in-kernel)
    xo = window_reverse(attn_w, ws, B, Dp, Hp, Wp)
    if shifted:
        xo = jnp.roll(xo, shift=(ss[0], ss[1], ss[2]), axis=(1, 2, 3))
    xo = xo[:, :D, :H, :W, :].reshape(M, C)

    # Fused: output projection + residual + LayerNorm2 + MLP + residual
    out2d = proj_mlp(xo, x2d, p["wproj"], p["bproj"], p["g2"], p["b2"],
                     p["w1"], p["b1m"], p["w2"], p["b2m"])
    return out2d.reshape(B, D, H, W, C)


def basic_layer_forward(x, blocks_params, window_size, num_heads):
    # TODO(synk): downsample (PatchMerging) is None in this config; not implemented.
    B, D, H, W, C = x.shape
    shift_base = [i // 2 for i in window_size]
    ws, ss = get_window_size((D, H, W), window_size, shift_base)
    Dp = int(math.ceil(D / ws[0])) * ws[0]
    Hp = int(math.ceil(H / ws[1])) * ws[1]
    Wp = int(math.ceil(W / ws[2])) * ws[2]
    attn_mask = jnp.asarray(compute_mask_np(Dp, Hp, Wp, ws, ss))  # (nW, N, N)
    rpi_flat = jnp.asarray(relative_position_index_np(ws).reshape(-1), jnp.int32)
    for i, p in enumerate(blocks_params):
        blk_shift = [0, 0, 0] if i % 2 == 0 else shift_base
        x = swin_block_forward(x, p, window_size, blk_shift, attn_mask,
                               rpi_flat, num_heads)
    return x.reshape(B, D, H, W, -1)


# ----------------------------------------------------------------------------
# Deterministic parameter init (qkv_bias=False, as in BasicLayer defaults)
# ----------------------------------------------------------------------------
def init_block_params(key, dim, num_heads, window_size, mlp_ratio):
    wd, wh, ww = window_size
    hidden = int(dim * mlp_ratio)
    n_rel = (2 * wd - 1) * (2 * wh - 1) * (2 * ww - 1)
    ks = jax.random.split(key, 5)
    f32 = jnp.float32
    return {
        "g1": jnp.ones((dim,), f32), "b1": jnp.zeros((dim,), f32),
        "g2": jnp.ones((dim,), f32), "b2": jnp.zeros((dim,), f32),
        "rpb_table": 0.02 * jax.random.normal(ks[0], (n_rel, num_heads), f32),
        "wqkv": 0.02 * jax.random.normal(ks[1], (dim, 3 * dim), f32),
        "wproj": 0.02 * jax.random.normal(ks[2], (dim, dim), f32),
        "bproj": jnp.zeros((dim,), f32),
        "w1": 0.02 * jax.random.normal(ks[3], (dim, hidden), f32),
        "b1m": jnp.zeros((hidden,), f32),
        "w2": 0.02 * jax.random.normal(ks[4], (hidden, dim), f32),
        "b2m": jnp.zeros((dim,), f32),
    }


if __name__ == "__main__":
    # small config consistent with the module: dim=32, heads=4, depth=2,
    # window=(2,4,4), input video feature of shape (B, D, H, W, C)
    B, D, H, W, C = 2, 4, 8, 8, 32
    num_heads = 4
    depth = 2
    window_size = [2, 4, 4]
    mlp_ratio = 4.0

    key = jax.random.PRNGKey(0)
    kx, kp = jax.random.split(key)
    x = jax.random.normal(kx, (B, D, H, W, C), jnp.float32)
    block_keys = jax.random.split(kp, depth)
    blocks = [init_block_params(k, C, num_heads, window_size, mlp_ratio)
              for k in block_keys]

    fwd = jax.jit(partial(basic_layer_forward,
                          window_size=tuple(window_size), num_heads=num_heads))
    out = fwd(x, blocks)
    out = jax.block_until_ready(out)
    assert out.shape == (B, D, H, W, C)
    assert bool(jnp.all(jnp.isfinite(out)))
    print("KERNEL_OK")
</pallas_src>

<mosaic_0001>
module attributes {stable_mosaic.version = 11 : i64} {
  func.func @_ln_qkv_kernel(%arg0: i32, %arg1: memref<128x32xf32, #tpu.memory_space<vmem>>, %arg2: memref<1x32xf32, #tpu.memory_space<vmem>>, %arg3: memref<1x32xf32, #tpu.memory_space<vmem>>, %arg4: memref<32x96xbf16, #tpu.memory_space<vmem>>, %arg5: memref<128x96xbf16, #tpu.memory_space<vmem>>) attributes {dimension_semantics = [#tpu.dimension_semantics<parallel>], iteration_bounds = array<i64: 4>, scalar_prefetch = 0 : i64, scratch_operands = 0 : i64, tpu.core_type = #tpu.core_type<tc>, window_params = [{transform_indices = @transform_0, window_bounds = array<i64: 128, 32>}, {pipeline_mode = #tpu.pipeline_mode<synchronous>, transform_indices = @transform_1, window_bounds = array<i64: 1, 32>}, {pipeline_mode = #tpu.pipeline_mode<synchronous>, transform_indices = @transform_2, window_bounds = array<i64: 1, 32>}, {pipeline_mode = #tpu.pipeline_mode<synchronous>, transform_indices = @transform_3, window_bounds = array<i64: 32, 96>}, {transform_indices = @transform_4, window_bounds = array<i64: 128, 96>}]} {
    %c0 = arith.constant 0 : index
    %c0_0 = arith.constant 0 : index
    %0 = vector.load %arg1[%c0, %c0_0] : memref<128x32xf32, #tpu.memory_space<vmem>>, vector<128x32xf32>
    %cst = arith.constant dense<0.000000e+00> : vector<128xf32>
    %1 = vector.multi_reduction <add>, %0, %cst [1] : vector<128x32xf32> to vector<128xf32>
    %2 = vector.shape_cast %1 : vector<128xf32> to vector<128x1xf32>
    %cst_1 = arith.constant 3.200000e+01 : f32
    %3 = vector.broadcast %cst_1 : f32 to vector<128x1xf32>
    %4 = arith.divf %2, %3 : vector<128x1xf32>
    %5 = vector.broadcast %4 : vector<128x1xf32> to vector<128x32xf32>
    %6 = arith.subf %0, %5 : vector<128x32xf32>
    %7 = arith.mulf %6, %6 : vector<128x32xf32>
    %cst_2 = arith.constant dense<0.000000e+00> : vector<128xf32>
    %8 = vector.multi_reduction <add>, %7, %cst_2 [1] : vector<128x32xf32> to vector<128xf32>
    %9 = vector.shape_cast %8 : vector<128xf32> to vector<128x1xf32>
    %cst_3 = arith.constant 3.200000e+01 : f32
    %10 = vector.broadcast %cst_3 : f32 to vector<128x1xf32>
    %11 = arith.divf %9, %10 : vector<128x1xf32>
    %cst_4 = arith.constant 9.99999974E-6 : f32
    %12 = vector.broadcast %cst_4 : f32 to vector<128x1xf32>
    %13 = arith.addf %11, %12 : vector<128x1xf32>
    %14 = math.rsqrt %13 : vector<128x1xf32>
    %15 = vector.broadcast %14 : vector<128x1xf32> to vector<128x32xf32>
    %16 = arith.mulf %6, %15 : vector<128x32xf32>
    %c0_5 = arith.constant 0 : index
    %c0_6 = arith.constant 0 : index
    %17 = vector.load %arg2[%c0_5, %c0_6] : memref<1x32xf32, #tpu.memory_space<vmem>>, vector<1x32xf32>
    %18 = vector.broadcast %17 : vector<1x32xf32> to vector<128x32xf32>
    %19 = arith.mulf %16, %18 : vector<128x32xf32>
    %c0_7 = arith.constant 0 : index
    %c0_8 = arith.constant 0 : index
    %20 = vector.load %arg3[%c0_7, %c0_8] : memref<1x32xf32, #tpu.memory_space<vmem>>, vector<1x32xf32>
    %21 = vector.broadcast %20 : vector<1x32xf32> to vector<128x32xf32>
    %22 = arith.addf %19, %21 : vector<128x32xf32>
    %23 = arith.truncf %22 : vector<128x32xf32> to vector<128x32xbf16>
    %c0_9 = arith.constant 0 : index
    %c0_10 = arith.constant 0 : index
    %24 = vector.load %arg4[%c0_9, %c0_10] : memref<32x96xbf16, #tpu.memory_space<vmem>>, vector<32x96xbf16>
    %cst_11 = arith.constant dense<0.000000e+00> : vector<128x96xf32>
    %25 = tpu.matmul %23, %24, %cst_11 {dimension_numbers = #tpu.dot_dimension_numbers<[1], [0], [0], [1], [0, 0, 1, 1], [], []>} : vector<128x32xbf16>, vector<32x96xbf16>, vector<128x96xf32> -> vector<128x96xf32>
    %26 = arith.truncf %25 : vector<128x96xf32> to vector<128x96xbf16>
    %c0_12 = arith.constant 0 : index
    %c0_13 = arith.constant 0 : index
    %27 = vector.load %arg5[%c0_12, %c0_13] : memref<128x96xbf16, #tpu.memory_space<vmem>>, vector<128x96xbf16>
    tpu.vector_store %arg5[%c0_12, %c0_13], %26 {strides = array<i32>} : memref<128x96xbf16, #tpu.memory_space<vmem>>, vector<128x96xbf16>,
    return
  }
  func.func @transform_0(%arg0: i32) -> (i32, i32) {
    %c0_i32 = arith.constant 0 : i32
    %c0_i32_0 = arith.constant 0 : i32
    return %arg0, %c0_i32 : i32, i32
  }
  func.func @transform_1(%arg0: i32) -> (i32, i32) {
    %c0_i32 = arith.constant 0 : i32
    %c0_i32_0 = arith.constant 0 : i32
    %c0_i32_1 = arith.constant 0 : i32
    return %c0_i32, %c0_i32_0 : i32, i32
  }
  func.func @transform_2(%arg0: i32) -> (i32, i32) {
    %c0_i32 = arith.constant 0 : i32
    %c0_i32_0 = arith.constant 0 : i32
    %c0_i32_1 = arith.constant 0 : i32
    return %c0_i32, %c0_i32_0 : i32, i32
  }
  func.func @transform_3(%arg0: i32) -> (i32, i32) {
    %c0_i32 = arith.constant 0 : i32
    %c0_i32_0 = arith.constant 0 : i32
    %c0_i32_1 = arith.constant 0 : i32
    return %c0_i32, %c0_i32_0 : i32, i32
  }
  func.func @transform_4(%arg0: i32) -> (i32, i32) {
    %c0_i32 = arith.constant 0 : i32
    %c0_i32_0 = arith.constant 0 : i32
    return %arg0, %c0_i32 : i32, i32
  }
}

module attributes {stable_mosaic.version = 11 : i64} {
  func.func @_attn_core_kernel(%arg0: i32, %arg1: memref<4x32x96xbf16, #tpu.memory_space<vmem>>, %arg2: memref<4x32x32xf32, #tpu.memory_space<vmem>>, %arg3: memref<4x32x32xbf16, #tpu.memory_space<vmem>>) attributes {dimension_semantics = [#tpu.dimension_semantics<parallel>], iteration_bounds = array<i64: 4>, scalar_prefetch = 0 : i64, scratch_operands = 0 : i64, tpu.core_type = #tpu.core_type<tc>, window_params = [{transform_indices = @transform_0, window_bounds = array<i64: 4, 32, 96>}, {pipeline_mode = #tpu.pipeline_mode<synchronous>, transform_indices = @transform_1, window_bounds = array<i64: 4, 32, 32>}, {transform_indices = @transform_2, window_bounds = array<i64: 4, 32, 32>}]} {
    %c0 = arith.constant 0 : index
    %c0_0 = arith.constant 0 : index
    %c0_1 = arith.constant 0 : index
    %0 = vector.load %arg1[%c0, %c0_0, %c0_1] : memref<4x32x96xbf16, #tpu.memory_space<vmem>>, vector<4x32x96xbf16>
    %c0_2 = arith.constant 0 : index
    %c0_3 = arith.constant 0 : index
    %c0_4 = arith.constant 0 : index
    %1 = vector.load %arg2[%c0_2, %c0_3, %c0_4] : memref<4x32x32xf32, #tpu.memory_space<vmem>>, vector<4x32x32xf32>
    %2 = vector.extract_strided_slice %0 {offsets = [0, 0, 0], sizes = [4, 32, 8], strides = [1, 1, 1]} : vector<4x32x96xbf16> to vector<4x32x8xbf16>
    %3 = vector.extract_strided_slice %0 {offsets = [0, 0, 32], sizes = [4, 32, 8], strides = [1, 1, 1]} : vector<4x32x96xbf16> to vector<4x32x8xbf16>
    %4 = vector.extract_strided_slice %0 {offsets = [0, 0, 64], sizes = [4, 32, 8], strides = [1, 1, 1]} : vector<4x32x96xbf16> to vector<4x32x8xbf16>
    "tpu.trace_start"() <{level = 10 : i32, message = "gqd,gkd->gqk"}> : () -> ()
    %cst = arith.constant dense<0.000000e+00> : vector<4x32x32xf32>
    %5 = tpu.matmul %2, %3, %cst {dimension_numbers = #tpu.dot_dimension_numbers<[2], [2], [1], [1], [0, 0, 0, 1, 1, 1], [0], [0]>} : vector<4x32x8xbf16>, vector<4x32x8xbf16>, vector<4x32x32xf32> -> vector<4x32x32xf32>
    "tpu.trace_stop"() : () -> ()
    %cst_5 = arith.constant 0.353553385 : f32
    %6 = vector.broadcast %cst_5 : f32 to vector<4x32x32xf32>
    %7 = arith.mulf %5, %6 : vector<4x32x32xf32>
    %8 = vector.extract_strided_slice %1 {offsets = [0, 0, 0], sizes = [1, 32, 32], strides = [1, 1, 1]} : vector<4x32x32xf32> to vector<1x32x32xf32>
    %9 = vector.shape_cast %8 : vector<1x32x32xf32> to vector<32x32xf32>
    %10 = vector.shape_cast %9 : vector<32x32xf32> to vector<1x32x32xf32>
    %11 = vector.broadcast %10 : vector<1x32x32xf32> to vector<4x32x32xf32>
    %12 = arith.addf %7, %11 : vector<4x32x32xf32>
    %cst_6 = arith.constant dense<0xFF800000> : vector<4x32xf32>
    %13 = vector.multi_reduction <maximumf>, %12, %cst_6 [2] : vector<4x32x32xf32> to vector<4x32xf32>
    %14 = vector.shape_cast %13 : vector<4x32xf32> to vector<4x32x1xf32>
    %15 = vector.broadcast %14 : vector<4x32x1xf32> to vector<4x32x32xf32>
    %16 = arith.subf %12, %15 : vector<4x32x32xf32>
    %17 = math.exp %16 : vector<4x32x32xf32>
    %cst_7 = arith.constant dense<0.000000e+00> : vector<4x32xf32>
    %18 = vector.multi_reduction <add>, %17, %cst_7 [2] : vector<4x32x32xf32> to vector<4x32xf32>
    %19 = vector.shape_cast %18 : vector<4x32xf32> to vector<4x32x1xf32>
    %20 = vector.broadcast %19 : vector<4x32x1xf32> to vector<4x32x32xf32>
    %21 = arith.divf %17, %20 : vector<4x32x32xf32>
    %22 = arith.truncf %21 : vector<4x32x32xf32> to vector<4x32x32xbf16>
    "tpu.trace_start"() <{level = 10 : i32, message = "gqk,gkd->gqd"}> : () -> ()
    %cst_8 = arith.constant dense<0.000000e+00> : vector<4x32x8xf32>
    %23 = tpu.matmul %22, %4, %cst_8 {dimension_numbers = #tpu.dot_dimension_numbers<[2], [1], [1], [2], [0, 0, 0, 1, 1, 2], [0], [0]>} : vector<4x32x32xbf16>, vector<4x32x8xbf16>, vector<4x32x8xf32> -> vector<4x32x8xf32>
    "tpu.trace_stop"() : () -> ()
    %24 = vector.extract_strided_slice %0 {offsets = [0, 0, 8], sizes = [4, 32, 8], strides = [1, 1, 1]} : vector<4x32x96xbf16> to vector<4x32x8xbf16>
    %25 = vector.extract_strided_slice %0 {offsets = [0, 0, 40], sizes = [4, 32, 8], strides = [1, 1, 1]} : vector<4x32x96xbf16> to vector<4x32x8xbf16>
    %26 = vector.extract_strided_slice %0 {offsets = [0, 0, 72], sizes = [4, 32, 8], strides = [1, 1, 1]} : vector<4x32x96xbf16> to vector<4x32x8xbf16>
    "tpu.trace_start"() <{level = 10 : i32, message = "gqd,gkd->gqk"}> : () -> ()
    %cst_9 = arith.constant dense<0.000000e+00> : vector<4x32x32xf32>
    %27 = tpu.matmul %24, %25, %cst_9 {dimension_numbers = #tpu.dot_dimension_numbers<[2], [2], [1], [1], [0, 0, 0, 1, 1, 1], [0], [0]>} : vector<4x32x8xbf16>, vector<4x32x8xbf16>, vector<4x32x32xf32> -> vector<4x32x32xf32>
    "tpu.trace_stop"() : () -> ()
    %cst_10 = arith.constant 0.353553385 : f32
    %28 = vector.broadcast %cst_10 : f32 to vector<4x32x32xf32>
    %29 = arith.mulf %27, %28 : vector<4x32x32xf32>
    %30 = vector.extract_strided_slice %1 {offsets = [1, 0, 0], sizes = [1, 32, 32], strides = [1, 1, 1]} : vector<4x32x32xf32> to vector<1x32x32xf32>
    %31 = vector.shape_cast %30 : vector<1x32x32xf32> to vector<32x32xf32>
    %32 = vector.shape_cast %31 : vector<32x32xf32> to vector<1x32x32xf32>
    %33 = vector.broadcast %32 : vector<1x32x32xf32> to vector<4x32x32xf32>
    %34 = arith.addf %29, %33 : vector<4x32x32xf32>
    %cst_11 = arith.constant dense<0xFF800000> : vector<4x32xf32>
    %35 = vector.multi_reduction <maximumf>, %34, %cst_11 [2] : vector<4x32x32xf32> to vector<4x32xf32>
    %36 = vector.shape_cast %35 : vector<4x32xf32> to vector<4x32x1xf32>
    %37 = vector.broadcast %36 : vector<4x32x1xf32> to vector<4x32x32xf32>
    %38 = arith.subf %34, %37 : vector<4x32x32xf32>
    %39 = math.exp %38 : vector<4x32x32xf32>
    %cst_12 = arith.constant dense<0.000000e+00> : vector<4x32xf32>
    %40 = vector.multi_reduction <add>, %39, %cst_12 [2] : vector<4x32x32xf32> to vector<4x32xf32>
    %41 = vector.shape_cast %40 : vector<4x32xf32> to vector<4x32x1xf32>
    %42 = vector.broadcast %41 : vector<4x32x1xf32> to vector<4x32x32xf32>
    %43 = arith.divf %39, %42 : vector<4x32x32xf32>
    %44 = arith.truncf %43 : vector<4x32x32xf32> to vector<4x32x32xbf16>
    "tpu.trace_start"() <{level = 10 : i32, message = "gqk,gkd->gqd"}> : () -> ()
    %cst_13 = arith.constant dense<0.000000e+00> : vector<4x32x8xf32>
    %45 = tpu.matmul %44, %26, %cst_13 {dimension_numbers = #tpu.dot_dimension_numbers<[2], [1], [1], [2], [0, 0, 0, 1, 1, 2], [0], [0]>} : vector<4x32x32xbf16>, vector<4x32x8xbf16>, vector<4x32x8xf32> -> vector<4x32x8xf32>
    "tpu.trace_stop"() : () -> ()
    %46 = vector.extract_strided_slice %0 {offsets = [0, 0, 16], sizes = [4, 32, 8], strides = [1, 1, 1]} : vector<4x32x96xbf16> to vector<4x32x8xbf16>
    %47 = vector.extract_strided_slice %0 {offsets = [0, 0, 48], sizes = [4, 32, 8], strides = [1, 1, 1]} : vector<4x32x96xbf16> to vector<4x32x8xbf16>
    %48 = vector.extract_strided_slice %0 {offsets = [0, 0, 80], sizes = [4, 32, 8], strides = [1, 1, 1]} : vector<4x32x96xbf16> to vector<4x32x8xbf16>
    "tpu.trace_start"() <{level = 10 : i32, message = "gqd,gkd->gqk"}> : () -> ()
    %cst_14 = arith.constant dense<0.000000e+00> : vector<4x32x32xf32>
    %49 = tpu.matmul %46, %47, %cst_14 {dimension_numbers = #tpu.dot_dimension_numbers<[2], [2], [1], [1], [0, 0, 0, 1, 1, 1], [0], [0]>} : vector<4x32x8xbf16>, vector<4x32x8xbf16>, vector<4x32x32xf32> -> vector<4x32x32xf32>
    "tpu.trace_stop"() : () -> ()
    %cst_15 = arith.constant 0.353553385 : f32
    %50 = vector.broadcast %cst_15 : f32 to vector<4x32x32xf32>
    %51 = arith.mulf %49, %50 : vector<4x32x32xf32>
    %52 = vector.extract_strided_slice %1 {offsets = [2, 0, 0], sizes = [1, 32, 32], strides = [1, 1, 1]} : vector<4x32x32xf32> to vector<1x32x32xf32>
    %53 = vector.shape_cast %52 : vector<1x32x32xf32> to vector<32x32xf32>
    %54 = vector.shape_cast %53 : vector<32x32xf32> to vector<1x32x32xf32>
    %55 = vector.broadcast %54 : vector<1x32x32xf32> to vector<4x32x32xf32>
    %56 = arith.addf %51, %55 : vector<4x32x32xf32>
    %cst_16 = arith.constant dense<0xFF800000> : vector<4x32xf32>
    %57 = vector.multi_reduction <maximumf>, %56, %cst_16 [2] : vector<4x32x32xf32> to vector<4x32xf32>
    %58 = vector.shape_cast %57 : vector<4x32xf32> to vector<4x32x1xf32>
    %59 = vector.broadcast %58 : vector<4x32x1xf32> to vector<4x32x32xf32>
    %60 = arith.subf %56, %59 : vector<4x32x32xf32>
    %61 = math.exp %60 : vector<4x32x32xf32>
    %cst_17 = arith.constant dense<0.000000e+00> : vector<4x32xf32>
    %62 = vector.multi_reduction <add>, %61, %cst_17 [2] : vector<4x32x32xf32> to vector<4x32xf32>
    %63 = vector.shape_cast %62 : vector<4x32xf32> to vector<4x32x1xf32>
    %64 = vector.broadcast %63 : vector<4x32x1xf32> to vector<4x32x32xf32>
    %65 = arith.divf %61, %64 : vector<4x32x32xf32>
    %66 = arith.truncf %65 : vector<4x32x32xf32> to vector<4x32x32xbf16>
    "tpu.trace_start"() <{level = 10 : i32, message = "gqk,gkd->gqd"}> : () -> ()
    %cst_18 = arith.constant dense<0.000000e+00> : vector<4x32x8xf32>
    %67 = tpu.matmul %66, %48, %cst_18 {dimension_numbers = #tpu.dot_dimension_numbers<[2], [1], [1], [2], [0, 0, 0, 1, 1, 2], [0], [0]>} : vector<4x32x32xbf16>, vector<4x32x8xbf16>, vector<4x32x8xf32> -> vector<4x32x8xf32>
    "tpu.trace_stop"() : () -> ()
    %68 = vector.extract_strided_slice %0 {offsets = [0, 0, 24], sizes = [4, 32, 8], strides = [1, 1, 1]} : vector<4x32x96xbf16> to vector<4x32x8xbf16>
    %69 = vector.extract_strided_slice %0 {offsets = [0, 0, 56], sizes = [4, 32, 8], strides = [1, 1, 1]} : vector<4x32x96xbf16> to vector<4x32x8xbf16>
    %70 = vector.extract_strided_slice %0 {offsets = [0, 0, 88], sizes = [4, 32, 8], strides = [1, 1, 1]} : vector<4x32x96xbf16> to vector<4x32x8xbf16>
    "tpu.trace_start"() <{level = 10 : i32, message = "gqd,gkd->gqk"}> : () -> ()
    %cst_19 = arith.constant dense<0.000000e+00> : vector<4x32x32xf32>
    %71 = tpu.matmul %68, %69, %cst_19 {dimension_numbers = #tpu.dot_dimension_numbers<[2], [2], [1], [1], [0, 0, 0, 1, 1, 1], [0], [0]>} : vector<4x32x8xbf16>, vector<4x32x8xbf16>, vector<4x32x32xf32> -> vector<4x32x32xf32>
    "tpu.trace_stop"() : () -> ()
    %cst_20 = arith.constant 0.353553385 : f32
    %72 = vector.broadcast %cst_20 : f32 to vector<4x32x32xf32>
    %73 = arith.mulf %71, %72 : vector<4x32x32xf32>
    %74 = vector.extract_strided_slice %1 {offsets = [3, 0, 0], sizes = [1, 32, 32], strides = [1, 1, 1]} : vector<4x32x32xf32> to vector<1x32x32xf32>
    %75 = vector.shape_cast %74 : vector<1x32x32xf32> to vector<32x32xf32>
    %76 = vector.shape_cast %75 : vector<32x32xf32> to vector<1x32x32xf32>
    %77 = vector.broadcast %76 : vector<1x32x32xf32> to vector<4x32x32xf32>
    %78 = arith.addf %73, %77 : vector<4x32x32xf32>
    %cst_21 = arith.constant dense<0xFF800000> : vector<4x32xf32>
    %79 = vector.multi_reduction <maximumf>, %78, %cst_21 [2] : vector<4x32x32xf32> to vector<4x32xf32>
    %80 = vector.shape_cast %79 : vector<4x32xf32> to vector<4x32x1xf32>
    %81 = vector.broadcast %80 : vector<4x32x1xf32> to vector<4x32x32xf32>
    %82 = arith.subf %78, %81 : vector<4x32x32xf32>
    %83 = math.exp %82 : vector<4x32x32xf32>
    %cst_22 = arith.constant dense<0.000000e+00> : vector<4x32xf32>
    %84 = vector.multi_reduction <add>, %83, %cst_22 [2] : vector<4x32x32xf32> to vector<4x32xf32>
    %85 = vector.shape_cast %84 : vector<4x32xf32> to vector<4x32x1xf32>
    %86 = vector.broadcast %85 : vector<4x32x1xf32> to vector<4x32x32xf32>
    %87 = arith.divf %83, %86 : vector<4x32x32xf32>
    %88 = arith.truncf %87 : vector<4x32x32xf32> to vector<4x32x32xbf16>
    "tpu.trace_start"() <{level = 10 : i32, message = "gqk,gkd->gqd"}> : () -> ()
    %cst_23 = arith.constant dense<0.000000e+00> : vector<4x32x8xf32>
    %89 = tpu.matmul %88, %70, %cst_23 {dimension_numbers = #tpu.dot_dimension_numbers<[2], [1], [1], [2], [0, 0, 0, 1, 1, 2], [0], [0]>} : vector<4x32x32xbf16>, vector<4x32x8xbf16>, vector<4x32x8xf32> -> vector<4x32x8xf32>
    "tpu.trace_stop"() : () -> ()
    %90 = tpu.concatenate %23, %45, %67, %89 in 2 : vector<4x32x8xf32>, vector<4x32x8xf32>, vector<4x32x8xf32>, vector<4x32x8xf32> -> vector<4x32x32xf32>
    %91 = arith.truncf %90 : vector<4x32x32xf32> to vector<4x32x32xbf16>
    %c0_24 = arith.constant 0 : index
    %c0_25 = arith.constant 0 : index
    %c0_26 = arith.constant 0 : index
    %92 = vector.load %arg3[%c0_24, %c0_25, %c0_26] : memref<4x32x32xbf16, #tpu.memory_space<vmem>>, vector<4x32x32xbf16>
    tpu.vector_store %arg3[%c0_24, %c0_25, %c0_26], %91 {strides = array<i32>} : memref<4x32x32xbf16, #tpu.memory_space<vmem>>, vector<4x32x32xbf16>,
    return
  }
  func.func @transform_0(%arg0: i32) -> (i32, i32, i32) {
    %c0_i32 = arith.constant 0 : i32
    %c0_i32_0 = arith.constant 0 : i32
    %c0_i32_1 = arith.constant 0 : i32
    return %arg0, %c0_i32, %c0_i32_0 : i32, i32, i32
  }
  func.func @transform_1(%arg0: i32) -> (i32, i32, i32) {
    %c0_i32 = arith.constant 0 : i32
    %c0_i32_0 = arith.constant 0 : i32
    %c0_i32_1 = arith.constant 0 : i32
    %c0_i32_2 = arith.constant 0 : i32
    return %c0_i32, %c0_i32_0, %c0_i32_1 : i32, i32, i32
  }
  func.func @transform_2(%arg0: i32) -> (i32, i32, i32) {
    %c0_i32 = arith.constant 0 : i32
    %c0_i32_0 = arith.constant 0 : i32
    %c0_i32_1 = arith.constant 0 : i32
    return %arg0, %c0_i32, %c0_i32_0 : i32, i32, i32
  }
}

module attributes {stable_mosaic.version = 11 : i64} {
  func.func @_proj_mlp_kernel(%arg0: i32, %arg1: memref<128x32xbf16, #tpu.memory_space<vmem>>, %arg2: memref<128x32xf32, #tpu.memory_space<vmem>>, %arg3: memref<32x32xbf16, #tpu.memory_space<vmem>>, %arg4: memref<1x32xf32, #tpu.memory_space<vmem>>, %arg5: memref<1x32xf32, #tpu.memory_space<vmem>>, %arg6: memref<1x32xf32, #tpu.memory_space<vmem>>, %arg7: memref<32x128xbf16, #tpu.memory_space<vmem>>, %arg8: memref<1x128xf32, #tpu.memory_space<vmem>>, %arg9: memref<128x32xbf16, #tpu.memory_space<vmem>>, %arg10: memref<1x32xf32, #tpu.memory_space<vmem>>, %arg11: memref<128x32xf32, #tpu.memory_space<vmem>>) attributes {dimension_semantics = [#tpu.dimension_semantics<parallel>], iteration_bounds = array<i64: 4>, scalar_prefetch = 0 : i64, scratch_operands = 0 : i64, tpu.core_type = #tpu.core_type<tc>, window_params = [{transform_indices = @transform_0, window_bounds = array<i64: 128, 32>}, {transform_indices = @transform_1, window_bounds = array<i64: 128, 32>}, {pipeline_mode = #tpu.pipeline_mode<synchronous>, transform_indices = @transform_2, window_bounds = array<i64: 32, 32>}, {pipeline_mode = #tpu.pipeline_mode<synchronous>, transform_indices = @transform_3, window_bounds = array<i64: 1, 32>}, {pipeline_mode = #tpu.pipeline_mode<synchronous>, transform_indices = @transform_4, window_bounds = array<i64: 1, 32>}, {pipeline_mode = #tpu.pipeline_mode<synchronous>, transform_indices = @transform_5, window_bounds = array<i64: 1, 32>}, {pipeline_mode = #tpu.pipeline_mode<synchronous>, transform_indices = @transform_6, window_bounds = array<i64: 32, 128>}, {pipeline_mode = #tpu.pipeline_mode<synchronous>, transform_indices = @transform_7, window_bounds = array<i64: 1, 128>}, {pipeline_mode = #tpu.pipeline_mode<synchronous>, transform_indices = @transform_8, window_bounds = array<i64: 128, 32>}, {pipeline_mode = #tpu.pipeline_mode<synchronous>, transform_indices = @transform_9, window_bounds = array<i64: 1, 32>}, {transform_indices = @transform_10, window_bounds = array<i64: 128, 32>}]} {
    %c0 = arith.constant 0 : index
    %c0_0 = arith.constant 0 : index
    %0 = vector.load %arg1[%c0, %c0_0] : memref<128x32xbf16, #tpu.memory_space<vmem>>, vector<128x32xbf16>
    %c0_1 = arith.constant 0 : index
    %c0_2 = arith.constant 0 : index
    %1 = vector.load %arg2[%c0_1, %c0_2] : memref<128x32xf32, #tpu.memory_space<vmem>>, vector<128x32xf32>
    %c0_3 = arith.constant 0 : index
    %c0_4 = arith.constant 0 : index
    %2 = vector.load %arg3[%c0_3, %c0_4] : memref<32x32xbf16, #tpu.memory_space<vmem>>, vector<32x32xbf16>
    %cst = arith.constant dense<0.000000e+00> : vector<128x32xf32>
    %3 = tpu.matmul %0, %2, %cst {dimension_numbers = #tpu.dot_dimension_numbers<[1], [0], [0], [1], [0, 0, 1, 1], [], []>} : vector<128x32xbf16>, vector<32x32xbf16>, vector<128x32xf32> -> vector<128x32xf32>
    %4 = arith.addf %1, %3 : vector<128x32xf32>
    %c0_5 = arith.constant 0 : index
    %c0_6 = arith.constant 0 : index
    %5 = vector.load %arg4[%c0_5, %c0_6] : memref<1x32xf32, #tpu.memory_space<vmem>>, vector<1x32xf32>
    %6 = vector.broadcast %5 : vector<1x32xf32> to vector<128x32xf32>
    %7 = arith.addf %4, %6 : vector<128x32xf32>
    %cst_7 = arith.constant dense<0.000000e+00> : vector<128xf32>
    %8 = vector.multi_reduction <add>, %7, %cst_7 [1] : vector<128x32xf32> to vector<128xf32>
    %9 = vector.shape_cast %8 : vector<128xf32> to vector<128x1xf32>
    %cst_8 = arith.constant 3.200000e+01 : f32
    %10 = vector.broadcast %cst_8 : f32 to vector<128x1xf32>
    %11 = arith.divf %9, %10 : vector<128x1xf32>
    %12 = vector.broadcast %11 : vector<128x1xf32> to vector<128x32xf32>
    %13 = arith.subf %7, %12 : vector<128x32xf32>
    %14 = arith.mulf %13, %13 : vector<128x32xf32>
    %cst_9 = arith.constant dense<0.000000e+00> : vector<128xf32>
    %15 = vector.multi_reduction <add>, %14, %cst_9 [1] : vector<128x32xf32> to vector<128xf32>
    %16 = vector.shape_cast %15 : vector<128xf32> to vector<128x1xf32>
    %cst_10 = arith.constant 3.200000e+01 : f32
    %17 = vector.broadcast %cst_10 : f32 to vector<128x1xf32>
    %18 = arith.divf %16, %17 : vector<128x1xf32>
    %cst_11 = arith.constant 9.99999974E-6 : f32
    %19 = vector.broadcast %cst_11 : f32 to vector<128x1xf32>
    %20 = arith.addf %18, %19 : vector<128x1xf32>
    %21 = math.rsqrt %20 : vector<128x1xf32>
    %22 = vector.broadcast %21 : vector<128x1xf32> to vector<128x32xf32>
    %23 = arith.mulf %13, %22 : vector<128x32xf32>
    %c0_12 = arith.constant 0 : index
    %c0_13 = arith.constant 0 : index
    %24 = vector.load %arg5[%c0_12, %c0_13] : memref<1x32xf32, #tpu.memory_space<vmem>>, vector<1x32xf32>
    %25 = vector.broadcast %24 : vector<1x32xf32> to vector<128x32xf32>
    %26 = arith.mulf %23, %25 : vector<128x32xf32>
    %c0_14 = arith.constant 0 : index
    %c0_15 = arith.constant 0 : index
    %27 = vector.load %arg6[%c0_14, %c0_15] : memref<1x32xf32, #tpu.memory_space<vmem>>, vector<1x32xf32>
    %28 = vector.broadcast %27 : vector<1x32xf32> to vector<128x32xf32>
    %29 = arith.addf %26, %28 : vector<128x32xf32>
    %30 = arith.truncf %29 : vector<128x32xf32> to vector<128x32xbf16>
    %c0_16 = arith.constant 0 : index
    %c0_17 = arith.constant 0 : index
    %31 = vector.load %arg7[%c0_16, %c0_17] : memref<32x128xbf16, #tpu.memory_space<vmem>>, vector<32x128xbf16>
    %cst_18 = arith.constant dense<0.000000e+00> : vector<128x128xf32>
    %32 = tpu.matmul %30, %31, %cst_18 {dimension_numbers = #tpu.dot_dimension_numbers<[1], [0], [0], [1], [0, 0, 1, 1], [], []>} : vector<128x32xbf16>, vector<32x128xbf16>, vector<128x128xf32> -> vector<128x128xf32>
    %c0_19 = arith.constant 0 : index
    %c0_20 = arith.constant 0 : index
    %33 = vector.load %arg8[%c0_19, %c0_20] : memref<1x128xf32, #tpu.memory_space<vmem>>, vector<1x128xf32>
    %34 = vector.broadcast %33 : vector<1x128xf32> to vector<128x128xf32>
    %35 = arith.addf %32, %34 : vector<128x128xf32>
    %cst_21 = arith.constant 0.707106769 : f32
    %36 = vector.broadcast %cst_21 : f32 to vector<128x128xf32>
    %37 = arith.mulf %35, %36 : vector<128x128xf32>
    %38 = math.absf %37 : vector<128x128xf32>
    %cst_22 = arith.constant 0.327591091 : f32
    %39 = vector.broadcast %cst_22 : f32 to vector<128x128xf32>
    %40 = arith.mulf %39, %38 : vector<128x128xf32>
    %cst_23 = arith.constant 1.000000e+00 : f32
    %41 = vector.broadcast %cst_23 : f32 to vector<128x128xf32>
    %42 = arith.addf %41, %40 : vector<128x128xf32>
    %cst_24 = arith.constant 1.000000e+00 : f32
    %43 = vector.broadcast %cst_24 : f32 to vector<128x128xf32>
    %44 = arith.divf %43, %42 : vector<128x128xf32>
    %cst_25 = arith.constant 1.06140542 : f32
    %45 = vector.broadcast %cst_25 : f32 to vector<128x128xf32>
    %46 = arith.mulf %44, %45 : vector<128x128xf32>
    %cst_26 = arith.constant -1.45315206 : f32
    %47 = vector.broadcast %cst_26 : f32 to vector<128x128xf32>
    %48 = arith.addf %47, %46 : vector<128x128xf32>
    %49 = arith.mulf %44, %48 : vector<128x128xf32>
    %cst_27 = arith.constant 1.42141378 : f32
    %50 = vector.broadcast %cst_27 : f32 to vector<128x128xf32>
    %51 = arith.addf %50, %49 : vector<128x128xf32>
    %52 = arith.mulf %44, %51 : vector<128x128xf32>
    %cst_28 = arith.constant -0.284496725 : f32
    %53 = vector.broadcast %cst_28 : f32 to vector<128x128xf32>
    %54 = arith.addf %53, %52 : vector<128x128xf32>
    %55 = arith.mulf %44, %54 : vector<128x128xf32>
    %cst_29 = arith.constant 0.254829586 : f32
    %56 = vector.broadcast %cst_29 : f32 to vector<128x128xf32>
    %57 = arith.addf %56, %55 : vector<128x128xf32>
    %58 = arith.mulf %44, %57 : vector<128x128xf32>
    %cst_30 = arith.constant 0.000000e+00 : f32
    %59 = vector.broadcast %cst_30 : f32 to vector<128x128xf32>
    %60 = arith.subf %59, %38 : vector<128x128xf32>
    %61 = arith.mulf %60, %38 : vector<128x128xf32>
    %62 = math.exp %61 : vector<128x128xf32>
    %63 = arith.mulf %58, %62 : vector<128x128xf32>
    %cst_31 = arith.constant 1.000000e+00 : f32
    %64 = vector.broadcast %cst_31 : f32 to vector<128x128xf32>
    %65 = arith.subf %64, %63 : vector<128x128xf32>
    %cst_32 = arith.constant 0.000000e+00 : f32
    %66 = vector.broadcast %cst_32 : f32 to vector<128x128xf32>
    %67 = arith.cmpf oge, %37, %66 : vector<128x128xf32>
    %cst_33 = arith.constant 0.000000e+00 : f32
    %68 = vector.broadcast %cst_33 : f32 to vector<128x128xf32>
    %69 = arith.subf %68, %65 : vector<128x128xf32>
    %70 = arith.select %67, %65, %69 : vector<128x128xi1>, vector<128x128xf32>
    %cst_34 = arith.constant 5.000000e-01 : f32
    %71 = vector.broadcast %cst_34 : f32 to vector<128x128xf32>
    %72 = arith.mulf %71, %35 : vector<128x128xf32>
    %cst_35 = arith.constant 1.000000e+00 : f32
    %73 = vector.broadcast %cst_35 : f32 to vector<128x128xf32>
    %74 = arith.addf %73, %70 : vector<128x128xf32>
    %75 = arith.mulf %72, %74 : vector<128x128xf32>
    %76 = arith.truncf %75 : vector<128x128xf32> to vector<128x128xbf16>
    %c0_36 = arith.constant 0 : index
    %c0_37 = arith.constant 0 : index
    %77 = vector.load %arg9[%c0_36, %c0_37] : memref<128x32xbf16, #tpu.memory_space<vmem>>, vector<128x32xbf16>
    %cst_38 = arith.constant dense<0.000000e+00> : vector<128x32xf32>
    %78 = tpu.matmul %76, %77, %cst_38 {dimension_numbers = #tpu.dot_dimension_numbers<[1], [0], [0], [1], [0, 0, 1, 1], [], []>} : vector<128x128xbf16>, vector<128x32xbf16>, vector<128x32xf32> -> vector<128x32xf32>
    %79 = arith.addf %7, %78 : vector<128x32xf32>
    %c0_39 = arith.constant 0 : index
    %c0_40 = arith.constant 0 : index
    %80 = vector.load %arg10[%c0_39, %c0_40] : memref<1x32xf32, #tpu.memory_space<vmem>>, vector<1x32xf32>
    %81 = vector.broadcast %80 : vector<1x32xf32> to vector<128x32xf32>
    %82 = arith.addf %79, %81 : vector<128x32xf32>
    %c0_41 = arith.constant 0 : index
    %c0_42 = arith.constant 0 : index
    %83 = vector.load %arg11[%c0_41, %c0_42] : memref<128x32xf32, #tpu.memory_space<vmem>>, vector<128x32xf32>
    tpu.vector_store %arg11[%c0_41, %c0_42], %82 {strides = array<i32>} : memref<128x32xf32, #tpu.memory_space<vmem>>, vector<128x32xf32>,
    return
  }
  func.func @transform_0(%arg0: i32) -> (i32, i32) {
    %c0_i32 = arith.constant 0 : i32
    %c0_i32_0 = arith.constant 0 : i32
    return %arg0, %c0_i32 : i32, i32
  }
  func.func @transform_1(%arg0: i32) -> (i32, i32) {
    %c0_i32 = arith.constant 0 : i32
    %c0_i32_0 = arith.constant 0 : i32
    return %arg0, %c0_i32 : i32, i32
  }
  func.func @transform_2(%arg0: i32) -> (i32, i32) {
    %c0_i32 = arith.constant 0 : i32
    %c0_i32_0 = arith.constant 0 : i32
    %c0_i32_1 = arith.constant 0 : i32
    return %c0_i32, %c0_i32_0 : i32, i32
  }
  func.func @transform_3(%arg0: i32) -> (i32, i32) {
    %c0_i32 = arith.constant 0 : i32
    %c0_i32_0 = arith.constant 0 : i32
    %c0_i32_1 = arith.constant 0 : i32
    return %c0_i32, %c0_i32_0 : i32, i32
  }
  func.func @transform_4(%arg0: i32) -> (i32, i32) {
    %c0_i32 = arith.constant 0 : i32
    %c0_i32_0 = arith.constant 0 : i32
    %c0_i32_1 = arith.constant 0 : i32
    return %c0_i32, %c0_i32_0 : i32, i32
  }
  func.func @transform_5(%arg0: i32) -> (i32, i32) {
    %c0_i32 = arith.constant 0 : i32
    %c0_i32_0 = arith.constant 0 : i32
    %c0_i32_1 = arith.constant 0 : i32
    return %c0_i32, %c0_i32_0 : i32, i32
  }
  func.func @transform_6(%arg0: i32) -> (i32, i32) {
    %c0_i32 = arith.constant 0 : i32
    %c0_i32_0 = arith.constant 0 : i32
    %c0_i32_1 = arith.constant 0 : i32
    return %c0_i32, %c0_i32_0 : i32, i32
  }
  func.func @transform_7(%arg0: i32) -> (i32, i32) {
    %c0_i32 = arith.constant 0 : i32
    %c0_i32_0 = arith.constant 0 : i32
    %c0_i32_1 = arith.constant 0 : i32
    return %c0_i32, %c0_i32_0 : i32, i32
  }
  func.func @transform_8(%arg0: i32) -> (i32, i32) {
    %c0_i32 = arith.constant 0 : i32
    %c0_i32_0 = arith.constant 0 : i32
    %c0_i32_1 = arith.constant 0 : i32
    return %c0_i32, %c0_i32_0 : i32, i32
  }
  func.func @transform_9(%arg0: i32) -> (i32, i32) {
    %c0_i32 = arith.constant 0 : i32
    %c0_i32_0 = arith.constant 0 : i32
    %c0_i32_1 = arith.constant 0 : i32
    return %c0_i32, %c0_i32_0 : i32, i32
  }
  func.func @transform_10(%arg0: i32) -> (i32, i32) {
    %c0_i32 = arith.constant 0 : i32
    %c0_i32_0 = arith.constant 0 : i32
    return %arg0, %c0_i32 : i32, i32
  }
}

module attributes {stable_mosaic.version = 11 : i64} {
  func.func @_attn_core_kernel(%arg0: i32, %arg1: memref<4x32x96xbf16, #tpu.memory_space<vmem>>, %arg2: memref<4x32x32xf32, #tpu.memory_space<vmem>>, %arg3: memref<4x32x32xf32, #tpu.memory_space<vmem>>, %arg4: memref<4x32x32xbf16, #tpu.memory_space<vmem>>) attributes {dimension_semantics = [#tpu.dimension_semantics<parallel>], iteration_bounds = array<i64: 4>, scalar_prefetch = 0 : i64, scratch_operands = 0 : i64, tpu.core_type = #tpu.core_type<tc>, window_params = [{transform_indices = @transform_0, window_bounds = array<i64: 4, 32, 96>}, {pipeline_mode = #tpu.pipeline_mode<synchronous>, transform_indices = @transform_1, window_bounds = array<i64: 4, 32, 32>}, {transform_indices = @transform_2, window_bounds = array<i64: 4, 32, 32>}, {transform_indices = @transform_3, window_bounds = array<i64: 4, 32, 32>}]} {
    %c0 = arith.constant 0 : index
    %c0_0 = arith.constant 0 : index
    %c0_1 = arith.constant 0 : index
    %0 = vector.load %arg1[%c0, %c0_0, %c0_1] : memref<4x32x96xbf16, #tpu.memory_space<vmem>>, vector<4x32x96xbf16>
    %c0_2 = arith.constant 0 : index
    %c0_3 = arith.constant 0 : index
    %c0_4 = arith.constant 0 : index
    %1 = vector.load %arg2[%c0_2, %c0_3, %c0_4] : memref<4x32x32xf32, #tpu.memory_space<vmem>>, vector<4x32x32xf32>
    %c0_5 = arith.constant 0 : index
    %c0_6 = arith.constant 0 : index
    %c0_7 = arith.constant 0 : index
    %2 = vector.load %arg3[%c0_5, %c0_6, %c0_7] : memref<4x32x32xf32, #tpu.memory_space<vmem>>, vector<4x32x32xf32>
    %3 = vector.extract_strided_slice %0 {offsets = [0, 0, 0], sizes = [4, 32, 8], strides = [1, 1, 1]} : vector<4x32x96xbf16> to vector<4x32x8xbf16>
    %4 = vector.extract_strided_slice %0 {offsets = [0, 0, 32], sizes = [4, 32, 8], strides = [1, 1, 1]} : vector<4x32x96xbf16> to vector<4x32x8xbf16>
    %5 = vector.extract_strided_slice %0 {offsets = [0, 0, 64], sizes = [4, 32, 8], strides = [1, 1, 1]} : vector<4x32x96xbf16> to vector<4x32x8xbf16>
    "tpu.trace_start"() <{level = 10 : i32, message = "gqd,gkd->gqk"}> : () -> ()
    %cst = arith.constant dense<0.000000e+00> : vector<4x32x32xf32>
    %6 = tpu.matmul %3, %4, %cst {dimension_numbers = #tpu.dot_dimension_numbers<[2], [2], [1], [1], [0, 0, 0, 1, 1, 1], [0], [0]>} : vector<4x32x8xbf16>, vector<4x32x8xbf16>, vector<4x32x32xf32> -> vector<4x32x32xf32>
    "tpu.trace_stop"() : () -> ()
    %cst_8 = arith.constant 0.353553385 : f32
    %7 = vector.broadcast %cst_8 : f32 to vector<4x32x32xf32>
    %8 = arith.mulf %6, %7 : vector<4x32x32xf32>
    %9 = vector.extract_strided_slice %1 {offsets = [0, 0, 0], sizes = [1, 32, 32], strides = [1, 1, 1]} : vector<4x32x32xf32> to vector<1x32x32xf32>
    %10 = vector.shape_cast %9 : vector<1x32x32xf32> to vector<32x32xf32>
    %11 = vector.shape_cast %10 : vector<32x32xf32> to vector<1x32x32xf32>
    %12 = vector.broadcast %11 : vector<1x32x32xf32> to vector<4x32x32xf32>
    %13 = arith.addf %8, %12 : vector<4x32x32xf32>
    %14 = arith.addf %13, %2 : vector<4x32x32xf32>
    %cst_9 = arith.constant dense<0xFF800000> : vector<4x32xf32>
    %15 = vector.multi_reduction <maximumf>, %14, %cst_9 [2] : vector<4x32x32xf32> to vector<4x32xf32>
    %16 = vector.shape_cast %15 : vector<4x32xf32> to vector<4x32x1xf32>
    %17 = vector.broadcast %16 : vector<4x32x1xf32> to vector<4x32x32xf32>
    %18 = arith.subf %14, %17 : vector<4x32x32xf32>
    %19 = math.exp %18 : vector<4x32x32xf32>
    %cst_10 = arith.constant dense<0.000000e+00> : vector<4x32xf32>
    %20 = vector.multi_reduction <add>, %19, %cst_10 [2] : vector<4x32x32xf32> to vector<4x32xf32>
    %21 = vector.shape_cast %20 : vector<4x32xf32> to vector<4x32x1xf32>
    %22 = vector.broadcast %21 : vector<4x32x1xf32> to vector<4x32x32xf32>
    %23 = arith.divf %19, %22 : vector<4x32x32xf32>
    %24 = arith.truncf %23 : vector<4x32x32xf32> to vector<4x32x32xbf16>
    "tpu.trace_start"() <{level = 10 : i32, message = "gqk,gkd->gqd"}> : () -> ()
    %cst_11 = arith.constant dense<0.000000e+00> : vector<4x32x8xf32>
    %25 = tpu.matmul %24, %5, %cst_11 {dimension_numbers = #tpu.dot_dimension_numbers<[2], [1], [1], [2], [0, 0, 0, 1, 1, 2], [0], [0]>} : vector<4x32x32xbf16>, vector<4x32x8xbf16>, vector<4x32x8xf32> -> vector<4x32x8xf32>
    "tpu.trace_stop"() : () -> ()
    %26 = vector.extract_strided_slice %0 {offsets = [0, 0, 8], sizes = [4, 32, 8], strides = [1, 1, 1]} : vector<4x32x96xbf16> to vector<4x32x8xbf16>
    %27 = vector.extract_strided_slice %0 {offsets = [0, 0, 40], sizes = [4, 32, 8], strides = [1, 1, 1]} : vector<4x32x96xbf16> to vector<4x32x8xbf16>
    %28 = vector.extract_strided_slice %0 {offsets = [0, 0, 72], sizes = [4, 32, 8], strides = [1, 1, 1]} : vector<4x32x96xbf16> to vector<4x32x8xbf16>
    "tpu.trace_start"() <{level = 10 : i32, message = "gqd,gkd->gqk"}> : () -> ()
    %cst_12 = arith.constant dense<0.000000e+00> : vector<4x32x32xf32>
    %29 = tpu.matmul %26, %27, %cst_12 {dimension_numbers = #tpu.dot_dimension_numbers<[2], [2], [1], [1], [0, 0, 0, 1, 1, 1], [0], [0]>} : vector<4x32x8xbf16>, vector<4x32x8xbf16>, vector<4x32x32xf32> -> vector<4x32x32xf32>
    "tpu.trace_stop"() : () -> ()
    %cst_13 = arith.constant 0.353553385 : f32
    %30 = vector.broadcast %cst_13 : f32 to vector<4x32x32xf32>
    %31 = arith.mulf %29, %30 : vector<4x32x32xf32>
    %32 = vector.extract_strided_slice %1 {offsets = [1, 0, 0], sizes = [1, 32, 32], strides = [1, 1, 1]} : vector<4x32x32xf32> to vector<1x32x32xf32>
    %33 = vector.shape_cast %32 : vector<1x32x32xf32> to vector<32x32xf32>
    %34 = vector.shape_cast %33 : vector<32x32xf32> to vector<1x32x32xf32>
    %35 = vector.broadcast %34 : vector<1x32x32xf32> to vector<4x32x32xf32>
    %36 = arith.addf %31, %35 : vector<4x32x32xf32>
    %37 = arith.addf %36, %2 : vector<4x32x32xf32>
    %cst_14 = arith.constant dense<0xFF800000> : vector<4x32xf32>
    %38 = vector.multi_reduction <maximumf>, %37, %cst_14 [2] : vector<4x32x32xf32> to vector<4x32xf32>
    %39 = vector.shape_cast %38 : vector<4x32xf32> to vector<4x32x1xf32>
    %40 = vector.broadcast %39 : vector<4x32x1xf32> to vector<4x32x32xf32>
    %41 = arith.subf %37, %40 : vector<4x32x32xf32>
    %42 = math.exp %41 : vector<4x32x32xf32>
    %cst_15 = arith.constant dense<0.000000e+00> : vector<4x32xf32>
    %43 = vector.multi_reduction <add>, %42, %cst_15 [2] : vector<4x32x32xf32> to vector<4x32xf32>
    %44 = vector.shape_cast %43 : vector<4x32xf32> to vector<4x32x1xf32>
    %45 = vector.broadcast %44 : vector<4x32x1xf32> to vector<4x32x32xf32>
    %46 = arith.divf %42, %45 : vector<4x32x32xf32>
    %47 = arith.truncf %46 : vector<4x32x32xf32> to vector<4x32x32xbf16>
    "tpu.trace_start"() <{level = 10 : i32, message = "gqk,gkd->gqd"}> : () -> ()
    %cst_16 = arith.constant dense<0.000000e+00> : vector<4x32x8xf32>
    %48 = tpu.matmul %47, %28, %cst_16 {dimension_numbers = #tpu.dot_dimension_numbers<[2], [1], [1], [2], [0, 0, 0, 1, 1, 2], [0], [0]>} : vector<4x32x32xbf16>, vector<4x32x8xbf16>, vector<4x32x8xf32> -> vector<4x32x8xf32>
    "tpu.trace_stop"() : () -> ()
    %49 = vector.extract_strided_slice %0 {offsets = [0, 0, 16], sizes = [4, 32, 8], strides = [1, 1, 1]} : vector<4x32x96xbf16> to vector<4x32x8xbf16>
    %50 = vector.extract_strided_slice %0 {offsets = [0, 0, 48], sizes = [4, 32, 8], strides = [1, 1, 1]} : vector<4x32x96xbf16> to vector<4x32x8xbf16>
    %51 = vector.extract_strided_slice %0 {offsets = [0, 0, 80], sizes = [4, 32, 8], strides = [1, 1, 1]} : vector<4x32x96xbf16> to vector<4x32x8xbf16>
    "tpu.trace_start"() <{level = 10 : i32, message = "gqd,gkd->gqk"}> : () -> ()
    %cst_17 = arith.constant dense<0.000000e+00> : vector<4x32x32xf32>
    %52 = tpu.matmul %49, %50, %cst_17 {dimension_numbers = #tpu.dot_dimension_numbers<[2], [2], [1], [1], [0, 0, 0, 1, 1, 1], [0], [0]>} : vector<4x32x8xbf16>, vector<4x32x8xbf16>, vector<4x32x32xf32> -> vector<4x32x32xf32>
    "tpu.trace_stop"() : () -> ()
    %cst_18 = arith.constant 0.353553385 : f32
    %53 = vector.broadcast %cst_18 : f32 to vector<4x32x32xf32>
    %54 = arith.mulf %52, %53 : vector<4x32x32xf32>
    %55 = vector.extract_strided_slice %1 {offsets = [2, 0, 0], sizes = [1, 32, 32], strides = [1, 1, 1]} : vector<4x32x32xf32> to vector<1x32x32xf32>
    %56 = vector.shape_cast %55 : vector<1x32x32xf32> to vector<32x32xf32>
    %57 = vector.shape_cast %56 : vector<32x32xf32> to vector<1x32x32xf32>
    %58 = vector.broadcast %57 : vector<1x32x32xf32> to vector<4x32x32xf32>
    %59 = arith.addf %54, %58 : vector<4x32x32xf32>
    %60 = arith.addf %59, %2 : vector<4x32x32xf32>
    %cst_19 = arith.constant dense<0xFF800000> : vector<4x32xf32>
    %61 = vector.multi_reduction <maximumf>, %60, %cst_19 [2] : vector<4x32x32xf32> to vector<4x32xf32>
    %62 = vector.shape_cast %61 : vector<4x32xf32> to vector<4x32x1xf32>
    %63 = vector.broadcast %62 : vector<4x32x1xf32> to vector<4x32x32xf32>
    %64 = arith.subf %60, %63 : vector<4x32x32xf32>
    %65 = math.exp %64 : vector<4x32x32xf32>
    %cst_20 = arith.constant dense<0.000000e+00> : vector<4x32xf32>
    %66 = vector.multi_reduction <add>, %65, %cst_20 [2] : vector<4x32x32xf32> to vector<4x32xf32>
    %67 = vector.shape_cast %66 : vector<4x32xf32> to vector<4x32x1xf32>
    %68 = vector.broadcast %67 : vector<4x32x1xf32> to vector<4x32x32xf32>
    %69 = arith.divf %65, %68 : vector<4x32x32xf32>
    %70 = arith.truncf %69 : vector<4x32x32xf32> to vector<4x32x32xbf16>
    "tpu.trace_start"() <{level = 10 : i32, message = "gqk,gkd->gqd"}> : () -> ()
    %cst_21 = arith.constant dense<0.000000e+00> : vector<4x32x8xf32>
    %71 = tpu.matmul %70, %51, %cst_21 {dimension_numbers = #tpu.dot_dimension_numbers<[2], [1], [1], [2], [0, 0, 0, 1, 1, 2], [0], [0]>} : vector<4x32x32xbf16>, vector<4x32x8xbf16>, vector<4x32x8xf32> -> vector<4x32x8xf32>
    "tpu.trace_stop"() : () -> ()
    %72 = vector.extract_strided_slice %0 {offsets = [0, 0, 24], sizes = [4, 32, 8], strides = [1, 1, 1]} : vector<4x32x96xbf16> to vector<4x32x8xbf16>
    %73 = vector.extract_strided_slice %0 {offsets = [0, 0, 56], sizes = [4, 32, 8], strides = [1, 1, 1]} : vector<4x32x96xbf16> to vector<4x32x8xbf16>
    %74 = vector.extract_strided_slice %0 {offsets = [0, 0, 88], sizes = [4, 32, 8], strides = [1, 1, 1]} : vector<4x32x96xbf16> to vector<4x32x8xbf16>
    "tpu.trace_start"() <{level = 10 : i32, message = "gqd,gkd->gqk"}> : () -> ()
    %cst_22 = arith.constant dense<0.000000e+00> : vector<4x32x32xf32>
    %75 = tpu.matmul %72, %73, %cst_22 {dimension_numbers = #tpu.dot_dimension_numbers<[2], [2], [1], [1], [0, 0, 0, 1, 1, 1], [0], [0]>} : vector<4x32x8xbf16>, vector<4x32x8xbf16>, vector<4x32x32xf32> -> vector<4x32x32xf32>
    "tpu.trace_stop"() : () -> ()
    %cst_23 = arith.constant 0.353553385 : f32
    %76 = vector.broadcast %cst_23 : f32 to vector<4x32x32xf32>
    %77 = arith.mulf %75, %76 : vector<4x32x32xf32>
    %78 = vector.extract_strided_slice %1 {offsets = [3, 0, 0], sizes = [1, 32, 32], strides = [1, 1, 1]} : vector<4x32x32xf32> to vector<1x32x32xf32>
    %79 = vector.shape_cast %78 : vector<1x32x32xf32> to vector<32x32xf32>
    %80 = vector.shape_cast %79 : vector<32x32xf32> to vector<1x32x32xf32>
    %81 = vector.broadcast %80 : vector<1x32x32xf32> to vector<4x32x32xf32>
    %82 = arith.addf %77, %81 : vector<4x32x32xf32>
    %83 = arith.addf %82, %2 : vector<4x32x32xf32>
    %cst_24 = arith.constant dense<0xFF800000> : vector<4x32xf32>
    %84 = vector.multi_reduction <maximumf>, %83, %cst_24 [2] : vector<4x32x32xf32> to vector<4x32xf32>
    %85 = vector.shape_cast %84 : vector<4x32xf32> to vector<4x32x1xf32>
    %86 = vector.broadcast %85 : vector<4x32x1xf32> to vector<4x32x32xf32>
    %87 = arith.subf %83, %86 : vector<4x32x32xf32>
    %88 = math.exp %87 : vector<4x32x32xf32>
    %cst_25 = arith.constant dense<0.000000e+00> : vector<4x32xf32>
    %89 = vector.multi_reduction <add>, %88, %cst_25 [2] : vector<4x32x32xf32> to vector<4x32xf32>
    %90 = vector.shape_cast %89 : vector<4x32xf32> to vector<4x32x1xf32>
    %91 = vector.broadcast %90 : vector<4x32x1xf32> to vector<4x32x32xf32>
    %92 = arith.divf %88, %91 : vector<4x32x32xf32>
    %93 = arith.truncf %92 : vector<4x32x32xf32> to vector<4x32x32xbf16>
    "tpu.trace_start"() <{level = 10 : i32, message = "gqk,gkd->gqd"}> : () -> ()
    %cst_26 = arith.constant dense<0.000000e+00> : vector<4x32x8xf32>
    %94 = tpu.matmul %93, %74, %cst_26 {dimension_numbers = #tpu.dot_dimension_numbers<[2], [1], [1], [2], [0, 0, 0, 1, 1, 2], [0], [0]>} : vector<4x32x32xbf16>, vector<4x32x8xbf16>, vector<4x32x8xf32> -> vector<4x32x8xf32>
    "tpu.trace_stop"() : () -> ()
    %95 = tpu.concatenate %25, %48, %71, %94 in 2 : vector<4x32x8xf32>, vector<4x32x8xf32>, vector<4x32x8xf32>, vector<4x32x8xf32> -> vector<4x32x32xf32>
    %96 = arith.truncf %95 : vector<4x32x32xf32> to vector<4x32x32xbf16>
    %c0_27 = arith.constant 0 : index
    %c0_28 = arith.constant 0 : index
    %c0_29 = arith.constant 0 : index
    %97 = vector.load %arg4[%c0_27, %c0_28, %c0_29] : memref<4x32x32xbf16, #tpu.memory_space<vmem>>, vector<4x32x32xbf16>
    tpu.vector_store %arg4[%c0_27, %c0_28, %c0_29], %96 {strides = array<i32>} : memref<4x32x32xbf16, #tpu.memory_space<vmem>>, vector<4x32x32xbf16>,
    return
  }
  func.func @transform_0(%arg0: i32) -> (i32, i32, i32) {
    %c0_i32 = arith.constant 0 : i32
    %c0_i32_0 = arith.constant 0 : i32
    %c0_i32_1 = arith.constant 0 : i32
    return %arg0, %c0_i32, %c0_i32_0 : i32, i32, i32
  }
  func.func @transform_1(%arg0: i32) -> (i32, i32, i32) {
    %c0_i32 = arith.constant 0 : i32
    %c0_i32_0 = arith.constant 0 : i32
    %c0_i32_1 = arith.constant 0 : i32
    %c0_i32_2 = arith.constant 0 : i32
    return %c0_i32, %c0_i32_0, %c0_i32_1 : i32, i32, i32
  }
  func.func @transform_2(%arg0: i32) -> (i32, i32, i32) {
    %c2_i32 = arith.constant 2 : i32
    %c0_i32 = arith.constant 0 : i32
    %0 = arith.cmpi eq, %c2_i32, %c0_i32 : i32
    %c1_i32 = arith.constant 1 : i32
    %1 = arith.select %0, %c1_i32, %c2_i32 : i32
    %2 = arith.remsi %arg0, %1 : i32
    %c0_i32_0 = arith.constant 0 : i32
    %3 = arith.cmpi ne, %2, %c0_i32_0 : i32
    %c0_i32_1 = arith.constant 0 : i32
    %4 = arith.cmpi slt, %2, %c0_i32_1 : i32
    %c0_i32_2 = arith.constant 0 : i32
    %5 = arith.cmpi slt, %1, %c0_i32_2 : i32
    %6 = arith.xori %4, %5 : i1
    %7 = arith.andi %6, %3 : i1
    %8 = arith.addi %2, %1 : i32
    %9 = arith.select %7, %8, %2 : i32
    %c0_i32_3 = arith.constant 0 : i32
    %c0_i32_4 = arith.constant 0 : i32
    %c0_i32_5 = arith.constant 0 : i32
    return %9, %c0_i32_3, %c0_i32_4 : i32, i32, i32
  }
  func.func @transform_3(%arg0: i32) -> (i32, i32, i32) {
    %c0_i32 = arith.constant 0 : i32
    %c0_i32_0 = arith.constant 0 : i32
    %c0_i32_1 = arith.constant 0 : i32
    return %arg0, %c0_i32, %c0_i32_0 : i32, i32, i32
  }
}

module attributes {stable_mosaic.version = 11 : i64} {
  func.func @_proj_mlp_kernel(%arg0: i32, %arg1: memref<128x32xbf16, #tpu.memory_space<vmem>>, %arg2: memref<128x32xf32, #tpu.memory_space<vmem>>, %arg3: memref<32x32xbf16, #tpu.memory_space<vmem>>, %arg4: memref<1x32xf32, #tpu.memory_space<vmem>>, %arg5: memref<1x32xf32, #tpu.memory_space<vmem>>, %arg6: memref<1x32xf32, #tpu.memory_space<vmem>>, %arg7: memref<32x128xbf16, #tpu.memory_space<vmem>>, %arg8: memref<1x128xf32, #tpu.memory_space<vmem>>, %arg9: memref<128x32xbf16, #tpu.memory_space<vmem>>, %arg10: memref<1x32xf32, #tpu.memory_space<vmem>>, %arg11: memref<128x32xf32, #tpu.memory_space<vmem>>) attributes {dimension_semantics = [#tpu.dimension_semantics<parallel>], iteration_bounds = array<i64: 4>, scalar_prefetch = 0 : i64, scratch_operands = 0 : i64, tpu.core_type = #tpu.core_type<tc>, window_params = [{transform_indices = @transform_0, window_bounds = array<i64: 128, 32>}, {transform_indices = @transform_1, window_bounds = array<i64: 128, 32>}, {pipeline_mode = #tpu.pipeline_mode<synchronous>, transform_indices = @transform_2, window_bounds = array<i64: 32, 32>}, {pipeline_mode = #tpu.pipeline_mode<synchronous>, transform_indices = @transform_3, window_bounds = array<i64: 1, 32>}, {pipeline_mode = #tpu.pipeline_mode<synchronous>, transform_indices = @transform_4, window_bounds = array<i64: 1, 32>}, {pipeline_mode = #tpu.pipeline_mode<synchronous>, transform_indices = @transform_5, window_bounds = array<i64: 1, 32>}, {pipeline_mode = #tpu.pipeline_mode<synchronous>, transform_indices = @transform_6, window_bounds = array<i64: 32, 128>}, {pipeline_mode = #tpu.pipeline_mode<synchronous>, transform_indices = @transform_7, window_bounds = array<i64: 1, 128>}, {pipeline_mode = #tpu.pipeline_mode<synchronous>, transform_indices = @transform_8, window_bounds = array<i64: 128, 32>}, {pipeline_mode = #tpu.pipeline_mode<synchronous>, transform_indices = @transform_9, window_bounds = array<i64: 1, 32>}, {transform_indices = @transform_10, window_bounds = array<i64: 128, 32>}]} {
    %c0 = arith.constant 0 : index
    %c0_0 = arith.constant 0 : index
    %0 = vector.load %arg1[%c0, %c0_0] : memref<128x32xbf16, #tpu.memory_space<vmem>>, vector<128x32xbf16>
    %c0_1 = arith.constant 0 : index
    %c0_2 = arith.constant 0 : index
    %1 = vector.load %arg2[%c0_1, %c0_2] : memref<128x32xf32, #tpu.memory_space<vmem>>, vector<128x32xf32>
    %c0_3 = arith.constant 0 : index
    %c0_4 = arith.constant 0 : index
    %2 = vector.load %arg3[%c0_3, %c0_4] : memref<32x32xbf16, #tpu.memory_space<vmem>>, vector<32x32xbf16>
    %cst = arith.constant dense<0.000000e+00> : vector<128x32xf32>
    %3 = tpu.matmul %0, %2, %cst {dimension_numbers = #tpu.dot_dimension_numbers<[1], [0], [0], [1], [0, 0, 1, 1], [], []>} : vector<128x32xbf16>, vector<32x32xbf16>, vector<128x32xf32> -> vector<128x32xf32>
    %4 = arith.addf %1, %3 : vector<128x32xf32>
    %c0_5 = arith.constant 0 : index
    %c0_6 = arith.constant 0 : index
    %5 = vector.load %arg4[%c0_5, %c0_6] : memref<1x32xf32, #tpu.memory_space<vmem>>, vector<1x32xf32>
    %6 = vector.broadcast %5 : vector<1x32xf32> to vector<128x32xf32>
    %7 = arith.addf %4, %6 : vector<128x32xf32>
    %cst_7 = arith.constant dense<0.000000e+00> : vector<128xf32>
    %8 = vector.multi_reduction <add>, %7, %cst_7 [1] : vector<128x32xf32> to vector<128xf32>
    %9 = vector.shape_cast %8 : vector<128xf32> to vector<128x1xf32>
    %cst_8 = arith.constant 3.200000e+01 : f32
    %10 = vector.broadcast %cst_8 : f32 to vector<128x1xf32>
    %11 = arith.divf %9, %10 : vector<128x1xf32>
    %12 = vector.broadcast %11 : vector<128x1xf32> to vector<128x32xf32>
    %13 = arith.subf %7, %12 : vector<128x32xf32>
    %14 = arith.mulf %13, %13 : vector<128x32xf32>
    %cst_9 = arith.constant dense<0.000000e+00> : vector<128xf32>
    %15 = vector.multi_reduction <add>, %14, %cst_9 [1] : vector<128x32xf32> to vector<128xf32>
    %16 = vector.shape_cast %15 : vector<128xf32> to vector<128x1xf32>
    %cst_10 = arith.constant 3.200000e+01 : f32
    %17 = vector.broadcast %cst_10 : f32 to vector<128x1xf32>
    %18 = arith.divf %16, %17 : vector<128x1xf32>
    %cst_11 = arith.constant 9.99999974E-6 : f32
    %19 = vector.broadcast %cst_11 : f32 to vector<128x1xf32>
    %20 = arith.addf %18, %19 : vector<128x1xf32>
    %21 = math.rsqrt %20 : vector<128x1xf32>
    %22 = vector.broadcast %21 : vector<128x1xf32> to vector<128x32xf32>
    %23 = arith.mulf %13, %22 : vector<128x32xf32>
    %c0_12 = arith.constant 0 : index
    %c0_13 = arith.constant 0 : index
    %24 = vector.load %arg5[%c0_12, %c0_13] : memref<1x32xf32, #tpu.memory_space<vmem>>, vector<1x32xf32>
    %25 = vector.broadcast %24 : vector<1x32xf32> to vector<128x32xf32>
    %26 = arith.mulf %23, %25 : vector<128x32xf32>
    %c0_14 = arith.constant 0 : index
    %c0_15 = arith.constant 0 : index
    %27 = vector.load %arg6[%c0_14, %c0_15] : memref<1x32xf32, #tpu.memory_space<vmem>>, vector<1x32xf32>
    %28 = vector.broadcast %27 : vector<1x32xf32> to vector<128x32xf32>
    %29 = arith.addf %26, %28 : vector<128x32xf32>
    %30 = arith.truncf %29 : vector<128x32xf32> to vector<128x32xbf16>
    %c0_16 = arith.constant 0 : index
    %c0_17 = arith.constant 0 : index
    %31 = vector.load %arg7[%c0_16, %c0_17] : memref<32x128xbf16, #tpu.memory_space<vmem>>, vector<32x128xbf16>
    %cst_18 = arith.constant dense<0.000000e+00> : vector<128x128xf32>
    %32 = tpu.matmul %30, %31, %cst_18 {dimension_numbers = #tpu.dot_dimension_numbers<[1], [0], [0], [1], [0, 0, 1, 1], [], []>} : vector<128x32xbf16>, vector<32x128xbf16>, vector<128x128xf32> -> vector<128x128xf32>
    %c0_19 = arith.constant 0 : index
    %c0_20 = arith.constant 0 : index
    %33 = vector.load %arg8[%c0_19, %c0_20] : memref<1x128xf32, #tpu.memory_space<vmem>>, vector<1x128xf32>
    %34 = vector.broadcast %33 : vector<1x128xf32> to vector<128x128xf32>
    %35 = arith.addf %32, %34 : vector<128x128xf32>
    %cst_21 = arith.constant 0.707106769 : f32
    %36 = vector.broadcast %cst_21 : f32 to vector<128x128xf32>
    %37 = arith.mulf %35, %36 : vector<128x128xf32>
    %38 = math.absf %37 : vector<128x128xf32>
    %cst_22 = arith.constant 0.327591091 : f32
    %39 = vector.broadcast %cst_22 : f32 to vector<128x128xf32>
    %40 = arith.mulf %39, %38 : vector<128x128xf32>
    %cst_23 = arith.constant 1.000000e+00 : f32
    %41 = vector.broadcast %cst_23 : f32 to vector<128x128xf32>
    %42 = arith.addf %41, %40 : vector<128x128xf32>
    %cst_24 = arith.constant 1.000000e+00 : f32
    %43 = vector.broadcast %cst_24 : f32 to vector<128x128xf32>
    %44 = arith.divf %43, %42 : vector<128x128xf32>
    %cst_25 = arith.constant 1.06140542 : f32
    %45 = vector.broadcast %cst_25 : f32 to vector<128x128xf32>
    %46 = arith.mulf %44, %45 : vector<128x128xf32>
    %cst_26 = arith.constant -1.45315206 : f32
    %47 = vector.broadcast %cst_26 : f32 to vector<128x128xf32>
    %48 = arith.addf %47, %46 : vector<128x128xf32>
    %49 = arith.mulf %44, %48 : vector<128x128xf32>
    %cst_27 = arith.constant 1.42141378 : f32
    %50 = vector.broadcast %cst_27 : f32 to vector<128x128xf32>
    %51 = arith.addf %50, %49 : vector<128x128xf32>
    %52 = arith.mulf %44, %51 : vector<128x128xf32>
    %cst_28 = arith.constant -0.284496725 : f32
    %53 = vector.broadcast %cst_28 : f32 to vector<128x128xf32>
    %54 = arith.addf %53, %52 : vector<128x128xf32>
    %55 = arith.mulf %44, %54 : vector<128x128xf32>
    %cst_29 = arith.constant 0.254829586 : f32
    %56 = vector.broadcast %cst_29 : f32 to vector<128x128xf32>
    %57 = arith.addf %56, %55 : vector<128x128xf32>
    %58 = arith.mulf %44, %57 : vector<128x128xf32>
    %cst_30 = arith.constant 0.000000e+00 : f32
    %59 = vector.broadcast %cst_30 : f32 to vector<128x128xf32>
    %60 = arith.subf %59, %38 : vector<128x128xf32>
    %61 = arith.mulf %60, %38 : vector<128x128xf32>
    %62 = math.exp %61 : vector<128x128xf32>
    %63 = arith.mulf %58, %62 : vector<128x128xf32>
    %cst_31 = arith.constant 1.000000e+00 : f32
    %64 = vector.broadcast %cst_31 : f32 to vector<128x128xf32>
    %65 = arith.subf %64, %63 : vector<128x128xf32>
    %cst_32 = arith.constant 0.000000e+00 : f32
    %66 = vector.broadcast %cst_32 : f32 to vector<128x128xf32>
    %67 = arith.cmpf oge, %37, %66 : vector<128x128xf32>
    %cst_33 = arith.constant 0.000000e+00 : f32
    %68 = vector.broadcast %cst_33 : f32 to vector<128x128xf32>
    %69 = arith.subf %68, %65 : vector<128x128xf32>
    %70 = arith.select %67, %65, %69 : vector<128x128xi1>, vector<128x128xf32>
    %cst_34 = arith.constant 5.000000e-01 : f32
    %71 = vector.broadcast %cst_34 : f32 to vector<128x128xf32>
    %72 = arith.mulf %71, %35 : vector<128x128xf32>
    %cst_35 = arith.constant 1.000000e+00 : f32
    %73 = vector.broadcast %cst_35 : f32 to vector<128x128xf32>
    %74 = arith.addf %73, %70 : vector<128x128xf32>
    %75 = arith.mulf %72, %74 : vector<128x128xf32>
    %76 = arith.truncf %75 : vector<128x128xf32> to vector<128x128xbf16>
    %c0_36 = arith.constant 0 : index
    %c0_37 = arith.constant 0 : index
    %77 = vector.load %arg9[%c0_36, %c0_37] : memref<128x32xbf16, #tpu.memory_space<vmem>>, vector<128x32xbf16>
    %cst_38 = arith.constant dense<0.000000e+00> : vector<128x32xf32>
    %78 = tpu.matmul %76, %77, %cst_38 {dimension_numbers = #tpu.dot_dimension_numbers<[1], [0], [0], [1], [0, 0, 1, 1], [], []>} : vector<128x128xbf16>, vector<128x32xbf16>, vector<128x32xf32> -> vector<128x32xf32>
    %79 = arith.addf %7, %78 : vector<128x32xf32>
    %c0_39 = arith.constant 0 : index
    %c0_40 = arith.constant 0 : index
    %80 = vector.load %arg10[%c0_39, %c0_40] : memref<1x32xf32, #tpu.memory_space<vmem>>, vector<1x32xf32>
    %81 = vector.broadcast %80 : vector<1x32xf32> to vector<128x32xf32>
    %82 = arith.addf %79, %81 : vector<128x32xf32>
    %c0_41 = arith.constant 0 : index
    %c0_42 = arith.constant 0 : index
    %83 = vector.load %arg11[%c0_41, %c0_42] : memref<128x32xf32, #tpu.memory_space<vmem>>, vector<128x32xf32>
    tpu.vector_store %arg11[%c0_41, %c0_42], %82 {strides = array<i32>} : memref<128x32xf32, #tpu.memory_space<vmem>>, vector<128x32xf32>,
    return
  }
  func.func @transform_0(%arg0: i32) -> (i32, i32) {
    %c0_i32 = arith.constant 0 : i32
    %c0_i32_0 = arith.constant 0 : i32
    return %arg0, %c0_i32 : i32, i32
  }
  func.func @transform_1(%arg0: i32) -> (i32, i32) {
    %c0_i32 = arith.constant 0 : i32
    %c0_i32_0 = arith.constant 0 : i32
    return %arg0, %c0_i32 : i32, i32
  }
  func.func @transform_2(%arg0: i32) -> (i32, i32) {
    %c0_i32 = arith.constant 0 : i32
    %c0_i32_0 = arith.constant 0 : i32
    %c0_i32_1 = arith.constant 0 : i32
    return %c0_i32, %c0_i32_0 : i32, i32
  }
  func.func @transform_3(%arg0: i32) -> (i32, i32) {
    %c0_i32 = arith.constant 0 : i32
    %c0_i32_0 = arith.constant 0 : i32
    %c0_i32_1 = arith.constant 0 : i32
    return %c0_i32, %c0_i32_0 : i32, i32
  }
  func.func @transform_4(%arg0: i32) -> (i32, i32) {
    %c0_i32 = arith.constant 0 : i32
    %c0_i32_0 = arith.constant 0 : i32
    %c0_i32_1 = arith.constant 0 : i32
    return %c0_i32, %c0_i32_0 : i32, i32
  }
  func.func @transform_5(%arg0: i32) -> (i32, i32) {
    %c0_i32 = arith.constant 0 : i32
    %c0_i32_0 = arith.constant 0 : i32
    %c0_i32_1 = arith.constant 0 : i32
    return %c0_i32, %c0_i32_0 : i32, i32
  }
  func.func @transform_6(%arg0: i32) -> (i32, i32) {
    %c0_i32 = arith.constant 0 : i32
    %c0_i32_0 = arith.constant 0 : i32
    %c0_i32_1 = arith.constant 0 : i32
    return %c0_i32, %c0_i32_0 : i32, i32
  }
  func.func @transform_7(%arg0: i32) -> (i32, i32) {
    %c0_i32 = arith.constant 0 : i32
    %c0_i32_0 = arith.constant 0 : i32
    %c0_i32_1 = arith.constant 0 : i32
    return %c0_i32, %c0_i32_0 : i32, i32
  }
  func.func @transform_8(%arg0: i32) -> (i32, i32) {
    %c0_i32 = arith.constant 0 : i32
    %c0_i32_0 = arith.constant 0 : i32
    %c0_i32_1 = arith.constant 0 : i32
    return %c0_i32, %c0_i32_0 : i32, i32
  }
  func.func @transform_9(%arg0: i32) -> (i32, i32) {
    %c0_i32 = arith.constant 0 : i32
    %c0_i32_0 = arith.constant 0 : i32
    %c0_i32_1 = arith.constant 0 : i32
    return %c0_i32, %c0_i32_0 : i32, i32
  }
  func.func @transform_10(%arg0: i32) -> (i32, i32) {
    %c0_i32 = arith.constant 0 : i32
    %c0_i32_0 = arith.constant 0 : i32
    return %arg0, %c0_i32 : i32, i32
  }
}

</mosaic_0001>

<bundles_post_ra>
// kernel: basic_layer_forward.6
= control target key start
LH: loop header
LB: loop body
LE: loop exit
PB: predicated region body
PF: predicated region fallthrough
CT: control target
= control target key end

     0   :  { %s920_s15 = smov 0   ;;  %s1201_s0 = inlined_call_operand.vmem [shape: f32[512,32], index: 0, kind: input, shape index: {}]   ;;  %s1202_s1 = inlined_call_operand.vmem [shape: f32[1,32], index: 1, kind: input, shape index: {}]   ;;  %s1203_s2 = inlined_call_operand.vmem [shape: f32[1,32], index: 2, kind: input, shape index: {}]   ;;  %s1204_s3 = inlined_call_operand.vmem [shape: bf16[32,96], index: 3, kind: input, shape index: {}]   ;;  %s1205_s4 = inlined_call_operand.vmem [shape: bf16[512,96], index: 4, kind: output, shape index: {}]  }
   0x1 LB: > { %s756_s16 = sadd.s32 4294967295, %s893_s15   ;;  %p760_p0 = scmp.ge.s32.totalorder %s893_s15, 1  ;;  %s893_s15 = sphi %s920_s15, %s14_s15  }
   0x2   : > { %p163_p1 = scmp.lt.s32.totalorder %s893_s15, 5 }
   0x4   : > { %p164_p2 = pnand %p760_p0, %p163_p1 }
   0x5   : > { %s761_s17 = sshll.u32 (!%p164_p2), %s756_s16, 4 }
   0x6   : > { %167 = sbr.rel (%p164_p2) target bundleno = 559 (0x22f), region = 36  ;;  %p190_p3 = scmp.lt.s32.totalorder (!%p164_p2), %s761_s17, 63 }
   0xb   : > { %s1207_s17 = smov (!%p190_p3, %s761_s17), 63  ;;  %vm218_vm0 = vcmask 261120   ;;  %vm683_vm1 = vcmask 781312  }
   0xc   : > { %s762_s18 = sshll.u32 %s1207_s17, 3  ;;  %s764_s30 = sshll.u32 %s1207_s17, 2 }
   0xd   : > { %s934_s21 = scalar_lea.vmem %s1201_s0, %s762_s18  ;;  %s1164_s7 = scalar_lea.vmem %s1205_s4, %s764_s30 }
   0xe   : > { %v202_v0 = vld [vmem:[%s934_s21] sm:$0xff]  ;;  %v203_v2 = vld [vmem:[%s934_s21 + $0x8] sm:$0xff]  ;;  %v204_v8 = vld [vmem:[%s934_s21 + $0x10] sm:$0xff] }
   0xf   : > { %v210_v1 = vld [vmem:[%s934_s21 + $0x40] sm:$0xff]  ;;  %v219_v3 = vsel %vm218_vm0, %v202_v0, 0.0  ;;  %v211_v5 = vld [vmem:[%s934_s21 + $0x48] sm:$0xff]  ;;  %v222_v6 = vsel %vm218_vm0, %v203_v2, 0.0  ;;  %v205_v9 = vld [vmem:[%s934_s21 + $0x18] sm:$0xff]  ;;  %v225_v10 = vsel %vm218_vm0, %v204_v8, 0.0 }
  0x10   : > { %v243_v4 = vsel %vm218_vm0, %v210_v1, 0.0  ;;  %220 = vadd.xlane.f32.xlu0 %v219_v3  ;;  %v246_v7 = vsel %vm218_vm0, %v211_v5, 0.0  ;;  %v228_v11 = vsel %vm218_vm0, %v205_v9, 0.0  ;;  %v949_v12 = vld [vmem:[%s934_s21 + $0x50] sm:$0xff]  ;;  %v952_v13 = vld [vmem:[%s934_s21 + $0x58] sm:$0xff]  ;;  %v959_v16 = vld [vmem:[%s934_s21 + $0x20] sm:$0xff] }
  0x11   : > { %244 = vadd.xlane.f32.xlu1 %v243_v4  ;;  %v249_v14 = vsel %vm218_vm0, %v949_v12, 0.0  ;;  %v252_v15 = vsel %vm218_vm0, %v952_v13, 0.0  ;;  %v962_v17 = vld [vmem:[%s934_s21 + $0x28] sm:$0xff]  ;;  %v231_v18 = vsel %vm218_vm0, %v959_v16, 0.0  ;;  %v969_v20 = vld [vmem:[%s934_s21 + $0x60] sm:$0xff]  ;;  %v979_v24 = vld [vmem:[%s934_s21 + $0x30] sm:$0xff] }
  0x12   : > { %v234_v19 = vsel %vm218_vm0, %v962_v17, 0.0  ;;  %v972_v21 = vld [vmem:[%s934_s21 + $0x68] sm:$0xff]  ;;  %v255_v22 = vsel %vm218_vm0, %v969_v20, 0.0  ;;  %v982_v25 = vld [vmem:[%s934_s21 + $0x38] sm:$0xff]  ;;  %v237_v26 = vsel %vm218_vm0, %v979_v24, 0.0  ;;  %v989_v28 = vld [vmem:[%s934_s21 + $0x70] sm:$0xff] }
  0x13   : > { %v258_v23 = vsel %vm218_vm0, %v972_v21, 0.0  ;;  %v240_v27 = vsel %vm218_vm0, %v982_v25, 0.0  ;;  %v992_v29 = vld [vmem:[%s934_s21 + $0x78] sm:$0xff]  ;;  %v261_v30 = vsel %vm218_vm0, %v989_v28, 0.0 }
  0x14   : > { %223 = vadd.xlane.f32.xlu0 %v222_v6  ;;  %v264_v31 = vsel %vm218_vm0, %v992_v29, 0.0 }
  0x15   : > { %247 = vadd.xlane.f32.xlu1 %v246_v7 }
  0x18   : > { %226 = vadd.xlane.f32.xlu0 %v225_v10 }
  0x19   : > { %229 = vadd.xlane.f32.xlu1 %v228_v11 }
  0x1c   : > { %250 = vadd.xlane.f32.xlu0 %v249_v14 }
  0x1d   : > { %253 = vadd.xlane.f32.xlu1 %v252_v15 }
  0x20   : > { %232 = vadd.xlane.f32.xlu0 %v231_v18 }
  0x21   : > { %235 = vadd.xlane.f32.xlu1 %v234_v19 }
  0x24   : > { %256 = vadd.xlane.f32.xlu0 %v255_v22 }
  0x25   : > { %259 = vadd.xlane.f32.xlu1 %v258_v23 }
  0x28   : > { %238 = vadd.xlane.f32.xlu0 %v237_v26 }
  0x29   : > { %241 = vadd.xlane.f32.xlu1 %v240_v27 }
  0x2c   : > { %262 = vadd.xlane.f32.xlu0 %v261_v30 }
  0x2d   : > { %265 = vadd.xlane.f32.xlu1 %v264_v31 }
  0x99   : > { %v221_v32 = vpop.xlane.xlu0 %220 }
  0x9a   : > { %v245_v33 = vpop.xlane.xlu1 %244  ;;  %v268_v34 = vmul.f32 0.03125, %v221_v32 }
  0x9b   : > { %v276_v35 = vmul.f32 0.03125, %v245_v33 }
  0x9c   : > { %v998_v36 = vsub.f32 %v202_v0, %v268_v34 }
  0x9d   : > { %v1000_v37 = vsub.f32 %v210_v1, %v276_v35  ;;  %v224_v38 = vpop.xlane.xlu0 %223 }
  0x9e   : > { %v248_v39 = vpop.xlane.xlu1 %247  ;;  %v269_v40 = vmul.f32 0.03125, %v224_v38  ;;  %v300_v42 = vmul.f32 %v998_v36, %v998_v36 }
  0x9f   : > { %v277_v41 = vmul.f32 0.03125, %v248_v39  ;;  %v308_v43 = vmul.f32 %v1000_v37, %v1000_v37 }
  0xa0   : > { %v1006_v44 = vsub.f32 %v203_v2, %v269_v40  ;;  %v316_v46 = vsel %vm218_vm0, %v300_v42, 0.0 }
  0xa1   : > { %v1008_v45 = vsub.f32 %v211_v5, %v277_v41  ;;  %317 = vadd.xlane.f32.xlu0 %v316_v46  ;;  %v227_v47 = vpop.xlane.xlu0 %226  ;;  %v340_v49 = vsel %vm218_vm0, %v308_v43, 0.0 }
  0xa2   : > { %v230_v48 = vpop.xlane.xlu1 %229  ;;  %v270_v50 = vmul.f32 0.03125, %v227_v47  ;;  %v301_v52 = vmul.f32 %v1006_v44, %v1006_v44 }
  0xa3   : > { %v271_v51 = vmul.f32 0.03125, %v230_v48  ;;  %v309_v53 = vmul.f32 %v1008_v45, %v1008_v45 }
  0xa4   : > { %v1016_v54 = vsub.f32 %v204_v8, %v270_v50  ;;  %v319_v56 = vsel %vm218_vm0, %v301_v52, 0.0 }
  0xa5   : > { %v1018_v55 = vsub.f32 %v205_v9, %v271_v51  ;;  %341 = vadd.xlane.f32.xlu0 %v340_v49  ;;  %320 = vadd.xlane.f32.xlu1 %v319_v56  ;;  %v251_v57 = vpop.xlane.xlu0 %250  ;;  %v343_v59 = vsel %vm218_vm0, %v309_v53, 0.0  ;;  %v854_v53 = vld [vmem:[%s1204_s3] sm:$0xff]  }
  0xa6   : > { %v254_v58 = vpop.xlane.xlu1 %253  ;;  %v278_v60 = vmul.f32 0.03125, %v251_v57  ;;  %v302_v62 = vmul.f32 %v1016_v54, %v1016_v54 }
  0xa7   : > { %v279_v61 = vmul.f32 0.03125, %v254_v58  ;;  %v303_v63 = vmul.f32 %v1018_v55, %v1018_v55 }
  0xa8   : > { %v1027_v0 = vsub.f32 %v949_v12, %v278_v60  ;;  %v322_v2 = vsel %vm218_vm0, %v302_v62, 0.0 }
  0xa9   : > { %v1030_v1 = vsub.f32 %v952_v13, %v279_v61  ;;  %344 = vadd.xlane.f32.xlu1 %v343_v59  ;;  %323 = vadd.xlane.f32.xlu0 %v322_v2  ;;  %v233_v3 = vpop.xlane.xlu0 %232  ;;  %v325_v5 = vsel %vm218_vm0, %v303_v63, 0.0 }
  0xaa   : > { %v236_v4 = vpop.xlane.xlu1 %235  ;;  %v272_v6 = vmul.f32 0.03125, %v233_v3  ;;  %v310_v8 = vmul.f32 %v1027_v0, %v1027_v0 }
  0xab   : > { %v273_v7 = vmul.f32 0.03125, %v236_v4  ;;  %v311_v9 = vmul.f32 %v1030_v1, %v1030_v1 }
  0xac   : > { %v1039_v10 = vsub.f32 %v959_v16, %v272_v6  ;;  %v346_v12 = vsel %vm218_vm0, %v310_v8, 0.0 }
  0xad   : > { %v1042_v11 = vsub.f32 %v962_v17, %v273_v7  ;;  %326 = vadd.xlane.f32.xlu1 %v325_v5  ;;  %347 = vadd.xlane.f32.xlu0 %v346_v12  ;;  %v257_v13 = vpop.xlane.xlu0 %256  ;;  %v349_v15 = vsel %vm218_vm0, %v311_v9, 0.0 }
  0xae   : > { %v260_v14 = vpop.xlane.xlu1 %259  ;;  %v280_v18 = vmul.f32 0.03125, %v257_v13  ;;  %v304_v22 = vmul.f32 %v1039_v10, %v1039_v10 }
  0xaf   : > { %v281_v19 = vmul.f32 0.03125, %v260_v14  ;;  %v305_v16 = vmul.f32 %v1042_v11, %v1042_v11 }
  0xb0   : > { %v1051_v23 = vsub.f32 %v969_v20, %v280_v18  ;;  %v328_v26 = vsel %vm218_vm0, %v304_v22, 0.0 }
  0xb1   : > { %v1054_v17 = vsub.f32 %v972_v21, %v281_v19  ;;  %350 = vadd.xlane.f32.xlu1 %v349_v15  ;;  %329 = vadd.xlane.f32.xlu0 %v328_v26  ;;  %v239_v27 = vpop.xlane.xlu0 %238  ;;  %v331_v31 = vsel %vm218_vm0, %v305_v16, 0.0 }
  0xb2   : > { %v242_v30 = vpop.xlane.xlu1 %241  ;;  %v274_v32 = vmul.f32 0.03125, %v239_v27  ;;  %v312_v34 = vmul.f32 %v1051_v23, %v1051_v23 }
  0xb3   : > { %v275_v33 = vmul.f32 0.03125, %v242_v30  ;;  %v313_v20 = vmul.f32 %v1054_v17, %v1054_v17 }
  0xb4   : > { %v1063_v35 = vsub.f32 %v979_v24, %v274_v32  ;;  %v352_v38 = vsel %vm218_vm0, %v312_v34, 0.0 }
  0xb5   : > { %v1066_v21 = vsub.f32 %v982_v25, %v275_v33  ;;  %332 = vadd.xlane.f32.xlu1 %v331_v31  ;;  %353 = vadd.xlane.f32.xlu0 %v352_v38  ;;  %v263_v39 = vpop.xlane.xlu0 %262  ;;  %v355_v41 = vsel %vm218_vm0, %v313_v20, 0.0  ;;  %v1098_v33 = vld [vmem:[%s1202_s1] ss:$0 sm:$0xff] }
  0xb6   : > { %v266_v40 = vpop.xlane.xlu1 %265  ;;  %v282_v42 = vmul.f32 0.03125, %v263_v39  ;;  %v306_v46 = vmul.f32 %v1063_v35, %v1063_v35 }
  0xb7   : > { %v283_v43 = vmul.f32 0.03125, %v266_v40  ;;  %v307_v24 = vmul.f32 %v1066_v21, %v1066_v21 }
  0xb8   : > { %v1075_v47 = vsub.f32 %v989_v28, %v282_v42  ;;  %v334_v48 = vsel %vm218_vm0, %v306_v46, 0.0 }
  0xb9   : > { %v1078_v25 = vsub.f32 %v992_v29, %v283_v43  ;;  %356 = vadd.xlane.f32.xlu1 %v355_v41  ;;  %335 = vadd.xlane.f32.xlu0 %v334_v48  ;;  %v337_v49 = vsel %vm218_vm0, %v307_v24, 0.0  ;;  %v853_v29 = vld [vmem:[%s1204_s3 + $0x8] sm:$0xff]  }
  0xba   : > { %v314_v50 = vmul.f32 %v1075_v47, %v1075_v47  ;;  %821 = vmatprep.subr.bf16.mxu0 %v853_v29  ;;  %841 = vmatprep.subr.bf16.mxu1 %v853_v29 }
  0xbb   : > { %v315_v51 = vmul.f32 %v1078_v25, %v1078_v25  ;;  %822 = vmatpush3.bf16.msra.mxu0 %v853_v29  ;;  %843 = vmatpush3.bf16.msra.mxu1 %v853_v29 }
  0xbc   : > { %v358_v52 = vsel %vm218_vm0, %v314_v50, 0.0  ;;  %823 = vmatprep.subr.bf16.mxu0 %v854_v53  ;;  %842 = vmatprep.subr.bf16.mxu1 %v854_v53 }
  0xbd   : > { %338 = vadd.xlane.f32.xlu1 %v337_v49  ;;  %359 = vadd.xlane.f32.xlu0 %v358_v52  ;;  %v361_v28 = vsel %vm218_vm0, %v315_v51, 0.0 }
  0xbf   : > { %824 = vmatpush3.bf16.msra.mxu0 %v854_v53  ;;  %844 = vmatpush3.bf16.msra.mxu1 %v854_v53 }
  0xc1   : > { %362 = vadd.xlane.f32.xlu1 %v361_v28 }
 0x12a   : > { %v318_v56 = vpop.xlane.xlu0 %317 }
 0x12b   : > { %v364_v57 = vmul.f32 0.03125, %v318_v56 }
 0x12d   : > { %v380_v58 = vadd.f32 1e-05, %v364_v57 }
 0x12e   : > { %v321_v59 = vpop.xlane.xlu1 %320  ;;  %v342_v60 = vpop.xlane.xlu0 %341 }
 0x12f   : > { %855 = vrsqrt.f32 %v380_v58  ;;  %v365_v61 = vmul.f32 0.03125, %v321_v59  ;;  %v372_v62 = vmul.f32 0.03125, %v342_v60 }
 0x131   : > { %v381_v63 = vadd.f32 1e-05, %v365_v61  ;;  %v388_v2 = vadd.f32 1e-05, %v372_v62 }
 0x132   : > { %v345_v3 = vpop.xlane.xlu1 %344  ;;  %v324_v4 = vpop.xlane.xlu0 %323 }
 0x133   : > { %857 = vrsqrt.f32 %v381_v63  ;;  %v373_v5 = vmul.f32 0.03125, %v345_v3  ;;  %v366_v6 = vmul.f32 0.03125, %v324_v4 }
 0x134   : > { %859 = vrsqrt.f32 %v388_v2 }
 0x135   : > { %v389_v7 = vadd.f32 1e-05, %v373_v5  ;;  %v382_v8 = vadd.f32 1e-05, %v366_v6 }
 0x136   : > { %v327_v9 = vpop.xlane.xlu1 %326  ;;  %v348_v12 = vpop.xlane.xlu0 %347 }
 0x137   : > { %861 = vrsqrt.f32 %v389_v7  ;;  %v367_v13 = vmul.f32 0.03125, %v327_v9  ;;  %v374_v14 = vmul.f32 0.03125, %v348_v12 }
 0x138   : > { %863 = vrsqrt.f32 %v382_v8 }
 0x139   : > { %v383_v15 = vadd.f32 1e-05, %v367_v13  ;;  %v390_v18 = vadd.f32 1e-05, %v374_v14 }
 0x13a   : > { %v351_v19 = vpop.xlane.xlu1 %350  ;;  %v330_v22 = vpop.xlane.xlu0 %329 }
 0x13b   : > { %865 = vrsqrt.f32 %v383_v15  ;;  %v375_v16 = vmul.f32 0.03125, %v351_v19  ;;  %v368_v26 = vmul.f32 0.03125, %v330_v22 }
 0x13c   : > { %v856_v27 = vpop.eup %855  ;;  %867 = vrsqrt.f32 %v390_v18 }
 0x13d   : > { %v391_v30 = vadd.f32 1e-05, %v375_v16  ;;  %v384_v31 = vadd.f32 1e-05, %v368_v26  ;;  %v412_v32 = vmul.f32 %v856_v27, %v998_v36  ;;  %v1105_v36 = vld [vmem:[%s1203_s2] ss:$0 sm:$0xff] }
 0x13e   : > { %v333_v34 = vpop.xlane.xlu1 %332  ;;  %v354_v20 = vpop.xlane.xlu0 %353 }
 0x13f   : > { %869 = vrsqrt.f32 %v391_v30  ;;  %v369_v38 = vmul.f32 0.03125, %v333_v34  ;;  %v376_v39 = vmul.f32 0.03125, %v354_v20  ;;  %v435_v41 = vmul.f32 %v1098_v33, %v412_v32 }
 0x140   : > { %v858_v40 = vpop.eup %857  ;;  %871 = vrsqrt.f32 %v384_v31 }
 0x141   : > { %v860_v42 = vpop.eup %859  ;;  %v385_v43 = vadd.f32 1e-05, %v369_v38  ;;  %v392_v46 = vadd.f32 1e-05, %v376_v39  ;;  %v413_v24 = vmul.f32 %v858_v40, %v1006_v44  ;;  %v458_v53 = vadd.f32 %v1105_v36, %v435_v41 }
 0x142   : > { %v357_v48 = vpop.xlane.xlu1 %356  ;;  %v336_v49 = vpop.xlane.xlu0 %335  ;;  %v420_v50 = vmul.f32 %v860_v42, %v1000_v37 }
 0x143   : > { %873 = vrsqrt.f32 %v385_v43  ;;  %v377_v51 = vmul.f32 0.03125, %v357_v48  ;;  %v370_v52 = vmul.f32 0.03125, %v336_v49  ;;  %v436_v28 = vmul.f32 %v1098_v33, %v413_v24 }
 0x144   : > { %v862_v29 = vpop.eup %861  ;;  %875 = vrsqrt.f32 %v392_v46  ;;  %v443_v37 = vmul.f32 %v1098_v33, %v420_v50 }
 0x145   : > { %v864_v56 = vpop.eup %863  ;;  %v393_v44 = vadd.f32 1e-05, %v377_v51  ;;  %v386_v57 = vadd.f32 1e-05, %v370_v52  ;;  %v459_v58 = vadd.f32 %v1105_v36, %v436_v28  ;;  %v421_v59 = vmul.f32 %v862_v29, %v1008_v45 }
 0x146   : > { %v339_v60 = vpop.xlane.xlu1 %338  ;;  %v360_v61 = vpop.xlane.xlu0 %359  ;;  %v414_v62 = vmul.f32 %v864_v56, %v1016_v54  ;;  %v466_v54 = vadd.f32 %v1105_v36, %v443_v37 }
 0x147   : > { %877 = vrsqrt.f32 %v393_v44  ;;  %v371_v63 = vmul.f32 0.03125, %v339_v60  ;;  %v378_v2 = vmul.f32 0.03125, %v360_v61  ;;  %v474_v3 = vpack.c.bf16 %v459_v58, %v458_v53 }
 0x148   : > { %v866_v4 = vpop.eup %865  ;;  %879 = vrsqrt.f32 %v386_v57  ;;  %v444_v5 = vmul.f32 %v1098_v33, %v421_v59  ;;  %v437_v6 = vmul.f32 %v1098_v33, %v414_v62 }
 0x149   : > { %v868_v7 = vpop.eup %867  ;;  %v387_v8 = vadd.f32 1e-05, %v371_v63  ;;  %v394_v9 = vadd.f32 1e-05, %v378_v2  ;;  %825 = vmatprep.mubr.msk.bf16.mxu0 %vm218_vm0, %v474_v3  ;;  %v415_v45 = vmul.f32 %v866_v4, %v1018_v55 }
 0x14a   : > { %v363_v12 = vpop.xlane.xlu1 %362  ;;  %v467_v13 = vadd.f32 %v1105_v36, %v444_v5  ;;  %v422_v14 = vmul.f32 %v868_v7, %v1027_v0  ;;  %v460_v16 = vadd.f32 %v1105_v36, %v437_v6 }
 0x14b   : > { %881 = vrsqrt.f32 %v387_v8  ;;  %v379_v15 = vmul.f32 0.03125, %v363_v12  ;;  %v438_v18 = vmul.f32 %v1098_v33, %v415_v45 }
 0x14c   : > { %v870_v19 = vpop.eup %869  ;;  %883 = vrsqrt.f32 %v394_v9  ;;  %v478_v22 = vpack.c.bf16 %v467_v13, %v466_v54  ;;  %v445_v31 = vmul.f32 %v1098_v33, %v422_v14 }
 0x14d   : > { %v872_v26 = vpop.eup %871  ;;  %v395_v27 = vadd.f32 1e-05, %v379_v15  ;;  %v461_v55 = vadd.f32 %v1105_v36, %v438_v18  ;;  %v423_v30 = vmul.f32 %v870_v19, %v1030_v1 }
 0x14e   : > { %833 = vmatprep.mubr.msk.bf16.mxu1 %vm218_vm0, %v478_v22  ;;  %v416_v0 = vmul.f32 %v872_v26, %v1039_v10  ;;  %v468_v39 = vadd.f32 %v1105_v36, %v445_v31 }
 0x14f   : > { %885 = vrsqrt.f32 %v395_v27  ;;  %v475_v32 = vpack.c.bf16 %v461_v55, %v460_v16  ;;  %v446_v34 = vmul.f32 %v1098_v33, %v423_v30 }
 0x150   : > { %v874_v20 = vpop.eup %873  ;;  %v439_v41 = vmul.f32 %v1098_v33, %v416_v0 }
 0x151   : > { %v876_v38 = vpop.eup %875  ;;  %826 = vmatmul.mubr.msk.bf16.vlgmr.msra.gmra.mxu0 %vm218_vm0, %v475_v32  ;;  %v469_v40 = vadd.f32 %v1105_v36, %v446_v34  ;;  %v417_v1 = vmul.f32 %v874_v20, %v1042_v11 }
 0x152   : > { %v424_v42 = vmul.f32 %v876_v38, %v1051_v23  ;;  %v462_v48 = vadd.f32 %v1105_v36, %v439_v41 }
 0x153   : > { %v479_v43 = vpack.c.bf16 %v469_v40, %v468_v39  ;;  %v440_v10 = vmul.f32 %v1098_v33, %v417_v1 }
 0x154   : > { %v878_v46 = vpop.eup %877  ;;  %v447_v51 = vmul.f32 %v1098_v33, %v424_v42 }
 0x155   : > { %v880_v24 = vpop.eup %879  ;;  %834 = vmatmul.mubr.msk.bf16.vlgmr.msra.gmra.mxu1 %vm218_vm0, %v479_v43  ;;  %v463_v49 = vadd.f32 %v1105_v36, %v440_v10  ;;  %v425_v50 = vmul.f32 %v878_v46, %v1054_v17 }
 0x156   : > { %v418_v11 = vmul.f32 %v880_v24, %v1063_v35  ;;  %v470_v53 = vadd.f32 %v1105_v36, %v447_v51 }
 0x157   : > { %v476_v52 = vpack.c.bf16 %v463_v49, %v462_v48  ;;  %v448_v23 = vmul.f32 %v1098_v33, %v425_v50 }
 0x158   : > { %v882_v28 = vpop.eup %881  ;;  %v441_v57 = vmul.f32 %v1098_v33, %v418_v11 }
 0x159   : > { %v884_v29 = vpop.eup %883  ;;  %829 = vmatprep.mubr.msk.bf16.mxu0 %vm218_vm0, %v476_v52  ;;  %v471_v56 = vadd.f32 %v1105_v36, %v448_v23  ;;  %v419_v44 = vmul.f32 %v882_v28, %v1066_v21 }
 0x15a   : > { %v426_v17 = vmul.f32 %v884_v29, %v1075_v47  ;;  %v464_v60 = vadd.f32 %v1105_v36, %v441_v57 }
 0x15b   : > { %v480_v58 = vpack.c.bf16 %v471_v56, %v470_v53  ;;  %v442_v35 = vmul.f32 %v1098_v33, %v419_v44 }
 0x15c   : > { %v886_v59 = vpop.eup %885  ;;  %v449_v62 = vmul.f32 %v1098_v33, %v426_v17 }
 0x15d   : > { %837 = vmatprep.mubr.msk.bf16.mxu1 %vm218_vm0, %v480_v58  ;;  %v465_v61 = vadd.f32 %v1105_v36, %v442_v35  ;;  %v427_v37 = vmul.f32 %v886_v59, %v1078_v25 }
 0x15e   : > { %v472_v47 = vadd.f32 %v1105_v36, %v449_v62 }
 0x15f   : > { %v477_v21 = vpack.c.bf16 %v465_v61, %v464_v60  ;;  %v450_v63 = vmul.f32 %v1098_v33, %v427_v37 }
 0x161   : > { %830 = vmatmul.mubr.msk.bf16.gmra.mxu0 %vm218_vm0, %v477_v21  ;;  %v473_v2 = vadd.f32 %v1105_v36, %v450_v63 }
 0x163   : > { %v481_v3 = vpack.c.bf16 %v473_v2, %v472_v47 }
 0x165   : > { %838 = vmatmul.mubr.msk.bf16.gmra.mxu1 %vm218_vm0, %v481_v3 }
 0x211   : > { %v827_v25 = vpop.f32.mrf.mxu0 }
 0x212   : > { %v797_v33 = vpack.c.bf16 %v827_v25, %v827_v25 }
 0x213   : > { %v556_v4 = vpop.f32.mrf.mxu0 }
 0x214   : > { %686 = vst.msk [vmem:[%s1164_s7 + $0x8] sm:$0xf] %vm683_vm1, %v797_v33  ;;  %v795_v36 = vpack.c.bf16 %v556_v4, %v556_v4 }
 0x215   : > { %v828_v5 = vpop.f32.mrf.mxu0  ;;  %v835_v6 = vpop.f32.mrf.mxu1 }
 0x216   : > { %684 = vst.msk [vmem:[%s1164_s7] sm:$0xf] %vm683_vm1, %v795_v36  ;;  %v798_v7 = vpack.c.bf16 %v828_v5, %v828_v5  ;;  %v805_v8 = vpack.c.bf16 %v835_v6, %v835_v6 }
 0x217   : > { %v559_v9 = vpop.f32.mrf.mxu0  ;;  %v588_v45 = vpop.f32.mrf.mxu1 }
 0x218   : > { %687 = vst.msk [vmem:[%s1164_s7 + $0xc] sm:$0xf] %vm683_vm1, %v798_v7  ;;  %694 = vst.msk [vmem:[%s1164_s7 + $0x28] sm:$0xf] %vm683_vm1, %v805_v8  ;;  %v796_v12 = vpack.c.bf16 %v559_v9, %v559_v9  ;;  %v803_v54 = vpack.c.bf16 %v588_v45, %v588_v45 }
 0x219   : > { %v836_v13 = vpop.f32.mrf.mxu1 }
 0x21a   : > { %685 = vst.msk [vmem:[%s1164_s7 + $0x4] sm:$0xf] %vm683_vm1, %v796_v12  ;;  %692 = vst.msk [vmem:[%s1164_s7 + $0x20] sm:$0xf] %vm683_vm1, %v803_v54  ;;  %v806_v14 = vpack.c.bf16 %v836_v13, %v836_v13 }
 0x21b   : > { %v591_v15 = vpop.f32.mrf.mxu1 }
 0x21c   : > { %695 = vst.msk [vmem:[%s1164_s7 + $0x2c] sm:$0xf] %vm683_vm1, %v806_v14  ;;  %v804_v18 = vpack.c.bf16 %v591_v15, %v591_v15 }
 0x21e   : > { %693 = vst.msk [vmem:[%s1164_s7 + $0x24] sm:$0xf] %vm683_vm1, %v804_v18 }
 0x221   : > { %v831_v19 = vpop.f32.mrf.mxu0 }
 0x222   : > { %v801_v22 = vpack.c.bf16 %v831_v19, %v831_v19 }
 0x223   : > { %v572_v16 = vpop.f32.mrf.mxu0 }
 0x224   : > { %690 = vst.msk [vmem:[%s1164_s7 + $0x18] sm:$0xf] %vm683_vm1, %v801_v22  ;;  %v799_v26 = vpack.c.bf16 %v572_v16, %v572_v16 }
 0x225   : > { %v832_v27 = vpop.f32.mrf.mxu0  ;;  %v839_v55 = vpop.f32.mrf.mxu1 }
 0x226   : > { %688 = vst.msk [vmem:[%s1164_s7 + $0x10] sm:$0xf] %vm683_vm1, %v799_v26  ;;  %v802_v30 = vpack.c.bf16 %v832_v27, %v832_v27  ;;  %v809_v31 = vpack.c.bf16 %v839_v55, %v839_v55 }
 0x227   : > { %v575_v0 = vpop.f32.mrf.mxu0  ;;  %v604_v32 = vpop.f32.mrf.mxu1 }
 0x228   : > { %691 = vst.msk [vmem:[%s1164_s7 + $0x1c] sm:$0xf] %vm683_vm1, %v802_v30  ;;  %698 = vst.msk [vmem:[%s1164_s7 + $0x38] sm:$0xf] %vm683_vm1, %v809_v31  ;;  %v800_v34 = vpack.c.bf16 %v575_v0, %v575_v0  ;;  %v807_v20 = vpack.c.bf16 %v604_v32, %v604_v32 }
 0x229   : > { %v840_v38 = vpop.f32.mrf.mxu1 }
 0x22a   : > { %689 = vst.msk [vmem:[%s1164_s7 + $0x14] sm:$0xf] %vm683_vm1, %v800_v34  ;;  %696 = vst.msk [vmem:[%s1164_s7 + $0x30] sm:$0xf] %vm683_vm1, %v807_v20  ;;  %v810_v39 = vpack.c.bf16 %v840_v38, %v840_v38 }
 0x22b   : > { %v607_v40 = vpop.f32.mrf.mxu1 }
 0x22c   : > { %699 = vst.msk [vmem:[%s1164_s7 + $0x3c] sm:$0xf] %vm683_vm1, %v810_v39  ;;  %v808_v1 = vpack.c.bf16 %v607_v40, %v607_v40 }
 0x22e   : > { %697 = vst.msk [vmem:[%s1164_s7 + $0x34] sm:$0xf] %vm683_vm1, %v808_v1 }
 0x22f PF: > { %s14_s15 = sadd.s32 1, %s893_s15  }
 0x230   : > { %p11_p4 = scmp.ge.s32.totalorder %s14_s15, 6  }
 0x232   :  { %13 = sbr.rel (!%p11_p4) target bundleno = 1 (0x1), region = 66 }

// kernel: basic_layer_forward.8
= control target key start
LH: loop header
LB: loop body
LE: loop exit
PB: predicated region body
PF: predicated region fallthrough
CT: control target
= control target key end

     0   :  { %s2131_s13 = smov 0   ;;  %s2923_s0 = inlined_call_operand.vmem [shape: bf16[512,32], index: 0, kind: input, shape index: {}]   ;;  %s2924_s1 = inlined_call_operand.vmem [shape: f32[512,32], index: 1, kind: input, shape index: {}]   ;;  %s2925_s2 = inlined_call_operand.vmem [shape: bf16[32,32], index: 2, kind: input, shape index: {}]   ;;  %s2926_s3 = inlined_call_operand.vmem [shape: f32[1,32], index: 3, kind: input, shape index: {}]   ;;  %s2927_s4 = inlined_call_operand.vmem [shape: f32[1,32], index: 4, kind: input, shape index: {}]   ;;  %s2928_s5 = inlined_call_operand.vmem [shape: f32[1,32], index: 5, kind: input, shape index: {}]   ;;  %s2929_s6 = inlined_call_operand.vmem [shape: bf16[32,128], index: 6, kind: input, shape index: {}]   ;;  %s2930_s7 = inlined_call_operand.vmem [shape: f32[1,128], index: 7, kind: input, shape index: {}]   ;;  %s2931_s8 = inlined_call_operand.vmem [shape: bf16[128,32], index: 8, kind: input, shape index: {}]   ;;  %s2932_s9 = inlined_call_operand.vmem [shape: f32[1,32], index: 9, kind: input, shape index: {}]   ;;  %s2933_s10 = inlined_call_operand.vmem [shape: f32[512,32], index: 10, kind: output, shape index: {}]  }
   0x1 LB: > { %s1766_s14 = sadd.s32 4294967295, %s2074_s13   ;;  %p1770_p0 = scmp.ge.s32.totalorder %s2074_s13, 1  ;;  %s2074_s13 = sphi %s2131_s13, %s20_s13  }
   0x2   : > { %p324_p1 = scmp.lt.s32.totalorder %s2074_s13, 5 }
   0x4   : > { %p325_p2 = pnand %p1770_p0, %p324_p1 }
   0x6   : > { %328 = sbr.rel (%p325_p2) target bundleno = 1070 (0x42e), region = 60 }
   0xb   : > { %v1952_v0 = vld [vmem:[%s2925_s2 + $0x8] sm:$0xff]   ;;  %s1771_s17 = sshll.u32 %s1766_s14, 4  ;;  %v1953_v1 = vld [vmem:[%s2925_s2] sm:$0xff]   ;;  %vm474_vm0 = vcmask 261120  }
   0xc   : > { %p368_p3 = scmp.lt.s32.totalorder %s1771_s17, 63  ;;  %1856 = vmatprep.subr.bf16.mxu0 %v1952_v0  ;;  %v2171_v12 = vld [vmem:[%s2926_s3] ss:$0 sm:$0xff] }
   0xd   : > { %1857 = vmatpush3.bf16.msra.mxu0 %v1952_v0 }
   0xe   : > { %s2968_s17 = smov (!%p368_p3, %s1771_s17), 63  ;;  %1858 = vmatprep.subr.bf16.mxu0 %v1953_v1 }
   0xf   : > { %s1772_s20 = sshll.u32 %s2968_s17, 2  ;;  %s1774_s24 = sshll.u32 %s2968_s17, 3 }
  0x10   : > { %s371_s23 = scalar_lea.vmem %s2923_s0, %s1772_s20  ;;  %s2165_s27 = scalar_lea.vmem %s2924_s1, %s1774_s24 }
  0x11   : > { %1859 = vmatpush3.bf16.msra.mxu0 %v1953_v1  ;;  %v1954_v2 = vld [vmem:[%s371_s23] sm:$0xff]   ;;  %v1955_v3 = vld [vmem:[%s371_s23 + $0x8] sm:$0xff]   ;;  %v1956_v4 = vld [vmem:[%s371_s23 + $0x10] sm:$0xff]   ;;  %s2855_s26 = scalar_lea.vmem %s2933_s10, %s1774_s24 }
  0x12   : > { %1860 = vmatprep.mubr.msk.bf16.mxu0 %vm474_vm0, %v1954_v2  ;;  %v1957_v5 = vld [vmem:[%s371_s23 + $0x18] sm:$0xff]   ;;  %v1958_v6 = vld [vmem:[%s371_s23 + $0x20] sm:$0xff]   ;;  %v1959_v7 = vld [vmem:[%s371_s23 + $0x28] sm:$0xff]  }
  0x13   : > { %v1960_v8 = vld [vmem:[%s371_s23 + $0x30] sm:$0xff]   ;;  %v1961_v9 = vld [vmem:[%s371_s23 + $0x38] sm:$0xff]   ;;  %v402_v13 = vld [vmem:[%s2165_s27] sm:$0xff] }
  0x14   : > { %1861 = vmatmul.mubr.msk.bf16.vlgmr.msra.gmra.mxu0 %vm474_vm0, %v1955_v3  ;;  %v404_v10 = vld [vmem:[%s2165_s27 + $0x10] sm:$0xff]  ;;  %v405_v16 = vld [vmem:[%s2165_s27 + $0x18] sm:$0xff]  ;;  %v403_v20 = vld [vmem:[%s2165_s27 + $0x8] sm:$0xff] }
  0x15   : > { %1864 = vmatprep.mubr.msk.bf16.mxu0 %vm474_vm0, %v1956_v4  ;;  %v408_v28 = vld [vmem:[%s2165_s27 + $0x30] sm:$0xff]  ;;  %v406_v30 = vld [vmem:[%s2165_s27 + $0x20] sm:$0xff]  ;;  %v409_v37 = vld [vmem:[%s2165_s27 + $0x38] sm:$0xff] }
  0x16   : > { %v407_v39 = vld [vmem:[%s2165_s27 + $0x28] sm:$0xff]  ;;  %v412_v46 = vld [vmem:[%s2165_s27 + $0x50] sm:$0xff]  ;;  %v410_v48 = vld [vmem:[%s2165_s27 + $0x40] sm:$0xff] }
  0x17   : > { %v413_v56 = vld [vmem:[%s2165_s27 + $0x58] sm:$0xff]  ;;  %v411_v58 = vld [vmem:[%s2165_s27 + $0x48] sm:$0xff]  ;;  %v416_v2 = vld [vmem:[%s2165_s27 + $0x70] sm:$0xff] }
  0x18   : > { %v414_v4 = vld [vmem:[%s2165_s27 + $0x60] sm:$0xff] }
  0x1c   : > { %1865 = vmatmul.mubr.msk.bf16.gmra.mxu0 %vm474_vm0, %v1957_v5 }
  0x1d   : > { %1868 = vmatprep.mubr.msk.bf16.mxu0 %vm474_vm0, %v1958_v6 }
  0x24   : > { %1869 = vmatmul.mubr.msk.bf16.gmra.mxu0 %vm474_vm0, %v1959_v7 }
  0x25   : > { %1872 = vmatprep.mubr.msk.bf16.mxu0 %vm474_vm0, %v1960_v8 }
  0x2c   : > { %1873 = vmatmul.mubr.msk.bf16.gmra.mxu0 %vm474_vm0, %v1961_v9 }
  0xd4   : > { %v1862_v11 = vpop.f32.mrf.mxu0 }
  0xd5   : > { %v598_v14 = vadd.f32 %v1862_v11, %v404_v10 }
  0xd6   : > { %v533_v15 = vpop.f32.mrf.mxu0 }
  0xd7   : > { %v2176_v17 = vadd.f32 %v2171_v12, %v598_v14  ;;  %v596_v18 = vadd.f32 %v533_v15, %v402_v13  ;;  %v417_v13 = vld [vmem:[%s2165_s27 + $0x78] sm:$0xff]  ;;  %v415_v15 = vld [vmem:[%s2165_s27 + $0x68] sm:$0xff] }
  0xd8   : > { %v1863_v19 = vpop.f32.mrf.mxu0 }
  0xd9   : > { %v2180_v21 = vadd.f32 %v2171_v12, %v596_v18  ;;  %v599_v22 = vadd.f32 %v1863_v19, %v405_v16  ;;  %v641_v23 = vsel %vm474_vm0, %v2176_v17, 0.0 }
  0xda   : > { %642 = vadd.xlane.f32.xlu1 %v641_v23  ;;  %v536_v24 = vpop.f32.mrf.mxu0 }
  0xdb   : > { %v2185_v25 = vadd.f32 %v2171_v12, %v599_v22  ;;  %v597_v26 = vadd.f32 %v536_v24, %v403_v20  ;;  %v635_v27 = vsel %vm474_vm0, %v2180_v21, 0.0 }
  0xdc   : > { %636 = vadd.xlane.f32.xlu0 %v635_v27  ;;  %v1866_v29 = vpop.f32.mrf.mxu0 }
  0xdd   : > { %v2192_v31 = vadd.f32 %v2171_v12, %v597_v26  ;;  %v644_v32 = vsel %vm474_vm0, %v2185_v25, 0.0  ;;  %v602_v33 = vadd.f32 %v1866_v29, %v408_v28 }
  0xde   : > { %645 = vadd.xlane.f32.xlu1 %v644_v32  ;;  %v549_v34 = vpop.f32.mrf.mxu0 }
  0xdf   : > { %v600_v35 = vadd.f32 %v549_v34, %v406_v30  ;;  %v638_v36 = vsel %vm474_vm0, %v2192_v31, 0.0  ;;  %v2204_v41 = vadd.f32 %v2171_v12, %v602_v33 }
  0xe0   : > { %639 = vadd.xlane.f32.xlu0 %v638_v36  ;;  %v1867_v38 = vpop.f32.mrf.mxu0 }
  0xe1   : > { %v2201_v40 = vadd.f32 %v2171_v12, %v600_v35  ;;  %v603_v43 = vadd.f32 %v1867_v38, %v409_v37  ;;  %v653_v51 = vsel %vm474_vm0, %v2204_v41, 0.0 }
  0xe2   : > { %v552_v42 = vpop.f32.mrf.mxu0 }
  0xe3   : > { %2945 = vst [vmem:[#allocation2_spill] sm:$0xff] %v2201_v40  ;;  %v601_v44 = vadd.f32 %v552_v42, %v407_v39  ;;  %v647_v45 = vsel %vm474_vm0, %v2201_v40, 0.0  ;;  %v2216_v52 = vadd.f32 %v2171_v12, %v603_v43 }
  0xe4   : > { %648 = vadd.xlane.f32.xlu0 %v647_v45  ;;  %v1870_v47 = vpop.f32.mrf.mxu0 }
  0xe5   : > { %v2211_v49 = vadd.f32 %v2171_v12, %v601_v44  ;;  %2947 = vst [vmem:[#allocation4_spill] sm:$0xff] %v2216_v52  ;;  %v606_v53 = vadd.f32 %v1870_v47, %v412_v46  ;;  %v656_v0 = vsel %vm474_vm0, %v2216_v52, 0.0 }
  0xe6   : > { %v565_v50 = vpop.f32.mrf.mxu0 }
  0xe7   : > { %2946 = vst [vmem:[#allocation3_spill] sm:$0xff] %v2211_v49  ;;  %v604_v54 = vadd.f32 %v565_v50, %v410_v48  ;;  %v650_v55 = vsel %vm474_vm0, %v2211_v49, 0.0  ;;  %v2226_v62 = vadd.f32 %v2171_v12, %v606_v53 }
  0xe8   : > { %654 = vadd.xlane.f32.xlu0 %v653_v51  ;;  %651 = vadd.xlane.f32.xlu1 %v650_v55  ;;  %v1871_v57 = vpop.f32.mrf.mxu0 }
  0xe9   : > { %v2223_v59 = vadd.f32 %v2171_v12, %v604_v54  ;;  %v607_v60 = vadd.f32 %v1871_v57, %v413_v56  ;;  %2949 = vst [vmem:[#allocation6_spill] sm:$0xff] %v2226_v62  ;;  %v665_v10 = vsel %vm474_vm0, %v2226_v62, 0.0 }
  0xea   : > { %v568_v61 = vpop.f32.mrf.mxu0 }
  0xeb   : > { %2948 = vst [vmem:[#allocation5_spill] sm:$0xff] %v2223_v59  ;;  %v605_v63 = vadd.f32 %v568_v61, %v411_v58  ;;  %v659_v1 = vsel %vm474_vm0, %v2223_v59, 0.0  ;;  %v2238_v6 = vadd.f32 %v2171_v12, %v607_v60 }
  0xec   : > { %657 = vadd.xlane.f32.xlu1 %v656_v0  ;;  %660 = vadd.xlane.f32.xlu0 %v659_v1  ;;  %v1874_v3 = vpop.f32.mrf.mxu0 }
  0xed   : > { %v2235_v5 = vadd.f32 %v2171_v12, %v605_v63  ;;  %2951 = vst [vmem:[#allocation8_spill] sm:$0xff] %v2238_v6  ;;  %v610_v8 = vadd.f32 %v1874_v3, %v416_v2  ;;  %v668_v19 = vsel %vm474_vm0, %v2238_v6, 0.0 }
  0xee   : > { %v581_v7 = vpop.f32.mrf.mxu0 }
  0xef   : > { %2950 = vst [vmem:[#allocation7_spill] sm:$0xff] %v2235_v5  ;;  %v608_v9 = vadd.f32 %v581_v7, %v414_v4  ;;  %v662_v11 = vsel %vm474_vm0, %v2235_v5, 0.0  ;;  %v2252_v20 = vadd.f32 %v2171_v12, %v610_v8 }
  0xf0   : > { %666 = vadd.xlane.f32.xlu0 %v665_v10  ;;  %663 = vadd.xlane.f32.xlu1 %v662_v11  ;;  %v1875_v14 = vpop.f32.mrf.mxu0 }
  0xf1   : > { %v2247_v16 = vadd.f32 %v2171_v12, %v608_v9  ;;  %2953 = vst [vmem:[#allocation10_spill] sm:$0xff] %v2252_v20  ;;  %v611_v22 = vadd.f32 %v1875_v14, %v417_v13  ;;  %v677_v28 = vsel %vm474_vm0, %v2252_v20, 0.0 }
  0xf2   : > { %v584_v18 = vpop.f32.mrf.mxu0 }
  0xf3   : > { %2952 = vst [vmem:[#allocation9_spill] sm:$0xff] %v2247_v16  ;;  %v609_v23 = vadd.f32 %v584_v18, %v415_v15  ;;  %v671_v24 = vsel %vm474_vm0, %v2247_v16, 0.0  ;;  %v2260_v27 = vadd.f32 %v2171_v12, %v611_v22 }
  0xf4   : > { %669 = vadd.xlane.f32.xlu1 %v668_v19  ;;  %672 = vadd.xlane.f32.xlu0 %v671_v24 }
  0xf5   : > { %v2257_v26 = vadd.f32 %v2171_v12, %v609_v23  ;;  %2955 = vst [vmem:[#allocation12_spill] sm:$0xff] %v2260_v27  ;;  %v680_v30 = vsel %vm474_vm0, %v2260_v27, 0.0 }
  0xf7   : > { %2954 = vst [vmem:[#allocation11_spill] sm:$0xff] %v2257_v26  ;;  %v674_v29 = vsel %vm474_vm0, %v2257_v26, 0.0 }
  0xf8   : > { %678 = vadd.xlane.f32.xlu0 %v677_v28  ;;  %675 = vadd.xlane.f32.xlu1 %v674_v29 }
  0xfc   : > { %681 = vadd.xlane.f32.xlu1 %v680_v30 }
 0x163   : > { %v643_v32 = vpop.xlane.xlu1 %642 }
 0x164   : > { %v686_v33 = vmul.f32 0.03125, %v643_v32 }
 0x165   : > { %v637_v34 = vpop.xlane.xlu0 %636 }
 0x166   : > { %v684_v35 = vmul.f32 0.03125, %v637_v34  ;;  %v2269_v12 = vsub.f32 %v2176_v17, %v686_v33 }
 0x167   : > { %v646_v36 = vpop.xlane.xlu1 %645 }
 0x168   : > { %v2272_v37 = vsub.f32 %v2180_v21, %v684_v35  ;;  %v687_v38 = vmul.f32 0.03125, %v646_v36  ;;  %v718_v47 = vmul.f32 %v2269_v12, %v2269_v12 }
 0x169   : > { %v640_v39 = vpop.xlane.xlu0 %639 }
 0x16a   : > { %v685_v42 = vmul.f32 0.03125, %v640_v39  ;;  %v716_v43 = vmul.f32 %v2272_v37, %v2272_v37  ;;  %v2277_v44 = vsub.f32 %v2185_v25, %v687_v38  ;;  %v738_v54 = vsel %vm474_vm0, %v718_v47, 0.0 }
 0x16c   : > { %v2280_v45 = vsub.f32 %v2192_v31, %v685_v42  ;;  %v732_v46 = vsel %vm474_vm0, %v716_v43, 0.0  ;;  %v719_v56 = vmul.f32 %v2277_v44, %v2277_v44 }
 0x16d   : > { %v649_v48 = vpop.xlane.xlu0 %648  ;;  %733 = vadd.xlane.f32.xlu0 %v732_v46 }
 0x16e   : > { %v688_v50 = vmul.f32 0.03125, %v649_v48  ;;  %v717_v51 = vmul.f32 %v2280_v45, %v2280_v45  ;;  %v741_v3 = vsel %vm474_vm0, %v719_v56, 0.0 }
 0x170   : > { %v2288_v53 = vsub.f32 %v2201_v40, %v688_v50  ;;  %v735_v55 = vsel %vm474_vm0, %v717_v51, 0.0 }
 0x171   : > { %v655_v57 = vpop.xlane.xlu0 %654  ;;  %v652_v58 = vpop.xlane.xlu1 %651  ;;  %739 = vadd.xlane.f32.xlu0 %v738_v54  ;;  %736 = vadd.xlane.f32.xlu1 %v735_v55 }
 0x172   : > { %v690_v60 = vmul.f32 0.03125, %v655_v57  ;;  %v689_v61 = vmul.f32 0.03125, %v652_v58  ;;  %v720_v63 = vmul.f32 %v2288_v53, %v2288_v53 }
 0x174   : > { %v2297_v0 = vsub.f32 %v2204_v41, %v690_v60  ;;  %v2300_v1 = vsub.f32 %v2211_v49, %v689_v61  ;;  %v744_v2 = vsel %vm474_vm0, %v720_v63, 0.0 }
 0x175   : > { %v658_v4 = vpop.xlane.xlu1 %657  ;;  %v661_v7 = vpop.xlane.xlu0 %660  ;;  %745 = vadd.xlane.f32.xlu0 %v744_v2  ;;  %742 = vadd.xlane.f32.xlu1 %v741_v3 }
 0x176   : > { %v691_v8 = vmul.f32 0.03125, %v658_v4  ;;  %v692_v9 = vmul.f32 0.03125, %v661_v7  ;;  %v722_v10 = vmul.f32 %v2297_v0, %v2297_v0  ;;  %v721_v11 = vmul.f32 %v2300_v1, %v2300_v1 }
 0x178   : > { %v2309_v13 = vsub.f32 %v2216_v52, %v691_v8  ;;  %v2312_v14 = vsub.f32 %v2223_v59, %v692_v9  ;;  %v750_v15 = vsel %vm474_vm0, %v722_v10, 0.0  ;;  %v747_v18 = vsel %vm474_vm0, %v721_v11, 0.0 }
 0x179   : > { %v667_v19 = vpop.xlane.xlu0 %666  ;;  %v664_v22 = vpop.xlane.xlu1 %663  ;;  %751 = vadd.xlane.f32.xlu0 %v750_v15  ;;  %748 = vadd.xlane.f32.xlu1 %v747_v18 }
 0x17a   : > { %v694_v23 = vmul.f32 0.03125, %v667_v19  ;;  %v693_v24 = vmul.f32 0.03125, %v664_v22  ;;  %v724_v28 = vmul.f32 %v2312_v14, %v2312_v14  ;;  %v723_v29 = vmul.f32 %v2309_v13, %v2309_v13  ;;  %v1962_v19 = vld [vmem:[%s2929_s6 + $0x8] sm:$0xff]   ;;  %v1963_v22 = vld [vmem:[%s2929_s6] sm:$0xff]  }
 0x17b   : > { %1876 = vmatprep.subr.bf16.mxu1 %v1962_v19 }
 0x17c   : > { %v2321_v30 = vsub.f32 %v2226_v62, %v694_v23  ;;  %v2324_v32 = vsub.f32 %v2235_v5, %v693_v24  ;;  %v756_v33 = vsel %vm474_vm0, %v724_v28, 0.0  ;;  %v753_v34 = vsel %vm474_vm0, %v723_v29, 0.0  ;;  %1877 = vmatpush3.bf16.msra.mxu1 %v1962_v19 }
 0x17d   : > { %v670_v35 = vpop.xlane.xlu1 %669  ;;  %757 = vadd.xlane.f32.xlu0 %v756_v33  ;;  %v673_v36 = vpop.xlane.xlu0 %672  ;;  %754 = vadd.xlane.f32.xlu1 %v753_v34 }
 0x17e   : > { %v695_v38 = vmul.f32 0.03125, %v670_v35  ;;  %v696_v39 = vmul.f32 0.03125, %v673_v36  ;;  %v726_v42 = vmul.f32 %v2321_v30, %v2321_v30  ;;  %v725_v43 = vmul.f32 %v2324_v32, %v2324_v32  ;;  %1878 = vmatprep.subr.bf16.mxu1 %v1963_v22 }
 0x180   : > { %v2333_v46 = vsub.f32 %v2238_v6, %v695_v38  ;;  %v2336_v47 = vsub.f32 %v2247_v16, %v696_v39  ;;  %v762_v48 = vsel %vm474_vm0, %v726_v42, 0.0  ;;  %v759_v50 = vsel %vm474_vm0, %v725_v43, 0.0  ;;  %1879 = vmatpush3.bf16.msra.mxu1 %v1963_v22 }
 0x181   : > { %763 = vadd.xlane.f32.xlu0 %v762_v48  ;;  %v679_v51 = vpop.xlane.xlu0 %678  ;;  %760 = vadd.xlane.f32.xlu1 %v759_v50  ;;  %v676_v54 = vpop.xlane.xlu1 %675 }
 0x182   : > { %v698_v55 = vmul.f32 0.03125, %v679_v51  ;;  %v697_v56 = vmul.f32 0.03125, %v676_v54  ;;  %v728_v57 = vmul.f32 %v2336_v47, %v2336_v47  ;;  %v727_v58 = vmul.f32 %v2333_v46, %v2333_v46 }
 0x184   : > { %v2345_v60 = vsub.f32 %v2252_v20, %v698_v55  ;;  %v2348_v61 = vsub.f32 %v2257_v26, %v697_v56  ;;  %v768_v63 = vsel %vm474_vm0, %v728_v57, 0.0  ;;  %v765_v2 = vsel %vm474_vm0, %v727_v58, 0.0 }
 0x185   : > { %769 = vadd.xlane.f32.xlu0 %v768_v63  ;;  %766 = vadd.xlane.f32.xlu1 %v765_v2  ;;  %v682_v3 = vpop.xlane.xlu1 %681 }
 0x186   : > { %v699_v4 = vmul.f32 0.03125, %v682_v3  ;;  %v730_v7 = vmul.f32 %v2345_v60, %v2345_v60  ;;  %v729_v8 = vmul.f32 %v2348_v61, %v2348_v61 }
 0x188   : > { %v2357_v9 = vsub.f32 %v2260_v27, %v699_v4  ;;  %v774_v10 = vsel %vm474_vm0, %v730_v7, 0.0  ;;  %v771_v11 = vsel %vm474_vm0, %v729_v8, 0.0 }
 0x189   : > { %775 = vadd.xlane.f32.xlu0 %v774_v10  ;;  %772 = vadd.xlane.f32.xlu1 %v771_v11 }
 0x18a   : > { %v731_v15 = vmul.f32 %v2357_v9, %v2357_v9 }
 0x18c   : > { %v777_v18 = vsel %vm474_vm0, %v731_v15, 0.0 }
 0x18d   : > { %778 = vadd.xlane.f32.xlu1 %v777_v18 }
 0x1f6   : > { %v734_v23 = vpop.xlane.xlu0 %733 }
 0x1f7   : > { %v780_v24 = vmul.f32 0.03125, %v734_v23 }
 0x1f9   : > { %v796_v28 = vadd.f32 1e-05, %v780_v24  ;;  %v2374_v24 = vld [vmem:[%s2927_s4] ss:$0 sm:$0xff] }
 0x1fa   : > { %v740_v29 = vpop.xlane.xlu0 %739  ;;  %v737_v33 = vpop.xlane.xlu1 %736 }
 0x1fb   : > { %1972 = vrsqrt.f32 %v796_v28  ;;  %v782_v34 = vmul.f32 0.03125, %v740_v29  ;;  %v781_v35 = vmul.f32 0.03125, %v737_v33 }
 0x1fd   : > { %v798_v36 = vadd.f32 1e-05, %v782_v34  ;;  %v797_v38 = vadd.f32 1e-05, %v781_v35 }
 0x1fe   : > { %v746_v39 = vpop.xlane.xlu0 %745  ;;  %v743_v42 = vpop.xlane.xlu1 %742 }
 0x1ff   : > { %1974 = vrsqrt.f32 %v798_v36  ;;  %v784_v43 = vmul.f32 0.03125, %v746_v39  ;;  %v783_v48 = vmul.f32 0.03125, %v743_v42 }
 0x200   : > { %1976 = vrsqrt.f32 %v797_v38 }
 0x201   : > { %v800_v50 = vadd.f32 1e-05, %v784_v43  ;;  %v799_v51 = vadd.f32 1e-05, %v783_v48  ;;  %v2382_v48 = vld [vmem:[%s2928_s5] ss:$0 sm:$0xff] }
 0x202   : > { %v752_v54 = vpop.xlane.xlu0 %751  ;;  %v749_v55 = vpop.xlane.xlu1 %748 }
 0x203   : > { %1978 = vrsqrt.f32 %v800_v50  ;;  %v786_v56 = vmul.f32 0.03125, %v752_v54  ;;  %v785_v57 = vmul.f32 0.03125, %v749_v55 }
 0x204   : > { %1980 = vrsqrt.f32 %v799_v51 }
 0x205   : > { %v802_v58 = vadd.f32 1e-05, %v786_v56  ;;  %v801_v63 = vadd.f32 1e-05, %v785_v57 }
 0x206   : > { %v758_v2 = vpop.xlane.xlu0 %757  ;;  %v755_v3 = vpop.xlane.xlu1 %754 }
 0x207   : > { %1982 = vrsqrt.f32 %v802_v58  ;;  %v788_v4 = vmul.f32 0.03125, %v758_v2  ;;  %v787_v7 = vmul.f32 0.03125, %v755_v3 }
 0x208   : > { %v1973_v8 = vpop.eup %1972  ;;  %1984 = vrsqrt.f32 %v801_v63 }
 0x209   : > { %v804_v10 = vadd.f32 1e-05, %v788_v4  ;;  %v803_v11 = vadd.f32 1e-05, %v787_v7  ;;  %v828_v19 = vmul.f32 %v1973_v8, %v2272_v37 }
 0x20a   : > { %v764_v15 = vpop.xlane.xlu0 %763  ;;  %v761_v18 = vpop.xlane.xlu1 %760 }
 0x20b   : > { %1986 = vrsqrt.f32 %v804_v10  ;;  %v790_v22 = vmul.f32 0.03125, %v764_v15  ;;  %v789_v23 = vmul.f32 0.03125, %v761_v18  ;;  %v851_v37 = vmul.f32 %v2374_v24, %v828_v19 }
 0x20c   : > { %v1975_v28 = vpop.eup %1974  ;;  %1988 = vrsqrt.f32 %v803_v11 }
 0x20d   : > { %v1977_v29 = vpop.eup %1976  ;;  %v806_v33 = vadd.f32 1e-05, %v790_v22  ;;  %v805_v34 = vadd.f32 1e-05, %v789_v23  ;;  %v830_v35 = vmul.f32 %v1975_v28, %v2269_v12  ;;  %v874_v58 = vadd.f32 %v2382_v48, %v851_v37 }
 0x20e   : > { %v770_v36 = vpop.xlane.xlu0 %769  ;;  %v767_v38 = vpop.xlane.xlu1 %766  ;;  %v829_v39 = vmul.f32 %v1977_v29, %v2280_v45 }
 0x20f   : > { %1990 = vrsqrt.f32 %v806_v33  ;;  %v792_v42 = vmul.f32 0.03125, %v770_v36  ;;  %v791_v43 = vmul.f32 0.03125, %v767_v38  ;;  %v853_v56 = vmul.f32 %v2374_v24, %v830_v35 }
 0x210   : > { %v1979_v50 = vpop.eup %1978  ;;  %1992 = vrsqrt.f32 %v805_v34  ;;  %v852_v51 = vmul.f32 %v2374_v24, %v829_v39 }
 0x211   : > { %v1981_v54 = vpop.eup %1980  ;;  %v808_v12 = vadd.f32 1e-05, %v792_v42  ;;  %v807_v55 = vadd.f32 1e-05, %v791_v43  ;;  %v832_v3 = vmul.f32 %v1979_v50, %v2288_v53  ;;  %v876_v22 = vadd.f32 %v2382_v48, %v853_v56 }
 0x212   : > { %v776_v45 = vpop.xlane.xlu0 %775  ;;  %v773_v57 = vpop.xlane.xlu1 %772  ;;  %v875_v63 = vadd.f32 %v2382_v48, %v852_v51  ;;  %v831_v2 = vmul.f32 %v1981_v54, %v2277_v44 }
 0x213   : > { %1994 = vrsqrt.f32 %v808_v12  ;;  %v794_v4 = vmul.f32 0.03125, %v776_v45  ;;  %v793_v7 = vmul.f32 0.03125, %v773_v57  ;;  %v855_v28 = vmul.f32 %v2374_v24, %v832_v3 }
 0x214   : > { %v1983_v8 = vpop.eup %1982  ;;  %1996 = vrsqrt.f32 %v807_v55  ;;  %v890_v10 = vpack.c.bf16 %v875_v63, %v874_v58  ;;  %v854_v11 = vmul.f32 %v2374_v24, %v831_v2 }
 0x215   : > { %v1985_v15 = vpop.eup %1984  ;;  %v810_v18 = vadd.f32 1e-05, %v794_v4  ;;  %v809_v19 = vadd.f32 1e-05, %v793_v7  ;;  %v834_v29 = vmul.f32 %v1983_v8, %v2297_v0  ;;  %v878_v42 = vadd.f32 %v2382_v48, %v855_v28 }
 0x216   : > { %1880 = vmatprep.mubr.msk.bf16.mxu1 %vm474_vm0, %v890_v10  ;;  %v779_v23 = vpop.xlane.xlu1 %778  ;;  %v877_v44 = vadd.f32 %v2382_v48, %v854_v11  ;;  %v833_v53 = vmul.f32 %v1985_v15, %v2300_v1 }
 0x217   : > { %1998 = vrsqrt.f32 %v810_v18  ;;  %v795_v33 = vmul.f32 0.03125, %v779_v23  ;;  %v857_v0 = vmul.f32 %v2374_v24, %v834_v29 }
 0x218   : > { %v1987_v34 = vpop.eup %1986  ;;  %2000 = vrsqrt.f32 %v809_v19  ;;  %v891_v35 = vpack.c.bf16 %v877_v44, %v876_v22  ;;  %v856_v36 = vmul.f32 %v2374_v24, %v833_v53 }
 0x219   : > { %v1989_v38 = vpop.eup %1988  ;;  %v811_v39 = vadd.f32 1e-05, %v795_v33  ;;  %v836_v37 = vmul.f32 %v1987_v34, %v2312_v14  ;;  %v880_v14 = vadd.f32 %v2382_v48, %v857_v0  ;;  %v2463_v0 = vld [vmem:[%s2930_s7] ss:$0 sm:$0xff] }
 0x21a   : > { %1881 = vmatmul.mubr.msk.bf16.vlgmr.msra.gmra.mxu1 %vm474_vm0, %v891_v35  ;;  %v879_v1 = vadd.f32 %v2382_v48, %v856_v36  ;;  %v835_v43 = vmul.f32 %v1989_v38, %v2309_v13 }
 0x21b   : > { %2002 = vrsqrt.f32 %v811_v39  ;;  %v859_v55 = vmul.f32 %v2374_v24, %v836_v37  ;;  %v1967_v39 = vld [vmem:[%s2931_s8 + $0x20] sm:$0xff]   ;;  %v1968_v37 = vld [vmem:[%s2931_s8 + $0x18] sm:$0xff]  }
 0x21c   : > { %v1991_v50 = vpop.eup %1990  ;;  %v892_v51 = vpack.c.bf16 %v879_v1, %v878_v42  ;;  %v858_v54 = vmul.f32 %v2374_v24, %v835_v43  ;;  %v1969_v42 = vld [vmem:[%s2931_s8 + $0x10] sm:$0xff]   ;;  %v1970_v1 = vld [vmem:[%s2931_s8 + $0x8] sm:$0xff]   ;;  %v1971_v43 = vld [vmem:[%s2931_s8] sm:$0xff]  }
 0x21d   : > { %v1993_v12 = vpop.eup %1992  ;;  %v838_v13 = vmul.f32 %v1991_v50, %v2321_v30  ;;  %v882_v3 = vadd.f32 %v2382_v48, %v859_v55 }
 0x21e   : > { %1884 = vmatprep.mubr.msk.bf16.mxu1 %vm474_vm0, %v892_v51  ;;  %v881_v56 = vadd.f32 %v2382_v48, %v858_v54  ;;  %v837_v45 = vmul.f32 %v1993_v12, %v2324_v32 }
 0x21f   : > { %v861_v8 = vmul.f32 %v2374_v24, %v838_v13 }
 0x220   : > { %v1995_v57 = vpop.eup %1994  ;;  %v893_v58 = vpack.c.bf16 %v881_v56, %v880_v14  ;;  %v860_v63 = vmul.f32 %v2374_v24, %v837_v45 }
 0x221   : > { %v1997_v2 = vpop.eup %1996  ;;  %v840_v10 = vmul.f32 %v1995_v57, %v2336_v47  ;;  %v884_v19 = vadd.f32 %v2382_v48, %v861_v8 }
 0x222   : > { %1885 = vmatmul.mubr.msk.bf16.gmra.mxu1 %vm474_vm0, %v893_v58  ;;  %v883_v4 = vadd.f32 %v2382_v48, %v860_v63  ;;  %v839_v7 = vmul.f32 %v1997_v2, %v2333_v46 }
 0x223   : > { %v863_v46 = vmul.f32 %v2374_v24, %v840_v10 }
 0x224   : > { %v1999_v32 = vpop.eup %1998  ;;  %v894_v11 = vpack.c.bf16 %v883_v4, %v882_v3  ;;  %v862_v30 = vmul.f32 %v2374_v24, %v839_v7 }
 0x225   : > { %v2001_v15 = vpop.eup %2000  ;;  %v842_v18 = vmul.f32 %v1999_v32, %v2345_v60  ;;  %v886_v60 = vadd.f32 %v2382_v48, %v863_v46 }
 0x226   : > { %1888 = vmatprep.mubr.msk.bf16.mxu1 %vm474_vm0, %v894_v11  ;;  %v885_v22 = vadd.f32 %v2382_v48, %v862_v30  ;;  %v841_v23 = vmul.f32 %v2001_v15, %v2348_v61 }
 0x227   : > { %v865_v29 = vmul.f32 %v2374_v24, %v842_v18 }
 0x228   : > { %v2003_v44 = vpop.eup %2002  ;;  %v895_v53 = vpack.c.bf16 %v885_v22, %v884_v19  ;;  %v864_v47 = vmul.f32 %v2374_v24, %v841_v23 }
 0x229   : > { %v843_v28 = vmul.f32 %v2003_v44, %v2357_v9  ;;  %v888_v61 = vadd.f32 %v2382_v48, %v865_v29  ;;  %v1964_v9 = vld [vmem:[%s2931_s8 + $0x38] sm:$0xff]  }
 0x22a   : > { %1889 = vmatmul.mubr.msk.bf16.gmra.mxu1 %vm474_vm0, %v895_v53  ;;  %v887_v33 = vadd.f32 %v2382_v48, %v864_v47  ;;  %1896 = vmatprep.subr.bf16.mxu0 %v1964_v9 }
 0x22b   : > { %v866_v34 = vmul.f32 %v2374_v24, %v843_v28  ;;  %1928 = vmatprep.subr.bf16.mxu1 %v1964_v9  ;;  %1897 = vmatpush3.bf16.msra.mxu0 %v1964_v9  ;;  %v1965_v24 = vld [vmem:[%s2931_s8 + $0x30] sm:$0xff]  }
 0x22c   : > { %v896_v35 = vpack.c.bf16 %v887_v33, %v886_v60  ;;  %1936 = vmatpush3.bf16.msra.mxu1 %v1964_v9  ;;  %1898 = vmatprep.subr.bf16.mxu0 %v1965_v24 }
 0x22d   : > { %v889_v36 = vadd.f32 %v2382_v48, %v866_v34  ;;  %1929 = vmatprep.subr.bf16.mxu1 %v1965_v24  ;;  %v1966_v48 = vld [vmem:[%s2931_s8 + $0x28] sm:$0xff]  }
 0x22e   : > { %1892 = vmatprep.mubr.msk.bf16.mxu1 %vm474_vm0, %v896_v35 }
 0x22f   : > { %v897_v38 = vpack.c.bf16 %v889_v36, %v888_v61  ;;  %1899 = vmatpush3.bf16.msra.mxu0 %v1965_v24 }
 0x230   : > { %1937 = vmatpush3.bf16.msra.mxu1 %v1965_v24  ;;  %1900 = vmatprep.subr.bf16.mxu0 %v1966_v48 }
 0x231   : > { %1930 = vmatprep.subr.bf16.mxu1 %v1966_v48 }
 0x232   : > { %1893 = vmatmul.mubr.msk.bf16.gmra.mxu1 %vm474_vm0, %v897_v38 }
 0x233   : > { %1901 = vmatpush3.bf16.msra.mxu0 %v1966_v48 }
 0x234   : > { %1938 = vmatpush3.bf16.msra.mxu1 %v1966_v48  ;;  %1902 = vmatprep.subr.bf16.mxu0 %v1967_v39 }
 0x235   : > { %1931 = vmatprep.subr.bf16.mxu1 %v1967_v39 }
 0x237   : > { %1903 = vmatpush3.bf16.msra.mxu0 %v1967_v39 }
 0x238   : > { %1939 = vmatpush3.bf16.msra.mxu1 %v1967_v39  ;;  %1904 = vmatprep.subr.bf16.mxu0 %v1968_v37 }
 0x239   : > { %1932 = vmatprep.subr.bf16.mxu1 %v1968_v37 }
 0x23b   : > { %1905 = vmatpush3.bf16.msra.mxu0 %v1968_v37 }
 0x23c   : > { %1940 = vmatpush3.bf16.msra.mxu1 %v1968_v37  ;;  %1906 = vmatprep.subr.bf16.mxu0 %v1969_v42 }
 0x23d   : > { %1933 = vmatprep.subr.bf16.mxu1 %v1969_v42 }
 0x23f   : > { %1907 = vmatpush3.bf16.msra.mxu0 %v1969_v42 }
 0x240   : > { %1941 = vmatpush3.bf16.msra.mxu1 %v1969_v42  ;;  %1908 = vmatprep.subr.bf16.mxu0 %v1970_v1 }
 0x241   : > { %1934 = vmatprep.subr.bf16.mxu1 %v1970_v1 }
 0x243   : > { %1909 = vmatpush3.bf16.msra.mxu0 %v1970_v1 }
 0x244   : > { %1942 = vmatpush3.bf16.msra.mxu1 %v1970_v1  ;;  %1910 = vmatprep.subr.bf16.mxu0 %v1971_v43 }
 0x245   : > { %1935 = vmatprep.subr.bf16.mxu1 %v1971_v43 }
 0x247   : > { %1911 = vmatpush3.bf16.msra.mxu0 %v1971_v43 }
 0x248   : > { %1943 = vmatpush3.bf16.msra.mxu1 %v1971_v43 }
 0x2da   : > { %v1882_v50 = vpop.f32.mrf.mxu1 }
 0x2db   : > { %v2466_v51 = vadd.f32 %v1882_v50, %v2463_v0 }
 0x2dc   : > { %v979_v54 = vpop.f32.mrf.mxu1 }
 0x2dd   : > { %v2469_v12 = vmul.f32 0.70710677, %v2466_v51  ;;  %v2472_v55 = vadd.f32 %v2463_v0, %v979_v54 }
 0x2de   : > { %v1883_v14 = vpop.f32.mrf.mxu1 }
 0x2df   : > { %v1060_v56 = vand.u32 2147483647, %v2469_v12  ;;  %v2476_v45 = vmul.f32 0.70710677, %v2472_v55  ;;  %v2479_v13 = vadd.f32 %v1883_v14, %v2463_v0  ;;  %vm1380_vm1 = vcmp.ge.f32.partialorder %v2469_v12, 0.0 }
 0x2e0   : > { %v982_v57 = vpop.f32.mrf.mxu1 }
 0x2e1   : > { %v1076_v58 = vmul.f32 0.3275911, %v1060_v56  ;;  %v2482_v63 = vand.u32 2147483647, %v2476_v45  ;;  %v2485_v2 = vmul.f32 0.70710677, %v2479_v13  ;;  %v2488_v3 = vadd.f32 %v2463_v0, %v982_v57 }
 0x2e2   : > { %v1886_v4 = vpop.f32.mrf.mxu1  ;;  %v1284_v37 = vsub.f32 0.0, %v1060_v56  ;;  %vm1378_vm2 = vcmp.ge.f32.partialorder %v2476_v45, 0.0 }
 0x2e3   : > { %v1092_v7 = vadd.f32 1.0, %v1076_v58  ;;  %v1074_v8 = vmul.f32 0.3275911, %v2482_v63  ;;  %v2492_v10 = vand.u32 2147483647, %v2485_v2  ;;  %v2502_v19 = vadd.f32 %v1886_v4, %v2463_v0 }
 0x2e4   : > { %v2495_v32 = vmul.f32 0.70710677, %v2488_v3  ;;  %v995_v11 = vpop.f32.mrf.mxu1  ;;  %vm1381_vm3 = vcmp.ge.f32.partialorder %v2485_v2, 0.0 }
 0x2e5   : > { %2004 = vrcp.f32 %v1092_v7  ;;  %v1090_v30 = vadd.f32 1.0, %v1074_v8  ;;  %v1077_v15 = vmul.f32 0.3275911, %v2492_v10  ;;  %v2505_v22 = vadd.f32 %v2463_v0, %v995_v11 }
 0x2e6   : > { %v2499_v18 = vand.u32 2147483647, %v2495_v32  ;;  %v1887_v44 = vpop.f32.mrf.mxu1  ;;  %v2509_v53 = vmul.f32 0.70710677, %v2502_v19  ;;  %v1300_v8 = vmul.f32 %v1284_v37, %v1060_v56  ;;  %v1282_v11 = vsub.f32 0.0, %v2482_v63 }
 0x2e7   : > { %2006 = vrcp.f32 %v1090_v30  ;;  %v1093_v23 = vadd.f32 1.0, %v1077_v15  ;;  %v2512_v28 = vmul.f32 0.70710677, %v2505_v22  ;;  %v2521_v33 = vadd.f32 %v1887_v44, %v2463_v0 }
 0x2e8   : > { %v1075_v46 = vmul.f32 0.3275911, %v2499_v18  ;;  %v2515_v29 = vand.u32 2147483647, %v2509_v53  ;;  %v998_v34 = vpop.f32.mrf.mxu1  ;;  %vm1379_vm4 = vcmp.ge.f32.partialorder %v2495_v32, 0.0  ;;  %vm1384_vm7 = vcmp.ge.f32.partialorder %v2509_v53, 0.0 }
 0x2e9   : > { %2008 = vrcp.f32 %v1093_v23  ;;  %v2518_v60 = vand.u32 2147483647, %v2512_v28  ;;  %v2526_v36 = vmul.f32 0.70710677, %v2521_v33  ;;  %v2529_v9 = vadd.f32 %v2463_v0, %v998_v34 }
 0x2ea   : > { %v1091_v47 = vadd.f32 1.0, %v1075_v46  ;;  %v1080_v35 = vmul.f32 0.3275911, %v2515_v29  ;;  %v1890_v39 = vpop.f32.mrf.mxu1  ;;  %v1288_v52 = vsub.f32 0.0, %v2515_v29  ;;  %vm1382_vm6 = vcmp.ge.f32.partialorder %v2512_v28, 0.0 }
 0x2eb   : > { %v1078_v61 = vmul.f32 0.3275911, %v2518_v60  ;;  %v2532_v48 = vand.u32 2147483647, %v2526_v36  ;;  %v2535_v42 = vmul.f32 0.70710677, %v2529_v9  ;;  %v2545_v57 = vadd.f32 %v1890_v39, %v2463_v0 }
 0x2ec   : > { %2010 = vrcp.f32 %v1091_v47  ;;  %v1096_v38 = vadd.f32 1.0, %v1080_v35  ;;  %v1011_v58 = vpop.f32.mrf.mxu1  ;;  %v1298_v39 = vmul.f32 %v1282_v11, %v2482_v63  ;;  %v1286_v6 = vsub.f32 0.0, %v2518_v60 }
 0x2ed   : > { %v1094_v24 = vadd.f32 1.0, %v1078_v61  ;;  %v1081_v43 = vmul.f32 0.3275911, %v2532_v48  ;;  %v2542_v54 = vand.u32 2147483647, %v2535_v42  ;;  %v2559_v34 = vadd.f32 %v2463_v0, %v1011_v58 }
 0x2ee   : > { %2012 = vrcp.f32 %v1096_v38  ;;  %v2553_v23 = vmul.f32 0.70710677, %v2545_v57  ;;  %v1314_v27 = vmul.f32 1.442695, %v1298_v39  ;;  %vm1383_vm5 = vcmp.ge.f32.partialorder %v2535_v42, 0.0 }
 0x2ef   : > { %2014 = vrcp.f32 %v1094_v24  ;;  %v1097_v14 = vadd.f32 1.0, %v1081_v43  ;;  %v1079_v30 = vmul.f32 0.3275911, %v2542_v54  ;;  %v1318_v24 = vmul.f32 1.442695, %v1300_v8 }
 0x2f0   : > { %v2563_v61 = vand.u32 2147483647, %v2553_v23  ;;  %v1287_v39 = vsub.f32 0.0, %v2542_v54  ;;  %vm1385_vm8 = vcmp.ge.f32.partialorder %v2526_v36, 0.0  ;;  %vm1388_vm9 = vcmp.ge.f32.partialorder %v2553_v23, 0.0 }
 0x2f1   : > { %2016 = vrcp.f32 %v1097_v14  ;;  %v1095_v47 = vadd.f32 1.0, %v1079_v30  ;;  %v1285_v14 = vsub.f32 0.0, %v2492_v10  ;;  %v1283_v30 = vsub.f32 0.0, %v2499_v18 }
 0x2f2   : > { %v2537_v1 = vpop.eup %2004  ;;  %v1084_v58 = vmul.f32 0.3275911, %v2563_v61 }
 0x2f3   : > { %v1140_v50 = vmul.f32 1.0614054, %v2537_v1  ;;  %2018 = vrcp.f32 %v1095_v47  ;;  %v1301_v20 = vmul.f32 %v1285_v14, %v2492_v10 }
 0x2f4   : > { %v2547_v4 = vpop.eup %2006  ;;  %2020 = vpow2.f32 %v1318_v24  ;;  %v1100_v47 = vadd.f32 1.0, %v1084_v58 }
 0x2f5   : > { %v1156_v7 = vadd.f32 -1.4531521, %v1140_v50  ;;  %v1138_v15 = vmul.f32 1.0614054, %v2547_v4  ;;  %v1320_v59 = vmul.f32 1.442695, %v1301_v20 }
 0x2f6   : > { %v2555_v46 = vpop.eup %2008  ;;  %2022 = vrcp.f32 %v1100_v47 }
 0x2f7   : > { %v1172_v44 = vmul.f32 %v2537_v1, %v1156_v7  ;;  %v1154_v35 = vadd.f32 -1.4531521, %v1138_v15  ;;  %v1141_v56 = vmul.f32 1.0614054, %v2555_v46  ;;  %v2574_v15 = vmul.f32 0.70710677, %v2559_v34 }
 0x2f8   : > { %2024 = vpow2.f32 %v1314_v27 }
 0x2f9   : > { %v1188_v38 = vadd.f32 1.4214138, %v1172_v44  ;;  %v2566_v37 = vpop.eup %2010  ;;  %v1170_v43 = vmul.f32 %v2547_v4, %v1154_v35  ;;  %v1157_v50 = vadd.f32 -1.4531521, %v1141_v56  ;;  %v2579_v35 = vand.u32 2147483647, %v2574_v15 }
 0x2fa   : > { %v1139_v7 = vmul.f32 1.0614054, %v2566_v37  ;;  %vm1386_vm10 = vcmp.ge.f32.partialorder %v2574_v15, 0.0 }
 0x2fb   : > { %v1204_v8 = vmul.f32 %v2537_v1, %v1188_v38  ;;  %v1186_v63 = vadd.f32 1.4214138, %v1170_v43  ;;  %v1173_v11 = vmul.f32 %v2555_v46, %v1157_v50  ;;  %v2581_v56 = vpop.eup %2012  ;;  %v1299_v43 = vmul.f32 %v1283_v30, %v2499_v18 }
 0x2fc   : > { %v1155_v44 = vadd.f32 -1.4531521, %v1139_v7  ;;  %v2585_v5 = vpop.eup %2014  ;;  %v1144_v24 = vmul.f32 1.0614054, %v2581_v56  ;;  %v1082_v50 = vmul.f32 0.3275911, %v2579_v35 }
 0x2fd   : > { %v1202_v26 = vmul.f32 %v2547_v4, %v1186_v63  ;;  %v1189_v16 = vadd.f32 1.4214138, %v1173_v11  ;;  %v1220_v58 = vadd.f32 -0.28449672, %v1204_v8  ;;  %v1142_v7 = vmul.f32 1.0614054, %v2585_v5 }
 0x2fe   : > { %v1171_v38 = vmul.f32 %v2566_v37, %v1155_v44  ;;  %v1160_v14 = vadd.f32 -1.4531521, %v1144_v24  ;;  %v1098_v18 = vadd.f32 1.0, %v1082_v50  ;;  %v2595_v30 = vpop.eup %2016  ;;  %v1316_v62 = vmul.f32 1.442695, %v1299_v43 }
 0x2ff   : > { %v1205_v63 = vmul.f32 %v2555_v46, %v1189_v16  ;;  %v1218_v11 = vadd.f32 -0.28449672, %v1202_v26  ;;  %v1158_v44 = vadd.f32 -1.4531521, %v1142_v7  ;;  %v1302_v16 = vmul.f32 %v1286_v6, %v2518_v60 }
 0x300   : > { %v1187_v10 = vadd.f32 1.4214138, %v1171_v38  ;;  %v1176_v49 = vmul.f32 %v2581_v56, %v1160_v14  ;;  %v1145_v47 = vmul.f32 1.0614054, %v2595_v30  ;;  %v1236_v26 = vmul.f32 %v2537_v1, %v1220_v58  ;;  %v2605_v20 = vpop.eup %2018 }
 0x301   : > { %v1174_v40 = vmul.f32 %v2585_v5, %v1158_v44  ;;  %v1221_v27 = vadd.f32 -0.28449672, %v1205_v63  ;;  %v1303_v38 = vmul.f32 %v1287_v39, %v2542_v54  ;;  %2026 = vrcp.f32 %v1098_v18 }
 0x302   : > { %v1203_v8 = vmul.f32 %v2566_v37, %v1187_v10  ;;  %v1234_v43 = vmul.f32 %v2547_v4, %v1218_v11  ;;  %v1161_v7 = vadd.f32 -1.4531521, %v1145_v47  ;;  %2028 = vpow2.f32 %v1320_v59  ;;  %v2021_v11 = vpop.eup %2020 }
 0x303   : > { %v1190_v50 = vadd.f32 1.4214138, %v1174_v40  ;;  %v1192_v10 = vadd.f32 1.4214138, %v1176_v49  ;;  %v1289_v14 = vsub.f32 0.0, %v2532_v48  ;;  %2030 = vpow2.f32 %v1316_v62 }
 0x304   : > { %v1219_v24 = vadd.f32 -0.28449672, %v1203_v8  ;;  %v1143_v6 = vmul.f32 1.0614054, %v2605_v20  ;;  %v1304_v60 = vmul.f32 %v1288_v52, %v2515_v29  ;;  %v1177_v54 = vmul.f32 %v2595_v30, %v1161_v7 }
 0x305   : > { %v1206_v58 = vmul.f32 %v2585_v5, %v1190_v50  ;;  %v1252_v39 = vadd.f32 0.2548296, %v1236_v26  ;;  %v1322_v63 = vmul.f32 1.442695, %v1302_v16  ;;  %v1324_v44 = vmul.f32 1.442695, %v1303_v38  ;;  %v2620_v38 = vpop.eup %2022 }
 0x306   : > { %v1250_v18 = vadd.f32 0.2548296, %v1234_v43  ;;  %v1237_v40 = vmul.f32 %v2555_v46, %v1221_v27  ;;  %v1235_v49 = vmul.f32 %v2566_v37, %v1219_v24  ;;  %v1193_v59 = vadd.f32 1.4214138, %v1177_v54  ;;  %v2025_v7 = vpop.eup %2024 }
 0x307   : > { %v1208_v8 = vmul.f32 %v2581_v56, %v1192_v10  ;;  %v1305_v62 = vmul.f32 %v1289_v14, %v2532_v48  ;;  %v1159_v47 = vadd.f32 -1.4531521, %v1143_v6  ;;  %v1326_v52 = vmul.f32 1.442695, %v1304_v60 }
 0x308   : > { %v1222_v29 = vadd.f32 -0.28449672, %v1206_v58  ;;  %v1268_v50 = vmul.f32 %v2537_v1, %v1252_v39  ;;  %2032 = vpow2.f32 %v1322_v63  ;;  %v1209_v16 = vmul.f32 %v2595_v30, %v1193_v59 }
 0x309   : > { %v1175_v26 = vmul.f32 %v2605_v20, %v1159_v47  ;;  %v1266_v27 = vmul.f32 %v2547_v4, %v1250_v18  ;;  %v1253_v43 = vadd.f32 0.2548296, %v1237_v40  ;;  %v1251_v24 = vadd.f32 0.2548296, %v1235_v49  ;;  %v1891_v40 = vpop.f32.mrf.mxu1 }
 0x30a   : > { %2034 = vpow2.f32 %v1324_v44  ;;  %v1224_v10 = vadd.f32 -0.28449672, %v1208_v8  ;;  %v1328_v48 = vmul.f32 1.442695, %v1305_v62  ;;  %v2624_v14 = vmul.f32 0.5, %v2466_v51 }
 0x30b   : > { %v2627_v1 = vmul.f32 0.5, %v2472_v55  ;;  %v1238_v6 = vmul.f32 %v2585_v5, %v1222_v29  ;;  %v1191_v60 = vadd.f32 1.4214138, %v1175_v26  ;;  %v1348_v58 = vmul.f32 %v2021_v11, %v1268_v50 }
 0x30c   : > { %2036 = vpow2.f32 %v1326_v52  ;;  %v1225_v54 = vadd.f32 -0.28449672, %v1209_v16  ;;  %v1148_v4 = vmul.f32 1.0614054, %v2620_v38  ;;  %v1346_v63 = vmul.f32 %v2025_v7, %v1266_v27 }
 0x30d   : > { %v1269_v44 = vmul.f32 %v2555_v46, %v1253_v43  ;;  %v1267_v18 = vmul.f32 %v2566_v37, %v1251_v24  ;;  %v1207_v51 = vmul.f32 %v2605_v20, %v1191_v60  ;;  %v1240_v55 = vmul.f32 %v2581_v56, %v1224_v10  ;;  %v1014_v24 = vpop.f32.mrf.mxu1 }
 0x30e   : > { %v2631_v39 = vpop.eup %2026  ;;  %2038 = vpow2.f32 %v1328_v48  ;;  %v1292_v49 = vsub.f32 0.0, %v2563_v61  ;;  %v2641_v8 = vmul.f32 0.5, %v2479_v13  ;;  %v2644_v46 = vmul.f32 0.5, %v2488_v3 }
 0x30f   : > { %v1146_v11 = vmul.f32 1.0614054, %v2631_v39  ;;  %v2029_v59 = vpop.eup %2028  ;;  %v1254_v37 = vadd.f32 0.2548296, %v1238_v6  ;;  %v1223_v62 = vadd.f32 -0.28449672, %v1207_v51  ;;  %v1241_v50 = vmul.f32 %v2595_v30, %v1225_v54 }
 0x310   : > { %v2031_v47 = vpop.eup %2030  ;;  %v1364_v52 = vsub.f32 1.0, %v1348_v58  ;;  %v2648_v29 = vmul.f32 0.5, %v2502_v19  ;;  %v1164_v16 = vadd.f32 -1.4531521, %v1148_v4  ;;  %v1362_v26 = vsub.f32 1.0, %v1346_v63 }
 0x311   : > { %v1349_v27 = vmul.f32 %v2029_v59, %v1269_v44  ;;  %v1347_v43 = vmul.f32 %v2031_v47, %v1267_v18  ;;  %v1239_v13 = vmul.f32 %v2605_v20, %v1223_v62  ;;  %v1256_v3 = vadd.f32 0.2548296, %v1240_v55 }
 0x312   : > { %v2653_v7 = vmul.f32 0.5, %v2505_v22  ;;  %v1308_v10 = vmul.f32 %v1292_v49, %v2563_v61  ;;  %v1162_v48 = vadd.f32 -1.4531521, %v1146_v11  ;;  %v1270_v6 = vmul.f32 %v2585_v5, %v1254_v37 }
 0x313   : > { %v2658_v19 = vmul.f32 0.5, %v2521_v33  ;;  %v1255_v60 = vadd.f32 0.2548296, %v1239_v13  ;;  %v2661_v58 = vadd.f32 %v1891_v40, %v2463_v0  ;;  %v1396_v54 = vsub.f32 0.0, %v1364_v52 }
 0x314   : > { %v1257_v4 = vadd.f32 0.2548296, %v1241_v50  ;;  %v1180_v22 = vmul.f32 %v2620_v38, %v1164_v16  ;;  %v2667_v61 = vadd.f32 %v2463_v0, %v1014_v24  ;;  %v1394_v5 = vsub.f32 0.0, %v1362_v26 }
 0x315   : > { %v2033_v63 = vpop.eup %2032  ;;  %v1365_v44 = vsub.f32 1.0, %v1349_v27  ;;  %v1363_v33 = vsub.f32 1.0, %v1347_v43  ;;  %v1271_v18 = vmul.f32 %v2605_v20, %v1255_v60  ;;  %v1272_v40 = vmul.f32 %v2581_v56, %v1256_v3 }
 0x316   : > { %v2672_v55 = vmul.f32 0.5, %v2529_v9  ;;  %v1334_v49 = vmul.f32 1.442695, %v1308_v10  ;;  %v1178_v11 = vmul.f32 %v2631_v39, %v1162_v48  ;;  %v1350_v59 = vmul.f32 %v2033_v63, %v1270_v6  ;;  %v1894_v9 = vpop.f32.mrf.mxu1 }
 0x317   : > { %v2035_v51 = vpop.eup %2034  ;;  %v1290_v62 = vsub.f32 0.0, %v2579_v35  ;;  %v2677_v47 = vmul.f32 0.70710677, %v2661_v58  ;;  %v1412_v50 = vsel %vm1380_vm1, %v1364_v52, %v1396_v54  ;;  %v1273_v20 = vmul.f32 %v2595_v30, %v1257_v4 }
 0x318   : > { %v1351_v37 = vmul.f32 %v2035_v51, %v1271_v18  ;;  %v1196_v16 = vadd.f32 1.4214138, %v1180_v22  ;;  %v2683_v56 = vmul.f32 0.70710677, %v2667_v61  ;;  %v1410_v43 = vsel %vm1378_vm2, %v1362_v26, %v1394_v5  ;;  %v1027_v63 = vpop.f32.mrf.mxu1 }
 0x319   : > { %v2037_v27 = vpop.eup %2036  ;;  %v1397_v13 = vsub.f32 0.0, %v1365_v44  ;;  %v1395_v24 = vsub.f32 0.0, %v1363_v33  ;;  %v2689_v3 = vand.u32 2147483647, %v2677_v47  ;;  %v1194_v52 = vadd.f32 1.4214138, %v1178_v11 }
 0x31a   : > { %v2691_v12 = vmul.f32 %v2037_v27, %v1272_v40  ;;  %v1367_v30 = vsub.f32 1.0, %v1351_v37  ;;  %v2695_v10 = vand.u32 2147483647, %v2683_v56  ;;  %v1366_v6 = vsub.f32 1.0, %v1350_v59 }
 0x31b   : > { %v2039_v48 = vpop.eup %2038  ;;  %2040 = vpow2.f32 %v1334_v49  ;;  %v1306_v45 = vmul.f32 %v1290_v62, %v2579_v35  ;;  %v1085_v26 = vmul.f32 0.3275911, %v2689_v3  ;;  %v1444_v60 = vadd.f32 1.0, %v1412_v50  ;;  %v1895_v50 = vpop.f32.mrf.mxu1 }
 0x31c   : > { %v1353_v54 = vmul.f32 %v2039_v48, %v1273_v20  ;;  %v1212_v4 = vmul.f32 %v2620_v38, %v1196_v16  ;;  %v1083_v22 = vmul.f32 0.3275911, %v2695_v10  ;;  %v1442_v5 = vadd.f32 1.0, %v1410_v43 }
 0x31d   : > { %v1413_v18 = vsel %vm1381_vm3, %v1365_v44, %v1397_v13  ;;  %v1411_v51 = vsel %vm1379_vm4, %v1363_v33, %v1395_v24  ;;  %v1101_v40 = vadd.f32 1.0, %v1085_v26  ;;  %v1368_v49 = vsub.f32 1.0, %v2691_v12 }
 0x31e   : > { %v1399_v35 = vsub.f32 0.0, %v1367_v30  ;;  %v1210_v11 = vmul.f32 %v2631_v39, %v1194_v52  ;;  %v1099_v59 = vadd.f32 1.0, %v1083_v22  ;;  %v1398_v37 = vsub.f32 0.0, %v1366_v6 }
 0x31f   : > { %v1330_v62 = vmul.f32 1.442695, %v1306_v45  ;;  %2042 = vrcp.f32 %v1101_v40  ;;  %v2710_v2 = vadd.f32 %v1894_v9, %v2463_v0  ;;  %v1369_v44 = vsub.f32 1.0, %v1353_v54 }
 0x320   : > { %v1228_v32 = vadd.f32 -0.28449672, %v1212_v4  ;;  %2044 = vrcp.f32 %v1099_v59  ;;  %v2713_v33 = vadd.f32 %v2463_v0, %v1027_v63  ;;  %v1460_v20 = vmul.f32 %v1444_v60, %v2624_v14 }
 0x321   : > { %v1458_v16 = vmul.f32 %v1442_v5, %v2627_v1  ;;  %v1445_v27 = vadd.f32 1.0, %v1413_v18  ;;  %v2718_v43 = vmul.f32 0.70710677, %v2710_v2  ;;  %v1443_v13 = vadd.f32 1.0, %v1411_v51 }
 0x322   : > { %v1415_v9 = vsel %vm1383_vm5, %v1367_v30, %v1399_v35  ;;  %v1226_v24 = vadd.f32 -0.28449672, %v1210_v11  ;;  %v2723_v12 = vmul.f32 0.70710677, %v2713_v33  ;;  %v1400_v52 = vsub.f32 0.0, %v1368_v49  ;;  %v1030_v35 = vpop.f32.mrf.mxu1 }
 0x323   : > { %v1414_v48 = vsel %vm1382_vm6, %v1366_v6, %v1398_v37  ;;  %v2728_v14 = vand.u32 2147483647, %v2718_v43  ;;  %v2731_v1 = vadd.f32 %v1895_v50, %v2463_v0  ;;  %v1401_v45 = vsub.f32 0.0, %v1369_v44 }
 0x324   : > { %v1244_v26 = vmul.f32 %v2620_v38, %v1228_v32  ;;  %2046 = vpow2.f32 %v1330_v62  ;;  %v2735_v42 = vand.u32 2147483647, %v2723_v12  ;;  %v1447_v30 = vadd.f32 1.0, %v1415_v9 }
 0x325   : > { %v1293_v60 = vsub.f32 0.0, %v2689_v3  ;;  %v1088_v54 = vmul.f32 0.3275911, %v2728_v14  ;;  %v2740_v28 = vmul.f32 0.70710677, %v2731_v1  ;;  %v1461_v6 = vmul.f32 %v1445_v27, %v2641_v8 }
 0x326   : > { %v1242_v4 = vmul.f32 %v2631_v39, %v1226_v24  ;;  %v1291_v22 = vsub.f32 0.0, %v2695_v10  ;;  %v1086_v63 = vmul.f32 0.3275911, %v2735_v42  ;;  %v1459_v5 = vmul.f32 %v1443_v13, %v2644_v46 }
 0x327   : > { %v1446_v18 = vadd.f32 1.0, %v1414_v48  ;;  %v1104_v51 = vadd.f32 1.0, %v1088_v54  ;;  %v2748_v40 = vand.u32 2147483647, %v2740_v28  ;;  %v1416_v59 = vsel %vm1384_vm7, %v1368_v49, %v1400_v52 }
 0x328   : > { %v2041_v11 = vpop.eup %2040  ;;  %v1417_v8 = vsel %vm1385_vm8, %v1369_v44, %v1401_v45  ;;  %v1260_v37 = vadd.f32 0.2548296, %v1244_v26  ;;  %v1102_v62 = vadd.f32 1.0, %v1086_v63  ;;  %v1463_v32 = vmul.f32 %v1447_v30, %v2672_v55 }
 0x329   : > { %v1309_v50 = vmul.f32 %v1293_v60, %v2689_v3  ;;  %2048 = vrcp.f32 %v1104_v51  ;;  %v1089_v46 = vmul.f32 0.3275911, %v2748_v40  ;;  %v1258_v27 = vadd.f32 0.2548296, %v1242_v4 }
 0x32a   : > { %v1307_v13 = vmul.f32 %v1291_v22, %v2695_v10  ;;  %2050 = vrcp.f32 %v1102_v62  ;;  %v2759_v9 = vadd.f32 %v2463_v0, %v1030_v35  ;;  %v1475_v53 = vpack.c.bf16 %v1461_v6, %v1460_v20 }
 0x32b   : > { %v1462_v36 = vmul.f32 %v1446_v18, %v2653_v7  ;;  %v1105_v49 = vadd.f32 1.0, %v1089_v46  ;;  %v1474_v44 = vpack.c.bf16 %v1459_v5, %v1458_v16  ;;  %v1448_v55 = vadd.f32 1.0, %v1416_v59 }
 0x32c   : > { %v2762_v24 = vpop.eup %2042  ;;  %v1449_v52 = vadd.f32 1.0, %v1417_v8  ;;  %v1276_v3 = vmul.f32 %v2620_v38, %v1260_v37  ;;  %v2766_v48 = vmul.f32 0.70710677, %v2759_v9  ;;  %v1336_v0 = vmul.f32 1.442695, %v1309_v50 }
 0x32d   : > { %v2768_v45 = vpop.eup %2044  ;;  %v1149_v10 = vmul.f32 1.0614054, %v2762_v24  ;;  %2052 = vrcp.f32 %v1105_v49  ;;  %1912 = vmatprep.mubr.bf16.mxu0 %v1474_v44  ;;  %v1476_v20 = vpack.c.bf16 %v1463_v32, %v1462_v36  ;;  %v1274_v7 = vmul.f32 %v2631_v39, %v1258_v27 }
 0x32e   : > { %v1147_v16 = vmul.f32 1.0614054, %v2768_v45  ;;  %v1332_v26 = vmul.f32 1.442695, %v1307_v13  ;;  %v1071_v30 = vand.u32 2147483647, %v2766_v48  ;;  %1913 = vmatmul.mubr.bf16.vlgmr.msra.gmra.mxu0 %v1475_v53  ;;  %v1464_v54 = vmul.f32 %v1448_v55, %v2648_v29 }
 0x32f   : > { %v1165_v38 = vadd.f32 -1.4531521, %v1149_v10  ;;  %v1294_v60 = vsub.f32 0.0, %v2735_v42  ;;  %1916 = vmatprep.mubr.bf16.mxu0 %v1476_v20  ;;  %v1465_v6 = vmul.f32 %v1449_v52, %v2658_v19  ;;  %v2777_v5 = vmul.f32 %v2041_v11, %v1276_v3 }
 0x330   : > { %v1163_v4 = vadd.f32 -1.4531521, %v1147_v16  ;;  %v1087_v22 = vmul.f32 0.3275911, %v1071_v30  ;;  %2054 = vpow2.f32 %v1336_v0  ;;  %v1296_v18 = vsub.f32 0.0, %v2728_v14 }
 0x331   : > { %v2047_v63 = vpop.eup %2046  ;;  %v1181_v39 = vmul.f32 %v2762_v24, %v1165_v38  ;;  %2056 = vpow2.f32 %v1332_v26  ;;  %v1310_v29 = vmul.f32 %v1294_v60, %v2735_v42  ;;  %v1297_v19 = vsub.f32 0.0, %v2748_v40 }
 0x332   : > { %v2781_v51 = vmul.f32 %v2047_v63, %v1274_v7  ;;  %v1179_v35 = vmul.f32 %v2768_v45, %v1163_v4  ;;  %v1103_v59 = vadd.f32 1.0, %v1087_v22  ;;  %v1477_v11 = vpack.c.bf16 %v1465_v6, %v1464_v54 }
 0x333   : > { %v1197_v8 = vadd.f32 1.4214138, %v1181_v39  ;;  %v1312_v32 = vmul.f32 %v1296_v18, %v2728_v14  ;;  %v1372_v46 = vsub.f32 1.0, %v2777_v5  ;;  %v1338_v49 = vmul.f32 1.442695, %v1310_v29 }
 0x334   : > { %v1195_v37 = vadd.f32 1.4214138, %v1179_v35  ;;  %2058 = vrcp.f32 %v1103_v59  ;;  %v1370_v27 = vsub.f32 1.0, %v2781_v51  ;;  %v1313_v44 = vmul.f32 %v1297_v19, %v2748_v40 }
 0x335   : > { %v1213_v62 = vmul.f32 %v2762_v24, %v1197_v8  ;;  %v1295_v52 = vsub.f32 0.0, %v1071_v30  ;;  %v2801_v3 = vmul.f32 0.5, %v2559_v34  ;;  %v1342_v20 = vmul.f32 1.442695, %v1312_v32 }
 0x336   : > { %v2788_v50 = vpop.eup %2048  ;;  %v1211_v13 = vmul.f32 %v2768_v45, %v1195_v37  ;;  %1917 = vmatmul.mubr.bf16.gmra.mxu0 %v1477_v11  ;;  %v1404_v16 = vsub.f32 0.0, %v1372_v46  ;;  %v1402_v26 = vsub.f32 0.0, %v1370_v27  ;;  %v1344_v4 = vmul.f32 1.442695, %v1313_v44 }
 0x337   : > { %v2793_v53 = vpop.eup %2050  ;;  %v1229_v42 = vadd.f32 -0.28449672, %v1213_v62  ;;  %v1152_v36 = vmul.f32 1.0614054, %v2788_v50  ;;  %2060 = vpow2.f32 %v1338_v49  ;;  %v1311_v63 = vmul.f32 %v1295_v52, %v1071_v30 }
 0x338   : > { %v1227_v14 = vadd.f32 -0.28449672, %v1211_v13  ;;  %v1150_v55 = vmul.f32 1.0614054, %v2793_v53  ;;  %2062 = vpow2.f32 %v1342_v20  ;;  %vm1389_vm11 = vcmp.ge.f32.partialorder %v2677_v47, 0.0 }
 0x339   : > { %v1245_v10 = vmul.f32 %v2762_v24, %v1229_v42  ;;  %v1168_v0 = vadd.f32 -1.4531521, %v1152_v36  ;;  %v1437_v35 = vmul.f32 0.5, %v2661_v58  ;;  %2064 = vpow2.f32 %v1344_v4 }
 0x33a   : > { %v2804_v7 = vpop.eup %2052  ;;  %v1243_v38 = vmul.f32 %v2768_v45, %v1227_v14  ;;  %v1166_v40 = vadd.f32 -1.4531521, %v1150_v55  ;;  %v1340_v32 = vmul.f32 1.442695, %v1311_v63  ;;  %v1418_v58 = vsel %vm1386_vm10, %v1370_v27, %v1402_v26 }
 0x33b   : > { %v1261_v60 = vadd.f32 0.2548296, %v1245_v10  ;;  %v1184_v54 = vmul.f32 %v2788_v50, %v1168_v0  ;;  %v1153_v6 = vmul.f32 1.0614054, %v2804_v7  ;;  %vm1387_vm12 = vcmp.ge.f32.partialorder %v2683_v56, 0.0 }
 0x33c   : > { %v1259_v22 = vadd.f32 0.2548296, %v1243_v38  ;;  %v1182_v34 = vmul.f32 %v2793_v53, %v1166_v40  ;;  %v1450_v10 = vadd.f32 1.0, %v1418_v58  ;;  %2066 = vpow2.f32 %v1340_v32 }
 0x33d   : > { %v1277_v5 = vmul.f32 %v2762_v24, %v1261_v60  ;;  %v1200_v39 = vadd.f32 1.4214138, %v1184_v54  ;;  %v1169_v18 = vadd.f32 -1.4531521, %v1153_v6  ;;  %v2055_v51 = vpop.eup %2054  ;;  %v1420_v24 = vsel %vm1388_vm9, %v1372_v46, %v1404_v16 }
 0x33e   : > { %v1275_v59 = vmul.f32 %v2768_v45, %v1259_v22  ;;  %v1198_v8 = vadd.f32 1.4214138, %v1182_v34  ;;  %v2057_v29 = vpop.eup %2056  ;;  %v1452_v55 = vadd.f32 1.0, %v1420_v24  ;;  %v1435_v6 = vmul.f32 0.5, %v2667_v61 }
 0x33f   : > { %v1357_v19 = vmul.f32 %v2055_v51, %v1277_v5  ;;  %v1216_v37 = vmul.f32 %v2788_v50, %v1200_v39  ;;  %v1185_v11 = vmul.f32 %v2804_v7, %v1169_v18  ;;  %v1436_v63 = vmul.f32 0.5, %v2545_v57 }
 0x340   : > { %v1355_v30 = vmul.f32 %v2057_v29, %v1275_v59  ;;  %v1214_v62 = vmul.f32 %v2793_v53, %v1198_v8  ;;  %v1466_v51 = vmul.f32 %v1450_v10, %v2801_v3  ;;  %vm1393_vm13 = vcmp.ge.f32.partialorder %v2740_v28, 0.0 }
 0x341   : > { %v2059_v13 = vpop.eup %2058  ;;  %v1373_v45 = vsub.f32 1.0, %v1357_v19  ;;  %v1232_v42 = vadd.f32 -0.28449672, %v1216_v37  ;;  %v1201_v36 = vadd.f32 1.4214138, %v1185_v11  ;;  %v1468_v29 = vmul.f32 %v1452_v55, %v1436_v63 }
 0x342   : > { %v1371_v49 = vsub.f32 1.0, %v1355_v30  ;;  %v1230_v44 = vadd.f32 -0.28449672, %v1214_v62  ;;  %v1151_v14 = vmul.f32 1.0614054, %v2059_v13  ;;  %vm1390_vm14 = vcmp.ge.f32.partialorder %v2723_v12, 0.0 }
 0x343   : > { %v1405_v52 = vsub.f32 0.0, %v1373_v45  ;;  %v1248_v23 = vmul.f32 %v2788_v50, %v1232_v42  ;;  %v1217_v46 = vmul.f32 %v2804_v7, %v1201_v36  ;;  %vm1392_vm15 = vcmp.ge.f32.partialorder %v2718_v43, 0.0 }
 0x344   : > { %v1403_v0 = vsub.f32 0.0, %v1371_v49  ;;  %v1246_v20 = vmul.f32 %v2793_v53, %v1230_v44  ;;  %v1167_v15 = vadd.f32 -1.4531521, %v1151_v14  ;;  %v2061_v18 = vpop.eup %2060  ;;  %vm1391_vm1 = vcmp.ge.f32.partialorder %v2766_v48, 0.0 }
 0x345   : > { %v1421_v27 = vsel %vm1389_vm11, %v1373_v45, %v1405_v52  ;;  %v1264_v16 = vadd.f32 0.2548296, %v1248_v23  ;;  %v1233_v26 = vadd.f32 -0.28449672, %v1217_v46  ;;  %v2063_v8 = vpop.eup %2062  ;;  %v1438_v28 = vmul.f32 0.5, %v2713_v33 }
 0x346   : > { %v1453_v38 = vadd.f32 1.0, %v1421_v27  ;;  %v1419_v40 = vsel %vm1387_vm12, %v1371_v49, %v1403_v0  ;;  %v1262_v60 = vadd.f32 0.2548296, %v1246_v20  ;;  %v1183_v54 = vmul.f32 %v2059_v13, %v1167_v15  ;;  %v2065_v24 = vpop.eup %2064 }
 0x347   : > { %v1451_v4 = vadd.f32 1.0, %v1419_v40  ;;  %v1280_v22 = vmul.f32 %v2788_v50, %v1264_v16  ;;  %v1249_v34 = vmul.f32 %v2804_v7, %v1233_v26  ;;  %v1439_v12 = vmul.f32 0.5, %v2759_v9 }
 0x348   : > { %v1469_v47 = vmul.f32 %v1453_v38, %v1437_v35  ;;  %v1278_v5 = vmul.f32 %v2793_v53, %v1262_v60  ;;  %v1199_v39 = vadd.f32 1.4214138, %v1183_v54  ;;  %v1440_v43 = vmul.f32 0.5, %v2710_v2 }
 0x349   : > { %v1467_v56 = vmul.f32 %v1451_v4, %v1435_v6  ;;  %v1265_v59 = vadd.f32 0.2548296, %v1249_v34  ;;  %v1360_v37 = vmul.f32 %v2063_v8, %v1280_v22  ;;  %v2067_v42 = vpop.eup %2066  ;;  %v2957_v8 = vld [vmem:[#allocation4_spill] sm:$0xff] }
 0x34a   : > { %v1358_v19 = vmul.f32 %v2061_v18, %v1278_v5  ;;  %v1215_v61 = vmul.f32 %v2059_v13, %v1199_v39  ;;  %v1479_v30 = vpack.c.bf16 %v1469_v47, %v1468_v29 }
 0x34b   : > { %v1281_v50 = vmul.f32 %v2804_v7, %v1265_v59  ;;  %v1478_v11 = vpack.c.bf16 %v1467_v56, %v1466_v51  ;;  %v1376_v32 = vsub.f32 1.0, %v1360_v37  ;;  %v2956_v51 = vld [vmem:[#allocation2_spill] sm:$0xff] }
 0x34c   : > { %v1231_v57 = vadd.f32 -0.28449672, %v1215_v61  ;;  %v1374_v53 = vsub.f32 1.0, %v1358_v19  ;;  %v2958_v61 = vld [vmem:[#allocation3_spill] sm:$0xff] }
 0x34d   : > { %v1361_v35 = vmul.f32 %v2065_v24, %v1281_v50  ;;  %1920 = vmatprep.mubr.bf16.mxu1 %v1478_v11  ;;  %v1408_v44 = vsub.f32 0.0, %v1376_v32  ;;  %v2959_v24 = vld [vmem:[#allocation6_spill] sm:$0xff] }
 0x34e   : > { %v1247_v62 = vmul.f32 %v2059_v13, %v1231_v57  ;;  %1921 = vmatmul.mubr.bf16.vlgmr.msra.gmra.mxu1 %v1479_v30  ;;  %v1406_v36 = vsub.f32 0.0, %v1374_v53 }
 0x34f   : > { %v1377_v3 = vsub.f32 1.0, %v1361_v35  ;;  %v1424_v23 = vsel %vm1392_vm15, %v1376_v32, %v1408_v44 }
 0x350   : > { %v1263_v58 = vadd.f32 0.2548296, %v1247_v62  ;;  %v1422_v55 = vsel %vm1390_vm14, %v1374_v53, %v1406_v36  ;;  %v1456_v20 = vadd.f32 1.0, %v1424_v23  ;;  %v2960_v53 = vld [vmem:[#allocation5_spill] sm:$0xff] }
 0x351   : > { %v1409_v45 = vsub.f32 0.0, %v1377_v3  ;;  %v1454_v0 = vadd.f32 1.0, %v1422_v55  ;;  %v2963_v55 = vld [vmem:[#allocation10_spill] sm:$0xff] }
 0x352   : > { %v1279_v49 = vmul.f32 %v2059_v13, %v1263_v58  ;;  %v1441_v13 = vmul.f32 0.5, %v2731_v1  ;;  %v1472_v40 = vmul.f32 %v1456_v20, %v1440_v43  ;;  %v2847_v1 = vld [vmem:[%s2932_s9] ss:$0 sm:$0xff]  ;;  %v2961_v58 = vld [vmem:[#allocation8_spill] sm:$0xff]  ;;  %v2966_v43 = vld [vmem:[#allocation11_spill] sm:$0xff] }
 0x353   : > { %v1425_v14 = vsel %vm1393_vm13, %v1377_v3, %v1409_v45  ;;  %v1470_v26 = vmul.f32 %v1454_v0, %v1438_v28 }
 0x354   : > { %v1359_v7 = vmul.f32 %v2067_v42, %v1279_v49  ;;  %v1457_v46 = vadd.f32 1.0, %v1425_v14  ;;  %v2962_v49 = vld [vmem:[#allocation7_spill] sm:$0xff] }
 0x356   : > { %v1375_v52 = vsub.f32 1.0, %v1359_v7  ;;  %v1473_v16 = vmul.f32 %v1457_v46, %v1441_v13 }
 0x358   : > { %v1407_v10 = vsub.f32 0.0, %v1375_v52  ;;  %v1481_v54 = vpack.c.bf16 %v1473_v16, %v1472_v40 }
 0x35a   : > { %v1423_v15 = vsel %vm1391_vm1, %v1375_v52, %v1407_v10  ;;  %v2964_v10 = vld [vmem:[#allocation9_spill] sm:$0xff] }
 0x35b   : > { %v1455_v27 = vadd.f32 1.0, %v1423_v15  ;;  %v2965_v15 = vld [vmem:[#allocation12_spill] sm:$0xff] }
 0x35d   : > { %v1471_v38 = vmul.f32 %v1455_v27, %v1439_v12 }
 0x35f   : > { %v1480_v60 = vpack.c.bf16 %v1471_v38, %v1470_v26 }
 0x361   : > { %1924 = vmatprep.mubr.bf16.mxu1 %v1480_v60 }
 0x362   : > { %1925 = vmatmul.mubr.bf16.gmra.mxu1 %v1481_v54 }
 0x3ee   : > { %v1914_v48 = vpop.f32.mrf.mxu0 }
 0x3ef   : > { %v1645_v33 = vadd.f32 %v1914_v48, %v2176_v17 }
 0x3f0   : > { %v1580_v2 = vpop.f32.mrf.mxu0 }
 0x3f1   : > { %v1668_v9 = vadd.f32 %v2847_v1, %v1645_v33  ;;  %v1643_v6 = vadd.f32 %v1580_v2, %v2180_v21 }
 0x3f2   : > { %v1915_v4 = vpop.f32.mrf.mxu0 }
 0x3f3   : > { %1684 = vst.msk [vmem:[%s2855_s26 + $0x10] sm:$0xff] %vm474_vm0, %v1668_v9  ;;  %v1666_v17 = vadd.f32 %v2847_v1, %v1643_v6  ;;  %v1646_v22 = vadd.f32 %v1915_v4, %v2185_v25 }
 0x3f4   : > { %v1583_v34 = vpop.f32.mrf.mxu0 }
 0x3f5   : > { %1682 = vst.msk [vmem:[%s2855_s26] sm:$0xff] %vm474_vm0, %v1666_v17  ;;  %v1669_v63 = vadd.f32 %v2847_v1, %v1646_v22  ;;  %v1644_v47 = vadd.f32 %v1583_v34, %v2192_v31 }
 0x3f6   : > { %v1918_v5 = vpop.f32.mrf.mxu0 }
 0x3f7   : > { %1685 = vst.msk [vmem:[%s2855_s26 + $0x18] sm:$0xff] %vm474_vm0, %v1669_v63  ;;  %v1667_v21 = vadd.f32 %v2847_v1, %v1644_v47  ;;  %v1649_v39 = vadd.f32 %v1918_v5, %v2204_v41 }
 0x3f8   : > { %v1596_v18 = vpop.f32.mrf.mxu0 }
 0x3f9   : > { %1683 = vst.msk [vmem:[%s2855_s26 + $0x8] sm:$0xff] %vm474_vm0, %v1667_v21  ;;  %v1672_v25 = vadd.f32 %v2847_v1, %v1649_v39  ;;  %v1647_v56 = vadd.f32 %v1596_v18, %v2956_v51 }
 0x3fa   : > { %v1919_v59 = vpop.f32.mrf.mxu0 }
 0x3fb   : > { %1688 = vst.msk [vmem:[%s2855_s26 + $0x30] sm:$0xff] %vm474_vm0, %v1672_v25  ;;  %v1670_v31 = vadd.f32 %v2847_v1, %v1647_v56  ;;  %v1650_v29 = vadd.f32 %v1919_v59, %v2957_v8 }
 0x3fc   : > { %v1599_v19 = vpop.f32.mrf.mxu0 }
 0x3fd   : > { %1686 = vst.msk [vmem:[%s2855_s26 + $0x20] sm:$0xff] %vm474_vm0, %v1670_v31  ;;  %v1673_v41 = vadd.f32 %v2847_v1, %v1650_v29  ;;  %v1648_v37 = vadd.f32 %v1599_v19, %v2958_v61 }
 0x3ff   : > { %1689 = vst.msk [vmem:[%s2855_s26 + $0x38] sm:$0xff] %vm474_vm0, %v1673_v41  ;;  %v1671_v50 = vadd.f32 %v2847_v1, %v1648_v37 }
 0x401   : > { %1687 = vst.msk [vmem:[%s2855_s26 + $0x28] sm:$0xff] %vm474_vm0, %v1671_v50 }
 0x40e   : > { %v1922_v11 = vpop.f32.mrf.mxu1 }
 0x40f   : > { %v1653_v30 = vadd.f32 %v1922_v11, %v2959_v24 }
 0x410   : > { %v1612_v57 = vpop.f32.mrf.mxu1 }
 0x411   : > { %v1676_v35 = vadd.f32 %v2847_v1, %v1653_v30  ;;  %v1651_v62 = vadd.f32 %v1612_v57, %v2960_v53 }
 0x412   : > { %v1923_v32 = vpop.f32.mrf.mxu1 }
 0x413   : > { %1692 = vst.msk [vmem:[%s2855_s26 + $0x50] sm:$0xff] %vm474_vm0, %v1676_v35  ;;  %v1674_v3 = vadd.f32 %v2847_v1, %v1651_v62  ;;  %v1654_v45 = vadd.f32 %v1923_v32, %v2961_v58 }
 0x414   : > { %v1615_v42 = vpop.f32.mrf.mxu1 }
 0x415   : > { %1690 = vst.msk [vmem:[%s2855_s26 + $0x40] sm:$0xff] %vm474_vm0, %v1674_v3  ;;  %v1677_v36 = vadd.f32 %v2847_v1, %v1654_v45  ;;  %v1652_v44 = vadd.f32 %v1615_v42, %v2962_v49 }
 0x417   : > { %1693 = vst.msk [vmem:[%s2855_s26 + $0x58] sm:$0xff] %vm474_vm0, %v1677_v36  ;;  %v1675_v7 = vadd.f32 %v2847_v1, %v1652_v44 }
 0x419   : > { %1691 = vst.msk [vmem:[%s2855_s26 + $0x48] sm:$0xff] %vm474_vm0, %v1675_v7 }
 0x422   : > { %v1926_v14 = vpop.f32.mrf.mxu1 }
 0x423   : > { %v1657_v52 = vadd.f32 %v1926_v14, %v2963_v55 }
 0x424   : > { %v1628_v23 = vpop.f32.mrf.mxu1 }
 0x425   : > { %v1680_v46 = vadd.f32 %v2847_v1, %v1657_v52  ;;  %v1655_v0 = vadd.f32 %v1628_v23, %v2964_v10 }
 0x426   : > { %v1927_v20 = vpop.f32.mrf.mxu1 }
 0x427   : > { %1696 = vst.msk [vmem:[%s2855_s26 + $0x70] sm:$0xff] %vm474_vm0, %v1680_v46  ;;  %v1678_v13 = vadd.f32 %v2847_v1, %v1655_v0  ;;  %v1658_v28 = vadd.f32 %v1927_v20, %v2965_v15 }
 0x428   : > { %v1631_v12 = vpop.f32.mrf.mxu1 }
 0x429   : > { %1694 = vst.msk [vmem:[%s2855_s26 + $0x60] sm:$0xff] %vm474_vm0, %v1678_v13  ;;  %v1681_v27 = vadd.f32 %v2847_v1, %v1658_v28  ;;  %v1656_v16 = vadd.f32 %v1631_v12, %v2966_v43 }
 0x42b   : > { %1697 = vst.msk [vmem:[%s2855_s26 + $0x78] sm:$0xff] %vm474_vm0, %v1681_v27  ;;  %v1679_v26 = vadd.f32 %v2847_v1, %v1656_v16 }
 0x42d   : > { %1695 = vst.msk [vmem:[%s2855_s26 + $0x68] sm:$0xff] %vm474_vm0, %v1679_v26 }
 0x42e PF: > { %s20_s13 = sadd.s32 1, %s2074_s13  }
 0x42f   : > { %p17_p4 = scmp.ge.s32.totalorder %s20_s13, 6  }
 0x431   :  { %19 = sbr.rel (!%p17_p4) target bundleno = 1 (0x1), region = 93 }

// kernel: basic_layer_forward.7
= control target key start
LH: loop header
LB: loop body
LE: loop exit
PB: predicated region body
PF: predicated region fallthrough
CT: control target
= control target key end

     0   :  { %s4530_s9 = smov 0   ;;  %s5971_s0 = inlined_call_operand.vmem [shape: bf16[16,32,96], index: 0, kind: input, shape index: {}]   ;;  %s5972_s1 = inlined_call_operand.vmem [shape: f32[4,32,32], index: 1, kind: input, shape index: {}]   ;;  %s5973_s2 = inlined_call_operand.vmem [shape: bf16[16,32,32], index: 2, kind: output, shape index: {}]  }
   0x1 LB: > { %s3536_s10 = sadd.s32 4294967295, %s4499_s9   ;;  %p3540_p0 = scmp.ge.s32.totalorder %s4499_s9, 1  ;;  %s4499_s9 = sphi %s4530_s9, %s12_s9  }
   0x2   : > { %p114_p1 = scmp.lt.s32.totalorder %s4499_s9, 5 }
   0x4   : > { %p115_p2 = pnand %p3540_p0, %p114_p1 }
   0x6   : > { %118 = sbr.rel (%p115_p2) target bundleno = 2707 (0xa93), region = 28 }
   0xb   : > { %s3541_s11 = sshll.u32 %s3536_s10, 2  ;;  %s4501_s16 = smov 96   ;;  %vm199_vm0 = vcmask 64512   ;;  %v171_v26 = vld [vmem:[%s5972_s1 + $0x10] sm:$0xff]  ;;  %vm518_vm1 = vcmask 261120   ;;  %v4620_v29 = vld [vmem:[%s5972_s1] sm:$0xff] }
   0xc   : > { %p139_p3 = scmp.lt.s32.totalorder %s3541_s11, 15  ;;  %s4502_s17 = smov 64   ;;  %v4632_v40 = vld [vmem:[%s5972_s1 + $0x8] sm:$0xff]  ;;  %v172_v46 = vld [vmem:[%s5972_s1 + $0x18] sm:$0xff]  ;;  %vm3363_vm2 = vcmask 130048   ;;  %vm3380_vm3 = vcmask 195584  }
   0xd   : > { %s4503_s26 = smov 88   ;;  %s4504_s27 = smov 120   ;;  %vm3461_vm4 = vcmask 257024  }
   0xe   : > { %s6032_s11 = smov (!%p139_p3, %s3541_s11), 15  ;;  %s4505_s28 = smov 56  }
   0xf   : > { %s3637_s12 = sshll.u32 %s6032_s11, 4  ;;  %s4506_s10 = smov 80  }
  0x10   : > { %s4546_s15 = scalar_lea.vmem %s5971_s0, %s3637_s12  ;;  %s4507_s13 = smov 112  }
  0x11   : > { %v4549_v0 = vld [vmem:[%s4546_s15 + $0x8] sm:$0xff]   ;;  %v4552_v1 = vld [vmem:[%s4546_s15 + $0x18] sm:$0xff]   ;;  %v4556_v2 = vld [vmem:[%s4546_s15] sm:$0xff]   ;;  %s4508_s14 = smov 48   ;;  %s4509_s24 = smov 72  }
  0x12   : > { %197 = vrot.lane.b32.xlu0 %v4549_v0, %s4501_s16  ;;  %v4559_v3 = vld [vmem:[%s4546_s15 + $0x10] sm:$0xff]   ;;  %195 = vrot.lane.b32.xlu1 %v4556_v2, %s4501_s16  ;;  %v4568_v4 = vld [vmem:[%s4546_s15 + $0x28] sm:$0xff]   ;;  %s4510_s25 = smov 104   ;;  %s4512_s6 = smov 8  }
  0x13   : > { %3787 = vmatprep.mubr.msk.bf16.mxu0 %vm199_vm0, %v4556_v2  ;;  %3795 = vmatprep.mubr.msk.bf16.mxu1 %vm199_vm0, %v4559_v3  ;;  %v4572_v5 = vld [vmem:[%s4546_s15 + $0x38] sm:$0xff]   ;;  %v4576_v6 = vld [vmem:[%s4546_s15 + $0x20] sm:$0xff]   ;;  %v4580_v7 = vld [vmem:[%s4546_s15 + $0x30] sm:$0xff]   ;;  %s4513_s7 = smov 16   ;;  %s4514_s8 = smov 24  }
  0x16   : > { %273 = vrot.lane.b32.xlu0 %v4552_v1, %s4501_s16  ;;  %271 = vrot.lane.b32.xlu1 %v4559_v3, %s4501_s16 }
  0x1a   : > { %348 = vrot.lane.b32.xlu0 %v4568_v4, %s4501_s16  ;;  %423 = vrot.lane.b32.xlu1 %v4572_v5, %s4501_s16 }
  0x1e   : > { %346 = vrot.lane.b32.xlu0 %v4576_v6, %s4501_s16  ;;  %421 = vrot.lane.b32.xlu1 %v4580_v7, %s4501_s16 }
  0x22   : > { %705 = vrot.lane.b32.xlu1 %v4549_v0, %s4502_s17 }
  0x84   : > { %v198_v8 = vpop.permute.xlu0 %197  ;;  %v196_v10 = vpop.permute.xlu1 %195 }
  0x85   : > { %4039 = vmatprep.subr.msk.bf16.mxu0 %vm199_vm0, %v198_v8  ;;  %v210_v9 = vsel %vm199_vm0, %v198_v8, 0  ;;  %v207_v14 = vsel %vm199_vm0, %v196_v10, 0 }
  0x86   : > { %3784 = vmatpush3.bf16.xpose.msra.mxu0 %v210_v9 }
  0x87   : > { %4040 = vmatprep.subr.msk.bf16.mxu0 %vm199_vm0, %v196_v10 }
  0x88   : > { %v274_v11 = vpop.permute.xlu0 %273  ;;  %v272_v13 = vpop.permute.xlu1 %271 }
  0x89   : > { %4041 = vmatprep.subr.msk.bf16.mxu1 %vm199_vm0, %v274_v11  ;;  %v285_v12 = vsel %vm199_vm0, %v274_v11, 0  ;;  %v282_v16 = vsel %vm199_vm0, %v272_v13, 0 }
  0x8a   : > { %3792 = vmatpush3.bf16.xpose.msra.mxu1 %v285_v12 }
  0x8b   : > { %4042 = vmatprep.subr.msk.bf16.mxu1 %vm199_vm0, %v272_v13 }
  0x8c   : > { %v349_v15 = vpop.permute.xlu0 %348  ;;  %v424_v17 = vpop.permute.xlu1 %423 }
  0x8d   : > { %v360_v18 = vsel %vm199_vm0, %v349_v15, 0  ;;  %v435_v20 = vsel %vm199_vm0, %v424_v17, 0 }
  0x8e   : > { %3786 = vmatpush3.bf16.xpose.msra.mxu0 %v207_v14 }
  0x8f   : > { %4043 = vmatprep.subr.msk.bf16.mxu0 %vm199_vm0, %v349_v15 }
  0x90   : > { %v347_v19 = vpop.permute.xlu0 %346  ;;  %v422_v21 = vpop.permute.xlu1 %421 }
  0x91   : > { %v357_v22 = vsel %vm199_vm0, %v347_v19, 0  ;;  %v432_v23 = vsel %vm199_vm0, %v422_v21, 0 }
  0x92   : > { %3794 = vmatpush3.bf16.xpose.msra.mxu1 %v282_v16 }
  0x93   : > { %4045 = vmatprep.subr.msk.bf16.mxu1 %vm199_vm0, %v424_v17 }
  0x94   : > { %v706_v24 = vpop.permute.xlu1 %705 }
  0x95   : > { %3788 = vmatmul.mubr.msk.bf16.vlgmr.msra.gmra.mxu0 %vm199_vm0, %v4549_v0 }
  0x96   : > { %3800 = vmatpush3.bf16.xpose.msra.mxu0 %v360_v18  ;;  %3803 = vmatprep.mubr.msk.bf16.mxu0 %vm199_vm0, %v4576_v6 }
  0x97   : > { %4044 = vmatprep.subr.msk.bf16.mxu0 %vm199_vm0, %v347_v19 }
  0x99   : > { %3796 = vmatmul.mubr.msk.bf16.vlgmr.msra.gmra.mxu1 %vm199_vm0, %v4552_v1 }
  0x9a   : > { %3808 = vmatpush3.bf16.xpose.msra.mxu1 %v435_v20  ;;  %3811 = vmatprep.mubr.msk.bf16.mxu1 %vm199_vm0, %v4580_v7 }
  0x9b   : > { %4046 = vmatprep.subr.msk.bf16.mxu1 %vm199_vm0, %v422_v21 }
  0x9e   : > { %3802 = vmatpush3.bf16.xpose.msra.mxu0 %v357_v22 }
  0x9f   : > { %3815 = vmatprep.subr.bf16.mxu0 %v706_v24 }
  0xa2   : > { %3810 = vmatpush3.bf16.xpose.msra.mxu1 %v432_v23 }
  0xa5   : > { %3804 = vmatmul.mubr.msk.bf16.vlgmr.msra.gmra.mxu0 %vm199_vm0, %v4568_v4 }
  0xa6   : > { %3816 = vmatpush3.bf16.msra.mxu0 %v706_v24 }
  0xa9   : > { %3812 = vmatmul.mubr.msk.bf16.vlgmr.msra.gmra.mxu1 %vm199_vm0, %v4572_v5 }
 0x155   : > { %v3789_v25 = vpop.f32.mrf.mxu0 }
 0x156   : > { %v488_v27 = vmul.f32 0.35355338, %v3789_v25 }
 0x157   : > { %v246_v28 = vpop.f32.mrf.mxu0 }
 0x158   : > { %v486_v30 = vmul.f32 0.35355338, %v246_v28  ;;  %v4622_v31 = vadd.f32 %v488_v27, %v171_v26 }
 0x159   : > { %v3790_v32 = vpop.f32.mrf.mxu0  ;;  %v3797_v33 = vpop.f32.mrf.mxu1 }
 0x15a   : > { %v492_v34 = vmul.f32 0.35355338, %v3797_v33  ;;  %v525_v35 = vsel %vm518_vm1, %v4622_v31, -inf  ;;  %v4627_v36 = vadd.f32 %v486_v30, %v4620_v29  ;;  %v489_v37 = vmul.f32 0.35355338, %v3790_v32 }
 0x15b   : > { %v321_v38 = vpop.f32.mrf.mxu1  ;;  %526 = vmax.xlane.f32.xlu1 %v525_v35  ;;  %v249_v39 = vpop.f32.mrf.mxu0 }
 0x15c   : > { %v490_v41 = vmul.f32 0.35355338, %v321_v38  ;;  %v487_v42 = vmul.f32 0.35355338, %v249_v39  ;;  %v519_v43 = vsel %vm518_vm1, %v4627_v36, -inf  ;;  %v4636_v44 = vadd.f32 %v492_v34, %v171_v26 }
 0x15d   : > { %v3798_v45 = vpop.f32.mrf.mxu1  ;;  %520 = vmax.xlane.f32.xlu0 %v519_v43  ;;  %v4651_v52 = vadd.f32 %v489_v37, %v172_v46 }
 0x15e   : > { %v537_v47 = vsel %vm518_vm1, %v4636_v44, -inf  ;;  %v4644_v48 = vadd.f32 %v490_v41, %v4620_v29  ;;  %v4647_v49 = vadd.f32 %v487_v42, %v4632_v40  ;;  %v493_v50 = vmul.f32 0.35355338, %v3798_v45 }
 0x15f   : > { %538 = vmax.xlane.f32.xlu1 %v537_v47  ;;  %v324_v53 = vpop.f32.mrf.mxu1  ;;  %v528_v56 = vsel %vm518_vm1, %v4651_v52, -inf }
 0x160   : > { %v531_v51 = vsel %vm518_vm1, %v4644_v48, -inf  ;;  %v522_v54 = vsel %vm518_vm1, %v4647_v49, -inf  ;;  %v491_v55 = vmul.f32 0.35355338, %v324_v53  ;;  %v4657_v57 = vadd.f32 %v493_v50, %v172_v46 }
 0x161   : > { %532 = vmax.xlane.f32.xlu0 %v531_v51 }
 0x162   : > { %v540_v61 = vsel %vm518_vm1, %v4657_v57, -inf  ;;  %v4664_v63 = vadd.f32 %v491_v55, %v4632_v40 }
 0x163   : > { %523 = vmax.xlane.f32.xlu1 %v522_v54 }
 0x164   : > { %v534_v15 = vsel %vm518_vm1, %v4664_v63, -inf }
 0x165   : > { %529 = vmax.xlane.f32.xlu0 %v528_v56  ;;  %v3805_v58 = vpop.f32.mrf.mxu0 }
 0x166   : > { %v496_v59 = vmul.f32 0.35355338, %v3805_v58 }
 0x167   : > { %v396_v60 = vpop.f32.mrf.mxu0 }
 0x168   : > { %v4661_v62 = vadd.f32 %v496_v59, %v171_v26  ;;  %v494_v8 = vmul.f32 0.35355338, %v396_v60 }
 0x169   : > { %v3813_v9 = vpop.f32.mrf.mxu1  ;;  %541 = vmax.xlane.f32.xlu0 %v540_v61  ;;  %v3806_v10 = vpop.f32.mrf.mxu0 }
 0x16a   : > { %v500_v11 = vmul.f32 0.35355338, %v3813_v9  ;;  %v497_v12 = vmul.f32 0.35355338, %v3806_v10  ;;  %v549_v13 = vsel %vm518_vm1, %v4661_v62, -inf  ;;  %v4675_v20 = vadd.f32 %v494_v8, %v4620_v29 }
 0x16b   : > { %v471_v14 = vpop.f32.mrf.mxu1  ;;  %550 = vmax.xlane.f32.xlu1 %v549_v13  ;;  %v399_v18 = vpop.f32.mrf.mxu0 }
 0x16c   : > { %v4670_v16 = vadd.f32 %v500_v11, %v171_v26  ;;  %v4672_v17 = vadd.f32 %v497_v12, %v172_v46  ;;  %v498_v21 = vmul.f32 0.35355338, %v471_v14  ;;  %v495_v25 = vmul.f32 0.35355338, %v399_v18 }
 0x16d   : > { %v3814_v19 = vpop.f32.mrf.mxu1  ;;  %535 = vmax.xlane.f32.xlu0 %v534_v15  ;;  %v543_v28 = vsel %vm518_vm1, %v4675_v20, -inf }
 0x16e   : > { %v501_v22 = vmul.f32 0.35355338, %v3814_v19  ;;  %v561_v23 = vsel %vm518_vm1, %v4670_v16, -inf  ;;  %v552_v24 = vsel %vm518_vm1, %v4672_v17, -inf  ;;  %v4688_v32 = vadd.f32 %v498_v21, %v4620_v29 }
 0x16f   : > { %562 = vmax.xlane.f32.xlu1 %v561_v23  ;;  %v474_v27 = vpop.f32.mrf.mxu1  ;;  %v4691_v34 = vadd.f32 %v495_v25, %v4632_v40 }
 0x170   : > { %v4681_v26 = vadd.f32 %v501_v22, %v172_v46  ;;  %v499_v33 = vmul.f32 0.35355338, %v474_v27  ;;  %v555_v35 = vsel %vm518_vm1, %v4688_v32, -inf }
 0x171   : > { %553 = vmax.xlane.f32.xlu0 %v552_v24  ;;  %v546_v37 = vsel %vm518_vm1, %v4691_v34, -inf }
 0x172   : > { %v564_v30 = vsel %vm518_vm1, %v4681_v26, -inf  ;;  %v4698_v38 = vadd.f32 %v499_v33, %v4632_v40 }
 0x173   : > { %544 = vmax.xlane.f32.xlu1 %v543_v28 }
 0x174   : > { %v558_v29 = vsel %vm518_vm1, %v4698_v38, -inf }
 0x175   : > { %565 = vmax.xlane.f32.xlu0 %v564_v30 }
 0x177   : > { %556 = vmax.xlane.f32.xlu1 %v555_v35 }
 0x179   : > { %547 = vmax.xlane.f32.xlu0 %v546_v37 }
 0x17d   : > { %559 = vmax.xlane.f32.xlu0 %v558_v29 }
 0x188   : > { %703 = vrot.lane.b32.xlu1 %v4556_v2, %s4502_s17 }
 0x18c   : > { %764 = vrot.lane.b32.xlu1 %v4559_v3, %s4502_s17 }
 0x190   : > { %888 = vrot.lane.b32.xlu1 %v4572_v5, %s4502_s17 }
 0x193   : > { %766 = vrot.lane.b32.xlu0 %v4552_v1, %s4502_s17 }
 0x194   : > { %886 = vrot.lane.b32.xlu1 %v4580_v7, %s4502_s17 }
 0x197   : > { %827 = vrot.lane.b32.xlu0 %v4568_v4, %s4502_s17 }
 0x19b   : > { %825 = vrot.lane.b32.xlu0 %v4576_v6, %s4502_s17 }
 0x1e4   : > { %v527_v39 = vpop.xlane.xlu1 %526 }
 0x1e5   : > { %v569_v40 = vsub.f32 %v4622_v31, %v527_v39 }
 0x1e6   : > { %v521_v41 = vpop.xlane.xlu0 %520 }
 0x1e7   : > { %v587_v42 = vmul.f32 1.442695, %v569_v40  ;;  %v567_v43 = vsub.f32 %v4627_v36, %v521_v41 }
 0x1e8   : > { %v539_v45 = vpop.xlane.xlu1 %538 }
 0x1e9   : > { %4221 = vpow2.f32 %v587_v42  ;;  %v573_v46 = vsub.f32 %v4636_v44, %v539_v45  ;;  %v583_v50 = vmul.f32 1.442695, %v567_v43 }
 0x1ea   : > { %v533_v47 = vpop.xlane.xlu0 %532 }
 0x1eb   : > { %v595_v51 = vmul.f32 1.442695, %v573_v46  ;;  %v571_v53 = vsub.f32 %v4644_v48, %v533_v47 }
 0x1ec   : > { %v524_v54 = vpop.xlane.xlu1 %523 }
 0x1ed   : > { %4223 = vpow2.f32 %v595_v51  ;;  %v591_v55 = vmul.f32 1.442695, %v571_v53  ;;  %v568_v58 = vsub.f32 %v4647_v49, %v524_v54 }
 0x1ee   : > { %v530_v56 = vpop.xlane.xlu0 %529  ;;  %4225 = vpow2.f32 %v583_v50 }
 0x1ef   : > { %v570_v31 = vsub.f32 %v4651_v52, %v530_v56  ;;  %4227 = vpow2.f32 %v591_v55  ;;  %v585_v60 = vmul.f32 1.442695, %v568_v58 }
 0x1f1   : > { %v589_v59 = vmul.f32 1.442695, %v570_v31 }
 0x1f2   : > { %v542_v36 = vpop.xlane.xlu0 %541 }
 0x1f3   : > { %4229 = vpow2.f32 %v589_v59  ;;  %v574_v44 = vsub.f32 %v4657_v57, %v542_v36 }
 0x1f4   : > { %v551_v61 = vpop.xlane.xlu1 %550 }
 0x1f5   : > { %v597_v8 = vmul.f32 1.442695, %v574_v44  ;;  %v577_v48 = vsub.f32 %v4661_v62, %v551_v61 }
 0x1f6   : > { %v4724_v9 = vpop.eup %4221  ;;  %v536_v10 = vpop.xlane.xlu0 %535 }
 0x1f7   : > { %4231 = vpow2.f32 %v597_v8  ;;  %v603_v11 = vmul.f32 1.442695, %v577_v48  ;;  %v572_v52 = vsub.f32 %v4664_v63, %v536_v10  ;;  %v621_v49 = vsel %vm518_vm1, %v4724_v9, 0.0 }
 0x1f8   : > { %4233 = vpow2.f32 %v585_v60  ;;  %v563_v12 = vpop.xlane.xlu1 %562  ;;  %622 = vadd.xlane.f32.xlu1 %v621_v49 }
 0x1f9   : > { %4235 = vpow2.f32 %v603_v11  ;;  %v593_v57 = vmul.f32 1.442695, %v572_v52  ;;  %v581_v13 = vsub.f32 %v4670_v16, %v563_v12 }
 0x1fa   : > { %v4730_v14 = vpop.eup %4223  ;;  %v554_v62 = vpop.xlane.xlu0 %553 }
 0x1fb   : > { %v611_v15 = vmul.f32 1.442695, %v581_v13  ;;  %v578_v18 = vsub.f32 %v4672_v17, %v554_v62  ;;  %v633_v19 = vsel %vm518_vm1, %v4730_v14, 0.0  ;;  %v4735_v63 = vpop.eup %4225  ;;  %4237 = vpow2.f32 %v593_v57 }
 0x1fc   : > { %634 = vadd.xlane.f32.xlu1 %v633_v19  ;;  %v545_v21 = vpop.xlane.xlu1 %544  ;;  %v4738_v16 = vpop.eup %4227  ;;  %v615_v17 = vsel %vm518_vm1, %v4735_v63, 0.0 }
 0x1fd   : > { %4239 = vpow2.f32 %v611_v15  ;;  %v605_v22 = vmul.f32 1.442695, %v578_v18  ;;  %v575_v23 = vsub.f32 %v4675_v20, %v545_v21  ;;  %v627_v39 = vsel %vm518_vm1, %v4738_v16, 0.0 }
 0x1fe   : > { %v566_v24 = vpop.xlane.xlu0 %565 }
 0x1ff   : > { %v599_v25 = vmul.f32 1.442695, %v575_v23  ;;  %v582_v27 = vsub.f32 %v4681_v26, %v566_v24  ;;  %4241 = vpow2.f32 %v605_v22 }
 0x200   : > { %v4743_v28 = vpop.eup %4229  ;;  %616 = vadd.xlane.f32.xlu1 %v615_v17  ;;  %v557_v30 = vpop.xlane.xlu1 %556 }
 0x201   : > { %4243 = vpow2.f32 %v599_v25  ;;  %v613_v33 = vmul.f32 1.442695, %v582_v27  ;;  %v579_v35 = vsub.f32 %v4688_v32, %v557_v30  ;;  %v624_v20 = vsel %vm518_vm1, %v4743_v28, 0.0 }
 0x202   : > { %625 = vadd.xlane.f32.xlu0 %v624_v20  ;;  %v548_v37 = vpop.xlane.xlu0 %547 }
 0x203   : > { %v607_v29 = vmul.f32 1.442695, %v579_v35  ;;  %v576_v26 = vsub.f32 %v4691_v34, %v548_v37  ;;  %4245 = vpow2.f32 %v613_v33 }
 0x204   : > { %v4751_v40 = vpop.eup %4231  ;;  %628 = vadd.xlane.f32.xlu1 %v627_v39  ;;  %v704_v41 = vpop.permute.xlu1 %703 }
 0x205   : > { %v4753_v42 = vpop.eup %4233  ;;  %4247 = vpow2.f32 %v607_v29  ;;  %v601_v32 = vmul.f32 1.442695, %v576_v26  ;;  %v636_v43 = vsel %vm518_vm1, %v4751_v40, 0.0  ;;  %3817 = vmatprep.subr.bf16.mxu0 %v704_v41 }
 0x206   : > { %v4757_v45 = vpop.eup %4235  ;;  %637 = vadd.xlane.f32.xlu0 %v636_v43  ;;  %v560_v34 = vpop.xlane.xlu0 %559  ;;  %3818 = vmatpush3.bf16.msra.mxu0 %v704_v41  ;;  %v618_v54 = vsel %vm518_vm1, %v4753_v42, 0.0 }
 0x207   : > { %v580_v46 = vsub.f32 %v4698_v38, %v560_v34  ;;  %v645_v47 = vsel %vm518_vm1, %v4757_v45, 0.0  ;;  %4249 = vpow2.f32 %v601_v32 }
 0x208   : > { %646 = vadd.xlane.f32.xlu1 %v645_v47  ;;  %v765_v50 = vpop.permute.xlu1 %764  ;;  %v4762_v51 = vpop.eup %4237 }
 0x209   : > { %v609_v53 = vmul.f32 1.442695, %v580_v46  ;;  %v630_v58 = vsel %vm518_vm1, %v4762_v51, 0.0 }
 0x20a   : > { %v4766_v55 = vpop.eup %4239  ;;  %619 = vadd.xlane.f32.xlu0 %v618_v54  ;;  %v767_v56 = vpop.permute.xlu0 %766 }
 0x20b   : > { %v657_v31 = vsel %vm518_vm1, %v4766_v55, 0.0  ;;  %3823 = vmatprep.subr.bf16.mxu1 %v767_v56  ;;  %4251 = vpow2.f32 %v609_v53 }
 0x20c   : > { %658 = vadd.xlane.f32.xlu1 %v657_v31  ;;  %3824 = vmatpush3.bf16.msra.mxu1 %v767_v56  ;;  %v4770_v38 = vpop.eup %4241  ;;  %v4776_v36 = vpop.permute.xlu1 %888 }
 0x20d   : > { %3825 = vmatprep.subr.bf16.mxu1 %v765_v50  ;;  %v648_v8 = vsel %vm518_vm1, %v4770_v38, 0.0 }
 0x20e   : > { %v4774_v59 = vpop.eup %4243  ;;  %631 = vadd.xlane.f32.xlu0 %v630_v58  ;;  %v4778_v44 = vpop.permute.xlu0 %827 }
 0x20f   : > { %v639_v60 = vsel %vm518_vm1, %v4774_v59, 0.0  ;;  %3831 = vmatprep.subr.bf16.mxu0 %v4778_v44 }
 0x210   : > { %640 = vadd.xlane.f32.xlu1 %v639_v60  ;;  %3826 = vmatpush3.bf16.msra.mxu1 %v765_v50  ;;  %v4783_v61 = vpop.eup %4245 }
 0x211   : > { %3839 = vmatprep.subr.bf16.mxu1 %v4776_v36  ;;  %v660_v11 = vsel %vm518_vm1, %v4783_v61, 0.0 }
 0x212   : > { %v4788_v48 = vpop.eup %4247  ;;  %649 = vadd.xlane.f32.xlu0 %v648_v8  ;;  %v826_v62 = vpop.permute.xlu0 %825 }
 0x213   : > { %v651_v10 = vsel %vm518_vm1, %v4788_v48, 0.0 }
 0x214   : > { %652 = vadd.xlane.f32.xlu1 %v651_v10  ;;  %v4794_v52 = vpop.eup %4249 }
 0x215   : > { %v642_v49 = vsel %vm518_vm1, %v4794_v52, 0.0 }
 0x216   : > { %661 = vadd.xlane.f32.xlu0 %v660_v11 }
 0x218   : > { %v4798_v12 = vpop.eup %4251 }
 0x219   : > { %v654_v57 = vsel %vm518_vm1, %v4798_v12, 0.0 }
 0x21a   : > { %643 = vadd.xlane.f32.xlu0 %v642_v49 }
 0x21e   : > { %655 = vadd.xlane.f32.xlu0 %v654_v57 }
 0x225   : > { %1022 = vrot.lane.b32.xlu1 %v4552_v1, %s4503_s26 }
 0x229   : > { %1020 = vrot.lane.b32.xlu1 %v4559_v3, %s4503_s26 }
 0x22d   : > { %1016 = vrot.lane.b32.xlu1 %v4559_v3, %s4504_s27 }
 0x231   : > { %1160 = vrot.lane.b32.xlu1 %v4572_v5, %s4503_s26 }
 0x234   : > { %953 = vrot.lane.b32.xlu0 %v4549_v0, %s4503_s26 }
 0x235   : > { %1018 = vrot.lane.b32.xlu1 %v4552_v1, %s4504_s27  ;;  %v4818_v1 = vpop.permute.xlu1 %886 }
 0x238   : > { %951 = vrot.lane.b32.xlu0 %v4556_v2, %s4503_s26 }
 0x239   : > { %1158 = vrot.lane.b32.xlu1 %v4580_v7, %s4503_s26 }
 0x23c   : > { %947 = vrot.lane.b32.xlu0 %v4556_v2, %s4504_s27 }
 0x23d   : > { %1154 = vrot.lane.b32.xlu1 %v4580_v7, %s4504_s27 }
 0x240   : > { %1091 = vrot.lane.b32.xlu0 %v4568_v4, %s4503_s26 }
 0x241   : > { %1156 = vrot.lane.b32.xlu1 %v4572_v5, %s4504_s27 }
 0x244   : > { %949 = vrot.lane.b32.xlu0 %v4549_v0, %s4504_s27 }
 0x245   : > { %1441 = vrot.lane.b32.xlu1 %v4549_v0, %s4505_s28 }
 0x248   : > { %1089 = vrot.lane.b32.xlu0 %v4576_v6, %s4503_s26  ;;  %s4511_s26 = smov 40  }
 0x24c   : > { %1085 = vrot.lane.b32.xlu0 %v4576_v6, %s4504_s27 }
 0x250   : > { %1087 = vrot.lane.b32.xlu0 %v4568_v4, %s4504_s27 }
 0x281   : > { %v623_v3 = vpop.xlane.xlu1 %622 }
 0x285   : > { %v635_v13 = vpop.xlane.xlu1 %634 }
 0x289   : > { %v617_v2 = vpop.xlane.xlu1 %616 }
 0x28b   : > { %v626_v15 = vpop.xlane.xlu0 %625 }
 0x28c   : > { %4253 = vrcp.f32 %v626_v15 }
 0x28d   : > { %v629_v7 = vpop.xlane.xlu1 %628  ;;  %4255 = vrcp.f32 %v617_v2 }
 0x28e   : > { %4257 = vrcp.f32 %v623_v3 }
 0x28f   : > { %v638_v18 = vpop.xlane.xlu0 %637 }
 0x291   : > { %v647_v19 = vpop.xlane.xlu1 %646 }
 0x293   : > { %v620_v5 = vpop.xlane.xlu0 %619 }
 0x294   : > { %4259 = vrcp.f32 %v620_v5 }
 0x295   : > { %4261 = vrcp.f32 %v638_v18  ;;  %v659_v6 = vpop.xlane.xlu1 %658 }
 0x296   : > { %4263 = vrcp.f32 %v629_v7 }
 0x297   : > { %4265 = vrcp.f32 %v635_v13  ;;  %v632_v4 = vpop.xlane.xlu0 %631 }
 0x298   : > { %4267 = vrcp.f32 %v632_v4 }
 0x299   : > { %v641_v22 = vpop.xlane.xlu1 %640  ;;  %v4254_v23 = vpop.eup %4253 }
 0x29a   : > { %v4256_v24 = vpop.eup %4255  ;;  %v670_v30 = vmul.f32 %v4254_v23, %v4743_v28 }
 0x29b   : > { %v650_v21 = vpop.xlane.xlu0 %649  ;;  %v4258_v27 = vpop.eup %4257  ;;  %v664_v35 = vmul.f32 %v4256_v24, %v4735_v63 }
 0x29c   : > { %4269 = vrcp.f32 %v650_v21  ;;  %v668_v39 = vmul.f32 %v4258_v27, %v4724_v9 }
 0x29d   : > { %4271 = vrcp.f32 %v641_v22  ;;  %v653_v29 = vpop.xlane.xlu1 %652 }
 0x29e   : > { %4273 = vrcp.f32 %v647_v19  ;;  %v696_v34 = vpack.c.bf16 %v670_v30, %v668_v39 }
 0x29f   : > { %v662_v25 = vpop.xlane.xlu0 %661 }
 0x2a1   : > { %v4260_v17 = vpop.eup %4259 }
 0x2a2   : > { %v4262_v33 = vpop.eup %4261  ;;  %v666_v20 = vmul.f32 %v4260_v17, %v4753_v42 }
 0x2a3   : > { %v4264_v37 = vpop.eup %4263  ;;  %v644_v26 = vpop.xlane.xlu0 %643  ;;  %v678_v28 = vmul.f32 %v4262_v33, %v4751_v40 }
 0x2a4   : > { %v4266_v41 = vpop.eup %4265  ;;  %4275 = vrcp.f32 %v644_v26  ;;  %v695_v32 = vpack.c.bf16 %v666_v20, %v664_v35  ;;  %v672_v63 = vmul.f32 %v4264_v37, %v4738_v16  ;;  %v1023_v40 = vpop.permute.xlu1 %1022 }
 0x2a5   : > { %v4268_v43 = vpop.eup %4267  ;;  %4277 = vrcp.f32 %v662_v25  ;;  %v676_v9 = vmul.f32 %v4266_v41, %v4730_v14 }
 0x2a6   : > { %4279 = vrcp.f32 %v653_v29  ;;  %3819 = vmatprep.mubr.msk.bf16.mxu0 %vm518_vm1, %v695_v32  ;;  %v674_v42 = vmul.f32 %v4268_v43, %v4762_v51 }
 0x2a7   : > { %4281 = vrcp.f32 %v659_v6  ;;  %3820 = vmatmul.mubr.msk.bf16.vlgmr.msra.gmra.mxu0 %vm518_vm1, %v696_v34  ;;  %v656_v46 = vpop.xlane.xlu0 %655  ;;  %v698_v50 = vpack.c.bf16 %v678_v28, %v676_v9  ;;  %v175_v9 = vld [vmem:[%s5972_s1 + $0x30] sm:$0xff] }
 0x2a8   : > { %3832 = vmatpush3.bf16.msra.mxu0 %v4778_v44  ;;  %4283 = vrcp.f32 %v656_v46  ;;  %v697_v47 = vpack.c.bf16 %v674_v42, %v672_v63  ;;  %v1021_v54 = vpop.permute.xlu1 %1020 }
 0x2a9   : > { %3833 = vmatprep.subr.bf16.mxu0 %v826_v62  ;;  %v4270_v14 = vpop.eup %4269  ;;  %v1031_v5 = vsel %vm199_vm0, %v1021_v54, 0 }
 0x2aa   : > { %3827 = vmatprep.mubr.msk.bf16.mxu1 %vm518_vm1, %v697_v47  ;;  %v4272_v51 = vpop.eup %4271  ;;  %v686_v58 = vmul.f32 %v4270_v14, %v4770_v38 }
 0x2ab   : > { %3828 = vmatmul.mubr.msk.bf16.vlgmr.msra.gmra.mxu1 %vm518_vm1, %v698_v50  ;;  %v954_v16 = vpop.permute.xlu0 %953  ;;  %v4274_v56 = vpop.eup %4273  ;;  %v680_v60 = vmul.f32 %v4272_v51, %v4774_v59 }
 0x2ac   : > { %3834 = vmatpush3.bf16.msra.mxu0 %v826_v62  ;;  %3840 = vmatpush3.bf16.msra.mxu1 %v4776_v36  ;;  %v684_v10 = vmul.f32 %v4274_v56, %v4757_v45  ;;  %v1017_v38 = vpop.permute.xlu1 %1016 }
 0x2ad   : > { %3841 = vmatprep.subr.bf16.mxu1 %v4818_v1  ;;  %4047 = vmatprep.subr.msk.bf16.mxu0 %vm199_vm0, %v954_v16 }
 0x2ae   : > { %v700_v13 = vpack.c.bf16 %v686_v58, %v684_v10 }
 0x2af   : > { %v952_v53 = vpop.permute.xlu0 %951 }
 0x2b0   : > { %3842 = vmatpush3.bf16.msra.mxu1 %v4818_v1  ;;  %v965_v1 = vsel %vm199_vm0, %v954_v16, 0  ;;  %v4912_v16 = vld [vmem:[%s5972_s1 + $0x20] sm:$0xff] }
 0x2b1   : > { %v4276_v31 = vpop.eup %4275  ;;  %4049 = vmatprep.subr.msk.bf16.mxu1 %vm199_vm0, %v1023_v40 }
 0x2b2   : > { %v4278_v44 = vpop.eup %4277  ;;  %v682_v36 = vmul.f32 %v4276_v31, %v4794_v52 }
 0x2b3   : > { %v4280_v8 = vpop.eup %4279  ;;  %v948_v11 = vpop.permute.xlu0 %947  ;;  %v694_v62 = vmul.f32 %v4278_v44, %v4783_v61  ;;  %v1034_v61 = vsel %vm199_vm0, %v1023_v40, 0 }
 0x2b4   : > { %v4282_v49 = vpop.eup %4281  ;;  %v699_v57 = vpack.c.bf16 %v682_v36, %v680_v60  ;;  %v688_v2 = vmul.f32 %v4280_v8, %v4788_v48  ;;  %v1161_v48 = vpop.permute.xlu1 %1160  ;;  %v4924_v8 = vld [vmem:[%s5972_s1 + $0x28] sm:$0xff] }
 0x2b5   : > { %v4284_v3 = vpop.eup %4283  ;;  %v692_v45 = vmul.f32 %v4282_v49, %v4766_v55  ;;  %v1172_v22 = vsel %vm199_vm0, %v1161_v48, 0 }
 0x2b6   : > { %3835 = vmatprep.mubr.msk.bf16.mxu0 %vm518_vm1, %v699_v57  ;;  %v690_v59 = vmul.f32 %v4284_v3, %v4798_v12  ;;  %v962_v12 = vsel %vm199_vm0, %v952_v53, 0 }
 0x2b7   : > { %3836 = vmatmul.mubr.msk.bf16.vlgmr.msra.gmra.mxu0 %vm518_vm1, %v700_v13  ;;  %v1092_v52 = vpop.permute.xlu0 %1091  ;;  %v702_v7 = vpack.c.bf16 %v694_v62, %v692_v45  ;;  %v176_v13 = vld [vmem:[%s5972_s1 + $0x38] sm:$0xff] }
 0x2b8   : > { %3848 = vmatpush3.bf16.xpose.msra.mxu0 %v965_v1  ;;  %v701_v15 = vpack.c.bf16 %v690_v59, %v688_v2  ;;  %3851 = vmatprep.mubr.msk.bf16.mxu0 %vm199_vm0, %v948_v11  ;;  %v1019_v18 = vpop.permute.xlu1 %1018  ;;  %v1103_v4 = vsel %vm199_vm0, %v1092_v52, 0 }
 0x2b9   : > { %4048 = vmatprep.subr.msk.bf16.mxu0 %vm199_vm0, %v952_v53 }
 0x2ba   : > { %3843 = vmatprep.mubr.msk.bf16.mxu1 %vm518_vm1, %v701_v15 }
 0x2bb   : > { %3844 = vmatmul.mubr.msk.bf16.vlgmr.msra.gmra.mxu1 %vm518_vm1, %v702_v7  ;;  %v950_v55 = vpop.permute.xlu0 %949 }
 0x2bc   : > { %3856 = vmatpush3.bf16.xpose.msra.mxu1 %v1034_v61  ;;  %3859 = vmatprep.mubr.msk.bf16.mxu1 %vm199_vm0, %v1017_v38  ;;  %v1159_v6 = vpop.permute.xlu1 %1158 }
 0x2bd   : > { %4050 = vmatprep.subr.msk.bf16.mxu1 %vm199_vm0, %v1021_v54  ;;  %v1169_v25 = vsel %vm199_vm0, %v1159_v6, 0 }
 0x2bf   : > { %v1090_v19 = vpop.permute.xlu0 %1089 }
 0x2c0   : > { %3850 = vmatpush3.bf16.xpose.msra.mxu0 %v962_v12  ;;  %v1155_v23 = vpop.permute.xlu1 %1154  ;;  %v1100_v24 = vsel %vm199_vm0, %v1090_v19, 0 }
 0x2c1   : > { %4051 = vmatprep.subr.msk.bf16.mxu0 %vm199_vm0, %v1092_v52 }
 0x2c3   : > { %v1086_v21 = vpop.permute.xlu0 %1085 }
 0x2c4   : > { %3858 = vmatpush3.bf16.xpose.msra.mxu1 %v1031_v5  ;;  %v1157_v17 = vpop.permute.xlu1 %1156 }
 0x2c5   : > { %4053 = vmatprep.subr.msk.bf16.mxu1 %vm199_vm0, %v1161_v48 }
 0x2c7   : > { %3852 = vmatmul.mubr.msk.bf16.vlgmr.msra.gmra.mxu0 %vm199_vm0, %v950_v55  ;;  %v1088_v27 = vpop.permute.xlu0 %1087 }
 0x2c8   : > { %3864 = vmatpush3.bf16.xpose.msra.mxu0 %v1103_v4  ;;  %3867 = vmatprep.mubr.msk.bf16.mxu0 %vm199_vm0, %v1086_v21  ;;  %v1442_v30 = vpop.permute.xlu1 %1441 }
 0x2c9   : > { %4052 = vmatprep.subr.msk.bf16.mxu0 %vm199_vm0, %v1090_v19 }
 0x2cb   : > { %3860 = vmatmul.mubr.msk.bf16.vlgmr.msra.gmra.mxu1 %vm199_vm0, %v1019_v18 }
 0x2cc   : > { %3872 = vmatpush3.bf16.xpose.msra.mxu1 %v1172_v22  ;;  %3875 = vmatprep.mubr.msk.bf16.mxu1 %vm199_vm0, %v1155_v23 }
 0x2cd   : > { %4054 = vmatprep.subr.msk.bf16.mxu1 %vm199_vm0, %v1159_v6 }
 0x2d0   : > { %3866 = vmatpush3.bf16.xpose.msra.mxu0 %v1100_v24 }
 0x2d1   : > { %3879 = vmatprep.subr.bf16.mxu0 %v1442_v30 }
 0x2d4   : > { %3874 = vmatpush3.bf16.xpose.msra.mxu1 %v1169_v25 }
 0x2d7   : > { %3868 = vmatmul.mubr.msk.bf16.vlgmr.msra.gmra.mxu0 %vm199_vm0, %v1088_v27 }
 0x2d8   : > { %3880 = vmatpush3.bf16.msra.mxu0 %v1442_v30 }
 0x2db   : > { %3876 = vmatmul.mubr.msk.bf16.vlgmr.msra.gmra.mxu1 %vm199_vm0, %v1157_v17 }
 0x367   : > { %v4874_v33 = vpop.f32.mrf.mxu0 }
 0x368   : > { %5977 = vst [vmem:[#allocation2_spill] sm:$0xff] %v4874_v33 }
 0x369   : > { %v4876_v35 = vpop.f32.mrf.mxu0 }
 0x36a   : > { %5978 = vst [vmem:[#allocation3_spill] sm:$0xff] %v4876_v35 }
 0x36b   : > { %v4878_v20 = vpop.f32.mrf.mxu1  ;;  %v4880_v37 = vpop.f32.mrf.mxu0 }
 0x36c   : > { %5979 = vst [vmem:[#allocation4_spill] sm:$0xff] %v4878_v20  ;;  %5980 = vst [vmem:[#allocation5_spill] sm:$0xff] %v4880_v37 }
 0x36d   : > { %v4882_v29 = vpop.f32.mrf.mxu1  ;;  %v4884_v26 = vpop.f32.mrf.mxu0 }
 0x36e   : > { %5981 = vst [vmem:[#allocation6_spill] sm:$0xff] %v4882_v29  ;;  %5982 = vst [vmem:[#allocation7_spill] sm:$0xff] %v4884_v26 }
 0x36f   : > { %v4886_v39 = vpop.f32.mrf.mxu1 }
 0x370   : > { %5983 = vst [vmem:[#allocation8_spill] sm:$0xff] %v4886_v39 }
 0x371   : > { %v4890_v0 = vpop.f32.mrf.mxu1 }
 0x372   : > { %5985 = vst [vmem:[#allocation10_spill] sm:$0xff] %v4890_v0 }
 0x377   : > { %v4888_v41 = vpop.f32.mrf.mxu0 }
 0x378   : > { %5984 = vst [vmem:[#allocation9_spill] sm:$0xff] %v4888_v41 }
 0x379   : > { %v4892_v32 = vpop.f32.mrf.mxu0 }
 0x37a   : > { %5986 = vst [vmem:[#allocation11_spill] sm:$0xff] %v4892_v32 }
 0x37b   : > { %v4894_v43 = vpop.f32.mrf.mxu1  ;;  %v4896_v34 = vpop.f32.mrf.mxu0 }
 0x37c   : > { %5987 = vst [vmem:[#allocation12_spill] sm:$0xff] %v4894_v43  ;;  %5988 = vst [vmem:[#allocation13_spill] sm:$0xff] %v4896_v34 }
 0x37d   : > { %v4898_v28 = vpop.f32.mrf.mxu1  ;;  %v4900_v63 = vpop.f32.mrf.mxu0 }
 0x37e   : > { %5989 = vst [vmem:[#allocation14_spill] sm:$0xff] %v4898_v28  ;;  %5990 = vst [vmem:[#allocation15_spill] sm:$0xff] %v4900_v63 }
 0x37f   : > { %v4902_v42 = vpop.f32.mrf.mxu1 }
 0x380   : > { %5991 = vst [vmem:[#allocation16_spill] sm:$0xff] %v4902_v42 }
 0x381   : > { %v4907_v50 = vpop.f32.mrf.mxu1 }
 0x382   : > { %5992 = vst [vmem:[#allocation17_spill] sm:$0xff] %v4907_v50 }
 0x387   : > { %v3853_v46 = vpop.f32.mrf.mxu0 }
 0x388   : > { %v1225_v47 = vmul.f32 0.35355338, %v3853_v46 }
 0x389   : > { %v1001_v40 = vpop.f32.mrf.mxu0 }
 0x38a   : > { %v1223_v14 = vmul.f32 0.35355338, %v1001_v40  ;;  %v4914_v51 = vadd.f32 %v1225_v47, %v175_v9 }
 0x38b   : > { %v3854_v53 = vpop.f32.mrf.mxu0  ;;  %v3861_v54 = vpop.f32.mrf.mxu1 }
 0x38c   : > { %v1229_v56 = vmul.f32 0.35355338, %v3861_v54  ;;  %v1261_v31 = vsel %vm518_vm1, %v4914_v51, -inf  ;;  %v4919_v58 = vadd.f32 %v1223_v14, %v4912_v16  ;;  %v1226_v44 = vmul.f32 0.35355338, %v3854_v53 }
 0x38d   : > { %v1070_v60 = vpop.f32.mrf.mxu1  ;;  %1262 = vmax.xlane.f32.xlu1 %v1261_v31  ;;  %v1004_v36 = vpop.f32.mrf.mxu0 }
 0x38e   : > { %v1227_v10 = vmul.f32 0.35355338, %v1070_v60  ;;  %v1224_v11 = vmul.f32 0.35355338, %v1004_v36  ;;  %v1255_v49 = vsel %vm518_vm1, %v4919_v58, -inf  ;;  %v4928_v57 = vadd.f32 %v1229_v56, %v175_v9 }
 0x38f   : > { %v3862_v3 = vpop.f32.mrf.mxu1  ;;  %1256 = vmax.xlane.f32.xlu0 %v1255_v49  ;;  %v4943_v45 = vadd.f32 %v1226_v44, %v176_v13 }
 0x390   : > { %v1273_v1 = vsel %vm518_vm1, %v4928_v57, -inf  ;;  %v4936_v62 = vadd.f32 %v1227_v10, %v4912_v16  ;;  %v4939_v38 = vadd.f32 %v1224_v11, %v4924_v8  ;;  %v1230_v2 = vmul.f32 0.35355338, %v3862_v3 }
 0x391   : > { %1274 = vmax.xlane.f32.xlu1 %v1273_v1  ;;  %v1073_v52 = vpop.f32.mrf.mxu1  ;;  %v1264_v61 = vsel %vm518_vm1, %v4943_v45, -inf }
 0x392   : > { %v1267_v59 = vsel %vm518_vm1, %v4936_v62, -inf  ;;  %v1258_v15 = vsel %vm518_vm1, %v4939_v38, -inf  ;;  %v1228_v7 = vmul.f32 0.35355338, %v1073_v52  ;;  %v4949_v48 = vadd.f32 %v1230_v2, %v176_v13  ;;  %v5000_v52 = vld [vmem:[%s4546_s15 + $0x10] sm:$0xff]  }
 0x393   : > { %1268 = vmax.xlane.f32.xlu0 %v1267_v59  ;;  %v4995_v59 = vld [vmem:[%s4546_s15] sm:$0xff]  }
 0x394   : > { %v1276_v19 = vsel %vm518_vm1, %v4949_v48, -inf  ;;  %v4956_v6 = vadd.f32 %v1228_v7, %v4924_v8  ;;  %v5015_v7 = vld [vmem:[%s4546_s15 + $0x30] sm:$0xff]  }
 0x395   : > { %1259 = vmax.xlane.f32.xlu1 %v1258_v15  ;;  %v5005_v15 = vld [vmem:[%s4546_s15 + $0x38] sm:$0xff]  }
 0x396   : > { %v1270_v17 = vsel %vm518_vm1, %v4956_v6, -inf }
 0x397   : > { %1265 = vmax.xlane.f32.xlu0 %v1264_v61  ;;  %v3869_v55 = vpop.f32.mrf.mxu0  ;;  %v5020_v61 = vld [vmem:[%s4546_s15 + $0x28] sm:$0xff]  }
 0x398   : > { %v1233_v12 = vmul.f32 0.35355338, %v3869_v55  ;;  %v5025_v55 = vld [vmem:[%s4546_s15 + $0x20] sm:$0xff]  }
 0x399   : > { %v1139_v18 = vpop.f32.mrf.mxu0 }
 0x39a   : > { %v4953_v5 = vadd.f32 %v1233_v12, %v175_v9  ;;  %v1231_v4 = vmul.f32 0.35355338, %v1139_v18 }
 0x39b   : > { %v3877_v21 = vpop.f32.mrf.mxu1  ;;  %1277 = vmax.xlane.f32.xlu0 %v1276_v19  ;;  %v3870_v22 = vpop.f32.mrf.mxu0 }
 0x39c   : > { %v1237_v23 = vmul.f32 0.35355338, %v3877_v21  ;;  %v1234_v24 = vmul.f32 0.35355338, %v3870_v22  ;;  %v1285_v25 = vsel %vm518_vm1, %v4953_v5, -inf  ;;  %v4967_v14 = vadd.f32 %v1231_v4, %v4912_v16 }
 0x39d   : > { %v1208_v27 = vpop.f32.mrf.mxu1  ;;  %1286 = vmax.xlane.f32.xlu1 %v1285_v25  ;;  %v1142_v47 = vpop.f32.mrf.mxu0 }
 0x39e   : > { %v4962_v30 = vadd.f32 %v1237_v23, %v175_v9  ;;  %v4964_v46 = vadd.f32 %v1234_v24, %v176_v13  ;;  %v1235_v53 = vmul.f32 0.35355338, %v1208_v27  ;;  %v1232_v44 = vmul.f32 0.35355338, %v1142_v47 }
 0x39f   : > { %v3878_v40 = vpop.f32.mrf.mxu1  ;;  %1271 = vmax.xlane.f32.xlu0 %v1270_v17  ;;  %v1279_v36 = vsel %vm518_vm1, %v4967_v14, -inf }
 0x3a0   : > { %v1238_v54 = vmul.f32 0.35355338, %v3878_v40  ;;  %v1297_v56 = vsel %vm518_vm1, %v4962_v30, -inf  ;;  %v1288_v31 = vsel %vm518_vm1, %v4964_v46, -inf  ;;  %v4980_v11 = vadd.f32 %v1235_v53, %v4912_v16 }
 0x3a1   : > { %1298 = vmax.xlane.f32.xlu1 %v1297_v56  ;;  %v1211_v60 = vpop.f32.mrf.mxu1  ;;  %v4983_v3 = vadd.f32 %v1232_v44, %v4924_v8 }
 0x3a2   : > { %v4973_v9 = vadd.f32 %v1238_v54, %v176_v13  ;;  %v1236_v49 = vmul.f32 0.35355338, %v1211_v60  ;;  %v1291_v13 = vsel %vm518_vm1, %v4980_v11, -inf }
 0x3a3   : > { %1289 = vmax.xlane.f32.xlu0 %v1288_v31  ;;  %v1282_v1 = vsel %vm518_vm1, %v4983_v3, -inf }
 0x3a4   : > { %v1300_v10 = vsel %vm518_vm1, %v4973_v9, -inf  ;;  %v4990_v16 = vadd.f32 %v1236_v49, %v4924_v8  ;;  %v5010_v8 = vld [vmem:[%s4546_s15 + $0x18] sm:$0xff]  }
 0x3a5   : > { %1280 = vmax.xlane.f32.xlu1 %v1279_v36 }
 0x3a6   : > { %v1294_v2 = vsel %vm518_vm1, %v4990_v16, -inf }
 0x3a7   : > { %1301 = vmax.xlane.f32.xlu0 %v1300_v10 }
 0x3a9   : > { %1292 = vmax.xlane.f32.xlu1 %v1291_v13 }
 0x3ab   : > { %1283 = vmax.xlane.f32.xlu0 %v1282_v1 }
 0x3af   : > { %1295 = vmax.xlane.f32.xlu0 %v1294_v2 }
 0x3ba   : > { %1439 = vrot.lane.b32.xlu1 %v4995_v59, %s4505_s28 }
 0x3be   : > { %1500 = vrot.lane.b32.xlu1 %v5000_v52, %s4505_s28 }
 0x3c2   : > { %1624 = vrot.lane.b32.xlu1 %v5005_v15, %s4505_s28 }
 0x3c5   : > { %1502 = vrot.lane.b32.xlu0 %v5010_v8, %s4505_s28 }
 0x3c6   : > { %1622 = vrot.lane.b32.xlu1 %v5015_v7, %s4505_s28 }
 0x3c9   : > { %1563 = vrot.lane.b32.xlu0 %v5020_v61, %s4505_s28 }
 0x3cd   : > { %1561 = vrot.lane.b32.xlu0 %v5025_v55, %s4505_s28 }
 0x416   : > { %v1263_v12 = vpop.xlane.xlu1 %1262 }
 0x417   : > { %v1305_v18 = vsub.f32 %v4914_v51, %v1263_v12 }
 0x418   : > { %v1257_v19 = vpop.xlane.xlu0 %1256 }
 0x419   : > { %v1323_v4 = vmul.f32 1.442695, %v1305_v18  ;;  %v1303_v21 = vsub.f32 %v4919_v58, %v1257_v19 }
 0x41a   : > { %v1275_v22 = vpop.xlane.xlu1 %1274 }
 0x41b   : > { %4285 = vpow2.f32 %v1323_v4  ;;  %v1309_v23 = vsub.f32 %v4928_v57, %v1275_v22  ;;  %v1319_v25 = vmul.f32 1.442695, %v1303_v21 }
 0x41c   : > { %v1269_v24 = vpop.xlane.xlu0 %1268 }
 0x41d   : > { %v1331_v27 = vmul.f32 1.442695, %v1309_v23  ;;  %v1307_v17 = vsub.f32 %v4936_v62, %v1269_v24 }
 0x41e   : > { %v1260_v47 = vpop.xlane.xlu1 %1259 }
 0x41f   : > { %4287 = vpow2.f32 %v1331_v27  ;;  %v1327_v40 = vmul.f32 1.442695, %v1307_v17  ;;  %v1304_v54 = vsub.f32 %v4939_v38, %v1260_v47 }
 0x420   : > { %v1266_v53 = vpop.xlane.xlu0 %1265  ;;  %4289 = vpow2.f32 %v1319_v25 }
 0x421   : > { %v1306_v51 = vsub.f32 %v4943_v45, %v1266_v53  ;;  %4291 = vpow2.f32 %v1327_v40  ;;  %v1321_v31 = vmul.f32 1.442695, %v1304_v54 }
 0x423   : > { %v1325_v56 = vmul.f32 1.442695, %v1306_v51 }
 0x424   : > { %v1278_v58 = vpop.xlane.xlu0 %1277 }
 0x425   : > { %4293 = vpow2.f32 %v1325_v56  ;;  %v1310_v57 = vsub.f32 %v4949_v48, %v1278_v58 }
 0x426   : > { %v1287_v44 = vpop.xlane.xlu1 %1286 }
 0x427   : > { %v1333_v60 = vmul.f32 1.442695, %v1310_v57  ;;  %v1313_v62 = vsub.f32 %v4953_v5, %v1287_v44 }
 0x428   : > { %v5037_v36 = vpop.eup %4285  ;;  %v1272_v10 = vpop.xlane.xlu0 %1271 }
 0x429   : > { %4295 = vpow2.f32 %v1333_v60  ;;  %v1339_v49 = vmul.f32 1.442695, %v1313_v62  ;;  %v1308_v45 = vsub.f32 %v4956_v6, %v1272_v10  ;;  %v1357_v38 = vsel %vm518_vm1, %v5037_v36, 0.0 }
 0x42a   : > { %4297 = vpow2.f32 %v1321_v31  ;;  %v1299_v13 = vpop.xlane.xlu1 %1298  ;;  %1358 = vadd.xlane.f32.xlu1 %v1357_v38 }
 0x42b   : > { %4299 = vpow2.f32 %v1339_v49  ;;  %v1329_v48 = vmul.f32 1.442695, %v1308_v45  ;;  %v1317_v1 = vsub.f32 %v4962_v30, %v1299_v13 }
 0x42c   : > { %v5043_v2 = vpop.eup %4287  ;;  %v1290_v5 = vpop.xlane.xlu0 %1289 }
 0x42d   : > { %v1347_v12 = vmul.f32 1.442695, %v1317_v1  ;;  %v1314_v18 = vsub.f32 %v4964_v46, %v1290_v5  ;;  %v1369_v19 = vsel %vm518_vm1, %v5043_v2, 0.0  ;;  %v5048_v6 = vpop.eup %4289  ;;  %4301 = vpow2.f32 %v1329_v48 }
 0x42e   : > { %1370 = vadd.xlane.f32.xlu1 %v1369_v19  ;;  %v1281_v4 = vpop.xlane.xlu1 %1280  ;;  %v5051_v30 = vpop.eup %4291  ;;  %v1351_v46 = vsel %vm518_vm1, %v5048_v6, 0.0 }
 0x42f   : > { %4303 = vpow2.f32 %v1347_v12  ;;  %v1341_v21 = vmul.f32 1.442695, %v1314_v18  ;;  %v1311_v22 = vsub.f32 %v4967_v14, %v1281_v4  ;;  %v1363_v54 = vsel %vm518_vm1, %v5051_v30, 0.0 }
 0x430   : > { %v1302_v23 = vpop.xlane.xlu0 %1301 }
 0x431   : > { %v1335_v24 = vmul.f32 1.442695, %v1311_v22  ;;  %v1318_v25 = vsub.f32 %v4973_v9, %v1302_v23  ;;  %4305 = vpow2.f32 %v1341_v21 }
 0x432   : > { %v5056_v27 = vpop.eup %4293  ;;  %v1293_v17 = vpop.xlane.xlu1 %1292  ;;  %1352 = vadd.xlane.f32.xlu1 %v1351_v46 }
 0x433   : > { %4307 = vpow2.f32 %v1335_v24  ;;  %v1349_v47 = vmul.f32 1.442695, %v1318_v25  ;;  %v1315_v40 = vsub.f32 %v4980_v11, %v1293_v17  ;;  %v1360_v14 = vsel %vm518_vm1, %v5056_v27, 0.0 }
 0x434   : > { %1361 = vadd.xlane.f32.xlu0 %v1360_v14  ;;  %v1284_v53 = vpop.xlane.xlu0 %1283  ;;  %v5120_v14 = vld [vmem:[%s4546_s15 + $0x8] sm:$0xff]  }
 0x435   : > { %v1343_v51 = vmul.f32 1.442695, %v1315_v40  ;;  %v1312_v9 = vsub.f32 %v4983_v3, %v1284_v53  ;;  %4309 = vpow2.f32 %v1349_v47 }
 0x436   : > { %v5064_v56 = vpop.eup %4295  ;;  %1364 = vadd.xlane.f32.xlu1 %v1363_v54  ;;  %v1440_v58 = vpop.permute.xlu1 %1439 }
 0x437   : > { %v5066_v57 = vpop.eup %4297  ;;  %4311 = vpow2.f32 %v1343_v51  ;;  %v1337_v11 = vmul.f32 1.442695, %v1312_v9  ;;  %v1372_v31 = vsel %vm518_vm1, %v5064_v56, 0.0  ;;  %3881 = vmatprep.subr.bf16.mxu0 %v1440_v58 }
 0x438   : > { %v5070_v44 = vpop.eup %4299  ;;  %1373 = vadd.xlane.f32.xlu0 %v1372_v31  ;;  %v1296_v3 = vpop.xlane.xlu0 %1295  ;;  %3882 = vmatpush3.bf16.msra.mxu0 %v1440_v58  ;;  %v1354_v38 = vsel %vm518_vm1, %v5066_v57, 0.0 }
 0x439   : > { %v1316_v60 = vsub.f32 %v4990_v16, %v1296_v3  ;;  %v1381_v62 = vsel %vm518_vm1, %v5070_v44, 0.0  ;;  %4313 = vpow2.f32 %v1337_v11 }
 0x43a   : > { %1382 = vadd.xlane.f32.xlu1 %v1381_v62  ;;  %v1501_v10 = vpop.permute.xlu1 %1500  ;;  %v5075_v49 = vpop.eup %4301 }
 0x43b   : > { %v1345_v45 = vmul.f32 1.442695, %v1316_v60  ;;  %v1366_v5 = vsel %vm518_vm1, %v5075_v49, 0.0 }
 0x43c   : > { %v5079_v13 = vpop.eup %4303  ;;  %1355 = vadd.xlane.f32.xlu0 %v1354_v38  ;;  %v1503_v48 = vpop.permute.xlu0 %1502 }
 0x43d   : > { %v1393_v1 = vsel %vm518_vm1, %v5079_v13, 0.0  ;;  %3887 = vmatprep.subr.bf16.mxu1 %v1503_v48  ;;  %4315 = vpow2.f32 %v1345_v45 }
 0x43e   : > { %1394 = vadd.xlane.f32.xlu1 %v1393_v1  ;;  %3888 = vmatpush3.bf16.msra.mxu1 %v1503_v48  ;;  %v5083_v16 = vpop.eup %4305  ;;  %v5089_v18 = vpop.permute.xlu1 %1624 }
 0x43f   : > { %3889 = vmatprep.subr.bf16.mxu1 %v1501_v10  ;;  %v1384_v22 = vsel %vm518_vm1, %v5083_v16, 0.0 }
 0x440   : > { %v5087_v12 = vpop.eup %4307  ;;  %1367 = vadd.xlane.f32.xlu0 %v1366_v5  ;;  %v5091_v19 = vpop.permute.xlu0 %1563 }
 0x441   : > { %v1375_v4 = vsel %vm518_vm1, %v5087_v12, 0.0  ;;  %3895 = vmatprep.subr.bf16.mxu0 %v5091_v19 }
 0x442   : > { %1376 = vadd.xlane.f32.xlu1 %v1375_v4  ;;  %3890 = vmatpush3.bf16.msra.mxu1 %v1501_v10  ;;  %v5096_v21 = vpop.eup %4309  ;;  %v5134_v53 = vpop.permute.xlu1 %1622 }
 0x443   : > { %3903 = vmatprep.subr.bf16.mxu1 %v5089_v18  ;;  %v1396_v25 = vsel %vm518_vm1, %v5096_v21, 0.0 }
 0x444   : > { %v5101_v23 = vpop.eup %4311  ;;  %1385 = vadd.xlane.f32.xlu0 %v1384_v22  ;;  %v1562_v54 = vpop.permute.xlu0 %1561 }
 0x445   : > { %v1387_v24 = vsel %vm518_vm1, %v5101_v23, 0.0 }
 0x446   : > { %1388 = vadd.xlane.f32.xlu1 %v1387_v24  ;;  %v5107_v46 = vpop.eup %4313 }
 0x447   : > { %v1378_v17 = vsel %vm518_vm1, %v5107_v46, 0.0 }
 0x448   : > { %1397 = vadd.xlane.f32.xlu0 %v1396_v25 }
 0x44a   : > { %v5111_v47 = vpop.eup %4315 }
 0x44b   : > { %v1390_v40 = vsel %vm518_vm1, %v5111_v47, 0.0 }
 0x44c   : > { %1379 = vadd.xlane.f32.xlu0 %v1378_v17 }
 0x450   : > { %1391 = vadd.xlane.f32.xlu0 %v1390_v40 }
 0x457   : > { %1758 = vrot.lane.b32.xlu1 %v5010_v8, %s4506_s10 }
 0x45b   : > { %1756 = vrot.lane.b32.xlu1 %v5000_v52, %s4506_s10 }
 0x45f   : > { %1752 = vrot.lane.b32.xlu1 %v5000_v52, %s4507_s13 }
 0x463   : > { %1896 = vrot.lane.b32.xlu1 %v5005_v15, %s4506_s10 }
 0x466   : > { %1689 = vrot.lane.b32.xlu0 %v5120_v14, %s4506_s10 }
 0x467   : > { %1754 = vrot.lane.b32.xlu1 %v5010_v8, %s4507_s13 }
 0x46a   : > { %1687 = vrot.lane.b32.xlu0 %v4995_v59, %s4506_s10 }
 0x46b   : > { %1894 = vrot.lane.b32.xlu1 %v5015_v7, %s4506_s10 }
 0x46e   : > { %1683 = vrot.lane.b32.xlu0 %v4995_v59, %s4507_s13 }
 0x46f   : > { %1890 = vrot.lane.b32.xlu1 %v5015_v7, %s4507_s13 }
 0x472   : > { %1827 = vrot.lane.b32.xlu0 %v5020_v61, %s4506_s10 }
 0x473   : > { %1892 = vrot.lane.b32.xlu1 %v5005_v15, %s4507_s13 }
 0x476   : > { %1685 = vrot.lane.b32.xlu0 %v5120_v14, %s4507_s13 }
 0x477   : > { %2177 = vrot.lane.b32.xlu1 %v5120_v14, %s4508_s14 }
 0x47a   : > { %1825 = vrot.lane.b32.xlu0 %v5025_v55, %s4506_s10 }
 0x47e   : > { %1821 = vrot.lane.b32.xlu0 %v5025_v55, %s4507_s13 }
 0x482   : > { %1823 = vrot.lane.b32.xlu0 %v5020_v61, %s4507_s13 }
 0x4b3   : > { %v1359_v51 = vpop.xlane.xlu1 %1358 }
 0x4b7   : > { %v1371_v9 = vpop.xlane.xlu1 %1370 }
 0x4bb   : > { %v1353_v58 = vpop.xlane.xlu1 %1352 }
 0x4bd   : > { %v1362_v11 = vpop.xlane.xlu0 %1361 }
 0x4be   : > { %4317 = vrcp.f32 %v1362_v11 }
 0x4bf   : > { %v1365_v31 = vpop.xlane.xlu1 %1364  ;;  %4319 = vrcp.f32 %v1353_v58 }
 0x4c0   : > { %4321 = vrcp.f32 %v1359_v51 }
 0x4c1   : > { %v1374_v3 = vpop.xlane.xlu0 %1373 }
 0x4c3   : > { %v1383_v60 = vpop.xlane.xlu1 %1382 }
 0x4c5   : > { %v1356_v62 = vpop.xlane.xlu0 %1355 }
 0x4c6   : > { %4323 = vrcp.f32 %v1356_v62 }
 0x4c7   : > { %4325 = vrcp.f32 %v1374_v3  ;;  %v1395_v10 = vpop.xlane.xlu1 %1394 }
 0x4c8   : > { %4327 = vrcp.f32 %v1365_v31 }
 0x4c9   : > { %4329 = vrcp.f32 %v1371_v9  ;;  %v1368_v45 = vpop.xlane.xlu0 %1367 }
 0x4ca   : > { %4331 = vrcp.f32 %v1368_v45 }
 0x4cb   : > { %v1377_v48 = vpop.xlane.xlu1 %1376  ;;  %v4318_v1 = vpop.eup %4317 }
 0x4cc   : > { %v4320_v5 = vpop.eup %4319  ;;  %v1406_v25 = vmul.f32 %v4318_v1, %v5056_v27 }
 0x4cd   : > { %v1386_v38 = vpop.xlane.xlu0 %1385  ;;  %v4322_v22 = vpop.eup %4321  ;;  %v1400_v40 = vmul.f32 %v4320_v5, %v5048_v6 }
 0x4ce   : > { %4333 = vrcp.f32 %v1386_v38  ;;  %v1404_v31 = vmul.f32 %v4322_v22, %v5037_v36 }
 0x4cf   : > { %4335 = vrcp.f32 %v1377_v48  ;;  %v1389_v58 = vpop.xlane.xlu1 %1388 }
 0x4d0   : > { %4337 = vrcp.f32 %v1383_v60  ;;  %v1432_v38 = vpack.c.bf16 %v1406_v25, %v1404_v31 }
 0x4d1   : > { %v1398_v4 = vpop.xlane.xlu0 %1397 }
 0x4d3   : > { %v4324_v24 = vpop.eup %4323 }
 0x4d4   : > { %v4326_v17 = vpop.eup %4325  ;;  %v1402_v51 = vmul.f32 %v4324_v24, %v5066_v57 }
 0x4d5   : > { %v4328_v9 = vpop.eup %4327  ;;  %v1380_v11 = vpop.xlane.xlu0 %1379  ;;  %v1414_v27 = vmul.f32 %v4326_v17, %v5064_v56 }
 0x4d6   : > { %v4330_v3 = vpop.eup %4329  ;;  %4339 = vrcp.f32 %v1380_v11  ;;  %v1431_v62 = vpack.c.bf16 %v1402_v51, %v1400_v40  ;;  %v1408_v6 = vmul.f32 %v4328_v9, %v5051_v30  ;;  %v1759_v56 = vpop.permute.xlu1 %1758 }
 0x4d7   : > { %v4332_v45 = vpop.eup %4331  ;;  %4341 = vrcp.f32 %v1398_v4  ;;  %v1412_v36 = vmul.f32 %v4330_v3, %v5043_v2 }
 0x4d8   : > { %4343 = vrcp.f32 %v1389_v58  ;;  %3883 = vmatprep.mubr.msk.bf16.mxu0 %vm518_vm1, %v1431_v62  ;;  %v1410_v57 = vmul.f32 %v4332_v45, %v5075_v49 }
 0x4d9   : > { %4345 = vrcp.f32 %v1395_v10  ;;  %3884 = vmatmul.mubr.msk.bf16.vlgmr.msra.gmra.mxu0 %vm518_vm1, %v1432_v38  ;;  %v1392_v60 = vpop.xlane.xlu0 %1391  ;;  %v1434_v1 = vpack.c.bf16 %v1414_v27, %v1412_v36 }
 0x4da   : > { %3896 = vmatpush3.bf16.msra.mxu0 %v5091_v19  ;;  %4347 = vrcp.f32 %v1392_v60  ;;  %v1433_v48 = vpack.c.bf16 %v1410_v57, %v1408_v6  ;;  %v1757_v10 = vpop.permute.xlu1 %1756 }
 0x4db   : > { %3897 = vmatprep.subr.bf16.mxu0 %v1562_v54  ;;  %v4334_v2 = vpop.eup %4333  ;;  %v1767_v6 = vsel %vm199_vm0, %v1757_v10, 0 }
 0x4dc   : > { %3891 = vmatprep.mubr.msk.bf16.mxu1 %vm518_vm1, %v1433_v48  ;;  %v4336_v49 = vpop.eup %4335  ;;  %v1422_v22 = vmul.f32 %v4334_v2, %v5083_v16 }
 0x4dd   : > { %3892 = vmatmul.mubr.msk.bf16.vlgmr.msra.gmra.mxu1 %vm518_vm1, %v1434_v1  ;;  %v1690_v30 = vpop.permute.xlu0 %1689  ;;  %v4338_v5 = vpop.eup %4337 }
 0x4de   : > { %3898 = vmatpush3.bf16.msra.mxu0 %v1562_v54  ;;  %3904 = vmatpush3.bf16.msra.mxu1 %v5089_v18  ;;  %v1416_v54 = vmul.f32 %v4336_v49, %v5087_v12  ;;  %v1420_v17 = vmul.f32 %v4338_v5, %v5070_v44  ;;  %v1753_v16 = vpop.permute.xlu1 %1752 }
 0x4df   : > { %3905 = vmatprep.subr.bf16.mxu1 %v5134_v53  ;;  %4055 = vmatprep.subr.msk.bf16.mxu0 %vm199_vm0, %v1690_v30 }
 0x4e0   : > { %v1436_v11 = vpack.c.bf16 %v1422_v22, %v1420_v17 }
 0x4e1   : > { %v1688_v19 = vpop.permute.xlu0 %1687 }
 0x4e2   : > { %3906 = vmatpush3.bf16.msra.mxu1 %v5134_v53  ;;  %v1701_v53 = vsel %vm199_vm0, %v1690_v30, 0 }
 0x4e3   : > { %v4340_v4 = vpop.eup %4339  ;;  %4057 = vmatprep.subr.msk.bf16.mxu1 %vm199_vm0, %v1759_v56 }
 0x4e4   : > { %v4342_v24 = vpop.eup %4341  ;;  %v1418_v18 = vmul.f32 %v4340_v4, %v5107_v46 }
 0x4e5   : > { %v4344_v25 = vpop.eup %4343  ;;  %v1684_v40 = vpop.permute.xlu0 %1683  ;;  %v1430_v31 = vmul.f32 %v4342_v24, %v5096_v21  ;;  %v1770_v21 = vsel %vm199_vm0, %v1759_v56, 0 }
 0x4e6   : > { %v4346_v51 = vpop.eup %4345  ;;  %v1435_v9 = vpack.c.bf16 %v1418_v18, %v1416_v54  ;;  %v1424_v3 = vmul.f32 %v4344_v25, %v5101_v23  ;;  %v1897_v23 = vpop.permute.xlu1 %1896 }
 0x4e7   : > { %v4348_v58 = vpop.eup %4347  ;;  %v1428_v44 = vmul.f32 %v4346_v51, %v5079_v13  ;;  %v1908_v48 = vsel %vm199_vm0, %v1897_v23, 0 }
 0x4e8   : > { %3899 = vmatprep.mubr.msk.bf16.mxu0 %vm518_vm1, %v1435_v9  ;;  %v1426_v12 = vmul.f32 %v4348_v58, %v5111_v47  ;;  %v1698_v47 = vsel %vm199_vm0, %v1688_v19, 0 }
 0x4e9   : > { %3900 = vmatmul.mubr.msk.bf16.vlgmr.msra.gmra.mxu0 %vm518_vm1, %v1436_v11  ;;  %v1828_v46 = vpop.permute.xlu0 %1827  ;;  %v1438_v45 = vpack.c.bf16 %v1430_v31, %v1428_v44 }
 0x4ea   : > { %3912 = vmatpush3.bf16.xpose.msra.mxu0 %v1701_v53  ;;  %v1437_v62 = vpack.c.bf16 %v1426_v12, %v1424_v3  ;;  %3915 = vmatprep.mubr.msk.bf16.mxu0 %vm199_vm0, %v1684_v40  ;;  %v1755_v38 = vpop.permute.xlu1 %1754  ;;  %v1839_v60 = vsel %vm199_vm0, %v1828_v46, 0 }
 0x4eb   : > { %4056 = vmatprep.subr.msk.bf16.mxu0 %vm199_vm0, %v1688_v19 }
 0x4ec   : > { %3907 = vmatprep.mubr.msk.bf16.mxu1 %vm518_vm1, %v1437_v62 }
 0x4ed   : > { %3908 = vmatmul.mubr.msk.bf16.vlgmr.msra.gmra.mxu1 %vm518_vm1, %v1438_v45  ;;  %v1686_v13 = vpop.permute.xlu0 %1685 }
 0x4ee   : > { %3920 = vmatpush3.bf16.xpose.msra.mxu1 %v1770_v21  ;;  %3923 = vmatprep.mubr.msk.bf16.mxu1 %vm199_vm0, %v1753_v16  ;;  %v1895_v57 = vpop.permute.xlu1 %1894 }
 0x4ef   : > { %4058 = vmatprep.subr.msk.bf16.mxu1 %vm199_vm0, %v1757_v10  ;;  %v1905_v30 = vsel %vm199_vm0, %v1895_v57, 0 }
 0x4f1   : > { %v1826_v27 = vpop.permute.xlu0 %1825 }
 0x4f2   : > { %3914 = vmatpush3.bf16.xpose.msra.mxu0 %v1698_v47  ;;  %v1891_v1 = vpop.permute.xlu1 %1890  ;;  %v1836_v56 = vsel %vm199_vm0, %v1826_v27, 0 }
 0x4f3   : > { %4059 = vmatprep.subr.msk.bf16.mxu0 %vm199_vm0, %v1828_v46 }
 0x4f5   : > { %v1822_v36 = vpop.permute.xlu0 %1821 }
 0x4f6   : > { %3922 = vmatpush3.bf16.xpose.msra.mxu1 %v1767_v6  ;;  %v1893_v49 = vpop.permute.xlu1 %1892 }
 0x4f7   : > { %4061 = vmatprep.subr.msk.bf16.mxu1 %vm199_vm0, %v1897_v23  ;;  %v179_v23 = vld [vmem:[%s5972_s1 + $0x50] sm:$0xff] }
 0x4f9   : > { %3916 = vmatmul.mubr.msk.bf16.vlgmr.msra.gmra.mxu0 %vm199_vm0, %v1686_v13  ;;  %v1824_v2 = vpop.permute.xlu0 %1823 }
 0x4fa   : > { %3928 = vmatpush3.bf16.xpose.msra.mxu0 %v1839_v60  ;;  %3931 = vmatprep.mubr.msk.bf16.mxu0 %vm199_vm0, %v1822_v36  ;;  %v2178_v19 = vpop.permute.xlu1 %2177 }
 0x4fb   : > { %4060 = vmatprep.subr.msk.bf16.mxu0 %vm199_vm0, %v1826_v27 }
 0x4fd   : > { %3924 = vmatmul.mubr.msk.bf16.vlgmr.msra.gmra.mxu1 %vm199_vm0, %v1755_v38  ;;  %v5244_v38 = vld [vmem:[%s5972_s1 + $0x40] sm:$0xff] }
 0x4fe   : > { %3936 = vmatpush3.bf16.xpose.msra.mxu1 %v1908_v48  ;;  %3939 = vmatprep.mubr.msk.bf16.mxu1 %vm199_vm0, %v1891_v1 }
 0x4ff   : > { %4062 = vmatprep.subr.msk.bf16.mxu1 %vm199_vm0, %v1895_v57 }
 0x502   : > { %3930 = vmatpush3.bf16.xpose.msra.mxu0 %v1836_v56 }
 0x503   : > { %3943 = vmatprep.subr.bf16.mxu0 %v2178_v19 }
 0x506   : > { %3938 = vmatpush3.bf16.xpose.msra.mxu1 %v1905_v30 }
 0x509   : > { %3932 = vmatmul.mubr.msk.bf16.vlgmr.msra.gmra.mxu0 %vm199_vm0, %v1824_v2  ;;  %v5256_v2 = vld [vmem:[%s5972_s1 + $0x48] sm:$0xff] }
 0x50a   : > { %3944 = vmatpush3.bf16.msra.mxu0 %v2178_v19 }
 0x50d   : > { %3940 = vmatmul.mubr.msk.bf16.vlgmr.msra.gmra.mxu1 %vm199_vm0, %v1893_v49 }
 0x599   : > { %v5190_v10 = vpop.f32.mrf.mxu0 }
 0x59b   : > { %v5192_v5 = vpop.f32.mrf.mxu0 }
 0x59d   : > { %v5194_v4 = vpop.f32.mrf.mxu0  ;;  %v5196_v22 = vpop.f32.mrf.mxu1 }
 0x59f   : > { %v5200_v54 = vpop.f32.mrf.mxu0  ;;  %v5202_v18 = vpop.f32.mrf.mxu1 }
 0x5a1   : > { %v5206_v17 = vpop.f32.mrf.mxu1 }
 0x5a3   : > { %v5210_v51 = vpop.f32.mrf.mxu1 }
 0x5a9   : > { %v5214_v58 = vpop.f32.mrf.mxu0 }
 0x5ab   : > { %v5216_v11 = vpop.f32.mrf.mxu0 }
 0x5ad   : > { %v5218_v53 = vpop.f32.mrf.mxu0  ;;  %v5220_v31 = vpop.f32.mrf.mxu1 }
 0x5af   : > { %v5224_v3 = vpop.f32.mrf.mxu0  ;;  %v5226_v12 = vpop.f32.mrf.mxu1 }
 0x5b1   : > { %v5230_v46 = vpop.f32.mrf.mxu1 }
 0x5b3   : > { %v5234_v45 = vpop.f32.mrf.mxu1 }
 0x5b9   : > { %v3917_v13 = vpop.f32.mrf.mxu0 }
 0x5ba   : > { %v1961_v47 = vmul.f32 0.35355338, %v3917_v13 }
 0x5bb   : > { %v1737_v27 = vpop.f32.mrf.mxu0 }
 0x5bc   : > { %v5246_v6 = vadd.f32 %v1961_v47, %v179_v23  ;;  %v1959_v57 = vmul.f32 0.35355338, %v1737_v27 }
 0x5bd   : > { %v3918_v60 = vpop.f32.mrf.mxu0  ;;  %v3925_v36 = vpop.f32.mrf.mxu1 }
 0x5be   : > { %v5249_v48 = vadd.f32 %v1959_v57, %v5244_v38  ;;  %v1965_v1 = vmul.f32 0.35355338, %v3925_v36  ;;  %v1997_v56 = vsel %vm518_vm1, %v5246_v6, -inf  ;;  %v1962_v27 = vmul.f32 0.35355338, %v3918_v60  ;;  %v180_v36 = vld [vmem:[%s5972_s1 + $0x58] sm:$0xff] }
 0x5bf   : > { %v1806_v30 = vpop.f32.mrf.mxu1  ;;  %1998 = vmax.xlane.f32.xlu1 %v1997_v56  ;;  %v1740_v49 = vpop.f32.mrf.mxu0 }
 0x5c0   : > { %v5258_v19 = vadd.f32 %v1965_v1, %v179_v23  ;;  %v1963_v13 = vmul.f32 0.35355338, %v1806_v30  ;;  %v1960_v47 = vmul.f32 0.35355338, %v1740_v49  ;;  %v1991_v57 = vsel %vm518_vm1, %v5249_v48, -inf }
 0x5c1   : > { %v3926_v44 = vpop.f32.mrf.mxu1  ;;  %1992 = vmax.xlane.f32.xlu0 %v1991_v57  ;;  %v5275_v30 = vadd.f32 %v1962_v27, %v180_v36 }
 0x5c2   : > { %v5266_v56 = vadd.f32 %v1963_v13, %v5244_v38  ;;  %v5269_v21 = vadd.f32 %v1960_v47, %v5256_v2  ;;  %v2009_v1 = vsel %vm518_vm1, %v5258_v19, -inf  ;;  %v1966_v49 = vmul.f32 0.35355338, %v3926_v44 }
 0x5c3   : > { %2010 = vmax.xlane.f32.xlu1 %v2009_v1  ;;  %v1809_v9 = vpop.f32.mrf.mxu1  ;;  %v2000_v57 = vsel %vm518_vm1, %v5275_v30, -inf }
 0x5c4   : > { %v2003_v60 = vsel %vm518_vm1, %v5266_v56, -inf  ;;  %v1994_v13 = vsel %vm518_vm1, %v5269_v21, -inf  ;;  %v5279_v47 = vadd.f32 %v1966_v49, %v180_v36  ;;  %v1964_v25 = vmul.f32 0.35355338, %v1809_v9 }
 0x5c5   : > { %2004 = vmax.xlane.f32.xlu0 %v2003_v60 }
 0x5c6   : > { %v5286_v44 = vadd.f32 %v1964_v25, %v5256_v2 }
 0x5c7   : > { %1995 = vmax.xlane.f32.xlu1 %v1994_v13  ;;  %v2012_v13 = vsel %vm518_vm1, %v5279_v47, -inf }
 0x5c9   : > { %v3933_v62 = vpop.f32.mrf.mxu0  ;;  %2001 = vmax.xlane.f32.xlu0 %v2000_v57 }
 0x5ca   : > { %v1969_v1 = vmul.f32 0.35355338, %v3933_v62 }
 0x5cb   : > { %v1875_v16 = vpop.f32.mrf.mxu0 }
 0x5cc   : > { %v5283_v40 = vadd.f32 %v1969_v1, %v179_v23  ;;  %v1967_v27 = vmul.f32 0.35355338, %v1875_v16  ;;  %v2006_v16 = vsel %vm518_vm1, %v5286_v44, -inf }
 0x5cd   : > { %v3941_v60 = vpop.f32.mrf.mxu1  ;;  %v3934_v49 = vpop.f32.mrf.mxu0  ;;  %2013 = vmax.xlane.f32.xlu0 %v2012_v13 }
 0x5ce   : > { %v1973_v24 = vmul.f32 0.35355338, %v3941_v60  ;;  %v1970_v9 = vmul.f32 0.35355338, %v3934_v49  ;;  %v2021_v28 = vsel %vm518_vm1, %v5283_v40, -inf  ;;  %v5299_v50 = vadd.f32 %v1967_v27, %v5244_v38 }
 0x5cf   : > { %v1944_v57 = vpop.f32.mrf.mxu1  ;;  %2022 = vmax.xlane.f32.xlu1 %v2021_v28  ;;  %v1878_v60 = vpop.f32.mrf.mxu0 }
 0x5d0   : > { %v5292_v62 = vadd.f32 %v1973_v24, %v179_v23  ;;  %v5294_v1 = vadd.f32 %v1970_v9, %v180_v36  ;;  %v1971_v32 = vmul.f32 0.35355338, %v1944_v57  ;;  %v1968_v23 = vmul.f32 0.35355338, %v1878_v60 }
 0x5d1   : > { %v3942_v25 = vpop.f32.mrf.mxu1  ;;  %2007 = vmax.xlane.f32.xlu0 %v2006_v16  ;;  %v2015_v27 = vsel %vm518_vm1, %v5299_v50, -inf }
 0x5d2   : > { %v1974_v13 = vmul.f32 0.35355338, %v3942_v25  ;;  %v2033_v49 = vsel %vm518_vm1, %v5292_v62, -inf  ;;  %v2024_v28 = vsel %vm518_vm1, %v5294_v1, -inf  ;;  %v5308_v9 = vadd.f32 %v1971_v32, %v5244_v38 }
 0x5d3   : > { %2034 = vmax.xlane.f32.xlu1 %v2033_v49  ;;  %v1947_v63 = vpop.f32.mrf.mxu1  ;;  %v5315_v25 = vadd.f32 %v1968_v23, %v5256_v2 }
 0x5d4   : > { %v5305_v24 = vadd.f32 %v1974_v13, %v180_v36  ;;  %v1972_v16 = vmul.f32 0.35355338, %v1947_v63  ;;  %v2027_v36 = vsel %vm518_vm1, %v5308_v9, -inf }
 0x5d5   : > { %2025 = vmax.xlane.f32.xlu0 %v2024_v28  ;;  %v2018_v38 = vsel %vm518_vm1, %v5315_v25, -inf }
 0x5d6   : > { %v2036_v57 = vsel %vm518_vm1, %v5305_v24, -inf  ;;  %v5320_v32 = vadd.f32 %v1972_v16, %v5256_v2 }
 0x5d7   : > { %2016 = vmax.xlane.f32.xlu1 %v2015_v27 }
 0x5d8   : > { %v2030_v60 = vsel %vm518_vm1, %v5320_v32, -inf }
 0x5d9   : > { %2037 = vmax.xlane.f32.xlu0 %v2036_v57 }
 0x5db   : > { %2028 = vmax.xlane.f32.xlu1 %v2027_v36 }
 0x5dd   : > { %2019 = vmax.xlane.f32.xlu0 %v2018_v38 }
 0x5e1   : > { %2031 = vmax.xlane.f32.xlu0 %v2030_v60 }
 0x5ec   : > { %2175 = vrot.lane.b32.xlu1 %v4995_v59, %s4508_s14 }
 0x5f0   : > { %2236 = vrot.lane.b32.xlu1 %v5000_v52, %s4508_s14 }
 0x5f4   : > { %2360 = vrot.lane.b32.xlu1 %v5005_v15, %s4508_s14 }
 0x5f7   : > { %2238 = vrot.lane.b32.xlu0 %v5010_v8, %s4508_s14 }
 0x5f8   : > { %2358 = vrot.lane.b32.xlu1 %v5015_v7, %s4508_s14 }
 0x5fb   : > { %2299 = vrot.lane.b32.xlu0 %v5020_v61, %s4508_s14 }
 0x5ff   : > { %2297 = vrot.lane.b32.xlu0 %v5025_v55, %s4508_s14  ;;  %s5872_s14 = scalar_lea.vmem %s5973_s2, %s3637_s12 }
 0x648   : > { %v1999_v63 = vpop.xlane.xlu1 %1998 }
 0x649   : > { %v2041_v59 = vsub.f32 %v5246_v6, %v1999_v63 }
 0x64a   : > { %v1993_v52 = vpop.xlane.xlu0 %1992 }
 0x64b   : > { %v2059_v2 = vmul.f32 1.442695, %v2041_v59  ;;  %v2039_v13 = vsub.f32 %v5249_v48, %v1993_v52 }
 0x64c   : > { %v2011_v15 = vpop.xlane.xlu1 %2010 }
 0x64d   : > { %4349 = vpow2.f32 %v2059_v2  ;;  %v2045_v8 = vsub.f32 %v5258_v19, %v2011_v15  ;;  %v2055_v49 = vmul.f32 1.442695, %v2039_v13 }
 0x64e   : > { %v2005_v7 = vpop.xlane.xlu0 %2004 }
 0x64f   : > { %v2067_v28 = vmul.f32 1.442695, %v2045_v8  ;;  %v2043_v23 = vsub.f32 %v5266_v56, %v2005_v7 }
 0x650   : > { %v1996_v55 = vpop.xlane.xlu1 %1995 }
 0x651   : > { %4351 = vpow2.f32 %v2067_v28  ;;  %v2063_v61 = vmul.f32 1.442695, %v2043_v23  ;;  %v2040_v57 = vsub.f32 %v5269_v21, %v1996_v55 }
 0x652   : > { %4353 = vpow2.f32 %v2055_v49  ;;  %v2002_v27 = vpop.xlane.xlu0 %2001 }
 0x653   : > { %v2042_v6 = vsub.f32 %v5275_v30, %v2002_v27  ;;  %4355 = vpow2.f32 %v2063_v61  ;;  %v2057_v56 = vmul.f32 1.442695, %v2040_v57 }
 0x655   : > { %v2061_v16 = vmul.f32 1.442695, %v2042_v6 }
 0x656   : > { %v2014_v48 = vpop.xlane.xlu0 %2013 }
 0x657   : > { %4357 = vpow2.f32 %v2061_v16  ;;  %v2046_v19 = vsub.f32 %v5279_v47, %v2014_v48 }
 0x658   : > { %v2023_v36 = vpop.xlane.xlu1 %2022 }
 0x659   : > { %v2049_v38 = vsub.f32 %v5283_v40, %v2023_v36  ;;  %v2069_v63 = vmul.f32 1.442695, %v2046_v19 }
 0x65a   : > { %v5348_v60 = vpop.eup %4349  ;;  %v2008_v2 = vpop.xlane.xlu0 %2007 }
 0x65b   : > { %v2075_v59 = vmul.f32 1.442695, %v2049_v38  ;;  %v2093_v30 = vsel %vm518_vm1, %v5348_v60, 0.0  ;;  %4359 = vpow2.f32 %v2069_v63  ;;  %v2044_v21 = vsub.f32 %v5286_v44, %v2008_v2 }
 0x65c   : > { %v2035_v52 = vpop.xlane.xlu1 %2034  ;;  %2094 = vadd.xlane.f32.xlu1 %v2093_v30 }
 0x65d   : > { %4361 = vpow2.f32 %v2075_v59  ;;  %v2053_v47 = vsub.f32 %v5292_v62, %v2035_v52  ;;  %v2065_v40 = vmul.f32 1.442695, %v2044_v21 }
 0x65e   : > { %v5354_v13 = vpop.eup %4351  ;;  %4363 = vpow2.f32 %v2057_v56  ;;  %v2026_v8 = vpop.xlane.xlu0 %2025 }
 0x65f   : > { %v2083_v15 = vmul.f32 1.442695, %v2053_v47  ;;  %v2105_v49 = vsel %vm518_vm1, %v5354_v13, 0.0  ;;  %v5358_v28 = vpop.eup %4353  ;;  %v2050_v7 = vsub.f32 %v5294_v1, %v2026_v8 }
 0x660   : > { %2106 = vadd.xlane.f32.xlu1 %v2105_v49  ;;  %v2017_v44 = vpop.xlane.xlu1 %2016  ;;  %v2087_v27 = vsel %vm518_vm1, %v5358_v28, 0.0  ;;  %v5364_v6 = vpop.eup %4355 }
 0x661   : > { %4365 = vpow2.f32 %v2083_v15  ;;  %v2047_v23 = vsub.f32 %v5299_v50, %v2017_v44  ;;  %v2077_v62 = vmul.f32 1.442695, %v2050_v7  ;;  %v2099_v56 = vsel %vm518_vm1, %v5364_v6, 0.0 }
 0x662   : > { %4367 = vpow2.f32 %v2065_v40  ;;  %v2038_v55 = vpop.xlane.xlu0 %2037 }
 0x663   : > { %v2071_v61 = vmul.f32 1.442695, %v2047_v23  ;;  %v2054_v57 = vsub.f32 %v5305_v24, %v2038_v55 }
 0x664   : > { %v2029_v16 = vpop.xlane.xlu1 %2028  ;;  %2088 = vadd.xlane.f32.xlu1 %v2087_v27  ;;  %v5367_v48 = vpop.eup %4357 }
 0x665   : > { %4369 = vpow2.f32 %v2071_v61  ;;  %v2051_v1 = vsub.f32 %v5308_v9, %v2029_v16  ;;  %v2085_v50 = vmul.f32 1.442695, %v2054_v57  ;;  %v2096_v19 = vsel %vm518_vm1, %v5367_v48, 0.0 }
 0x666   : > { %4371 = vpow2.f32 %v2077_v62  ;;  %2097 = vadd.xlane.f32.xlu0 %v2096_v19  ;;  %v2020_v38 = vpop.xlane.xlu0 %2019 }
 0x667   : > { %v2079_v36 = vmul.f32 1.442695, %v2051_v1  ;;  %v2048_v24 = vsub.f32 %v5315_v25, %v2020_v38 }
 0x668   : > { %2100 = vadd.xlane.f32.xlu1 %v2099_v56  ;;  %v2176_v63 = vpop.permute.xlu1 %2175  ;;  %v5375_v59 = vpop.eup %4359 }
 0x669   : > { %4373 = vpow2.f32 %v2079_v36  ;;  %3945 = vmatprep.subr.bf16.mxu0 %v2176_v63  ;;  %v2073_v2 = vmul.f32 1.442695, %v2048_v24  ;;  %v2108_v30 = vsel %vm518_vm1, %v5375_v59, 0.0 }
 0x66a   : > { %v5377_v9 = vpop.eup %4361  ;;  %4375 = vpow2.f32 %v2085_v50  ;;  %3946 = vmatpush3.bf16.msra.mxu0 %v2176_v63  ;;  %2109 = vadd.xlane.f32.xlu0 %v2108_v30  ;;  %v2032_v52 = vpop.xlane.xlu0 %2031  ;;  %v5431_v30 = vld [vmem:[%s4546_s15 + $0x10] sm:$0xff]  }
 0x66b   : > { %v5381_v21 = vpop.eup %4363  ;;  %v2117_v25 = vsel %vm518_vm1, %v5377_v9, 0.0  ;;  %v2052_v47 = vsub.f32 %v5320_v32, %v2032_v52  ;;  %4377 = vpow2.f32 %v2073_v2  ;;  %v5427_v2 = vld [vmem:[%s4546_s15 + $0x18] sm:$0xff]  }
 0x66c   : > { %2118 = vadd.xlane.f32.xlu1 %v2117_v25  ;;  %v2237_v40 = vpop.permute.xlu1 %2236  ;;  %v2090_v49 = vsel %vm518_vm1, %v5381_v21, 0.0  ;;  %v5436_v52 = vld [vmem:[%s4546_s15 + $0x38] sm:$0xff]   ;;  %v5442_v25 = vld [vmem:[%s4546_s15] sm:$0xff]  }
 0x66d   : > { %v2081_v8 = vmul.f32 1.442695, %v2052_v47  ;;  %v5446_v47 = vld [vmem:[%s4546_s15 + $0x30] sm:$0xff]  }
 0x66e   : > { %v5386_v15 = vpop.eup %4365  ;;  %2091 = vadd.xlane.f32.xlu0 %v2090_v49  ;;  %v2239_v23 = vpop.permute.xlu0 %2238 }
 0x66f   : > { %v5390_v7 = vpop.eup %4367  ;;  %v2129_v44 = vsel %vm518_vm1, %v5386_v15, 0.0  ;;  %3951 = vmatprep.subr.bf16.mxu1 %v2239_v23  ;;  %4379 = vpow2.f32 %v2081_v8  ;;  %v5458_v8 = vld [vmem:[%s4546_s15 + $0x20] sm:$0xff]  }
 0x670   : > { %2130 = vadd.xlane.f32.xlu1 %v2129_v44  ;;  %3952 = vmatpush3.bf16.msra.mxu1 %v2239_v23  ;;  %v2102_v62 = vsel %vm518_vm1, %v5390_v7, 0.0  ;;  %v5402_v27 = vpop.permute.xlu1 %2360 }
 0x671   : > { %3953 = vmatprep.subr.bf16.mxu1 %v2237_v40 }
 0x672   : > { %v5394_v32 = vpop.eup %4369  ;;  %2103 = vadd.xlane.f32.xlu0 %v2102_v62  ;;  %v5404_v57 = vpop.permute.xlu0 %2299 }
 0x673   : > { %v5398_v61 = vpop.eup %4371  ;;  %v2111_v55 = vsel %vm518_vm1, %v5394_v32, 0.0  ;;  %3959 = vmatprep.subr.bf16.mxu0 %v5404_v57 }
 0x674   : > { %2112 = vadd.xlane.f32.xlu1 %v2111_v55  ;;  %3954 = vmatpush3.bf16.msra.mxu1 %v2237_v40  ;;  %v2120_v1 = vsel %vm518_vm1, %v5398_v61, 0.0  ;;  %v5452_v40 = vld [vmem:[%s4546_s15 + $0x28] sm:$0xff]   ;;  %v5463_v49 = vpop.permute.xlu1 %2358 }
 0x675   : > { %3967 = vmatprep.subr.bf16.mxu1 %v5402_v27 }
 0x676   : > { %v5407_v16 = vpop.eup %4373  ;;  %2121 = vadd.xlane.f32.xlu0 %v2120_v1  ;;  %v2298_v62 = vpop.permute.xlu0 %2297 }
 0x677   : > { %v5412_v50 = vpop.eup %4375  ;;  %v2123_v19 = vsel %vm518_vm1, %v5407_v16, 0.0 }
 0x678   : > { %2124 = vadd.xlane.f32.xlu1 %v2123_v19  ;;  %v2132_v36 = vsel %vm518_vm1, %v5412_v50, 0.0  ;;  %v5418_v38 = vpop.eup %4377 }
 0x679   : > { %v2114_v56 = vsel %vm518_vm1, %v5418_v38, 0.0 }
 0x67a   : > { %2133 = vadd.xlane.f32.xlu0 %v2132_v36 }
 0x67c   : > { %v5422_v24 = vpop.eup %4379 }
 0x67d   : > { %v2126_v63 = vsel %vm518_vm1, %v5422_v24, 0.0 }
 0x67e   : > { %2115 = vadd.xlane.f32.xlu0 %v2114_v56 }
 0x682   : > { %2127 = vadd.xlane.f32.xlu0 %v2126_v63 }
 0x689   : > { %2494 = vrot.lane.b32.xlu1 %v5427_v2, %s4509_s24 }
 0x68d   : > { %2492 = vrot.lane.b32.xlu1 %v5431_v30, %s4509_s24 }
 0x691   : > { %2488 = vrot.lane.b32.xlu1 %v5431_v30, %s4510_s25 }
 0x695   : > { %2632 = vrot.lane.b32.xlu1 %v5436_v52, %s4509_s24 }
 0x698   : > { %2425 = vrot.lane.b32.xlu0 %v5120_v14, %s4509_s24 }
 0x699   : > { %2490 = vrot.lane.b32.xlu1 %v5427_v2, %s4510_s25 }
 0x69c   : > { %2423 = vrot.lane.b32.xlu0 %v5442_v25, %s4509_s24 }
 0x69d   : > { %2630 = vrot.lane.b32.xlu1 %v5446_v47, %s4509_s24 }
 0x6a0   : > { %2419 = vrot.lane.b32.xlu0 %v5442_v25, %s4510_s25 }
 0x6a1   : > { %2626 = vrot.lane.b32.xlu1 %v5446_v47, %s4510_s25 }
 0x6a4   : > { %2563 = vrot.lane.b32.xlu0 %v5452_v40, %s4509_s24 }
 0x6a5   : > { %2628 = vrot.lane.b32.xlu1 %v5436_v52, %s4510_s25 }
 0x6a8   : > { %2421 = vrot.lane.b32.xlu0 %v5120_v14, %s4510_s25 }
 0x6ac   : > { %2561 = vrot.lane.b32.xlu0 %v5458_v8, %s4509_s24 }
 0x6b0   : > { %2557 = vrot.lane.b32.xlu0 %v5458_v8, %s4510_s25 }
 0x6b4   : > { %2559 = vrot.lane.b32.xlu0 %v5452_v40, %s4510_s25 }
 0x6e5   : > { %v2095_v44 = vpop.xlane.xlu1 %2094 }
 0x6e9   : > { %v2107_v23 = vpop.xlane.xlu1 %2106 }
 0x6ed   : > { %v2089_v55 = vpop.xlane.xlu1 %2088 }
 0x6ef   : > { %v2098_v1 = vpop.xlane.xlu0 %2097 }
 0x6f0   : > { %4381 = vrcp.f32 %v2098_v1 }
 0x6f1   : > { %v2101_v19 = vpop.xlane.xlu1 %2100  ;;  %4383 = vrcp.f32 %v2089_v55 }
 0x6f2   : > { %4385 = vrcp.f32 %v2095_v44 }
 0x6f3   : > { %v2110_v36 = vpop.xlane.xlu0 %2109 }
 0x6f5   : > { %v2119_v56 = vpop.xlane.xlu1 %2118 }
 0x6f7   : > { %v2092_v14 = vpop.xlane.xlu0 %2091 }
 0x6f8   : > { %4387 = vrcp.f32 %v2092_v14 }
 0x6f9   : > { %4389 = vrcp.f32 %v2110_v36  ;;  %v2131_v63 = vpop.xlane.xlu1 %2130 }
 0x6fa   : > { %4391 = vrcp.f32 %v2101_v19 }
 0x6fb   : > { %4393 = vrcp.f32 %v2107_v23  ;;  %v2104_v43 = vpop.xlane.xlu0 %2103 }
 0x6fc   : > { %4395 = vrcp.f32 %v2104_v43 }
 0x6fd   : > { %v2113_v41 = vpop.xlane.xlu1 %2112  ;;  %v4382_v34 = vpop.eup %4381 }
 0x6fe   : > { %v4384_v29 = vpop.eup %4383  ;;  %v2142_v1 = vmul.f32 %v4382_v34, %v5367_v48 }
 0x6ff   : > { %v2122_v42 = vpop.xlane.xlu0 %2121  ;;  %v4386_v35 = vpop.eup %4385  ;;  %v2136_v44 = vmul.f32 %v4384_v29, %v5358_v28 }
 0x700   : > { %4397 = vrcp.f32 %v2122_v42  ;;  %v2140_v14 = vmul.f32 %v4386_v35, %v5348_v60 }
 0x701   : > { %4399 = vrcp.f32 %v2113_v41  ;;  %v2125_v36 = vpop.xlane.xlu1 %2124 }
 0x702   : > { %4401 = vrcp.f32 %v2119_v56  ;;  %v2168_v42 = vpack.c.bf16 %v2142_v1, %v2140_v14 }
 0x703   : > { %v2134_v0 = vpop.xlane.xlu0 %2133 }
 0x705   : > { %v4388_v26 = vpop.eup %4387  ;;  %v2495_v28 = vpop.permute.xlu1 %2494 }
 0x706   : > { %v4390_v55 = vpop.eup %4389  ;;  %v2138_v19 = vmul.f32 %v4388_v26, %v5381_v21  ;;  %v2506_v14 = vsel %vm199_vm0, %v2495_v28, 0 }
 0x707   : > { %v4392_v23 = vpop.eup %4391  ;;  %v2116_v43 = vpop.xlane.xlu0 %2115  ;;  %v2150_v34 = vmul.f32 %v4390_v55, %v5375_v59 }
 0x708   : > { %v4394_v20 = vpop.eup %4393  ;;  %4403 = vrcp.f32 %v2116_v43  ;;  %v2167_v39 = vpack.c.bf16 %v2138_v19, %v2136_v44  ;;  %v2144_v29 = vmul.f32 %v4392_v23, %v5364_v6 }
 0x709   : > { %v4396_v33 = vpop.eup %4395  ;;  %4405 = vrcp.f32 %v2134_v0  ;;  %v2148_v35 = vmul.f32 %v4394_v20, %v5354_v13  ;;  %v2493_v6 = vpop.permute.xlu1 %2492 }
 0x70a   : > { %4407 = vrcp.f32 %v2125_v36  ;;  %3947 = vmatprep.mubr.msk.bf16.mxu0 %vm518_vm1, %v2167_v39  ;;  %v2146_v26 = vmul.f32 %v4396_v33, %v5390_v7 }
 0x70b   : > { %4409 = vrcp.f32 %v2131_v63  ;;  %3948 = vmatmul.mubr.msk.bf16.vlgmr.msra.gmra.mxu0 %vm518_vm1, %v2168_v42  ;;  %v2128_v41 = vpop.xlane.xlu0 %2127  ;;  %v2170_v60 = vpack.c.bf16 %v2150_v34, %v2148_v35 }
 0x70c   : > { %3960 = vmatpush3.bf16.msra.mxu0 %v5404_v57  ;;  %4411 = vrcp.f32 %v2128_v41  ;;  %v2169_v0 = vpack.c.bf16 %v2146_v26, %v2144_v29  ;;  %v2503_v29 = vsel %vm199_vm0, %v2493_v6, 0 }
 0x70d   : > { %3961 = vmatprep.subr.bf16.mxu0 %v2298_v62  ;;  %v4398_v33 = vpop.eup %4397 }
 0x70e   : > { %3955 = vmatprep.mubr.msk.bf16.mxu1 %vm518_vm1, %v2169_v0  ;;  %v4400_v20 = vpop.eup %4399  ;;  %v2158_v21 = vmul.f32 %v4398_v33, %v5398_v61  ;;  %v2489_v61 = vpop.permute.xlu1 %2488 }
 0x70f   : > { %3956 = vmatmul.mubr.msk.bf16.vlgmr.msra.gmra.mxu1 %vm518_vm1, %v2170_v60  ;;  %v2426_v39 = vpop.permute.xlu0 %2425  ;;  %v4402_v48 = vpop.eup %4401  ;;  %v2152_v57 = vmul.f32 %v4400_v20, %v5394_v32 }
 0x710   : > { %3962 = vmatpush3.bf16.msra.mxu0 %v2298_v62  ;;  %3968 = vmatpush3.bf16.msra.mxu1 %v5402_v27  ;;  %v2156_v56 = vmul.f32 %v4402_v48, %v5377_v9  ;;  %v2437_v19 = vsel %vm199_vm0, %v2426_v39, 0 }
 0x711   : > { %3969 = vmatprep.subr.bf16.mxu1 %v5463_v49  ;;  %4063 = vmatprep.subr.msk.bf16.mxu0 %vm199_vm0, %v2426_v39 }
 0x713   : > { %v2424_v13 = vpop.permute.xlu0 %2423 }
 0x714   : > { %3970 = vmatpush3.bf16.msra.mxu1 %v5463_v49  ;;  %v2172_v49 = vpack.c.bf16 %v2158_v21, %v2156_v56 }
 0x715   : > { %v4404_v59 = vpop.eup %4403  ;;  %4065 = vmatprep.subr.msk.bf16.mxu1 %vm199_vm0, %v2495_v28 }
 0x716   : > { %v4406_v7 = vpop.eup %4405  ;;  %v2154_v27 = vmul.f32 %v4404_v59, %v5418_v38 }
 0x717   : > { %v4408_v62 = vpop.eup %4407  ;;  %v2420_v63 = vpop.permute.xlu0 %2419  ;;  %v2166_v23 = vmul.f32 %v4406_v7, %v5412_v50 }
 0x718   : > { %v4410_v1 = vpop.eup %4409  ;;  %v2171_v55 = vpack.c.bf16 %v2154_v27, %v2152_v57  ;;  %v2160_v36 = vmul.f32 %v4408_v62, %v5407_v16  ;;  %v2633_v16 = vpop.permute.xlu1 %2632 }
 0x719   : > { %v4412_v44 = vpop.eup %4411  ;;  %v2164_v9 = vmul.f32 %v4410_v1, %v5386_v15  ;;  %v2644_v0 = vsel %vm199_vm0, %v2633_v16, 0 }
 0x71a   : > { %3963 = vmatprep.mubr.msk.bf16.mxu0 %vm518_vm1, %v2171_v55  ;;  %v2162_v32 = vmul.f32 %v4412_v44, %v5422_v24  ;;  %v2434_v24 = vsel %vm199_vm0, %v2424_v13, 0 }
 0x71b   : > { %3964 = vmatmul.mubr.msk.bf16.vlgmr.msra.gmra.mxu0 %vm518_vm1, %v2172_v49  ;;  %v2564_v38 = vpop.permute.xlu0 %2563  ;;  %v2174_v50 = vpack.c.bf16 %v2166_v23, %v2164_v9 }
 0x71c   : > { %3976 = vmatpush3.bf16.xpose.msra.mxu0 %v2437_v19  ;;  %v2173_v43 = vpack.c.bf16 %v2162_v32, %v2160_v36  ;;  %3979 = vmatprep.mubr.msk.bf16.mxu0 %vm199_vm0, %v2420_v63  ;;  %v2491_v42 = vpop.permute.xlu1 %2490  ;;  %v2575_v41 = vsel %vm199_vm0, %v2564_v38, 0 }
 0x71d   : > { %4064 = vmatprep.subr.msk.bf16.mxu0 %vm199_vm0, %v2424_v13  ;;  %v4492_v13 = vld [vmem:[%s4546_s15 + $0x8] sm:$0xff]  }
 0x71e   : > { %3971 = vmatprep.mubr.msk.bf16.mxu1 %vm518_vm1, %v2173_v43  ;;  %2913 = vrot.lane.b32.xlu1 %v4492_v13, %s4511_s26 }
 0x71f   : > { %3972 = vmatmul.mubr.msk.bf16.vlgmr.msra.gmra.mxu1 %vm518_vm1, %v2174_v50  ;;  %v2422_v15 = vpop.permute.xlu0 %2421 }
 0x720   : > { %3984 = vmatpush3.bf16.xpose.msra.mxu1 %v2506_v14  ;;  %3987 = vmatprep.mubr.msk.bf16.mxu1 %vm199_vm0, %v2489_v61  ;;  %v2631_v26 = vpop.permute.xlu1 %2630 }
 0x721   : > { %4066 = vmatprep.subr.msk.bf16.mxu1 %vm199_vm0, %v2493_v6  ;;  %v2641_v39 = vsel %vm199_vm0, %v2631_v26, 0 }
 0x723   : > { %v2562_v34 = vpop.permute.xlu0 %2561 }
 0x724   : > { %3978 = vmatpush3.bf16.xpose.msra.mxu0 %v2434_v24  ;;  %v2627_v60 = vpop.permute.xlu1 %2626  ;;  %v2572_v28 = vsel %vm199_vm0, %v2562_v34, 0 }
 0x725   : > { %4067 = vmatprep.subr.msk.bf16.mxu0 %vm199_vm0, %v2564_v38 }
 0x727   : > { %v2558_v35 = vpop.permute.xlu0 %2557 }
 0x728   : > { %3986 = vmatpush3.bf16.xpose.msra.mxu1 %v2503_v29  ;;  %v2629_v20 = vpop.permute.xlu1 %2628 }
 0x729   : > { %4069 = vmatprep.subr.msk.bf16.mxu1 %vm199_vm0, %v2633_v16 }
 0x72b   : > { %3980 = vmatmul.mubr.msk.bf16.vlgmr.msra.gmra.mxu0 %vm199_vm0, %v2422_v15  ;;  %v2560_v33 = vpop.permute.xlu0 %2559  ;;  %v183_v15 = vld [vmem:[%s5972_s1 + $0x70] sm:$0xff] }
 0x72c   : > { %3992 = vmatpush3.bf16.xpose.msra.mxu0 %v2575_v41  ;;  %3995 = vmatprep.mubr.msk.bf16.mxu0 %vm199_vm0, %v2558_v35 }
 0x72d   : > { %4068 = vmatprep.subr.msk.bf16.mxu0 %vm199_vm0, %v2562_v34  ;;  %v5573_v34 = vld [vmem:[%s5972_s1 + $0x60] sm:$0xff] }
 0x72f   : > { %3988 = vmatmul.mubr.msk.bf16.vlgmr.msra.gmra.mxu1 %vm199_vm0, %v2491_v42 }
 0x730   : > { %4000 = vmatpush3.bf16.xpose.msra.mxu1 %v2644_v0  ;;  %4003 = vmatprep.mubr.msk.bf16.mxu1 %vm199_vm0, %v2627_v60 }
 0x731   : > { %4070 = vmatprep.subr.msk.bf16.mxu1 %vm199_vm0, %v2631_v26 }
 0x734   : > { %3994 = vmatpush3.bf16.xpose.msra.mxu0 %v2572_v28 }
 0x738   : > { %4002 = vmatpush3.bf16.xpose.msra.mxu1 %v2641_v39 }
 0x73b   : > { %3996 = vmatmul.mubr.msk.bf16.vlgmr.msra.gmra.mxu0 %vm199_vm0, %v2560_v33 }
 0x73f   : > { %4004 = vmatmul.mubr.msk.bf16.vlgmr.msra.gmra.mxu1 %vm199_vm0, %v2629_v20  ;;  %v5585_v20 = vld [vmem:[%s5972_s1 + $0x68] sm:$0xff] }
 0x790   : > { %v2914_v6 = vpop.permute.xlu1 %2913 }
 0x791   : > { %4007 = vmatprep.subr.bf16.mxu0 %v2914_v6 }
 0x792   : > { %4008 = vmatpush3.bf16.msra.mxu0 %v2914_v6 }
 0x7cb   : > { %v5519_v48 = vpop.f32.mrf.mxu0 }
 0x7cd   : > { %v5521_v59 = vpop.f32.mrf.mxu0 }
 0x7cf   : > { %v5523_v21 = vpop.f32.mrf.mxu0  ;;  %v5525_v7 = vpop.f32.mrf.mxu1 }
 0x7d1   : > { %v5529_v27 = vpop.f32.mrf.mxu0  ;;  %v5531_v62 = vpop.f32.mrf.mxu1 }
 0x7d3   : > { %v5535_v63 = vpop.f32.mrf.mxu1 }
 0x7d5   : > { %v5539_v55 = vpop.f32.mrf.mxu1 }
 0x7db   : > { %v5543_v19 = vpop.f32.mrf.mxu0 }
 0x7dd   : > { %v5545_v49 = vpop.f32.mrf.mxu0 }
 0x7de   : > { %5993 = vst [vmem:[#allocation18_spill] sm:$0xff] %v5545_v49 }
 0x7df   : > { %v5547_v23 = vpop.f32.mrf.mxu0  ;;  %v5549_v61 = vpop.f32.mrf.mxu1 }
 0x7e1   : > { %v5553_v32 = vpop.f32.mrf.mxu0  ;;  %v5555_v9 = vpop.f32.mrf.mxu1 }
 0x7e2   : > { %5994 = vst [vmem:[#allocation19_spill] sm:$0xff] %v5555_v9 }
 0x7e3   : > { %v5559_v43 = vpop.f32.mrf.mxu1 }
 0x7e5   : > { %v5563_v50 = vpop.f32.mrf.mxu1 }
 0x7e6   : > { %5995 = vst [vmem:[#allocation20_spill] sm:$0xff] %v5563_v50 }
 0x7eb   : > { %v3981_v24 = vpop.f32.mrf.mxu0 }
 0x7ec   : > { %v2697_v42 = vmul.f32 0.35355338, %v3981_v24 }
 0x7ed   : > { %v2473_v29 = vpop.f32.mrf.mxu0 }
 0x7ee   : > { %v5575_v26 = vadd.f32 %v2697_v42, %v183_v15  ;;  %v2695_v41 = vmul.f32 0.35355338, %v2473_v29 }
 0x7ef   : > { %v3982_v35 = vpop.f32.mrf.mxu0  ;;  %v3989_v0 = vpop.f32.mrf.mxu1 }
 0x7f0   : > { %v5578_v60 = vadd.f32 %v2695_v41, %v5573_v34  ;;  %v2701_v28 = vmul.f32 0.35355338, %v3989_v0  ;;  %v2733_v39 = vsel %vm518_vm1, %v5575_v26, -inf  ;;  %v2698_v29 = vmul.f32 0.35355338, %v3982_v35  ;;  %v184_v0 = vld [vmem:[%s5972_s1 + $0x78] sm:$0xff] }
 0x7f1   : > { %v2542_v33 = vpop.f32.mrf.mxu1  ;;  %2734 = vmax.xlane.f32.xlu1 %v2733_v39  ;;  %v2476_v13 = vpop.f32.mrf.mxu0 }
 0x7f2   : > { %v5587_v6 = vadd.f32 %v2701_v28, %v183_v15  ;;  %v2699_v24 = vmul.f32 0.35355338, %v2542_v33  ;;  %v2696_v42 = vmul.f32 0.35355338, %v2476_v13  ;;  %v2727_v41 = vsel %vm518_vm1, %v5578_v60, -inf }
 0x7f3   : > { %v3990_v38 = vpop.f32.mrf.mxu1  ;;  %2728 = vmax.xlane.f32.xlu0 %v2727_v41  ;;  %v5604_v33 = vadd.f32 %v2698_v29, %v184_v0 }
 0x7f4   : > { %v5595_v39 = vadd.f32 %v2699_v24, %v5573_v34  ;;  %v5598_v16 = vadd.f32 %v2696_v42, %v5585_v20  ;;  %v2745_v28 = vsel %vm518_vm1, %v5587_v6, -inf  ;;  %v2702_v13 = vmul.f32 0.35355338, %v3990_v38 }
 0x7f5   : > { %2746 = vmax.xlane.f32.xlu1 %v2745_v28  ;;  %v2545_v44 = vpop.f32.mrf.mxu1  ;;  %v2736_v41 = vsel %vm518_vm1, %v5604_v33, -inf }
 0x7f6   : > { %v2739_v35 = vsel %vm518_vm1, %v5595_v39, -inf  ;;  %v2730_v24 = vsel %vm518_vm1, %v5598_v16, -inf  ;;  %v5608_v42 = vadd.f32 %v2702_v13, %v184_v0  ;;  %v2700_v56 = vmul.f32 0.35355338, %v2545_v44 }
 0x7f7   : > { %2740 = vmax.xlane.f32.xlu0 %v2739_v35 }
 0x7f8   : > { %v5615_v38 = vadd.f32 %v2700_v56, %v5585_v20 }
 0x7f9   : > { %2731 = vmax.xlane.f32.xlu1 %v2730_v24  ;;  %v2748_v24 = vsel %vm518_vm1, %v5608_v42, -inf }
 0x7fb   : > { %v3997_v14 = vpop.f32.mrf.mxu0  ;;  %2737 = vmax.xlane.f32.xlu0 %v2736_v41 }
 0x7fc   : > { %v2705_v28 = vmul.f32 0.35355338, %v3997_v14 }
 0x7fd   : > { %v2611_v36 = vpop.f32.mrf.mxu0 }
 0x7fe   : > { %v5612_v1 = vadd.f32 %v2705_v28, %v183_v15  ;;  %v2703_v29 = vmul.f32 0.35355338, %v2611_v36  ;;  %v2742_v36 = vsel %vm518_vm1, %v5615_v38, -inf }
 0x7ff   : > { %v4005_v35 = vpop.f32.mrf.mxu1  ;;  %v3998_v13 = vpop.f32.mrf.mxu0  ;;  %2749 = vmax.xlane.f32.xlu0 %v2748_v24 }
 0x800   : > { %v2709_v57 = vmul.f32 0.35355338, %v4005_v35  ;;  %v2706_v44 = vmul.f32 0.35355338, %v3998_v13  ;;  %v2757_v37 = vsel %vm518_vm1, %v5612_v1, -inf  ;;  %v5628_v9 = vadd.f32 %v2703_v29, %v5573_v34 }
 0x801   : > { %v2680_v41 = vpop.f32.mrf.mxu1  ;;  %2758 = vmax.xlane.f32.xlu1 %v2757_v37  ;;  %v2614_v35 = vpop.f32.mrf.mxu0 }
 0x802   : > { %v5621_v14 = vadd.f32 %v2709_v57, %v183_v15  ;;  %v5623_v28 = vadd.f32 %v2706_v44, %v184_v0  ;;  %v2707_v50 = vmul.f32 0.35355338, %v2680_v41  ;;  %v2704_v15 = vmul.f32 0.35355338, %v2614_v35 }
 0x803   : > { %v4006_v56 = vpop.f32.mrf.mxu1  ;;  %2743 = vmax.xlane.f32.xlu0 %v2742_v36  ;;  %v2751_v29 = vsel %vm518_vm1, %v5628_v9, -inf }
 0x804   : > { %v2710_v24 = vmul.f32 0.35355338, %v4006_v56  ;;  %v2769_v13 = vsel %vm518_vm1, %v5621_v14, -inf  ;;  %v2760_v37 = vsel %vm518_vm1, %v5623_v28, -inf  ;;  %v5637_v44 = vadd.f32 %v2707_v50, %v5573_v34 }
 0x805   : > { %2770 = vmax.xlane.f32.xlu1 %v2769_v13  ;;  %v2683_v49 = vpop.f32.mrf.mxu1  ;;  %v5644_v56 = vadd.f32 %v2704_v15, %v5585_v20 }
 0x806   : > { %v5634_v57 = vadd.f32 %v2710_v24, %v184_v0  ;;  %v2708_v36 = vmul.f32 0.35355338, %v2683_v49  ;;  %v2763_v0 = vsel %vm518_vm1, %v5637_v44, -inf }
 0x807   : > { %2761 = vmax.xlane.f32.xlu0 %v2760_v37  ;;  %v2754_v34 = vsel %vm518_vm1, %v5644_v56, -inf }
 0x808   : > { %v2772_v41 = vsel %vm518_vm1, %v5634_v57, -inf  ;;  %v5649_v50 = vadd.f32 %v2708_v36, %v5585_v20 }
 0x809   : > { %2752 = vmax.xlane.f32.xlu1 %v2751_v29 }
 0x80a   : > { %v2766_v35 = vsel %vm518_vm1, %v5649_v50, -inf }
 0x80b   : > { %2773 = vmax.xlane.f32.xlu0 %v2772_v41 }
 0x80d   : > { %2764 = vmax.xlane.f32.xlu1 %v2763_v0 }
 0x80f   : > { %2755 = vmax.xlane.f32.xlu0 %v2754_v34 }
 0x813   : > { %2767 = vmax.xlane.f32.xlu0 %v2766_v35 }
 0x81e   : > { %2911 = vrot.lane.b32.xlu1 %v5442_v25, %s4511_s26 }
 0x822   : > { %2972 = vrot.lane.b32.xlu1 %v5431_v30, %s4511_s26 }
 0x826   : > { %3096 = vrot.lane.b32.xlu1 %v5436_v52, %s4511_s26 }
 0x829   : > { %2974 = vrot.lane.b32.xlu0 %v5427_v2, %s4511_s26 }
 0x82d   : > { %3035 = vrot.lane.b32.xlu0 %v5452_v40, %s4511_s26 }
 0x87a   : > { %v2735_v49 = vpop.xlane.xlu1 %2734 }
 0x87b   : > { %v2777_v20 = vsub.f32 %v5575_v26, %v2735_v49 }
 0x87c   : > { %v2729_v13 = vpop.xlane.xlu0 %2728 }
 0x87d   : > { %v2795_v24 = vmul.f32 1.442695, %v2777_v20  ;;  %v2775_v37 = vsub.f32 %v5578_v60, %v2729_v13 }
 0x87e   : > { %v2747_v25 = vpop.xlane.xlu1 %2746 }
 0x87f   : > { %4413 = vpow2.f32 %v2795_v24  ;;  %v2781_v30 = vsub.f32 %v5587_v6, %v2747_v25  ;;  %v2791_v15 = vmul.f32 1.442695, %v2775_v37 }
 0x880   : > { %v2741_v52 = vpop.xlane.xlu0 %2740 }
 0x881   : > { %v2803_v29 = vmul.f32 1.442695, %v2781_v30  ;;  %v2779_v41 = vsub.f32 %v5595_v39, %v2741_v52 }
 0x882   : > { %v2732_v40 = vpop.xlane.xlu1 %2731 }
 0x883   : > { %4415 = vpow2.f32 %v2803_v29  ;;  %v2799_v2 = vmul.f32 1.442695, %v2779_v41  ;;  %v2776_v0 = vsub.f32 %v5598_v16, %v2732_v40 }
 0x884   : > { %4417 = vpow2.f32 %v2791_v15  ;;  %v2738_v36 = vpop.xlane.xlu0 %2737 }
 0x885   : > { %v2778_v26 = vsub.f32 %v5604_v33, %v2738_v36  ;;  %4419 = vpow2.f32 %v2799_v2  ;;  %v2793_v39 = vmul.f32 1.442695, %v2776_v0 }
 0x887   : > { %v2797_v34 = vmul.f32 1.442695, %v2778_v26 }
 0x888   : > { %v2750_v60 = vpop.xlane.xlu0 %2749 }
 0x889   : > { %4421 = vpow2.f32 %v2797_v34  ;;  %v2782_v6 = vsub.f32 %v5608_v42, %v2750_v60 }
 0x88a   : > { %v2759_v35 = vpop.xlane.xlu1 %2758 }
 0x88b   : > { %v2785_v49 = vsub.f32 %v5612_v1, %v2759_v35  ;;  %v2805_v24 = vmul.f32 1.442695, %v2782_v6 }
 0x88c   : > { %v5673_v20 = vpop.eup %4413  ;;  %v2744_v37 = vpop.xlane.xlu0 %2743 }
 0x88d   : > { %v2811_v13 = vmul.f32 1.442695, %v2785_v49  ;;  %v2829_v33 = vsel %vm518_vm1, %v5673_v20, 0.0  ;;  %4423 = vpow2.f32 %v2805_v24  ;;  %v2780_v16 = vsub.f32 %v5615_v38, %v2744_v37 }
 0x88e   : > { %v2771_v25 = vpop.xlane.xlu1 %2770  ;;  %2830 = vadd.xlane.f32.xlu1 %v2829_v33 }
 0x88f   : > { %4425 = vpow2.f32 %v2811_v13  ;;  %v2789_v42 = vsub.f32 %v5621_v14, %v2771_v25  ;;  %v2801_v1 = vmul.f32 1.442695, %v2780_v16 }
 0x890   : > { %v5679_v30 = vpop.eup %4415  ;;  %4427 = vpow2.f32 %v2793_v39  ;;  %v2762_v29 = vpop.xlane.xlu0 %2761 }
 0x891   : > { %v2819_v15 = vmul.f32 1.442695, %v2789_v42  ;;  %v2841_v52 = vsel %vm518_vm1, %v5679_v30, 0.0  ;;  %v5683_v41 = vpop.eup %4417  ;;  %v2786_v2 = vsub.f32 %v5623_v28, %v2762_v29 }
 0x892   : > { %2842 = vadd.xlane.f32.xlu1 %v2841_v52  ;;  %v2753_v38 = vpop.xlane.xlu1 %2752  ;;  %v2823_v0 = vsel %vm518_vm1, %v5683_v41, 0.0  ;;  %v5689_v34 = vpop.eup %4419 }
 0x893   : > { %4429 = vpow2.f32 %v2819_v15  ;;  %v2783_v40 = vsub.f32 %v5628_v9, %v2753_v38  ;;  %v2813_v14 = vmul.f32 1.442695, %v2786_v2  ;;  %v2835_v13 = vsel %vm518_vm1, %v5689_v34, 0.0 }
 0x894   : > { %4431 = vpow2.f32 %v2801_v1  ;;  %v2774_v26 = vpop.xlane.xlu0 %2773 }
 0x895   : > { %v2807_v36 = vmul.f32 1.442695, %v2783_v40  ;;  %v2790_v60 = vsub.f32 %v5634_v57, %v2774_v26 }
 0x896   : > { %v2765_v6 = vpop.xlane.xlu1 %2764  ;;  %2824 = vadd.xlane.f32.xlu1 %v2823_v0  ;;  %v5692_v35 = vpop.eup %4421 }
 0x897   : > { %4433 = vpow2.f32 %v2807_v36  ;;  %v2787_v28 = vsub.f32 %v5637_v44, %v2765_v6  ;;  %v2821_v9 = vmul.f32 1.442695, %v2790_v60  ;;  %v2832_v49 = vsel %vm518_vm1, %v5692_v35, 0.0 }
 0x898   : > { %4435 = vpow2.f32 %v2813_v14  ;;  %2833 = vadd.xlane.f32.xlu0 %v2832_v49  ;;  %v2756_v24 = vpop.xlane.xlu0 %2755 }
 0x899   : > { %v2815_v39 = vmul.f32 1.442695, %v2787_v28  ;;  %v2784_v57 = vsub.f32 %v5644_v56, %v2756_v24 }
 0x89a   : > { %2836 = vadd.xlane.f32.xlu1 %v2835_v13  ;;  %v2912_v37 = vpop.permute.xlu1 %2911  ;;  %v5700_v33 = vpop.eup %4423 }
 0x89b   : > { %4437 = vpow2.f32 %v2815_v39  ;;  %4009 = vmatprep.subr.bf16.mxu0 %v2912_v37  ;;  %v2809_v16 = vmul.f32 1.442695, %v2784_v57  ;;  %v2844_v25 = vsel %vm518_vm1, %v5700_v33, 0.0 }
 0x89c   : > { %v5702_v44 = vpop.eup %4425  ;;  %4439 = vpow2.f32 %v2821_v9  ;;  %4010 = vmatpush3.bf16.msra.mxu0 %v2912_v37  ;;  %2845 = vadd.xlane.f32.xlu0 %v2844_v25  ;;  %v2768_v1 = vpop.xlane.xlu0 %2767 }
 0x89d   : > { %v5706_v42 = vpop.eup %4427  ;;  %v2853_v56 = vsel %vm518_vm1, %v5702_v44, 0.0  ;;  %v2788_v15 = vsub.f32 %v5649_v50, %v2768_v1  ;;  %4441 = vpow2.f32 %v2809_v16  ;;  %v5996_v1 = vpack.i.bf16 %v5194_v4, %v5190_v10 }
 0x89e   : > { %2854 = vadd.xlane.f32.xlu1 %v2853_v56  ;;  %v2973_v29 = vpop.permute.xlu1 %2972  ;;  %v2826_v38 = vsel %vm518_vm1, %v5706_v42, 0.0  ;;  %v5997_v56 = vpack.i.bf16 %v5206_v17, %v5196_v22  ;;  %v6001_v10 = vpack.i.bf16 %v5523_v21, %v5519_v48  ;;  %v6002_v4 = vpack.i.bf16 %v5210_v51, %v5202_v18 }
 0x89f   : > { %v2817_v2 = vmul.f32 1.442695, %v2788_v15  ;;  %v5998_v15 = vpack.i.bf16 %v5218_v53, %v5214_v58  ;;  %v6003_v22 = vpack.i.bf16 %v5535_v63, %v5525_v7  ;;  %v6004_v17 = vpack.i.bf16 %v5224_v3, %v5216_v11  ;;  %v6010_v11 = vld [vmem:[#allocation18_spill] sm:$0xff]  ;;  %v6013_v3 = vld [vmem:[#allocation19_spill] sm:$0xff] }
 0x8a0   : > { %v5711_v52 = vpop.eup %4429  ;;  %2827 = vadd.xlane.f32.xlu0 %v2826_v38  ;;  %v2975_v36 = vpop.permute.xlu0 %2974  ;;  %v6007_v18 = vpack.i.bf16 %v5559_v43, %v5549_v61  ;;  %v6008_v51 = vpack.i.bf16 %v5529_v27, %v5521_v59  ;;  %v6009_v58 = vpack.i.bf16 %v5539_v55, %v5531_v62  ;;  %v6011_v53 = vpack.i.bf16 %v5553_v32, %v6010_v11 }
 0x8a1   : > { %v5715_v40 = vpop.eup %4431  ;;  %v2865_v14 = vsel %vm518_vm1, %v5711_v52, 0.0  ;;  %4015 = vmatprep.subr.bf16.mxu1 %v2975_v36  ;;  %4443 = vpow2.f32 %v2817_v2 }
 0x8a2   : > { %2866 = vadd.xlane.f32.xlu1 %v2865_v14  ;;  %4016 = vmatpush3.bf16.msra.mxu1 %v2975_v36  ;;  %v2838_v26 = vsel %vm518_vm1, %v5715_v40, 0.0  ;;  %v5727_v6 = vpop.permute.xlu1 %3096 }
 0x8a3   : > { %4017 = vmatprep.subr.bf16.mxu1 %v2973_v29 }
 0x8a4   : > { %v5719_v50 = vpop.eup %4433  ;;  %2839 = vadd.xlane.f32.xlu0 %v2838_v26  ;;  %v5729_v28 = vpop.permute.xlu0 %3035 }
 0x8a5   : > { %v5723_v0 = vpop.eup %4435  ;;  %v2847_v60 = vsel %vm518_vm1, %v5719_v50, 0.0  ;;  %4023 = vmatprep.subr.bf16.mxu0 %v5729_v28 }
 0x8a6   : > { %2848 = vadd.xlane.f32.xlu1 %v2847_v60  ;;  %4018 = vmatpush3.bf16.msra.mxu1 %v2973_v29  ;;  %v2856_v49 = vsel %vm518_vm1, %v5723_v0, 0.0  ;;  %v5999_v29 = vpack.i.bf16 %v5230_v46, %v5220_v31  ;;  %v6012_v31 = vld [vmem:[#allocation20_spill] sm:$0xff] }
 0x8a7   : > { %4031 = vmatprep.subr.bf16.mxu1 %v5727_v6 }
 0x8a8   : > { %v5732_v9 = vpop.eup %4437  ;;  %2857 = vadd.xlane.f32.xlu0 %v2856_v49 }
 0x8a9   : > { %v5737_v39 = vpop.eup %4439  ;;  %v2859_v24 = vsel %vm518_vm1, %v5732_v9, 0.0 }
 0x8aa   : > { %2860 = vadd.xlane.f32.xlu1 %v2859_v24  ;;  %v2868_v13 = vsel %vm518_vm1, %v5737_v39, 0.0  ;;  %v5743_v57 = vpop.eup %4441 }
 0x8ab   : > { %v2850_v37 = vsel %vm518_vm1, %v5743_v57, 0.0 }
 0x8ac   : > { %2869 = vadd.xlane.f32.xlu0 %v2868_v13 }
 0x8ae   : > { %v5747_v16 = vpop.eup %4443 }
 0x8af   : > { %v2862_v25 = vsel %vm518_vm1, %v5747_v16, 0.0 }
 0x8b0   : > { %2851 = vadd.xlane.f32.xlu0 %v2850_v37 }
 0x8b4   : > { %2863 = vadd.xlane.f32.xlu0 %v2862_v25 }
 0x8bb   : > { %3094 = vrot.lane.b32.xlu1 %v5446_v47, %s4511_s26  ;;  %v6000_v47 = vpack.i.bf16 %v5200_v54, %v5192_v5  ;;  %v6005_v5 = vpack.i.bf16 %v5547_v23, %v5543_v19  ;;  %v6006_v54 = vpack.i.bf16 %v5234_v45, %v5226_v12  ;;  %v6014_v12 = vpack.i.bf16 %v6012_v31, %v6013_v3 }
 0x8bf   : > { %4099 = vrot.lane.b32.xlu1 %v5996_v1, %s4512_s6 }
 0x8c3   : > { %4109 = vrot.lane.b32.xlu1 %v5997_v56, %s4512_s6 }
 0x8c7   : > { %4119 = vrot.lane.b32.xlu1 %v5998_v15, %s4512_s6 }
 0x8ca   : > { %3033 = vrot.lane.b32.xlu0 %v5458_v8, %s4511_s26 }
 0x8cb   : > { %4129 = vrot.lane.b32.xlu1 %v5999_v29, %s4512_s6 }
 0x8ce   : > { %4094 = vrot.lane.b32.xlu0 %v6000_v47, %s4512_s6 }
 0x8cf   : > { %4139 = vrot.lane.b32.xlu1 %v6001_v10, %s4513_s7 }
 0x8d2   : > { %4104 = vrot.lane.b32.xlu0 %v6002_v4, %s4512_s6 }
 0x8d3   : > { %4149 = vrot.lane.b32.xlu1 %v6003_v22, %s4513_s7 }
 0x8d6   : > { %4114 = vrot.lane.b32.xlu0 %v6004_v17, %s4512_s6 }
 0x8d7   : > { %4159 = vrot.lane.b32.xlu1 %v6005_v5, %s4513_s7 }
 0x8da   : > { %4124 = vrot.lane.b32.xlu0 %v6006_v54, %s4512_s6 }
 0x8db   : > { %4169 = vrot.lane.b32.xlu1 %v6007_v18, %s4513_s7 }
 0x8de   : > { %4134 = vrot.lane.b32.xlu0 %v6008_v51, %s4513_s7 }
 0x8e2   : > { %4144 = vrot.lane.b32.xlu0 %v6009_v58, %s4513_s7 }
 0x8e6   : > { %4154 = vrot.lane.b32.xlu0 %v6011_v53, %s4513_s7 }
 0x8ea   : > { %4164 = vrot.lane.b32.xlu0 %v6014_v12, %s4513_s7 }
 0x917   : > { %v2831_v46 = vpop.xlane.xlu1 %2830 }
 0x91b   : > { %v2843_v45 = vpop.xlane.xlu1 %2842 }
 0x91f   : > { %v2825_v8 = vpop.xlane.xlu1 %2824 }
 0x921   : > { %v2834_v48 = vpop.xlane.xlu0 %2833 }
 0x922   : > { %4445 = vrcp.f32 %v2834_v48 }
 0x923   : > { %v2837_v21 = vpop.xlane.xlu1 %2836  ;;  %4447 = vrcp.f32 %v2825_v8 }
 0x924   : > { %4449 = vrcp.f32 %v2831_v46 }
 0x925   : > { %v2846_v7 = vpop.xlane.xlu0 %2845 }
 0x927   : > { %v2855_v59 = vpop.xlane.xlu1 %2854 }
 0x929   : > { %v2828_v27 = vpop.xlane.xlu0 %2827 }
 0x92a   : > { %4451 = vrcp.f32 %v2828_v27 }
 0x92b   : > { %4453 = vrcp.f32 %v2846_v7  ;;  %v2867_v62 = vpop.xlane.xlu1 %2866 }
 0x92c   : > { %4455 = vrcp.f32 %v2837_v21 }
 0x92d   : > { %4457 = vrcp.f32 %v2843_v45  ;;  %v2840_v63 = vpop.xlane.xlu0 %2839 }
 0x92e   : > { %4459 = vrcp.f32 %v2840_v63 }
 0x92f   : > { %v2849_v19 = vpop.xlane.xlu1 %2848  ;;  %v4446_v23 = vpop.eup %4445 }
 0x930   : > { %v4448_v61 = vpop.eup %4447  ;;  %v2878_v38 = vmul.f32 %v4446_v23, %v5692_v35 }
 0x931   : > { %v2858_v55 = vpop.xlane.xlu0 %2857  ;;  %v4450_v43 = vpop.eup %4449  ;;  %v2872_v36 = vmul.f32 %v4448_v61, %v5683_v41 }
 0x932   : > { %4461 = vrcp.f32 %v2858_v55  ;;  %v2876_v13 = vmul.f32 %v4450_v43, %v5673_v20 }
 0x933   : > { %4463 = vrcp.f32 %v2849_v19  ;;  %v2861_v49 = vpop.xlane.xlu1 %2860 }
 0x934   : > { %4465 = vrcp.f32 %v2855_v59  ;;  %v2904_v56 = vpack.c.bf16 %v2878_v38, %v2876_v13 }
 0x935   : > { %v2870_v32 = vpop.xlane.xlu0 %2869 }
 0x937   : > { %v4452_v2 = vpop.eup %4451  ;;  %v3095_v10 = vpop.permute.xlu1 %3094 }
 0x938   : > { %v4454_v14 = vpop.eup %4453  ;;  %v2874_v26 = vmul.f32 %v4452_v2, %v5706_v42 }
 0x939   : > { %v4456_v60 = vpop.eup %4455  ;;  %v2852_v24 = vpop.xlane.xlu0 %2851  ;;  %v2886_v35 = vmul.f32 %v4454_v14, %v5700_v33 }
 0x93a   : > { %v4458_v37 = vpop.eup %4457  ;;  %4467 = vrcp.f32 %v2852_v24  ;;  %v2903_v25 = vpack.c.bf16 %v2874_v26, %v2872_v36  ;;  %v2880_v41 = vmul.f32 %v4456_v60, %v5689_v34 }
 0x93b   : > { %v4460_v1 = vpop.eup %4459  ;;  %4469 = vrcp.f32 %v2870_v32  ;;  %v2884_v20 = vmul.f32 %v4458_v37, %v5679_v30  ;;  %v4100_v14 = vpop.permute.xlu1 %4099 }
 0x93c   : > { %4471 = vrcp.f32 %v2861_v49  ;;  %4011 = vmatprep.mubr.msk.bf16.mxu0 %vm518_vm1, %v2903_v25  ;;  %v2882_v42 = vmul.f32 %v4460_v1, %v5715_v40 }
 0x93d   : > { %4473 = vrcp.f32 %v2867_v62  ;;  %4012 = vmatmul.mubr.msk.bf16.vlgmr.msra.gmra.mxu0 %vm518_vm1, %v2904_v56  ;;  %v2864_v15 = vpop.xlane.xlu0 %2863  ;;  %v2906_v47 = vpack.c.bf16 %v2886_v35, %v2884_v20  ;;  %v4101_v20 = vunpack.i.l.bf16 %v4100_v14 }
 0x93e   : > { %4024 = vmatpush3.bf16.msra.mxu0 %v5729_v28  ;;  %4475 = vrcp.f32 %v2864_v15  ;;  %v2905_v29 = vpack.c.bf16 %v2882_v42, %v2880_v41  ;;  %v4102_v15 = vunpack.i.h.bf16 %v4100_v14 }
 0x93f   : > { %v4462_v34 = vpop.eup %4461  ;;  %v4110_v26 = vpop.permute.xlu1 %4109 }
 0x940   : > { %4019 = vmatprep.mubr.msk.bf16.mxu1 %vm518_vm1, %v2905_v29  ;;  %v4464_v40 = vpop.eup %4463  ;;  %v2894_v28 = vmul.f32 %v4462_v34, %v5723_v0  ;;  %v4112_v29 = vunpack.i.h.bf16 %v4110_v26 }
 0x941   : > { %4020 = vmatmul.mubr.msk.bf16.vlgmr.msra.gmra.mxu1 %vm518_vm1, %v2906_v47  ;;  %v3034_v33 = vpop.permute.xlu0 %3033  ;;  %v4466_v4 = vpop.eup %4465  ;;  %v2888_v17 = vmul.f32 %v4464_v40, %v5719_v50  ;;  %v4111_v47 = vunpack.i.l.bf16 %v4110_v26 }
 0x942   : > { %4032 = vmatpush3.bf16.msra.mxu1 %v5727_v6  ;;  %4025 = vmatprep.subr.bf16.mxu0 %v3034_v33  ;;  %v2892_v18 = vmul.f32 %v4466_v4, %v5702_v44 }
 0x943   : > { %4026 = vmatpush3.bf16.msra.mxu0 %v3034_v33  ;;  %4033 = vmatprep.subr.bf16.mxu1 %v3095_v10  ;;  %v5829_v49 = vpop.permute.xlu1 %4119 }
 0x944   : > { %v2908_v11 = vpack.c.bf16 %v2894_v28, %v2892_v18 }
 0x945   : > { %v4095_v36 = vpop.permute.xlu0 %4094 }
 0x946   : > { %4034 = vmatpush3.bf16.msra.mxu1 %v3095_v10  ;;  %v4097_v33 = vunpack.i.h.bf16 %v4095_v36  ;;  %v4096_v10 = vunpack.i.l.bf16 %v4095_v36 }
 0x947   : > { %v4468_v30 = vpop.eup %4467  ;;  %v5833_v13 = vpop.permute.xlu1 %4129 }
 0x948   : > { %v4470_v22 = vpop.eup %4469  ;;  %v2890_v5 = vmul.f32 %v4468_v30, %v5743_v57 }
 0x949   : > { %v4472_v54 = vpop.eup %4471  ;;  %v2902_v53 = vmul.f32 %v4470_v22, %v5737_v39  ;;  %v4105_v60 = vpop.permute.xlu0 %4104  ;;  %v6015_v22 = vld [vmem:[#allocation5_spill] sm:$0xff] }
 0x94a   : > { %v4474_v51 = vpop.eup %4473  ;;  %v2907_v6 = vpack.c.bf16 %v2890_v5, %v2888_v17  ;;  %v2896_v31 = vmul.f32 %v4472_v54, %v5732_v9  ;;  %v4107_v34 = vunpack.i.h.bf16 %v4105_v60  ;;  %v4106_v40 = vunpack.i.l.bf16 %v4105_v60  ;;  %v6016_v5 = vld [vmem:[#allocation2_spill] sm:$0xff] }
 0x94b   : > { %v4476_v58 = vpop.eup %4475  ;;  %v2900_v50 = vmul.f32 %v4474_v51, %v5711_v52  ;;  %v4140_v25 = vpop.permute.xlu1 %4139  ;;  %v3350_v17 = vsel %vm199_vm0, %v6015_v22, %v4102_v15  ;;  %v3349_v54 = vsel %vm199_vm0, %v6016_v5, %v4101_v20  ;;  %v4122_v5 = vunpack.i.h.bf16 %v5829_v49 }
 0x94c   : > { %4027 = vmatprep.mubr.msk.bf16.mxu0 %vm518_vm1, %v2907_v6  ;;  %v2898_v0 = vmul.f32 %v4476_v58, %v5747_v16  ;;  %v4141_v4 = vunpack.i.l.bf16 %v4140_v25  ;;  %v4142_v28 = vunpack.i.h.bf16 %v4140_v25  ;;  %v6017_v58 = vld [vmem:[#allocation8_spill] sm:$0xff] }
 0x94d   : > { %4028 = vmatmul.mubr.msk.bf16.vlgmr.msra.gmra.mxu0 %vm518_vm1, %v2908_v11  ;;  %v2910_v3 = vpack.c.bf16 %v2902_v53, %v2900_v50  ;;  %v5831_v24 = vpop.permute.xlu0 %4114  ;;  %v3354_v11 = vsel %vm199_vm0, %v6017_v58, %v4112_v29  ;;  %v6018_v53 = vld [vmem:[#allocation4_spill] sm:$0xff] }
 0x94e   : > { %v2909_v57 = vpack.c.bf16 %v2898_v0, %v2896_v31  ;;  %v3353_v31 = vsel %vm199_vm0, %v6018_v53, %v4111_v47  ;;  %v6019_v0 = vld [vmem:[#allocation7_spill] sm:$0xff]  ;;  %v4117_v58 = vunpack.i.h.bf16 %v5831_v24 }
 0x94f   : > { %v4150_v56 = vpop.permute.xlu1 %4149  ;;  %v3348_v50 = vsel %vm199_vm0, %v6019_v0, %v4097_v33 }
 0x950   : > { %4035 = vmatprep.mubr.msk.bf16.mxu1 %vm518_vm1, %v2909_v57  ;;  %v6020_v57 = vld [vmem:[#allocation3_spill] sm:$0xff] }
 0x951   : > { %4036 = vmatmul.mubr.msk.bf16.vlgmr.msra.gmra.mxu1 %vm518_vm1, %v2910_v3  ;;  %v5835_v37 = vpop.permute.xlu0 %4124  ;;  %v3347_v3 = vsel %vm199_vm0, %v6020_v57, %v4096_v10  ;;  %v6023_v57 = vld [vmem:[#allocation13_spill] sm:$0xff] }
 0x952   : > { %v4127_v53 = vunpack.i.h.bf16 %v5835_v37 }
 0x953   : > { %v5839_v41 = vpop.permute.xlu1 %4159 }
 0x954   : > { %v4162_v0 = vunpack.i.h.bf16 %v5839_v41 }
 0x955   : > { %v4135_v1 = vpop.permute.xlu0 %4134 }
 0x956   : > { %v4137_v18 = vunpack.i.h.bf16 %v4135_v1  ;;  %v4136_v51 = vunpack.i.l.bf16 %v4135_v1 }
 0x957   : > { %v5843_v30 = vpop.permute.xlu1 %4169 }
 0x959   : > { %v5837_v35 = vpop.permute.xlu0 %4144 }
 0x95d   : > { %v5841_v42 = vpop.permute.xlu0 %4154 }
 0x961   : > { %v5849_v6 = vpop.permute.xlu0 %4164 }
 0x9fd   : > { %v4013_v44 = vpop.f32.mrf.mxu0 }
 0x9ff   : > { %v2957_v12 = vpop.f32.mrf.mxu0 }
 0xa01   : > { %v4014_v46 = vpop.f32.mrf.mxu0  ;;  %v4021_v39 = vpop.f32.mrf.mxu1 }
 0xa02   : > { %v4173_v45 = vpack.i.bf16 %v4014_v46, %v4013_v44  ;;  %v6021_v44 = vld [vmem:[#allocation10_spill] sm:$0xff] }
 0xa03   : > { %v2960_v8 = vpop.f32.mrf.mxu0  ;;  %v3018_v48 = vpop.f32.mrf.mxu1  ;;  %v6022_v46 = vld [vmem:[#allocation6_spill] sm:$0xff] }
 0xa04   : > { %v4183_v9 = vpack.i.bf16 %v2960_v8, %v2957_v12  ;;  %4174 = vrot.lane.b32.xlu1 %v4173_v45, %s4514_s8  ;;  %v3352_v12 = vsel %vm199_vm0, %v6021_v44, %v4107_v34  ;;  %v3366_v45 = vsel %vm3363_vm2, %v3349_v54, %v4141_v4  ;;  %v4121_v54 = vunpack.i.l.bf16 %v5829_v49 }
 0xa05   : > { %v4022_v16 = vpop.f32.mrf.mxu1  ;;  %v4161_v49 = vunpack.i.l.bf16 %v5839_v41  ;;  %v6028_v41 = vld [vmem:[#allocation11_spill] sm:$0xff] }
 0xa06   : > { %v4178_v21 = vpack.i.bf16 %v4022_v16, %v4021_v39  ;;  %4184 = vrot.lane.b32.xlu0 %v4183_v9, %s4514_s8  ;;  %v3351_v39 = vsel %vm199_vm0, %v6022_v46, %v4106_v40  ;;  %v4152_v9 = vunpack.i.h.bf16 %v4150_v56  ;;  %v6026_v46 = vld [vmem:[#allocation12_spill] sm:$0xff] }
 0xa07   : > { %v3021_v52 = vpop.f32.mrf.mxu1 }
 0xa08   : > { %v4188_v7 = vpack.i.bf16 %v3021_v52, %v3018_v48  ;;  %4179 = vrot.lane.b32.xlu1 %v4178_v21, %s4514_s8  ;;  %v3367_v48 = vsel %vm3363_vm2, %v3350_v17, %v4142_v28  ;;  %v4151_v52 = vunpack.i.l.bf16 %v4150_v56  ;;  %v3371_v25 = vsel %vm3363_vm2, %v3354_v11, %v4152_v9  ;;  %v6029_v9 = vld [vmem:[#allocation17_spill] sm:$0xff] }
 0xa09   : > { %v4116_v11 = vunpack.i.l.bf16 %v5831_v24  ;;  %v6024_v24 = vld [vmem:[#allocation9_spill] sm:$0xff] }
 0xa0a   : > { %4189 = vrot.lane.b32.xlu0 %v4188_v7, %s4514_s8  ;;  %v3364_v7 = vsel %vm3363_vm2, %v3347_v3, %v4136_v51  ;;  %v3370_v60 = vsel %vm3363_vm2, %v3353_v31, %v4151_v52  ;;  %v4131_v51 = vunpack.i.l.bf16 %v5833_v13  ;;  %v4126_v31 = vunpack.i.l.bf16 %v5835_v37 }
 0xa0b   : > { %v3358_v3 = vsel %vm199_vm0, %v6023_v57, %v4122_v5  ;;  %v3357_v44 = vsel %vm199_vm0, %v6024_v24, %v4121_v54 }
 0xa0d   : > { %v4029_v59 = vpop.f32.mrf.mxu0 }
 0xa0f   : > { %v3079_v27 = vpop.f32.mrf.mxu0 }
 0xa11   : > { %v4030_v62 = vpop.f32.mrf.mxu0  ;;  %v4037_v63 = vpop.f32.mrf.mxu1 }
 0xa12   : > { %v4193_v55 = vpack.i.bf16 %v4030_v62, %v4029_v59  ;;  %v3365_v59 = vsel %vm3363_vm2, %v3348_v50, %v4137_v18  ;;  %v4132_v18 = vunpack.i.h.bf16 %v5833_v13  ;;  %v4157_v50 = vunpack.i.h.bf16 %v5841_v42 }
 0xa13   : > { %v3082_v19 = vpop.f32.mrf.mxu0  ;;  %v3140_v23 = vpop.f32.mrf.mxu1  ;;  %v4156_v13 = vunpack.i.l.bf16 %v5841_v42  ;;  %v3360_v42 = vsel %vm199_vm0, %v6029_v9, %v4127_v53 }
 0xa14   : > { %v4198_v61 = vpack.i.bf16 %v3082_v19, %v3079_v27  ;;  %4194 = vrot.lane.b32.xlu1 %v4193_v55, %s4514_s8 }
 0xa15   : > { %v4038_v32 = vpop.f32.mrf.mxu1 }
 0xa16   : > { %v4208_v43 = vpack.i.bf16 %v4038_v32, %v4037_v63  ;;  %4199 = vrot.lane.b32.xlu0 %v4198_v61, %s4514_s8  ;;  %v4146_v61 = vunpack.i.l.bf16 %v5837_v35 }
 0xa17   : > { %v3143_v2 = vpop.f32.mrf.mxu1 }
 0xa18   : > { %v4203_v38 = vpack.i.bf16 %v3143_v2, %v3140_v23  ;;  %4209 = vrot.lane.b32.xlu1 %v4208_v43, %s4514_s8  ;;  %v4147_v23 = vunpack.i.h.bf16 %v5837_v35  ;;  %v3368_v33 = vsel %vm3363_vm2, %v3351_v39, %v4146_v61  ;;  %v3361_v39 = vsel %vm199_vm0, %v6026_v46, %v4131_v51 }
 0xa1a   : > { %4204 = vrot.lane.b32.xlu0 %v4203_v38, %s4514_s8  ;;  %v3369_v10 = vsel %vm3363_vm2, %v3352_v12, %v4147_v23  ;;  %v6025_v12 = vld [vmem:[#allocation16_spill] sm:$0xff] }
 0xa1b   : > { %v3362_v37 = vsel %vm199_vm0, %v6025_v12, %v4132_v18 }
 0xa76   : > { %v4175_v8 = vpop.permute.xlu1 %4174 }
 0xa77   : > { %v4177_v16 = vunpack.i.h.bf16 %v4175_v8  ;;  %v4176_v21 = vunpack.i.l.bf16 %v4175_v8 }
 0xa78   : > { %v4185_v27 = vpop.permute.xlu0 %4184 }
 0xa79   : > { %v3384_v62 = vsel %vm3380_vm3, %v3367_v48, %v4177_v16  ;;  %v3383_v63 = vsel %vm3380_vm3, %v3366_v45, %v4176_v21  ;;  %v4187_v55 = vunpack.i.h.bf16 %v4185_v27  ;;  %v4186_v19 = vunpack.i.l.bf16 %v4185_v27  ;;  %v6027_v45 = vld [vmem:[#allocation15_spill] sm:$0xff]  ;;  %v6030_v16 = vld [vmem:[#allocation14_spill] sm:$0xff] }
 0xa7a   : > { %v3642_v32 = vpack.c.bf16 %v3384_v62, %v3384_v62  ;;  %v3641_v43 = vpack.c.bf16 %v3383_v63, %v3383_v63  ;;  %v4180_v2 = vpop.permute.xlu1 %4179  ;;  %v3356_v8 = vsel %vm199_vm0, %v6027_v45, %v4117_v58  ;;  %v3355_v48 = vsel %vm199_vm0, %v6028_v41, %v4116_v11 }
 0xa7b   : > { %v3381_v38 = vsel %vm3380_vm3, %v3364_v7, %v4186_v19  ;;  %v3382_v14 = vsel %vm3380_vm3, %v3365_v59, %v4187_v55  ;;  %v4182_v36 = vunpack.i.h.bf16 %v4180_v2  ;;  %v4181_v26 = vunpack.i.l.bf16 %v4180_v2 }
 0xa7c   : > { %3465 = vst.msk [vmem:[%s5872_s14 + $0xc] sm:$0xf] %vm3461_vm4, %v3642_v32  ;;  %3464 = vst.msk [vmem:[%s5872_s14 + $0x8] sm:$0xf] %vm3461_vm4, %v3641_v43  ;;  %v3639_v1 = vpack.c.bf16 %v3381_v38, %v3381_v38  ;;  %v3640_v56 = vpack.c.bf16 %v3382_v14, %v3382_v14  ;;  %v4190_v35 = vpop.permute.xlu0 %4189  ;;  %v3359_v21 = vsel %vm199_vm0, %v6030_v16, %v4126_v31  ;;  %v4172_v63 = vunpack.i.h.bf16 %v5843_v30 }
 0xa7d   : > { %v3388_v15 = vsel %vm3380_vm3, %v3371_v25, %v4182_v36  ;;  %v3387_v20 = vsel %vm3380_vm3, %v3370_v60, %v4181_v26  ;;  %v4192_v29 = vunpack.i.h.bf16 %v4190_v35  ;;  %v4191_v47 = vunpack.i.l.bf16 %v4190_v35 }
 0xa7e   : > { %3462 = vst.msk [vmem:[%s5872_s14] sm:$0xf] %vm3461_vm4, %v3639_v1  ;;  %3463 = vst.msk [vmem:[%s5872_s14 + $0x4] sm:$0xf] %vm3461_vm4, %v3640_v56  ;;  %v3646_v34 = vpack.c.bf16 %v3388_v15, %v3388_v15  ;;  %v3645_v40 = vpack.c.bf16 %v3387_v20, %v3387_v20  ;;  %v3374_v7 = vsel %vm3363_vm2, %v3357_v44, %v4161_v49  ;;  %v4171_v55 = vunpack.i.l.bf16 %v5843_v30 }
 0xa7f   : > { %v3385_v4 = vsel %vm3380_vm3, %v3368_v33, %v4191_v47  ;;  %v3386_v28 = vsel %vm3380_vm3, %v3369_v10, %v4192_v29  ;;  %v3375_v59 = vsel %vm3363_vm2, %v3358_v3, %v4162_v0  ;;  %v3372_v19 = vsel %vm3363_vm2, %v3355_v48, %v4156_v13 }
 0xa80   : > { %3469 = vst.msk [vmem:[%s5872_s14 + $0x1c] sm:$0xf] %vm3461_vm4, %v3646_v34  ;;  %3468 = vst.msk [vmem:[%s5872_s14 + $0x18] sm:$0xf] %vm3461_vm4, %v3645_v40  ;;  %v3643_v22 = vpack.c.bf16 %v3385_v4, %v3385_v4  ;;  %v3644_v17 = vpack.c.bf16 %v3386_v28, %v3386_v28  ;;  %v3373_v23 = vsel %vm3363_vm2, %v3356_v8, %v4157_v50  ;;  %v4167_v14 = vunpack.i.h.bf16 %v5849_v6 }
 0xa81   : > { %v4166_v36 = vunpack.i.l.bf16 %v5849_v6  ;;  %v3378_v15 = vsel %vm3363_vm2, %v3361_v39, %v4171_v55  ;;  %v3379_v20 = vsel %vm3363_vm2, %v3362_v37, %v4172_v63 }
 0xa82   : > { %3466 = vst.msk [vmem:[%s5872_s14 + $0x10] sm:$0xf] %vm3461_vm4, %v3643_v22  ;;  %3467 = vst.msk [vmem:[%s5872_s14 + $0x14] sm:$0xf] %vm3461_vm4, %v3644_v17  ;;  %v3377_v28 = vsel %vm3363_vm2, %v3360_v42, %v4167_v14 }
 0xa83   : > { %v3376_v4 = vsel %vm3363_vm2, %v3359_v21, %v4166_v36 }
 0xa86   : > { %v4195_v52 = vpop.permute.xlu1 %4194 }
 0xa87   : > { %v4197_v27 = vunpack.i.h.bf16 %v4195_v52  ;;  %v4196_v62 = vunpack.i.l.bf16 %v4195_v52 }
 0xa88   : > { %v4200_v61 = vpop.permute.xlu0 %4199 }
 0xa89   : > { %v3392_v32 = vsel %vm3380_vm3, %v3375_v59, %v4197_v27  ;;  %v3391_v43 = vsel %vm3380_vm3, %v3374_v7, %v4196_v62  ;;  %v4202_v2 = vunpack.i.h.bf16 %v4200_v61  ;;  %v4201_v38 = vunpack.i.l.bf16 %v4200_v61 }
 0xa8a   : > { %v3650_v26 = vpack.c.bf16 %v3392_v32, %v3392_v32  ;;  %v3649_v60 = vpack.c.bf16 %v3391_v43, %v3391_v43  ;;  %v4210_v30 = vpop.permute.xlu1 %4209 }
 0xa8b   : > { %v3389_v25 = vsel %vm3380_vm3, %v3372_v19, %v4201_v38  ;;  %v3390_v1 = vsel %vm3380_vm3, %v3373_v23, %v4202_v2  ;;  %v4212_v56 = vunpack.i.h.bf16 %v4210_v30  ;;  %v4211_v35 = vunpack.i.l.bf16 %v4210_v30 }
 0xa8c   : > { %3473 = vst.msk [vmem:[%s5872_s14 + $0x2c] sm:$0xf] %vm3461_vm4, %v3650_v26  ;;  %3472 = vst.msk [vmem:[%s5872_s14 + $0x28] sm:$0xf] %vm3461_vm4, %v3649_v60  ;;  %v3647_v6 = vpack.c.bf16 %v3389_v25, %v3389_v25  ;;  %v3648_v29 = vpack.c.bf16 %v3390_v1, %v3390_v1  ;;  %v4205_v47 = vpop.permute.xlu0 %4204 }
 0xa8d   : > { %v3396_v33 = vsel %vm3380_vm3, %v3379_v20, %v4212_v56  ;;  %v3395_v10 = vsel %vm3380_vm3, %v3378_v15, %v4211_v35  ;;  %v4207_v34 = vunpack.i.h.bf16 %v4205_v47  ;;  %v4206_v40 = vunpack.i.l.bf16 %v4205_v47 }
 0xa8e   : > { %3470 = vst.msk [vmem:[%s5872_s14 + $0x20] sm:$0xf] %vm3461_vm4, %v3647_v6  ;;  %3471 = vst.msk [vmem:[%s5872_s14 + $0x24] sm:$0xf] %vm3461_vm4, %v3648_v29  ;;  %v3654_v22 = vpack.c.bf16 %v3396_v33, %v3396_v33  ;;  %v3653_v17 = vpack.c.bf16 %v3395_v10, %v3395_v10 }
 0xa8f   : > { %v3393_v5 = vsel %vm3380_vm3, %v3376_v4, %v4206_v40  ;;  %v3394_v54 = vsel %vm3380_vm3, %v3377_v28, %v4207_v34 }
 0xa90   : > { %3477 = vst.msk [vmem:[%s5872_s14 + $0x3c] sm:$0xf] %vm3461_vm4, %v3654_v22  ;;  %3476 = vst.msk [vmem:[%s5872_s14 + $0x38] sm:$0xf] %vm3461_vm4, %v3653_v17  ;;  %v3651_v18 = vpack.c.bf16 %v3393_v5, %v3393_v5  ;;  %v3652_v51 = vpack.c.bf16 %v3394_v54, %v3394_v54 }
 0xa92   : > { %3474 = vst.msk [vmem:[%s5872_s14 + $0x30] sm:$0xf] %vm3461_vm4, %v3651_v18  ;;  %3475 = vst.msk [vmem:[%s5872_s14 + $0x34] sm:$0xf] %vm3461_vm4, %v3652_v51 }
 0xa93 PF: > { %s12_s9 = sadd.s32 1, %s4499_s9  }
 0xa94   : > { %p9_p4 = scmp.ge.s32.totalorder %s12_s9, 6  }
 0xa96   :  { %11 = sbr.rel (!%p9_p4) target bundleno = 1 (0x1), region = 58 }

// kernel: basic_layer_forward.11
= control target key start
LH: loop header
LB: loop body
LE: loop exit
PB: predicated region body
PF: predicated region fallthrough
CT: control target
= control target key end

     0   :  { %15 = vsyncpa [#allocation3], 0  ;;  %s3114_s0 = inlined_call_operand.vmem [shape: bf16[512,32], index: 0, kind: input, shape index: {}]   ;;  %s3115_s1 = inlined_call_operand.vmem [shape: f32[512,32], index: 1, kind: input, shape index: {}]   ;;  %s3116_s2 = inlined_call_operand.vmem [shape: bf16[32,32], index: 2, kind: input, shape index: {}]   ;;  %s3117_s3 = inlined_call_operand.vmem [shape: f32[1,32], index: 3, kind: input, shape index: {}]   ;;  %s3118_s4 = inlined_call_operand.vmem [shape: f32[1,32], index: 4, kind: input, shape index: {}]   ;;  %s3119_s5 = inlined_call_operand.vmem [shape: f32[1,32], index: 5, kind: input, shape index: {}]   ;;  %s3120_s6 = inlined_call_operand.vmem [shape: bf16[32,128], index: 6, kind: input, shape index: {}]   ;;  %s3121_s7 = inlined_call_operand.vmem [shape: f32[1,128], index: 7, kind: input, shape index: {}]   ;;  %s3122_s8 = inlined_call_operand.vmem [shape: bf16[128,32], index: 8, kind: input, shape index: {}]   ;;  %s3123_s9 = inlined_call_operand.vmem [shape: f32[1,32], index: 9, kind: input, shape index: {}]   ;;  %s3124_s10 = inlined_call_operand.hbm [shape: f32[512,32], index: 10, kind: output, shape index: {}]  }
   0x1   :  { %17 = vsyncpa [#allocation3 + $0x1], 0  ;;  %s2241_s13 = smov 0   ;;  %s2243_s14 = smov 0  }
   0x2   :  { %s2245_s15 = smov 0   ;;  %s2247_s16 = smov 0  }
   0x3 LB: > { %s2262_s17 = sadd.s32 4294967295, %s2181_s16   ;;  %s1784_s18 = sadd.s32 4294967294, %s2181_s16   ;;  %s2181_s16 = sphi %s2247_s16, %s3163_s16   ;;  %s2177_s15 = sphi %s2245_s15, %s3162_s15   ;;  %s2173_s14 = sphi %s2243_s14, %s3161_s14   ;;  %s2169_s13 = sphi %s2241_s13, %s3160_s13  }
   0x4   : > { %s2266_s19 = sadd.s32 1, %s2181_s16   ;;  %s250_s20 = sadd.s32 1, %s2177_s15 }
   0x5   : > { %s247_s21 = ssub.s32 %s2181_s16, %s2266_s19  ;;  %p260_p0 = scmp.ne.s32.totalorder %s2177_s15, %s2173_s14 }
   0x6   : > { %p248_p1 = scmp.eq.s32.totalorder %s247_s21, 0  ;;  %p261_p2 = scmp.eq.s32.totalorder %s2262_s17, 3 }
   0x7   : > { %p266_p3 = scmp.ne.s32.totalorder %s2173_s14, %s2169_s13  ;;  %p267_p4 = scmp.eq.s32.totalorder %s1784_s18, 3 }
   0x8   : > { %s2277_s22 = scalar_select %p248_p1, %s2177_s15, %s250_s20  }
   0x9   : > { %p2279_p5 = por %p261_p2, %p260_p0  ;;  %p2283_p6 = por %p267_p4, %p266_p3 }
   0xa   : > { %p1787_p7 = scmp.ge.s32.totalorder %s2181_s16, 1  ;;  %p327_p8 = scmp.lt.s32.totalorder %s2181_s16, 5 }
   0xc   : > { %p328_p9 = pnand %p1787_p7, %p327_p8 }
   0xe   : > { %331 = sbr.rel (%p328_p9) target bundleno = 1091 (0x443), region = 60 }
  0x13   : > { %v2005_v0 = vld [vmem:[%s3116_s2 + $0x8] sm:$0xff]   ;;  %s1789_s27 = sshll.u32 %s2262_s17, 4  ;;  %v2006_v1 = vld [vmem:[%s3116_s2] sm:$0xff]   ;;  %vm472_vm0 = vcmask 261120   ;;  %s1839_s28 = sshll.u32 %s2262_s17, 11 }
  0x14   : > { %p371_p10 = scmp.lt.s32.totalorder %s1789_s27, 63  ;;  %1876 = vmatprep.subr.bf16.mxu0 %v2005_v0  ;;  %v2316_v12 = vld [vmem:[%s3117_s3] ss:$0 sm:$0xff]  ;;  %s3063_s11 = scalar_lea.hbm %s3124_s10, %s1839_s28 }
  0x15   : > { %1877 = vmatpush3.bf16.msra.mxu0 %v2005_v0 }
  0x16   : > { %s3165_s27 = smov (!%p371_p10, %s1789_s27), 63  ;;  %1878 = vmatprep.subr.bf16.mxu0 %v2006_v1 }
  0x17   : > { %s1790_s30 = sshll.u32 %s3165_s27, 2  ;;  %s1792_s20 = sshll.u32 %s3165_s27, 3 }
  0x18   : > { %s374_s18 = scalar_lea.vmem %s3114_s0, %s1790_s30  ;;  %s2310_s26 = scalar_lea.vmem %s3115_s1, %s1792_s20 }
  0x19   : > { %1879 = vmatpush3.bf16.msra.mxu0 %v2006_v1  ;;  %v2007_v2 = vld [vmem:[%s374_s18] sm:$0xff]   ;;  %v2008_v3 = vld [vmem:[%s374_s18 + $0x8] sm:$0xff]   ;;  %v2009_v4 = vld [vmem:[%s374_s18 + $0x10] sm:$0xff]  }
  0x1a   : > { %1880 = vmatprep.mubr.msk.bf16.mxu0 %vm472_vm0, %v2007_v2  ;;  %v2010_v5 = vld [vmem:[%s374_s18 + $0x18] sm:$0xff]   ;;  %v2011_v6 = vld [vmem:[%s374_s18 + $0x20] sm:$0xff]   ;;  %v2012_v7 = vld [vmem:[%s374_s18 + $0x28] sm:$0xff]  }
  0x1b   : > { %v2013_v8 = vld [vmem:[%s374_s18 + $0x30] sm:$0xff]   ;;  %v2014_v9 = vld [vmem:[%s374_s18 + $0x38] sm:$0xff]   ;;  %v400_v13 = vld [vmem:[%s2310_s26] sm:$0xff]  ;;  %s367_s18 = sand.u32 1, %s2173_s14  }
  0x1c   : > { %1881 = vmatmul.mubr.msk.bf16.vlgmr.msra.gmra.mxu0 %vm472_vm0, %v2008_v3  ;;  %v402_v10 = vld [vmem:[%s2310_s26 + $0x10] sm:$0xff]  ;;  %v403_v16 = vld [vmem:[%s2310_s26 + $0x18] sm:$0xff]  ;;  %v401_v20 = vld [vmem:[%s2310_s26 + $0x8] sm:$0xff]  ;;  %s1788_s20 = sshll.u32 %s367_s18, 7  ;;  %s3074_s17 = scalar_lea.sflag [#allocation3], %s367_s18 }
  0x1d   : > { %1884 = vmatprep.mubr.msk.bf16.mxu0 %vm472_vm0, %v2009_v4  ;;  %v406_v28 = vld [vmem:[%s2310_s26 + $0x30] sm:$0xff]  ;;  %v404_v30 = vld [vmem:[%s2310_s26 + $0x20] sm:$0xff]  ;;  %v407_v37 = vld [vmem:[%s2310_s26 + $0x38] sm:$0xff] }
  0x1e   : > { %v405_v39 = vld [vmem:[%s2310_s26 + $0x28] sm:$0xff]  ;;  %v410_v46 = vld [vmem:[%s2310_s26 + $0x50] sm:$0xff]  ;;  %v408_v48 = vld [vmem:[%s2310_s26 + $0x40] sm:$0xff] }
  0x1f   : > { %v411_v56 = vld [vmem:[%s2310_s26 + $0x58] sm:$0xff]  ;;  %v409_v58 = vld [vmem:[%s2310_s26 + $0x48] sm:$0xff]  ;;  %v414_v2 = vld [vmem:[%s2310_s26 + $0x70] sm:$0xff] }
  0x20   : > { %v412_v4 = vld [vmem:[%s2310_s26 + $0x60] sm:$0xff] }
  0x24   : > { %1885 = vmatmul.mubr.msk.bf16.gmra.mxu0 %vm472_vm0, %v2010_v5 }
  0x25   : > { %1888 = vmatprep.mubr.msk.bf16.mxu0 %vm472_vm0, %v2011_v6 }
  0x2c   : > { %1889 = vmatmul.mubr.msk.bf16.gmra.mxu0 %vm472_vm0, %v2012_v7 }
  0x2d   : > { %1892 = vmatprep.mubr.msk.bf16.mxu0 %vm472_vm0, %v2013_v8 }
  0x34   : > { %1893 = vmatmul.mubr.msk.bf16.gmra.mxu0 %vm472_vm0, %v2014_v9 }
  0xdc   : > { %v1882_v11 = vpop.f32.mrf.mxu0 }
  0xdd   : > { %v596_v14 = vadd.f32 %v1882_v11, %v402_v10 }
  0xde   : > { %v531_v15 = vpop.f32.mrf.mxu0 }
  0xdf   : > { %v2321_v17 = vadd.f32 %v2316_v12, %v596_v14  ;;  %v594_v18 = vadd.f32 %v531_v15, %v400_v13  ;;  %v415_v13 = vld [vmem:[%s2310_s26 + $0x78] sm:$0xff]  ;;  %v413_v15 = vld [vmem:[%s2310_s26 + $0x68] sm:$0xff]  ;;  %s3000_s26 = scalar_lea.vmem [#allocation2], %s1788_s20  ;;  %s2183_s20 = smov [#allocation2]  }
  0xe0   : > { %v1883_v19 = vpop.f32.mrf.mxu0  ;;  %s1710_s29 = sshll.u32 %s3000_s26, 4  ;;  %s2125_s21 = sshll.u32 %s2183_s20, 4  ;;  %s3065_s29 = int_to_ptr.vmem [resolvable:$true] %s1710_s29  ;;  %s2126_s21 = int_to_ptr.vmem [resolvable:$false] %s2125_s21 }
  0xe1   : > { %v2325_v21 = vadd.f32 %v2316_v12, %v594_v18  ;;  %v597_v22 = vadd.f32 %v1883_v19, %v403_v16  ;;  %v639_v23 = vsel %vm472_vm0, %v2321_v17, 0.0  ;;  %s2121_s12 = scalar_lea.vmem %s3065_s29, 2048  ;;  %s2127_s25 = scalar_lea.vmem %s2126_s21, 4096 }
  0xe2   : > { %640 = vadd.xlane.f32.xlu1 %v639_v23  ;;  %v534_v24 = vpop.f32.mrf.mxu0  ;;  %p2122_p11 = scmp.ne.s32.totalorder %s3065_s29, %s2121_s12  ;;  %p2128_p0 = scmp.lt.s32.totalorder %s3065_s29, %s2126_s21 }
  0xe3   : > { %v2330_v25 = vadd.f32 %v2316_v12, %v597_v22  ;;  %v595_v26 = vadd.f32 %v534_v24, %v401_v20  ;;  %v633_v27 = vsel %vm472_vm0, %v2325_v21, 0.0  ;;  %p2129_p1 = scmp.lt.s32.totalorder %s2127_s25, %s2121_s12 }
  0xe4   : > { %634 = vadd.xlane.f32.xlu0 %v633_v27  ;;  %v1886_v29 = vpop.f32.mrf.mxu0  ;;  %p2123_p12 = pnand %p2122_p11, %p2279_p5 }
  0xe5   : > { %v2337_v31 = vadd.f32 %v2316_v12, %v595_v26  ;;  %v642_v32 = vsel %vm472_vm0, %v2330_v25, 0.0  ;;  %v600_v33 = vadd.f32 %v1886_v29, %v406_v28  ;;  %p2130_p2 = por %p2129_p1, %p2128_p0 }
  0xe6   : > { %643 = vadd.xlane.f32.xlu1 %v642_v32  ;;  %v547_v34 = vpop.f32.mrf.mxu0  ;;  %p2124_p13 = pneg %p2123_p12 }
  0xe7   : > { %v598_v35 = vadd.f32 %v547_v34, %v404_v30  ;;  %v636_v36 = vsel %vm472_vm0, %v2337_v31, 0.0  ;;  %v2349_v41 = vadd.f32 %v2316_v12, %v600_v33 }
  0xe8   : > { %637 = vadd.xlane.f32.xlu0 %v636_v36  ;;  %v1887_v38 = vpop.f32.mrf.mxu0  ;;  %p2131_p3 = pnand %p2130_p2, %p2124_p13 }
  0xe9   : > { %v2346_v40 = vadd.f32 %v2316_v12, %v598_v35  ;;  %v601_v43 = vadd.f32 %v1887_v38, %v407_v37  ;;  %v651_v51 = vsel %vm472_vm0, %v2349_v41, 0.0 }
  0xea   : > { %v550_v42 = vpop.f32.mrf.mxu0 }
  0xeb   : > { %3138 = vst [vmem:[#allocation5_spill] sm:$0xff] %v2346_v40  ;;  %v599_v44 = vadd.f32 %v550_v42, %v405_v39  ;;  %v645_v45 = vsel %vm472_vm0, %v2346_v40, 0.0  ;;  %v2361_v52 = vadd.f32 %v2316_v12, %v601_v43 }
  0xec   : > { %646 = vadd.xlane.f32.xlu0 %v645_v45  ;;  %v1890_v47 = vpop.f32.mrf.mxu0 }
  0xed   : > { %v2356_v49 = vadd.f32 %v2316_v12, %v599_v44  ;;  %3140 = vst [vmem:[#allocation7_spill] sm:$0xff] %v2361_v52  ;;  %v604_v53 = vadd.f32 %v1890_v47, %v410_v46  ;;  %v654_v0 = vsel %vm472_vm0, %v2361_v52, 0.0 }
  0xee   : > { %v563_v50 = vpop.f32.mrf.mxu0 }
  0xef   : > { %3139 = vst [vmem:[#allocation6_spill] sm:$0xff] %v2356_v49  ;;  %v602_v54 = vadd.f32 %v563_v50, %v408_v48  ;;  %v648_v55 = vsel %vm472_vm0, %v2356_v49, 0.0  ;;  %v2371_v62 = vadd.f32 %v2316_v12, %v604_v53 }
  0xf0   : > { %652 = vadd.xlane.f32.xlu0 %v651_v51  ;;  %649 = vadd.xlane.f32.xlu1 %v648_v55  ;;  %v1891_v57 = vpop.f32.mrf.mxu0 }
  0xf1   : > { %v2368_v59 = vadd.f32 %v2316_v12, %v602_v54  ;;  %v605_v60 = vadd.f32 %v1891_v57, %v411_v56  ;;  %3142 = vst [vmem:[#allocation9_spill] sm:$0xff] %v2371_v62  ;;  %v663_v10 = vsel %vm472_vm0, %v2371_v62, 0.0 }
  0xf2   : > { %v566_v61 = vpop.f32.mrf.mxu0 }
  0xf3   : > { %3141 = vst [vmem:[#allocation8_spill] sm:$0xff] %v2368_v59  ;;  %v603_v63 = vadd.f32 %v566_v61, %v409_v58  ;;  %v657_v1 = vsel %vm472_vm0, %v2368_v59, 0.0  ;;  %v2383_v6 = vadd.f32 %v2316_v12, %v605_v60 }
  0xf4   : > { %655 = vadd.xlane.f32.xlu1 %v654_v0  ;;  %658 = vadd.xlane.f32.xlu0 %v657_v1  ;;  %v1894_v3 = vpop.f32.mrf.mxu0 }
  0xf5   : > { %v2380_v5 = vadd.f32 %v2316_v12, %v603_v63  ;;  %3144 = vst [vmem:[#allocation11_spill] sm:$0xff] %v2383_v6  ;;  %v608_v8 = vadd.f32 %v1894_v3, %v414_v2  ;;  %v666_v19 = vsel %vm472_vm0, %v2383_v6, 0.0 }
  0xf6   : > { %v579_v7 = vpop.f32.mrf.mxu0 }
  0xf7   : > { %3143 = vst [vmem:[#allocation10_spill] sm:$0xff] %v2380_v5  ;;  %v606_v9 = vadd.f32 %v579_v7, %v412_v4  ;;  %v660_v11 = vsel %vm472_vm0, %v2380_v5, 0.0  ;;  %v2397_v20 = vadd.f32 %v2316_v12, %v608_v8 }
  0xf8   : > { %664 = vadd.xlane.f32.xlu0 %v663_v10  ;;  %661 = vadd.xlane.f32.xlu1 %v660_v11  ;;  %v1895_v14 = vpop.f32.mrf.mxu0 }
  0xf9   : > { %v2392_v16 = vadd.f32 %v2316_v12, %v606_v9  ;;  %3146 = vst [vmem:[#allocation13_spill] sm:$0xff] %v2397_v20  ;;  %v609_v22 = vadd.f32 %v1895_v14, %v415_v13  ;;  %v675_v28 = vsel %vm472_vm0, %v2397_v20, 0.0 }
  0xfa   : > { %v582_v18 = vpop.f32.mrf.mxu0 }
  0xfb   : > { %3145 = vst [vmem:[#allocation12_spill] sm:$0xff] %v2392_v16  ;;  %v607_v23 = vadd.f32 %v582_v18, %v413_v15  ;;  %v669_v24 = vsel %vm472_vm0, %v2392_v16, 0.0  ;;  %v2405_v27 = vadd.f32 %v2316_v12, %v609_v22 }
  0xfc   : > { %667 = vadd.xlane.f32.xlu1 %v666_v19  ;;  %670 = vadd.xlane.f32.xlu0 %v669_v24 }
  0xfd   : > { %v2402_v26 = vadd.f32 %v2316_v12, %v607_v23  ;;  %3148 = vst [vmem:[#allocation15_spill] sm:$0xff] %v2405_v27  ;;  %v678_v30 = vsel %vm472_vm0, %v2405_v27, 0.0 }
  0xff   : > { %3147 = vst [vmem:[#allocation14_spill] sm:$0xff] %v2402_v26  ;;  %v672_v29 = vsel %vm472_vm0, %v2402_v26, 0.0 }
 0x100   : > { %676 = vadd.xlane.f32.xlu0 %v675_v28  ;;  %673 = vadd.xlane.f32.xlu1 %v672_v29 }
 0x104   : > { %679 = vadd.xlane.f32.xlu1 %v678_v30 }
 0x16b   : > { %v641_v32 = vpop.xlane.xlu1 %640 }
 0x16c   : > { %v684_v33 = vmul.f32 0.03125, %v641_v32 }
 0x16d   : > { %v635_v34 = vpop.xlane.xlu0 %634 }
 0x16e   : > { %v682_v35 = vmul.f32 0.03125, %v635_v34  ;;  %v2414_v12 = vsub.f32 %v2321_v17, %v684_v33 }
 0x16f   : > { %v644_v36 = vpop.xlane.xlu1 %643 }
 0x170   : > { %v2417_v37 = vsub.f32 %v2325_v21, %v682_v35  ;;  %v685_v38 = vmul.f32 0.03125, %v644_v36  ;;  %v716_v47 = vmul.f32 %v2414_v12, %v2414_v12 }
 0x171   : > { %v638_v39 = vpop.xlane.xlu0 %637 }
 0x172   : > { %v683_v42 = vmul.f32 0.03125, %v638_v39  ;;  %v714_v43 = vmul.f32 %v2417_v37, %v2417_v37  ;;  %v2422_v44 = vsub.f32 %v2330_v25, %v685_v38  ;;  %v736_v54 = vsel %vm472_vm0, %v716_v47, 0.0 }
 0x174   : > { %v2425_v45 = vsub.f32 %v2337_v31, %v683_v42  ;;  %v730_v46 = vsel %vm472_vm0, %v714_v43, 0.0  ;;  %v717_v56 = vmul.f32 %v2422_v44, %v2422_v44 }
 0x175   : > { %v647_v48 = vpop.xlane.xlu0 %646  ;;  %731 = vadd.xlane.f32.xlu0 %v730_v46 }
 0x176   : > { %v686_v50 = vmul.f32 0.03125, %v647_v48  ;;  %v715_v51 = vmul.f32 %v2425_v45, %v2425_v45  ;;  %v739_v3 = vsel %vm472_vm0, %v717_v56, 0.0 }
 0x178   : > { %v2433_v53 = vsub.f32 %v2346_v40, %v686_v50  ;;  %v733_v55 = vsel %vm472_vm0, %v715_v51, 0.0 }
 0x179   : > { %v653_v57 = vpop.xlane.xlu0 %652  ;;  %v650_v58 = vpop.xlane.xlu1 %649  ;;  %737 = vadd.xlane.f32.xlu0 %v736_v54  ;;  %734 = vadd.xlane.f32.xlu1 %v733_v55 }
 0x17a   : > { %v688_v60 = vmul.f32 0.03125, %v653_v57  ;;  %v687_v61 = vmul.f32 0.03125, %v650_v58  ;;  %v718_v63 = vmul.f32 %v2433_v53, %v2433_v53 }
 0x17c   : > { %v2442_v0 = vsub.f32 %v2349_v41, %v688_v60  ;;  %v2445_v1 = vsub.f32 %v2356_v49, %v687_v61  ;;  %v742_v2 = vsel %vm472_vm0, %v718_v63, 0.0 }
 0x17d   : > { %v656_v4 = vpop.xlane.xlu1 %655  ;;  %v659_v7 = vpop.xlane.xlu0 %658  ;;  %743 = vadd.xlane.f32.xlu0 %v742_v2  ;;  %740 = vadd.xlane.f32.xlu1 %v739_v3 }
 0x17e   : > { %v689_v8 = vmul.f32 0.03125, %v656_v4  ;;  %v690_v9 = vmul.f32 0.03125, %v659_v7  ;;  %v720_v10 = vmul.f32 %v2442_v0, %v2442_v0  ;;  %v719_v11 = vmul.f32 %v2445_v1, %v2445_v1 }
 0x180   : > { %v2454_v13 = vsub.f32 %v2361_v52, %v689_v8  ;;  %v2457_v14 = vsub.f32 %v2368_v59, %v690_v9  ;;  %v748_v15 = vsel %vm472_vm0, %v720_v10, 0.0  ;;  %v745_v18 = vsel %vm472_vm0, %v719_v11, 0.0 }
 0x181   : > { %v665_v19 = vpop.xlane.xlu0 %664  ;;  %v662_v22 = vpop.xlane.xlu1 %661  ;;  %749 = vadd.xlane.f32.xlu0 %v748_v15  ;;  %746 = vadd.xlane.f32.xlu1 %v745_v18 }
 0x182   : > { %v692_v23 = vmul.f32 0.03125, %v665_v19  ;;  %v691_v24 = vmul.f32 0.03125, %v662_v22  ;;  %v722_v28 = vmul.f32 %v2457_v14, %v2457_v14  ;;  %v721_v29 = vmul.f32 %v2454_v13, %v2454_v13  ;;  %v2015_v19 = vld [vmem:[%s3120_s6 + $0x8] sm:$0xff]   ;;  %v2016_v22 = vld [vmem:[%s3120_s6] sm:$0xff]  }
 0x183   : > { %1896 = vmatprep.subr.bf16.mxu1 %v2015_v19 }
 0x184   : > { %v2466_v30 = vsub.f32 %v2371_v62, %v692_v23  ;;  %v2469_v32 = vsub.f32 %v2380_v5, %v691_v24  ;;  %v754_v33 = vsel %vm472_vm0, %v722_v28, 0.0  ;;  %v751_v34 = vsel %vm472_vm0, %v721_v29, 0.0  ;;  %1897 = vmatpush3.bf16.msra.mxu1 %v2015_v19 }
 0x185   : > { %v668_v35 = vpop.xlane.xlu1 %667  ;;  %755 = vadd.xlane.f32.xlu0 %v754_v33  ;;  %v671_v36 = vpop.xlane.xlu0 %670  ;;  %752 = vadd.xlane.f32.xlu1 %v751_v34 }
 0x186   : > { %v693_v38 = vmul.f32 0.03125, %v668_v35  ;;  %v694_v39 = vmul.f32 0.03125, %v671_v36  ;;  %v724_v42 = vmul.f32 %v2466_v30, %v2466_v30  ;;  %v723_v43 = vmul.f32 %v2469_v32, %v2469_v32  ;;  %1898 = vmatprep.subr.bf16.mxu1 %v2016_v22 }
 0x188   : > { %v2478_v46 = vsub.f32 %v2383_v6, %v693_v38  ;;  %v2481_v47 = vsub.f32 %v2392_v16, %v694_v39  ;;  %v760_v48 = vsel %vm472_vm0, %v724_v42, 0.0  ;;  %v757_v50 = vsel %vm472_vm0, %v723_v43, 0.0  ;;  %1899 = vmatpush3.bf16.msra.mxu1 %v2016_v22 }
 0x189   : > { %761 = vadd.xlane.f32.xlu0 %v760_v48  ;;  %v677_v51 = vpop.xlane.xlu0 %676  ;;  %758 = vadd.xlane.f32.xlu1 %v757_v50  ;;  %v674_v54 = vpop.xlane.xlu1 %673 }
 0x18a   : > { %v696_v55 = vmul.f32 0.03125, %v677_v51  ;;  %v695_v56 = vmul.f32 0.03125, %v674_v54  ;;  %v726_v57 = vmul.f32 %v2481_v47, %v2481_v47  ;;  %v725_v58 = vmul.f32 %v2478_v46, %v2478_v46 }
 0x18c   : > { %v2490_v60 = vsub.f32 %v2397_v20, %v696_v55  ;;  %v2493_v61 = vsub.f32 %v2402_v26, %v695_v56  ;;  %v766_v63 = vsel %vm472_vm0, %v726_v57, 0.0  ;;  %v763_v2 = vsel %vm472_vm0, %v725_v58, 0.0 }
 0x18d   : > { %767 = vadd.xlane.f32.xlu0 %v766_v63  ;;  %764 = vadd.xlane.f32.xlu1 %v763_v2  ;;  %v680_v3 = vpop.xlane.xlu1 %679 }
 0x18e   : > { %v697_v4 = vmul.f32 0.03125, %v680_v3  ;;  %v728_v7 = vmul.f32 %v2490_v60, %v2490_v60  ;;  %v727_v8 = vmul.f32 %v2493_v61, %v2493_v61 }
 0x190   : > { %v2502_v9 = vsub.f32 %v2405_v27, %v697_v4  ;;  %v772_v10 = vsel %vm472_vm0, %v728_v7, 0.0  ;;  %v769_v11 = vsel %vm472_vm0, %v727_v8, 0.0 }
 0x191   : > { %773 = vadd.xlane.f32.xlu0 %v772_v10  ;;  %770 = vadd.xlane.f32.xlu1 %v769_v11 }
 0x192   : > { %v729_v15 = vmul.f32 %v2502_v9, %v2502_v9 }
 0x194   : > { %v775_v18 = vsel %vm472_vm0, %v729_v15, 0.0 }
 0x195   : > { %776 = vadd.xlane.f32.xlu1 %v775_v18 }
 0x1fe   : > { %v732_v23 = vpop.xlane.xlu0 %731 }
 0x1ff   : > { %v778_v24 = vmul.f32 0.03125, %v732_v23 }
 0x201   : > { %v794_v28 = vadd.f32 1e-05, %v778_v24  ;;  %v2519_v24 = vld [vmem:[%s3118_s4] ss:$0 sm:$0xff] }
 0x202   : > { %v738_v29 = vpop.xlane.xlu0 %737  ;;  %v735_v33 = vpop.xlane.xlu1 %734 }
 0x203   : > { %2025 = vrsqrt.f32 %v794_v28  ;;  %v780_v34 = vmul.f32 0.03125, %v738_v29  ;;  %v779_v35 = vmul.f32 0.03125, %v735_v33 }
 0x205   : > { %v796_v36 = vadd.f32 1e-05, %v780_v34  ;;  %v795_v38 = vadd.f32 1e-05, %v779_v35 }
 0x206   : > { %v744_v39 = vpop.xlane.xlu0 %743  ;;  %v741_v42 = vpop.xlane.xlu1 %740 }
 0x207   : > { %2027 = vrsqrt.f32 %v796_v36  ;;  %v782_v43 = vmul.f32 0.03125, %v744_v39  ;;  %v781_v48 = vmul.f32 0.03125, %v741_v42 }
 0x208   : > { %2029 = vrsqrt.f32 %v795_v38 }
 0x209   : > { %v798_v50 = vadd.f32 1e-05, %v782_v43  ;;  %v797_v51 = vadd.f32 1e-05, %v781_v48  ;;  %v2527_v48 = vld [vmem:[%s3119_s5] ss:$0 sm:$0xff] }
 0x20a   : > { %v750_v54 = vpop.xlane.xlu0 %749  ;;  %v747_v55 = vpop.xlane.xlu1 %746 }
 0x20b   : > { %2031 = vrsqrt.f32 %v798_v50  ;;  %v784_v56 = vmul.f32 0.03125, %v750_v54  ;;  %v783_v57 = vmul.f32 0.03125, %v747_v55 }
 0x20c   : > { %2033 = vrsqrt.f32 %v797_v51 }
 0x20d   : > { %v800_v58 = vadd.f32 1e-05, %v784_v56  ;;  %v799_v63 = vadd.f32 1e-05, %v783_v57 }
 0x20e   : > { %v756_v2 = vpop.xlane.xlu0 %755  ;;  %v753_v3 = vpop.xlane.xlu1 %752 }
 0x20f   : > { %2035 = vrsqrt.f32 %v800_v58  ;;  %v786_v4 = vmul.f32 0.03125, %v756_v2  ;;  %v785_v7 = vmul.f32 0.03125, %v753_v3 }
 0x210   : > { %v2026_v8 = vpop.eup %2025  ;;  %2037 = vrsqrt.f32 %v799_v63 }
 0x211   : > { %v802_v10 = vadd.f32 1e-05, %v786_v4  ;;  %v801_v11 = vadd.f32 1e-05, %v785_v7  ;;  %v826_v19 = vmul.f32 %v2026_v8, %v2417_v37 }
 0x212   : > { %v762_v15 = vpop.xlane.xlu0 %761  ;;  %v759_v18 = vpop.xlane.xlu1 %758 }
 0x213   : > { %2039 = vrsqrt.f32 %v802_v10  ;;  %v788_v22 = vmul.f32 0.03125, %v762_v15  ;;  %v787_v23 = vmul.f32 0.03125, %v759_v18  ;;  %v849_v37 = vmul.f32 %v2519_v24, %v826_v19 }
 0x214   : > { %v2028_v28 = vpop.eup %2027  ;;  %2041 = vrsqrt.f32 %v801_v11 }
 0x215   : > { %v2030_v29 = vpop.eup %2029  ;;  %v804_v33 = vadd.f32 1e-05, %v788_v22  ;;  %v803_v34 = vadd.f32 1e-05, %v787_v23  ;;  %v828_v35 = vmul.f32 %v2028_v28, %v2414_v12  ;;  %v872_v58 = vadd.f32 %v2527_v48, %v849_v37 }
 0x216   : > { %v768_v36 = vpop.xlane.xlu0 %767  ;;  %v765_v38 = vpop.xlane.xlu1 %764  ;;  %v827_v39 = vmul.f32 %v2030_v29, %v2425_v45 }
 0x217   : > { %2043 = vrsqrt.f32 %v804_v33  ;;  %v790_v42 = vmul.f32 0.03125, %v768_v36  ;;  %v789_v43 = vmul.f32 0.03125, %v765_v38  ;;  %v851_v56 = vmul.f32 %v2519_v24, %v828_v35 }
 0x218   : > { %v2032_v50 = vpop.eup %2031  ;;  %2045 = vrsqrt.f32 %v803_v34  ;;  %v850_v51 = vmul.f32 %v2519_v24, %v827_v39 }
 0x219   : > { %v2034_v54 = vpop.eup %2033  ;;  %v806_v12 = vadd.f32 1e-05, %v790_v42  ;;  %v805_v55 = vadd.f32 1e-05, %v789_v43  ;;  %v830_v3 = vmul.f32 %v2032_v50, %v2433_v53  ;;  %v874_v22 = vadd.f32 %v2527_v48, %v851_v56 }
 0x21a   : > { %v774_v45 = vpop.xlane.xlu0 %773  ;;  %v771_v57 = vpop.xlane.xlu1 %770  ;;  %v873_v63 = vadd.f32 %v2527_v48, %v850_v51  ;;  %v829_v2 = vmul.f32 %v2034_v54, %v2422_v44 }
 0x21b   : > { %2047 = vrsqrt.f32 %v806_v12  ;;  %v792_v4 = vmul.f32 0.03125, %v774_v45  ;;  %v791_v7 = vmul.f32 0.03125, %v771_v57  ;;  %v853_v28 = vmul.f32 %v2519_v24, %v830_v3 }
 0x21c   : > { %v2036_v8 = vpop.eup %2035  ;;  %2049 = vrsqrt.f32 %v805_v55  ;;  %v888_v10 = vpack.c.bf16 %v873_v63, %v872_v58  ;;  %v852_v11 = vmul.f32 %v2519_v24, %v829_v2 }
 0x21d   : > { %v2038_v15 = vpop.eup %2037  ;;  %v808_v18 = vadd.f32 1e-05, %v792_v4  ;;  %v807_v19 = vadd.f32 1e-05, %v791_v7  ;;  %v832_v29 = vmul.f32 %v2036_v8, %v2442_v0  ;;  %v876_v42 = vadd.f32 %v2527_v48, %v853_v28 }
 0x21e   : > { %1900 = vmatprep.mubr.msk.bf16.mxu1 %vm472_vm0, %v888_v10  ;;  %v777_v23 = vpop.xlane.xlu1 %776  ;;  %v875_v44 = vadd.f32 %v2527_v48, %v852_v11  ;;  %v831_v53 = vmul.f32 %v2038_v15, %v2445_v1 }
 0x21f   : > { %2051 = vrsqrt.f32 %v808_v18  ;;  %v793_v33 = vmul.f32 0.03125, %v777_v23  ;;  %v855_v0 = vmul.f32 %v2519_v24, %v832_v29 }
 0x220   : > { %v2040_v34 = vpop.eup %2039  ;;  %2053 = vrsqrt.f32 %v807_v19  ;;  %v889_v35 = vpack.c.bf16 %v875_v44, %v874_v22  ;;  %v854_v36 = vmul.f32 %v2519_v24, %v831_v53 }
 0x221   : > { %v2042_v38 = vpop.eup %2041  ;;  %v809_v39 = vadd.f32 1e-05, %v793_v33  ;;  %v834_v37 = vmul.f32 %v2040_v34, %v2457_v14  ;;  %v878_v14 = vadd.f32 %v2527_v48, %v855_v0  ;;  %v2608_v0 = vld [vmem:[%s3121_s7] ss:$0 sm:$0xff] }
 0x222   : > { %1901 = vmatmul.mubr.msk.bf16.vlgmr.msra.gmra.mxu1 %vm472_vm0, %v889_v35  ;;  %v877_v1 = vadd.f32 %v2527_v48, %v854_v36  ;;  %v833_v43 = vmul.f32 %v2042_v38, %v2454_v13 }
 0x223   : > { %2055 = vrsqrt.f32 %v809_v39  ;;  %v857_v55 = vmul.f32 %v2519_v24, %v834_v37  ;;  %v2020_v39 = vld [vmem:[%s3122_s8 + $0x20] sm:$0xff]   ;;  %v2021_v37 = vld [vmem:[%s3122_s8 + $0x18] sm:$0xff]  }
 0x224   : > { %v2044_v50 = vpop.eup %2043  ;;  %v890_v51 = vpack.c.bf16 %v877_v1, %v876_v42  ;;  %v856_v54 = vmul.f32 %v2519_v24, %v833_v43  ;;  %v2022_v42 = vld [vmem:[%s3122_s8 + $0x10] sm:$0xff]   ;;  %v2023_v1 = vld [vmem:[%s3122_s8 + $0x8] sm:$0xff]   ;;  %v2024_v43 = vld [vmem:[%s3122_s8] sm:$0xff]  }
 0x225   : > { %v2046_v12 = vpop.eup %2045  ;;  %v836_v13 = vmul.f32 %v2044_v50, %v2466_v30  ;;  %v880_v3 = vadd.f32 %v2527_v48, %v857_v55 }
 0x226   : > { %1904 = vmatprep.mubr.msk.bf16.mxu1 %vm472_vm0, %v890_v51  ;;  %v879_v56 = vadd.f32 %v2527_v48, %v856_v54  ;;  %v835_v45 = vmul.f32 %v2046_v12, %v2469_v32 }
 0x227   : > { %v859_v8 = vmul.f32 %v2519_v24, %v836_v13 }
 0x228   : > { %v2048_v57 = vpop.eup %2047  ;;  %v891_v58 = vpack.c.bf16 %v879_v56, %v878_v14  ;;  %v858_v63 = vmul.f32 %v2519_v24, %v835_v45 }
 0x229   : > { %v2050_v2 = vpop.eup %2049  ;;  %v838_v10 = vmul.f32 %v2048_v57, %v2481_v47  ;;  %v882_v19 = vadd.f32 %v2527_v48, %v859_v8 }
 0x22a   : > { %1905 = vmatmul.mubr.msk.bf16.gmra.mxu1 %vm472_vm0, %v891_v58  ;;  %v881_v4 = vadd.f32 %v2527_v48, %v858_v63  ;;  %v837_v7 = vmul.f32 %v2050_v2, %v2478_v46 }
 0x22b   : > { %v861_v46 = vmul.f32 %v2519_v24, %v838_v10 }
 0x22c   : > { %v2052_v32 = vpop.eup %2051  ;;  %v892_v11 = vpack.c.bf16 %v881_v4, %v880_v3  ;;  %v860_v30 = vmul.f32 %v2519_v24, %v837_v7 }
 0x22d   : > { %v2054_v15 = vpop.eup %2053  ;;  %v840_v18 = vmul.f32 %v2052_v32, %v2490_v60  ;;  %v884_v60 = vadd.f32 %v2527_v48, %v861_v46 }
 0x22e   : > { %1908 = vmatprep.mubr.msk.bf16.mxu1 %vm472_vm0, %v892_v11  ;;  %v883_v22 = vadd.f32 %v2527_v48, %v860_v30  ;;  %v839_v23 = vmul.f32 %v2054_v15, %v2493_v61 }
 0x22f   : > { %v863_v29 = vmul.f32 %v2519_v24, %v840_v18 }
 0x230   : > { %v2056_v44 = vpop.eup %2055  ;;  %v893_v53 = vpack.c.bf16 %v883_v22, %v882_v19  ;;  %v862_v47 = vmul.f32 %v2519_v24, %v839_v23 }
 0x231   : > { %v841_v28 = vmul.f32 %v2056_v44, %v2502_v9  ;;  %v886_v61 = vadd.f32 %v2527_v48, %v863_v29  ;;  %v2017_v9 = vld [vmem:[%s3122_s8 + $0x38] sm:$0xff]  }
 0x232   : > { %1909 = vmatmul.mubr.msk.bf16.gmra.mxu1 %vm472_vm0, %v893_v53  ;;  %v885_v33 = vadd.f32 %v2527_v48, %v862_v47  ;;  %1916 = vmatprep.subr.bf16.mxu0 %v2017_v9 }
 0x233   : > { %v864_v34 = vmul.f32 %v2519_v24, %v841_v28  ;;  %1948 = vmatprep.subr.bf16.mxu1 %v2017_v9  ;;  %1917 = vmatpush3.bf16.msra.mxu0 %v2017_v9  ;;  %v2018_v24 = vld [vmem:[%s3122_s8 + $0x30] sm:$0xff]  }
 0x234   : > { %v894_v35 = vpack.c.bf16 %v885_v33, %v884_v60  ;;  %1956 = vmatpush3.bf16.msra.mxu1 %v2017_v9  ;;  %1918 = vmatprep.subr.bf16.mxu0 %v2018_v24 }
 0x235   : > { %v887_v36 = vadd.f32 %v2527_v48, %v864_v34  ;;  %1949 = vmatprep.subr.bf16.mxu1 %v2018_v24  ;;  %v2019_v48 = vld [vmem:[%s3122_s8 + $0x28] sm:$0xff]  }
 0x236   : > { %1912 = vmatprep.mubr.msk.bf16.mxu1 %vm472_vm0, %v894_v35 }
 0x237   : > { %v895_v38 = vpack.c.bf16 %v887_v36, %v886_v61  ;;  %1919 = vmatpush3.bf16.msra.mxu0 %v2018_v24 }
 0x238   : > { %1957 = vmatpush3.bf16.msra.mxu1 %v2018_v24  ;;  %1920 = vmatprep.subr.bf16.mxu0 %v2019_v48 }
 0x239   : > { %1950 = vmatprep.subr.bf16.mxu1 %v2019_v48 }
 0x23a   : > { %1913 = vmatmul.mubr.msk.bf16.gmra.mxu1 %vm472_vm0, %v895_v38 }
 0x23b   : > { %1921 = vmatpush3.bf16.msra.mxu0 %v2019_v48 }
 0x23c   : > { %1958 = vmatpush3.bf16.msra.mxu1 %v2019_v48  ;;  %1922 = vmatprep.subr.bf16.mxu0 %v2020_v39 }
 0x23d   : > { %1951 = vmatprep.subr.bf16.mxu1 %v2020_v39 }
 0x23f   : > { %1923 = vmatpush3.bf16.msra.mxu0 %v2020_v39 }
 0x240   : > { %1959 = vmatpush3.bf16.msra.mxu1 %v2020_v39  ;;  %1924 = vmatprep.subr.bf16.mxu0 %v2021_v37 }
 0x241   : > { %1952 = vmatprep.subr.bf16.mxu1 %v2021_v37 }
 0x243   : > { %1925 = vmatpush3.bf16.msra.mxu0 %v2021_v37 }
 0x244   : > { %1960 = vmatpush3.bf16.msra.mxu1 %v2021_v37  ;;  %1926 = vmatprep.subr.bf16.mxu0 %v2022_v42 }
 0x245   : > { %1953 = vmatprep.subr.bf16.mxu1 %v2022_v42 }
 0x247   : > { %1927 = vmatpush3.bf16.msra.mxu0 %v2022_v42 }
 0x248   : > { %1961 = vmatpush3.bf16.msra.mxu1 %v2022_v42  ;;  %1928 = vmatprep.subr.bf16.mxu0 %v2023_v1 }
 0x249   : > { %1954 = vmatprep.subr.bf16.mxu1 %v2023_v1 }
 0x24b   : > { %1929 = vmatpush3.bf16.msra.mxu0 %v2023_v1 }
 0x24c   : > { %1962 = vmatpush3.bf16.msra.mxu1 %v2023_v1  ;;  %1930 = vmatprep.subr.bf16.mxu0 %v2024_v43 }
 0x24d   : > { %1955 = vmatprep.subr.bf16.mxu1 %v2024_v43 }
 0x24f   : > { %1931 = vmatpush3.bf16.msra.mxu0 %v2024_v43 }
 0x250   : > { %1963 = vmatpush3.bf16.msra.mxu1 %v2024_v43 }
 0x2e2   : > { %v1902_v50 = vpop.f32.mrf.mxu1 }
 0x2e3   : > { %v2611_v51 = vadd.f32 %v1902_v50, %v2608_v0 }
 0x2e4   : > { %v977_v54 = vpop.f32.mrf.mxu1 }
 0x2e5   : > { %v2614_v12 = vmul.f32 0.70710677, %v2611_v51  ;;  %v2617_v55 = vadd.f32 %v2608_v0, %v977_v54 }
 0x2e6   : > { %v1903_v14 = vpop.f32.mrf.mxu1 }
 0x2e7   : > { %v1058_v56 = vand.u32 2147483647, %v2614_v12  ;;  %v2621_v45 = vmul.f32 0.70710677, %v2617_v55  ;;  %v2624_v13 = vadd.f32 %v1903_v14, %v2608_v0  ;;  %vm1378_vm1 = vcmp.ge.f32.partialorder %v2614_v12, 0.0 }
 0x2e8   : > { %v980_v57 = vpop.f32.mrf.mxu1 }
 0x2e9   : > { %v1074_v58 = vmul.f32 0.3275911, %v1058_v56  ;;  %v2627_v63 = vand.u32 2147483647, %v2621_v45  ;;  %v2630_v2 = vmul.f32 0.70710677, %v2624_v13  ;;  %v2633_v3 = vadd.f32 %v2608_v0, %v980_v57 }
 0x2ea   : > { %v1906_v4 = vpop.f32.mrf.mxu1  ;;  %v1282_v37 = vsub.f32 0.0, %v1058_v56  ;;  %vm1376_vm2 = vcmp.ge.f32.partialorder %v2621_v45, 0.0 }
 0x2eb   : > { %v1090_v7 = vadd.f32 1.0, %v1074_v58  ;;  %v1072_v8 = vmul.f32 0.3275911, %v2627_v63  ;;  %v2637_v10 = vand.u32 2147483647, %v2630_v2  ;;  %v2647_v19 = vadd.f32 %v1906_v4, %v2608_v0 }
 0x2ec   : > { %v2640_v32 = vmul.f32 0.70710677, %v2633_v3  ;;  %v993_v11 = vpop.f32.mrf.mxu1  ;;  %vm1379_vm3 = vcmp.ge.f32.partialorder %v2630_v2, 0.0 }
 0x2ed   : > { %2057 = vrcp.f32 %v1090_v7  ;;  %v1088_v30 = vadd.f32 1.0, %v1072_v8  ;;  %v1075_v15 = vmul.f32 0.3275911, %v2637_v10  ;;  %v2650_v22 = vadd.f32 %v2608_v0, %v993_v11 }
 0x2ee   : > { %v2644_v18 = vand.u32 2147483647, %v2640_v32  ;;  %v1907_v44 = vpop.f32.mrf.mxu1  ;;  %v2654_v53 = vmul.f32 0.70710677, %v2647_v19  ;;  %v1298_v8 = vmul.f32 %v1282_v37, %v1058_v56  ;;  %v1280_v11 = vsub.f32 0.0, %v2627_v63 }
 0x2ef   : > { %2059 = vrcp.f32 %v1088_v30  ;;  %v1091_v23 = vadd.f32 1.0, %v1075_v15  ;;  %v2657_v28 = vmul.f32 0.70710677, %v2650_v22  ;;  %v2666_v33 = vadd.f32 %v1907_v44, %v2608_v0 }
 0x2f0   : > { %v1073_v46 = vmul.f32 0.3275911, %v2644_v18  ;;  %v2660_v29 = vand.u32 2147483647, %v2654_v53  ;;  %v996_v34 = vpop.f32.mrf.mxu1  ;;  %vm1377_vm4 = vcmp.ge.f32.partialorder %v2640_v32, 0.0  ;;  %vm1382_vm7 = vcmp.ge.f32.partialorder %v2654_v53, 0.0 }
 0x2f1   : > { %2061 = vrcp.f32 %v1091_v23  ;;  %v2663_v60 = vand.u32 2147483647, %v2657_v28  ;;  %v2671_v36 = vmul.f32 0.70710677, %v2666_v33  ;;  %v2674_v9 = vadd.f32 %v2608_v0, %v996_v34 }
 0x2f2   : > { %v1089_v47 = vadd.f32 1.0, %v1073_v46  ;;  %v1078_v35 = vmul.f32 0.3275911, %v2660_v29  ;;  %v1910_v39 = vpop.f32.mrf.mxu1  ;;  %v1286_v52 = vsub.f32 0.0, %v2660_v29  ;;  %vm1380_vm6 = vcmp.ge.f32.partialorder %v2657_v28, 0.0 }
 0x2f3   : > { %v1076_v61 = vmul.f32 0.3275911, %v2663_v60  ;;  %v2677_v48 = vand.u32 2147483647, %v2671_v36  ;;  %v2680_v42 = vmul.f32 0.70710677, %v2674_v9  ;;  %v2690_v57 = vadd.f32 %v1910_v39, %v2608_v0 }
 0x2f4   : > { %2063 = vrcp.f32 %v1089_v47  ;;  %v1094_v38 = vadd.f32 1.0, %v1078_v35  ;;  %v1009_v58 = vpop.f32.mrf.mxu1  ;;  %v1296_v39 = vmul.f32 %v1280_v11, %v2627_v63  ;;  %v1284_v6 = vsub.f32 0.0, %v2663_v60 }
 0x2f5   : > { %v1092_v24 = vadd.f32 1.0, %v1076_v61  ;;  %v1079_v43 = vmul.f32 0.3275911, %v2677_v48  ;;  %v2687_v54 = vand.u32 2147483647, %v2680_v42  ;;  %v2704_v34 = vadd.f32 %v2608_v0, %v1009_v58 }
 0x2f6   : > { %2065 = vrcp.f32 %v1094_v38  ;;  %v2698_v23 = vmul.f32 0.70710677, %v2690_v57  ;;  %v1312_v27 = vmul.f32 1.442695, %v1296_v39  ;;  %vm1381_vm5 = vcmp.ge.f32.partialorder %v2680_v42, 0.0 }
 0x2f7   : > { %2067 = vrcp.f32 %v1092_v24  ;;  %v1095_v14 = vadd.f32 1.0, %v1079_v43  ;;  %v1077_v30 = vmul.f32 0.3275911, %v2687_v54  ;;  %v1316_v24 = vmul.f32 1.442695, %v1298_v8 }
 0x2f8   : > { %v2708_v61 = vand.u32 2147483647, %v2698_v23  ;;  %v1285_v39 = vsub.f32 0.0, %v2687_v54  ;;  %vm1383_vm8 = vcmp.ge.f32.partialorder %v2671_v36, 0.0  ;;  %vm1386_vm9 = vcmp.ge.f32.partialorder %v2698_v23, 0.0 }
 0x2f9   : > { %2069 = vrcp.f32 %v1095_v14  ;;  %v1093_v47 = vadd.f32 1.0, %v1077_v30  ;;  %v1283_v14 = vsub.f32 0.0, %v2637_v10  ;;  %v1281_v30 = vsub.f32 0.0, %v2644_v18 }
 0x2fa   : > { %v2682_v1 = vpop.eup %2057  ;;  %v1082_v58 = vmul.f32 0.3275911, %v2708_v61 }
 0x2fb   : > { %v1138_v50 = vmul.f32 1.0614054, %v2682_v1  ;;  %2071 = vrcp.f32 %v1093_v47  ;;  %v1299_v20 = vmul.f32 %v1283_v14, %v2637_v10 }
 0x2fc   : > { %v2692_v4 = vpop.eup %2059  ;;  %2073 = vpow2.f32 %v1316_v24  ;;  %v1098_v47 = vadd.f32 1.0, %v1082_v58 }
 0x2fd   : > { %v1154_v7 = vadd.f32 -1.4531521, %v1138_v50  ;;  %v1136_v15 = vmul.f32 1.0614054, %v2692_v4  ;;  %v1318_v59 = vmul.f32 1.442695, %v1299_v20 }
 0x2fe   : > { %v2700_v46 = vpop.eup %2061  ;;  %2075 = vrcp.f32 %v1098_v47 }
 0x2ff   : > { %v1170_v44 = vmul.f32 %v2682_v1, %v1154_v7  ;;  %v1152_v35 = vadd.f32 -1.4531521, %v1136_v15  ;;  %v1139_v56 = vmul.f32 1.0614054, %v2700_v46  ;;  %v2719_v15 = vmul.f32 0.70710677, %v2704_v34 }
 0x300   : > { %2077 = vpow2.f32 %v1312_v27 }
 0x301   : > { %v1186_v38 = vadd.f32 1.4214138, %v1170_v44  ;;  %v2711_v37 = vpop.eup %2063  ;;  %v1168_v43 = vmul.f32 %v2692_v4, %v1152_v35  ;;  %v1155_v50 = vadd.f32 -1.4531521, %v1139_v56  ;;  %v2724_v35 = vand.u32 2147483647, %v2719_v15 }
 0x302   : > { %v1137_v7 = vmul.f32 1.0614054, %v2711_v37  ;;  %vm1384_vm10 = vcmp.ge.f32.partialorder %v2719_v15, 0.0 }
 0x303   : > { %v1202_v8 = vmul.f32 %v2682_v1, %v1186_v38  ;;  %v1184_v63 = vadd.f32 1.4214138, %v1168_v43  ;;  %v1171_v11 = vmul.f32 %v2700_v46, %v1155_v50  ;;  %v2726_v56 = vpop.eup %2065  ;;  %v1297_v43 = vmul.f32 %v1281_v30, %v2644_v18 }
 0x304   : > { %v1153_v44 = vadd.f32 -1.4531521, %v1137_v7  ;;  %v2730_v5 = vpop.eup %2067  ;;  %v1142_v24 = vmul.f32 1.0614054, %v2726_v56  ;;  %v1080_v50 = vmul.f32 0.3275911, %v2724_v35 }
 0x305   : > { %v1200_v26 = vmul.f32 %v2692_v4, %v1184_v63  ;;  %v1187_v16 = vadd.f32 1.4214138, %v1171_v11  ;;  %v1218_v58 = vadd.f32 -0.28449672, %v1202_v8  ;;  %v1140_v7 = vmul.f32 1.0614054, %v2730_v5 }
 0x306   : > { %v1169_v38 = vmul.f32 %v2711_v37, %v1153_v44  ;;  %v1158_v14 = vadd.f32 -1.4531521, %v1142_v24  ;;  %v1096_v18 = vadd.f32 1.0, %v1080_v50  ;;  %v2740_v30 = vpop.eup %2069  ;;  %v1314_v62 = vmul.f32 1.442695, %v1297_v43 }
 0x307   : > { %v1203_v63 = vmul.f32 %v2700_v46, %v1187_v16  ;;  %v1216_v11 = vadd.f32 -0.28449672, %v1200_v26  ;;  %v1156_v44 = vadd.f32 -1.4531521, %v1140_v7  ;;  %v1300_v16 = vmul.f32 %v1284_v6, %v2663_v60 }
 0x308   : > { %v1185_v10 = vadd.f32 1.4214138, %v1169_v38  ;;  %v1174_v49 = vmul.f32 %v2726_v56, %v1158_v14  ;;  %v1143_v47 = vmul.f32 1.0614054, %v2740_v30  ;;  %v1234_v26 = vmul.f32 %v2682_v1, %v1218_v58  ;;  %v2750_v20 = vpop.eup %2071 }
 0x309   : > { %v1172_v40 = vmul.f32 %v2730_v5, %v1156_v44  ;;  %v1219_v27 = vadd.f32 -0.28449672, %v1203_v63  ;;  %v1301_v38 = vmul.f32 %v1285_v39, %v2687_v54  ;;  %2079 = vrcp.f32 %v1096_v18 }
 0x30a   : > { %v1201_v8 = vmul.f32 %v2711_v37, %v1185_v10  ;;  %v1232_v43 = vmul.f32 %v2692_v4, %v1216_v11  ;;  %v1159_v7 = vadd.f32 -1.4531521, %v1143_v47  ;;  %2081 = vpow2.f32 %v1318_v59  ;;  %v2074_v11 = vpop.eup %2073 }
 0x30b   : > { %v1188_v50 = vadd.f32 1.4214138, %v1172_v40  ;;  %v1190_v10 = vadd.f32 1.4214138, %v1174_v49  ;;  %v1287_v14 = vsub.f32 0.0, %v2677_v48  ;;  %2083 = vpow2.f32 %v1314_v62 }
 0x30c   : > { %v1217_v24 = vadd.f32 -0.28449672, %v1201_v8  ;;  %v1141_v6 = vmul.f32 1.0614054, %v2750_v20  ;;  %v1302_v60 = vmul.f32 %v1286_v52, %v2660_v29  ;;  %v1175_v54 = vmul.f32 %v2740_v30, %v1159_v7 }
 0x30d   : > { %v1204_v58 = vmul.f32 %v2730_v5, %v1188_v50  ;;  %v1250_v39 = vadd.f32 0.2548296, %v1234_v26  ;;  %v1320_v63 = vmul.f32 1.442695, %v1300_v16  ;;  %v1322_v44 = vmul.f32 1.442695, %v1301_v38  ;;  %v2765_v38 = vpop.eup %2075 }
 0x30e   : > { %v1248_v18 = vadd.f32 0.2548296, %v1232_v43  ;;  %v1235_v40 = vmul.f32 %v2700_v46, %v1219_v27  ;;  %v1233_v49 = vmul.f32 %v2711_v37, %v1217_v24  ;;  %v1191_v59 = vadd.f32 1.4214138, %v1175_v54  ;;  %v2078_v7 = vpop.eup %2077 }
 0x30f   : > { %v1206_v8 = vmul.f32 %v2726_v56, %v1190_v10  ;;  %v1303_v62 = vmul.f32 %v1287_v14, %v2677_v48  ;;  %v1157_v47 = vadd.f32 -1.4531521, %v1141_v6  ;;  %v1324_v52 = vmul.f32 1.442695, %v1302_v60 }
 0x310   : > { %v1220_v29 = vadd.f32 -0.28449672, %v1204_v58  ;;  %v1266_v50 = vmul.f32 %v2682_v1, %v1250_v39  ;;  %2085 = vpow2.f32 %v1320_v63  ;;  %v1207_v16 = vmul.f32 %v2740_v30, %v1191_v59 }
 0x311   : > { %v1173_v26 = vmul.f32 %v2750_v20, %v1157_v47  ;;  %v1264_v27 = vmul.f32 %v2692_v4, %v1248_v18  ;;  %v1251_v43 = vadd.f32 0.2548296, %v1235_v40  ;;  %v1249_v24 = vadd.f32 0.2548296, %v1233_v49  ;;  %v1911_v40 = vpop.f32.mrf.mxu1 }
 0x312   : > { %2087 = vpow2.f32 %v1322_v44  ;;  %v1222_v10 = vadd.f32 -0.28449672, %v1206_v8  ;;  %v1326_v48 = vmul.f32 1.442695, %v1303_v62  ;;  %v2769_v14 = vmul.f32 0.5, %v2611_v51 }
 0x313   : > { %v2772_v1 = vmul.f32 0.5, %v2617_v55  ;;  %v1236_v6 = vmul.f32 %v2730_v5, %v1220_v29  ;;  %v1189_v60 = vadd.f32 1.4214138, %v1173_v26  ;;  %v1346_v58 = vmul.f32 %v2074_v11, %v1266_v50 }
 0x314   : > { %2089 = vpow2.f32 %v1324_v52  ;;  %v1223_v54 = vadd.f32 -0.28449672, %v1207_v16  ;;  %v1146_v4 = vmul.f32 1.0614054, %v2765_v38  ;;  %v1344_v63 = vmul.f32 %v2078_v7, %v1264_v27 }
 0x315   : > { %v1267_v44 = vmul.f32 %v2700_v46, %v1251_v43  ;;  %v1265_v18 = vmul.f32 %v2711_v37, %v1249_v24  ;;  %v1205_v51 = vmul.f32 %v2750_v20, %v1189_v60  ;;  %v1238_v55 = vmul.f32 %v2726_v56, %v1222_v10  ;;  %v1012_v24 = vpop.f32.mrf.mxu1 }
 0x316   : > { %v2776_v39 = vpop.eup %2079  ;;  %2091 = vpow2.f32 %v1326_v48  ;;  %v1290_v49 = vsub.f32 0.0, %v2708_v61  ;;  %v2786_v8 = vmul.f32 0.5, %v2624_v13  ;;  %v2789_v46 = vmul.f32 0.5, %v2633_v3 }
 0x317   : > { %v1144_v11 = vmul.f32 1.0614054, %v2776_v39  ;;  %v2082_v59 = vpop.eup %2081  ;;  %v1252_v37 = vadd.f32 0.2548296, %v1236_v6  ;;  %v1221_v62 = vadd.f32 -0.28449672, %v1205_v51  ;;  %v1239_v50 = vmul.f32 %v2740_v30, %v1223_v54 }
 0x318   : > { %v2084_v47 = vpop.eup %2083  ;;  %v1362_v52 = vsub.f32 1.0, %v1346_v58  ;;  %v2793_v29 = vmul.f32 0.5, %v2647_v19  ;;  %v1162_v16 = vadd.f32 -1.4531521, %v1146_v4  ;;  %v1360_v26 = vsub.f32 1.0, %v1344_v63 }
 0x319   : > { %v1347_v27 = vmul.f32 %v2082_v59, %v1267_v44  ;;  %v1345_v43 = vmul.f32 %v2084_v47, %v1265_v18  ;;  %v1237_v13 = vmul.f32 %v2750_v20, %v1221_v62  ;;  %v1254_v3 = vadd.f32 0.2548296, %v1238_v55 }
 0x31a   : > { %v2798_v7 = vmul.f32 0.5, %v2650_v22  ;;  %v1306_v10 = vmul.f32 %v1290_v49, %v2708_v61  ;;  %v1160_v48 = vadd.f32 -1.4531521, %v1144_v11  ;;  %v1268_v6 = vmul.f32 %v2730_v5, %v1252_v37 }
 0x31b   : > { %v2803_v19 = vmul.f32 0.5, %v2666_v33  ;;  %v1253_v60 = vadd.f32 0.2548296, %v1237_v13  ;;  %v2806_v58 = vadd.f32 %v1911_v40, %v2608_v0  ;;  %v1394_v54 = vsub.f32 0.0, %v1362_v52 }
 0x31c   : > { %v1255_v4 = vadd.f32 0.2548296, %v1239_v50  ;;  %v1178_v22 = vmul.f32 %v2765_v38, %v1162_v16  ;;  %v2812_v61 = vadd.f32 %v2608_v0, %v1012_v24  ;;  %v1392_v5 = vsub.f32 0.0, %v1360_v26 }
 0x31d   : > { %v2086_v63 = vpop.eup %2085  ;;  %v1363_v44 = vsub.f32 1.0, %v1347_v27  ;;  %v1361_v33 = vsub.f32 1.0, %v1345_v43  ;;  %v1269_v18 = vmul.f32 %v2750_v20, %v1253_v60  ;;  %v1270_v40 = vmul.f32 %v2726_v56, %v1254_v3 }
 0x31e   : > { %v2817_v55 = vmul.f32 0.5, %v2674_v9  ;;  %v1332_v49 = vmul.f32 1.442695, %v1306_v10  ;;  %v1176_v11 = vmul.f32 %v2776_v39, %v1160_v48  ;;  %v1348_v59 = vmul.f32 %v2086_v63, %v1268_v6  ;;  %v1914_v9 = vpop.f32.mrf.mxu1 }
 0x31f   : > { %v2088_v51 = vpop.eup %2087  ;;  %v1288_v62 = vsub.f32 0.0, %v2724_v35  ;;  %v2822_v47 = vmul.f32 0.70710677, %v2806_v58  ;;  %v1410_v50 = vsel %vm1378_vm1, %v1362_v52, %v1394_v54  ;;  %v1271_v20 = vmul.f32 %v2740_v30, %v1255_v4 }
 0x320   : > { %v1349_v37 = vmul.f32 %v2088_v51, %v1269_v18  ;;  %v1194_v16 = vadd.f32 1.4214138, %v1178_v22  ;;  %v2828_v56 = vmul.f32 0.70710677, %v2812_v61  ;;  %v1408_v43 = vsel %vm1376_vm2, %v1360_v26, %v1392_v5  ;;  %v1025_v63 = vpop.f32.mrf.mxu1 }
 0x321   : > { %v2090_v27 = vpop.eup %2089  ;;  %v1395_v13 = vsub.f32 0.0, %v1363_v44  ;;  %v1393_v24 = vsub.f32 0.0, %v1361_v33  ;;  %v2834_v3 = vand.u32 2147483647, %v2822_v47  ;;  %v1192_v52 = vadd.f32 1.4214138, %v1176_v11 }
 0x322   : > { %v2836_v12 = vmul.f32 %v2090_v27, %v1270_v40  ;;  %v1365_v30 = vsub.f32 1.0, %v1349_v37  ;;  %v2840_v10 = vand.u32 2147483647, %v2828_v56  ;;  %v1364_v6 = vsub.f32 1.0, %v1348_v59 }
 0x323   : > { %v2092_v48 = vpop.eup %2091  ;;  %2093 = vpow2.f32 %v1332_v49  ;;  %v1304_v45 = vmul.f32 %v1288_v62, %v2724_v35  ;;  %v1083_v26 = vmul.f32 0.3275911, %v2834_v3  ;;  %v1442_v60 = vadd.f32 1.0, %v1410_v50  ;;  %v1915_v50 = vpop.f32.mrf.mxu1 }
 0x324   : > { %v1351_v54 = vmul.f32 %v2092_v48, %v1271_v20  ;;  %v1210_v4 = vmul.f32 %v2765_v38, %v1194_v16  ;;  %v1081_v22 = vmul.f32 0.3275911, %v2840_v10  ;;  %v1440_v5 = vadd.f32 1.0, %v1408_v43 }
 0x325   : > { %v1411_v18 = vsel %vm1379_vm3, %v1363_v44, %v1395_v13  ;;  %v1409_v51 = vsel %vm1377_vm4, %v1361_v33, %v1393_v24  ;;  %v1099_v40 = vadd.f32 1.0, %v1083_v26  ;;  %v1366_v49 = vsub.f32 1.0, %v2836_v12 }
 0x326   : > { %v1397_v35 = vsub.f32 0.0, %v1365_v30  ;;  %v1208_v11 = vmul.f32 %v2776_v39, %v1192_v52  ;;  %v1097_v59 = vadd.f32 1.0, %v1081_v22  ;;  %v1396_v37 = vsub.f32 0.0, %v1364_v6 }
 0x327   : > { %v1328_v62 = vmul.f32 1.442695, %v1304_v45  ;;  %2095 = vrcp.f32 %v1099_v40  ;;  %v2855_v2 = vadd.f32 %v1914_v9, %v2608_v0  ;;  %v1367_v44 = vsub.f32 1.0, %v1351_v54 }
 0x328   : > { %v1226_v32 = vadd.f32 -0.28449672, %v1210_v4  ;;  %2097 = vrcp.f32 %v1097_v59  ;;  %v2858_v33 = vadd.f32 %v2608_v0, %v1025_v63  ;;  %v1458_v20 = vmul.f32 %v1442_v60, %v2769_v14 }
 0x329   : > { %v1456_v16 = vmul.f32 %v1440_v5, %v2772_v1  ;;  %v1443_v27 = vadd.f32 1.0, %v1411_v18  ;;  %v2863_v43 = vmul.f32 0.70710677, %v2855_v2  ;;  %v1441_v13 = vadd.f32 1.0, %v1409_v51 }
 0x32a   : > { %v1413_v9 = vsel %vm1381_vm5, %v1365_v30, %v1397_v35  ;;  %v1224_v24 = vadd.f32 -0.28449672, %v1208_v11  ;;  %v2868_v12 = vmul.f32 0.70710677, %v2858_v33  ;;  %v1398_v52 = vsub.f32 0.0, %v1366_v49  ;;  %v1028_v35 = vpop.f32.mrf.mxu1 }
 0x32b   : > { %v1412_v48 = vsel %vm1380_vm6, %v1364_v6, %v1396_v37  ;;  %v2873_v14 = vand.u32 2147483647, %v2863_v43  ;;  %v2876_v1 = vadd.f32 %v1915_v50, %v2608_v0  ;;  %v1399_v45 = vsub.f32 0.0, %v1367_v44 }
 0x32c   : > { %v1242_v26 = vmul.f32 %v2765_v38, %v1226_v32  ;;  %2099 = vpow2.f32 %v1328_v62  ;;  %v2880_v42 = vand.u32 2147483647, %v2868_v12  ;;  %v1445_v30 = vadd.f32 1.0, %v1413_v9 }
 0x32d   : > { %v1291_v60 = vsub.f32 0.0, %v2834_v3  ;;  %v1086_v54 = vmul.f32 0.3275911, %v2873_v14  ;;  %v2885_v28 = vmul.f32 0.70710677, %v2876_v1  ;;  %v1459_v6 = vmul.f32 %v1443_v27, %v2786_v8 }
 0x32e   : > { %v1240_v4 = vmul.f32 %v2776_v39, %v1224_v24  ;;  %v1289_v22 = vsub.f32 0.0, %v2840_v10  ;;  %v1084_v63 = vmul.f32 0.3275911, %v2880_v42  ;;  %v1457_v5 = vmul.f32 %v1441_v13, %v2789_v46 }
 0x32f   : > { %v1444_v18 = vadd.f32 1.0, %v1412_v48  ;;  %v1102_v51 = vadd.f32 1.0, %v1086_v54  ;;  %v2893_v40 = vand.u32 2147483647, %v2885_v28  ;;  %v1414_v59 = vsel %vm1382_vm7, %v1366_v49, %v1398_v52 }
 0x330   : > { %v2094_v11 = vpop.eup %2093  ;;  %v1415_v8 = vsel %vm1383_vm8, %v1367_v44, %v1399_v45  ;;  %v1258_v37 = vadd.f32 0.2548296, %v1242_v26  ;;  %v1100_v62 = vadd.f32 1.0, %v1084_v63  ;;  %v1461_v32 = vmul.f32 %v1445_v30, %v2817_v55 }
 0x331   : > { %v1307_v50 = vmul.f32 %v1291_v60, %v2834_v3  ;;  %2101 = vrcp.f32 %v1102_v51  ;;  %v1087_v46 = vmul.f32 0.3275911, %v2893_v40  ;;  %v1256_v27 = vadd.f32 0.2548296, %v1240_v4 }
 0x332   : > { %v1305_v13 = vmul.f32 %v1289_v22, %v2840_v10  ;;  %2103 = vrcp.f32 %v1100_v62  ;;  %v2904_v9 = vadd.f32 %v2608_v0, %v1028_v35  ;;  %v1473_v53 = vpack.c.bf16 %v1459_v6, %v1458_v20 }
 0x333   : > { %v1460_v36 = vmul.f32 %v1444_v18, %v2798_v7  ;;  %v1103_v49 = vadd.f32 1.0, %v1087_v46  ;;  %v1472_v44 = vpack.c.bf16 %v1457_v5, %v1456_v16  ;;  %v1446_v55 = vadd.f32 1.0, %v1414_v59 }
 0x334   : > { %v2907_v24 = vpop.eup %2095  ;;  %v1447_v52 = vadd.f32 1.0, %v1415_v8  ;;  %v1274_v3 = vmul.f32 %v2765_v38, %v1258_v37  ;;  %v2911_v48 = vmul.f32 0.70710677, %v2904_v9  ;;  %v1334_v0 = vmul.f32 1.442695, %v1307_v50 }
 0x335   : > { %v2913_v45 = vpop.eup %2097  ;;  %v1147_v10 = vmul.f32 1.0614054, %v2907_v24  ;;  %2105 = vrcp.f32 %v1103_v49  ;;  %1932 = vmatprep.mubr.bf16.mxu0 %v1472_v44  ;;  %v1474_v20 = vpack.c.bf16 %v1461_v32, %v1460_v36  ;;  %v1272_v7 = vmul.f32 %v2776_v39, %v1256_v27 }
 0x336   : > { %v1145_v16 = vmul.f32 1.0614054, %v2913_v45  ;;  %v1330_v26 = vmul.f32 1.442695, %v1305_v13  ;;  %v1069_v30 = vand.u32 2147483647, %v2911_v48  ;;  %1933 = vmatmul.mubr.bf16.vlgmr.msra.gmra.mxu0 %v1473_v53  ;;  %v1462_v54 = vmul.f32 %v1446_v55, %v2793_v29 }
 0x337   : > { %v1163_v38 = vadd.f32 -1.4531521, %v1147_v10  ;;  %v1292_v60 = vsub.f32 0.0, %v2880_v42  ;;  %1936 = vmatprep.mubr.bf16.mxu0 %v1474_v20  ;;  %v1463_v6 = vmul.f32 %v1447_v52, %v2803_v19  ;;  %v2922_v5 = vmul.f32 %v2094_v11, %v1274_v3 }
 0x338   : > { %v1161_v4 = vadd.f32 -1.4531521, %v1145_v16  ;;  %v1085_v22 = vmul.f32 0.3275911, %v1069_v30  ;;  %2107 = vpow2.f32 %v1334_v0  ;;  %v1294_v18 = vsub.f32 0.0, %v2873_v14 }
 0x339   : > { %v2100_v63 = vpop.eup %2099  ;;  %v1179_v39 = vmul.f32 %v2907_v24, %v1163_v38  ;;  %2109 = vpow2.f32 %v1330_v26  ;;  %v1308_v29 = vmul.f32 %v1292_v60, %v2880_v42  ;;  %v1295_v19 = vsub.f32 0.0, %v2893_v40 }
 0x33a   : > { %v2926_v51 = vmul.f32 %v2100_v63, %v1272_v7  ;;  %v1177_v35 = vmul.f32 %v2913_v45, %v1161_v4  ;;  %v1101_v59 = vadd.f32 1.0, %v1085_v22  ;;  %v1475_v11 = vpack.c.bf16 %v1463_v6, %v1462_v54 }
 0x33b   : > { %v1195_v8 = vadd.f32 1.4214138, %v1179_v39  ;;  %v1310_v32 = vmul.f32 %v1294_v18, %v2873_v14  ;;  %v1370_v46 = vsub.f32 1.0, %v2922_v5  ;;  %v1336_v49 = vmul.f32 1.442695, %v1308_v29 }
 0x33c   : > { %v1193_v37 = vadd.f32 1.4214138, %v1177_v35  ;;  %2111 = vrcp.f32 %v1101_v59  ;;  %v1368_v27 = vsub.f32 1.0, %v2926_v51  ;;  %v1311_v44 = vmul.f32 %v1295_v19, %v2893_v40 }
 0x33d   : > { %v1211_v62 = vmul.f32 %v2907_v24, %v1195_v8  ;;  %v1293_v52 = vsub.f32 0.0, %v1069_v30  ;;  %v2946_v3 = vmul.f32 0.5, %v2704_v34  ;;  %v1340_v20 = vmul.f32 1.442695, %v1310_v32 }
 0x33e   : > { %v2933_v50 = vpop.eup %2101  ;;  %v1209_v13 = vmul.f32 %v2913_v45, %v1193_v37  ;;  %1937 = vmatmul.mubr.bf16.gmra.mxu0 %v1475_v11  ;;  %v1402_v16 = vsub.f32 0.0, %v1370_v46  ;;  %v1400_v26 = vsub.f32 0.0, %v1368_v27  ;;  %v1342_v4 = vmul.f32 1.442695, %v1311_v44 }
 0x33f   : > { %v2938_v53 = vpop.eup %2103  ;;  %v1227_v42 = vadd.f32 -0.28449672, %v1211_v62  ;;  %v1150_v36 = vmul.f32 1.0614054, %v2933_v50  ;;  %2113 = vpow2.f32 %v1336_v49  ;;  %v1309_v63 = vmul.f32 %v1293_v52, %v1069_v30 }
 0x340   : > { %v1225_v14 = vadd.f32 -0.28449672, %v1209_v13  ;;  %v1148_v55 = vmul.f32 1.0614054, %v2938_v53  ;;  %2115 = vpow2.f32 %v1340_v20  ;;  %vm1387_vm11 = vcmp.ge.f32.partialorder %v2822_v47, 0.0 }
 0x341   : > { %v1243_v10 = vmul.f32 %v2907_v24, %v1227_v42  ;;  %v1166_v0 = vadd.f32 -1.4531521, %v1150_v36  ;;  %v1435_v35 = vmul.f32 0.5, %v2806_v58  ;;  %2117 = vpow2.f32 %v1342_v4 }
 0x342   : > { %v2949_v7 = vpop.eup %2105  ;;  %v1241_v38 = vmul.f32 %v2913_v45, %v1225_v14  ;;  %v1164_v40 = vadd.f32 -1.4531521, %v1148_v55  ;;  %v1338_v32 = vmul.f32 1.442695, %v1309_v63  ;;  %v1416_v58 = vsel %vm1384_vm10, %v1368_v27, %v1400_v26 }
 0x343   : > { %v1259_v60 = vadd.f32 0.2548296, %v1243_v10  ;;  %v1182_v54 = vmul.f32 %v2933_v50, %v1166_v0  ;;  %v1151_v6 = vmul.f32 1.0614054, %v2949_v7  ;;  %vm1385_vm12 = vcmp.ge.f32.partialorder %v2828_v56, 0.0 }
 0x344   : > { %v1257_v22 = vadd.f32 0.2548296, %v1241_v38  ;;  %v1180_v34 = vmul.f32 %v2938_v53, %v1164_v40  ;;  %v1448_v10 = vadd.f32 1.0, %v1416_v58  ;;  %2119 = vpow2.f32 %v1338_v32 }
 0x345   : > { %v1275_v5 = vmul.f32 %v2907_v24, %v1259_v60  ;;  %v1198_v39 = vadd.f32 1.4214138, %v1182_v54  ;;  %v1167_v18 = vadd.f32 -1.4531521, %v1151_v6  ;;  %v2108_v51 = vpop.eup %2107  ;;  %v1418_v24 = vsel %vm1386_vm9, %v1370_v46, %v1402_v16 }
 0x346   : > { %v1273_v59 = vmul.f32 %v2913_v45, %v1257_v22  ;;  %v1196_v8 = vadd.f32 1.4214138, %v1180_v34  ;;  %v2110_v29 = vpop.eup %2109  ;;  %v1450_v55 = vadd.f32 1.0, %v1418_v24  ;;  %v1433_v6 = vmul.f32 0.5, %v2812_v61 }
 0x347   : > { %v1355_v19 = vmul.f32 %v2108_v51, %v1275_v5  ;;  %v1214_v37 = vmul.f32 %v2933_v50, %v1198_v39  ;;  %v1183_v11 = vmul.f32 %v2949_v7, %v1167_v18  ;;  %v1434_v63 = vmul.f32 0.5, %v2690_v57 }
 0x348   : > { %v1353_v30 = vmul.f32 %v2110_v29, %v1273_v59  ;;  %v1212_v62 = vmul.f32 %v2938_v53, %v1196_v8  ;;  %v1464_v51 = vmul.f32 %v1448_v10, %v2946_v3  ;;  %vm1391_vm13 = vcmp.ge.f32.partialorder %v2885_v28, 0.0 }
 0x349   : > { %v2112_v13 = vpop.eup %2111  ;;  %v1371_v45 = vsub.f32 1.0, %v1355_v19  ;;  %v1230_v42 = vadd.f32 -0.28449672, %v1214_v37  ;;  %v1199_v36 = vadd.f32 1.4214138, %v1183_v11  ;;  %v1466_v29 = vmul.f32 %v1450_v55, %v1434_v63 }
 0x34a   : > { %v1369_v49 = vsub.f32 1.0, %v1353_v30  ;;  %v1228_v44 = vadd.f32 -0.28449672, %v1212_v62  ;;  %v1149_v14 = vmul.f32 1.0614054, %v2112_v13  ;;  %vm1388_vm14 = vcmp.ge.f32.partialorder %v2868_v12, 0.0 }
 0x34b   : > { %v1403_v52 = vsub.f32 0.0, %v1371_v45  ;;  %v1246_v23 = vmul.f32 %v2933_v50, %v1230_v42  ;;  %v1215_v46 = vmul.f32 %v2949_v7, %v1199_v36  ;;  %vm1390_vm15 = vcmp.ge.f32.partialorder %v2863_v43, 0.0 }
 0x34c   : > { %v1401_v0 = vsub.f32 0.0, %v1369_v49  ;;  %v1244_v20 = vmul.f32 %v2938_v53, %v1228_v44  ;;  %v1165_v15 = vadd.f32 -1.4531521, %v1149_v14  ;;  %v2114_v18 = vpop.eup %2113  ;;  %vm1389_vm1 = vcmp.ge.f32.partialorder %v2911_v48, 0.0 }
 0x34d   : > { %v1419_v27 = vsel %vm1387_vm11, %v1371_v45, %v1403_v52  ;;  %v1262_v16 = vadd.f32 0.2548296, %v1246_v23  ;;  %v1231_v26 = vadd.f32 -0.28449672, %v1215_v46  ;;  %v2116_v8 = vpop.eup %2115  ;;  %v1437_v12 = vmul.f32 0.5, %v2904_v9 }
 0x34e   : > { %v1451_v38 = vadd.f32 1.0, %v1419_v27  ;;  %v1417_v40 = vsel %vm1385_vm12, %v1369_v49, %v1401_v0  ;;  %v1260_v60 = vadd.f32 0.2548296, %v1244_v20  ;;  %v1181_v54 = vmul.f32 %v2112_v13, %v1165_v15  ;;  %v2118_v24 = vpop.eup %2117 }
 0x34f   : > { %v1449_v4 = vadd.f32 1.0, %v1417_v40  ;;  %v1278_v22 = vmul.f32 %v2933_v50, %v1262_v16  ;;  %v1247_v34 = vmul.f32 %v2949_v7, %v1231_v26  ;;  %v1436_v15 = vmul.f32 0.5, %v2858_v33  ;;  %v2995_v33 = vld [vmem:[%s3123_s9] ss:$0 sm:$0xff] }
 0x350   : > { %v1467_v47 = vmul.f32 %v1451_v38, %v1435_v35  ;;  %v1276_v5 = vmul.f32 %v2938_v53, %v1260_v60  ;;  %v1197_v39 = vadd.f32 1.4214138, %v1181_v54  ;;  %v1438_v43 = vmul.f32 0.5, %v2855_v2 }
 0x351   : > { %v1465_v56 = vmul.f32 %v1449_v4, %v1433_v6  ;;  %v1263_v59 = vadd.f32 0.2548296, %v1247_v34  ;;  %v1358_v37 = vmul.f32 %v2116_v8, %v1278_v22  ;;  %v2120_v42 = vpop.eup %2119  ;;  %v3150_v8 = vld [vmem:[#allocation7_spill] sm:$0xff] }
 0x352   : > { %v1356_v19 = vmul.f32 %v2114_v18, %v1276_v5  ;;  %v1213_v61 = vmul.f32 %v2112_v13, %v1197_v39  ;;  %v1477_v30 = vpack.c.bf16 %v1467_v47, %v1466_v29 }
 0x353   : > { %v1279_v50 = vmul.f32 %v2949_v7, %v1263_v59  ;;  %v1476_v11 = vpack.c.bf16 %v1465_v56, %v1464_v51  ;;  %v1374_v32 = vsub.f32 1.0, %v1358_v37  ;;  %v3149_v51 = vld [vmem:[#allocation5_spill] sm:$0xff] }
 0x354   : > { %v1229_v57 = vadd.f32 -0.28449672, %v1213_v61  ;;  %v1372_v53 = vsub.f32 1.0, %v1356_v19  ;;  %v3151_v61 = vld [vmem:[#allocation6_spill] sm:$0xff] }
 0x355   : > { %v1359_v35 = vmul.f32 %v2118_v24, %v1279_v50  ;;  %1940 = vmatprep.mubr.bf16.mxu1 %v1476_v11  ;;  %v1406_v44 = vsub.f32 0.0, %v1374_v32  ;;  %v3152_v24 = vld [vmem:[#allocation9_spill] sm:$0xff] }
 0x356   : > { %v1245_v62 = vmul.f32 %v2112_v13, %v1229_v57  ;;  %1941 = vmatmul.mubr.bf16.vlgmr.msra.gmra.mxu1 %v1477_v30  ;;  %v1404_v36 = vsub.f32 0.0, %v1372_v53 }
 0x357   : > { %v1375_v3 = vsub.f32 1.0, %v1359_v35  ;;  %v1422_v23 = vsel %vm1390_vm15, %v1374_v32, %v1406_v44 }
 0x358   : > { %v1261_v58 = vadd.f32 0.2548296, %v1245_v62  ;;  %v1420_v55 = vsel %vm1388_vm14, %v1372_v53, %v1404_v36  ;;  %v1454_v20 = vadd.f32 1.0, %v1422_v23  ;;  %v3153_v53 = vld [vmem:[#allocation8_spill] sm:$0xff] }
 0x359   : > { %v1407_v45 = vsub.f32 0.0, %v1375_v3  ;;  %v1452_v0 = vadd.f32 1.0, %v1420_v55  ;;  %v3156_v55 = vld [vmem:[#allocation13_spill] sm:$0xff] }
 0x35a   : > { %v1277_v49 = vmul.f32 %v2112_v13, %v1261_v58  ;;  %v1439_v13 = vmul.f32 0.5, %v2876_v1  ;;  %v1470_v40 = vmul.f32 %v1454_v20, %v1438_v43  ;;  %v3154_v58 = vld [vmem:[#allocation11_spill] sm:$0xff]  ;;  %v3159_v43 = vld [vmem:[#allocation14_spill] sm:$0xff] }
 0x35b   : > { %v1423_v14 = vsel %vm1391_vm13, %v1375_v3, %v1407_v45  ;;  %v1468_v26 = vmul.f32 %v1452_v0, %v1436_v15 }
 0x35c   : > { %v1357_v7 = vmul.f32 %v2120_v42, %v1277_v49  ;;  %v1455_v46 = vadd.f32 1.0, %v1423_v14  ;;  %v3155_v49 = vld [vmem:[#allocation10_spill] sm:$0xff] }
 0x35e   : > { %v1373_v52 = vsub.f32 1.0, %v1357_v7  ;;  %v1471_v16 = vmul.f32 %v1455_v46, %v1439_v13 }
 0x360   : > { %v1405_v10 = vsub.f32 0.0, %v1373_v52  ;;  %v1479_v54 = vpack.c.bf16 %v1471_v16, %v1470_v40 }
 0x362   : > { %v1421_v28 = vsel %vm1389_vm1, %v1373_v52, %v1405_v10  ;;  %v3157_v10 = vld [vmem:[#allocation12_spill] sm:$0xff] }
 0x363   : > { %v1453_v27 = vadd.f32 1.0, %v1421_v28  ;;  %v3158_v28 = vld [vmem:[#allocation15_spill] sm:$0xff] }
 0x365   : > { %v1469_v38 = vmul.f32 %v1453_v27, %v1437_v12 }
 0x367   : > { %v1478_v60 = vpack.c.bf16 %v1469_v38, %v1468_v26 }
 0x369   : > { %1944 = vmatprep.mubr.bf16.mxu1 %v1478_v60 }
 0x36a   : > { %1945 = vmatmul.mubr.bf16.gmra.mxu1 %v1479_v54 }
 0x3f6   : > { %v1934_v1 = vpop.f32.mrf.mxu0 }
 0x3f7   : > { %v1643_v9 = vadd.f32 %v1934_v1, %v2321_v17 }
 0x3f8   : > { %v1578_v2 = vpop.f32.mrf.mxu0 }
 0x3f9   : > { %v1666_v48 = vadd.f32 %v2995_v33, %v1643_v9  ;;  %v1641_v6 = vadd.f32 %v1578_v2, %v2325_v21 }
 0x3fa   : > { %v1935_v4 = vpop.f32.mrf.mxu0 }
 0x3fb   : > { %1682 = vst.msk [vmem:[%s3000_s26 + $0x10] sm:$0xff] %vm472_vm0, %v1666_v48  ;;  %v1664_v22 = vadd.f32 %v2995_v33, %v1641_v6  ;;  %v1644_v34 = vadd.f32 %v1935_v4, %v2330_v25 }
 0x3fc   : > { %v1581_v17 = vpop.f32.mrf.mxu0 }
 0x3fd   : > { %1680 = vst.msk [vmem:[%s3000_s26] sm:$0xff] %vm472_vm0, %v1664_v22  ;;  %v1667_v21 = vadd.f32 %v2995_v33, %v1644_v34  ;;  %v1642_v63 = vadd.f32 %v1581_v17, %v2337_v31 }
 0x3fe   : > { %v1938_v47 = vpop.f32.mrf.mxu0 }
 0x3ff   : > { %1683 = vst.msk [vmem:[%s3000_s26 + $0x18] sm:$0xff] %vm472_vm0, %v1667_v21  ;;  %v1665_v5 = vadd.f32 %v2995_v33, %v1642_v63  ;;  %v1647_v39 = vadd.f32 %v1938_v47, %v2349_v41 }
 0x400   : > { %v1594_v18 = vpop.f32.mrf.mxu0 }
 0x401   : > { %1681 = vst.msk [vmem:[%s3000_s26 + $0x8] sm:$0xff] %vm472_vm0, %v1665_v5  ;;  %v1670_v25 = vadd.f32 %v2995_v33, %v1647_v39  ;;  %v1645_v56 = vadd.f32 %v1594_v18, %v3149_v51 }
 0x402   : > { %v1939_v59 = vpop.f32.mrf.mxu0 }
 0x403   : > { %1686 = vst.msk [vmem:[%s3000_s26 + $0x30] sm:$0xff] %vm472_vm0, %v1670_v25  ;;  %v1668_v31 = vadd.f32 %v2995_v33, %v1645_v56  ;;  %v1648_v29 = vadd.f32 %v1939_v59, %v3150_v8 }
 0x404   : > { %v1597_v19 = vpop.f32.mrf.mxu0 }
 0x405   : > { %1684 = vst.msk [vmem:[%s3000_s26 + $0x20] sm:$0xff] %vm472_vm0, %v1668_v31  ;;  %v1671_v41 = vadd.f32 %v2995_v33, %v1648_v29  ;;  %v1646_v37 = vadd.f32 %v1597_v19, %v3151_v61 }
 0x407   : > { %1687 = vst.msk [vmem:[%s3000_s26 + $0x38] sm:$0xff] %vm472_vm0, %v1671_v41  ;;  %v1669_v50 = vadd.f32 %v2995_v33, %v1646_v37 }
 0x409   : > { %1685 = vst.msk [vmem:[%s3000_s26 + $0x28] sm:$0xff] %vm472_vm0, %v1669_v50 }
 0x416   : > { %v1942_v11 = vpop.f32.mrf.mxu1 }
 0x417   : > { %v1651_v30 = vadd.f32 %v1942_v11, %v3152_v24 }
 0x418   : > { %v1610_v57 = vpop.f32.mrf.mxu1 }
 0x419   : > { %v1674_v35 = vadd.f32 %v2995_v33, %v1651_v30  ;;  %v1649_v62 = vadd.f32 %v1610_v57, %v3153_v53 }
 0x41a   : > { %v1943_v32 = vpop.f32.mrf.mxu1 }
 0x41b   : > { %1690 = vst.msk [vmem:[%s3000_s26 + $0x50] sm:$0xff] %vm472_vm0, %v1674_v35  ;;  %v1672_v3 = vadd.f32 %v2995_v33, %v1649_v62  ;;  %v1652_v45 = vadd.f32 %v1943_v32, %v3154_v58 }
 0x41c   : > { %v1613_v42 = vpop.f32.mrf.mxu1 }
 0x41d   : > { %1688 = vst.msk [vmem:[%s3000_s26 + $0x40] sm:$0xff] %vm472_vm0, %v1672_v3  ;;  %v1675_v36 = vadd.f32 %v2995_v33, %v1652_v45  ;;  %v1650_v44 = vadd.f32 %v1613_v42, %v3155_v49 }
 0x41f   : > { %1691 = vst.msk [vmem:[%s3000_s26 + $0x58] sm:$0xff] %vm472_vm0, %v1675_v36  ;;  %v1673_v7 = vadd.f32 %v2995_v33, %v1650_v44 }
 0x421   : > { %1689 = vst.msk [vmem:[%s3000_s26 + $0x48] sm:$0xff] %vm472_vm0, %v1673_v7 }
 0x42a   : > { %v1946_v14 = vpop.f32.mrf.mxu1 }
 0x42b   : > { %v1655_v52 = vadd.f32 %v1946_v14, %v3156_v55 }
 0x42c   : > { %v1626_v23 = vpop.f32.mrf.mxu1 }
 0x42d   : > { %v1678_v46 = vadd.f32 %v2995_v33, %v1655_v52  ;;  %v1653_v0 = vadd.f32 %v1626_v23, %v3157_v10 }
 0x42e   : > { %v1947_v20 = vpop.f32.mrf.mxu1 }
 0x42f   : > { %1694 = vst.msk [vmem:[%s3000_s26 + $0x70] sm:$0xff] %vm472_vm0, %v1678_v46  ;;  %v1676_v13 = vadd.f32 %v2995_v33, %v1653_v0  ;;  %v1656_v15 = vadd.f32 %v1947_v20, %v3158_v28 }
 0x430   : > { %v1629_v12 = vpop.f32.mrf.mxu1 }
 0x431   : > { %1692 = vst.msk [vmem:[%s3000_s26 + $0x60] sm:$0xff] %vm472_vm0, %v1676_v13  ;;  %v1679_v27 = vadd.f32 %v2995_v33, %v1656_v15  ;;  %v1654_v16 = vadd.f32 %v1629_v12, %v3159_v43 }
 0x433   : > { %1695 = vst.msk [vmem:[%s3000_s26 + $0x78] sm:$0xff] %vm472_vm0, %v1679_v27  ;;  %v1677_v26 = vadd.f32 %v2995_v33, %v1654_v16 }
 0x435   : > { %1693 = vst.msk [vmem:[%s3000_s26 + $0x68] sm:$0xff] %vm472_vm0, %v1677_v26 }
 0x436   : > { %2134 = shalt.err (!%p2131_p3)
}
 0x437   : > { %s2135_s18 = scalar_lea.hbm %s3063_s11, 2048  ;;  %s2139_s27 = scalar_lea.hbm %s3124_s10, 8192 }
 0x438   : > { %p2136_p4 = scmp.ne.s32.totalorder %s3063_s11, %s2135_s18  ;;  %p2140_p9 = scmp.lt.s32.totalorder %s3063_s11, %s3124_s10 }
 0x439   : > { %p2141_p10 = scmp.lt.s32.totalorder %s2139_s27, %s2135_s18 }
 0x43a   : > { %p2137_p7 = pnand %p2136_p4, %p2279_p5 }
 0x43b   : > { %p2142_p11 = por %p2141_p10, %p2140_p9 }
 0x43c   : > { %p2138_p8 = pneg %p2137_p7 }
 0x43e   : > { %p2143_p12 = pnand %p2142_p11, %p2138_p8 }
 0x440   : > { %2146 = shalt.err (!%p2143_p12)
}
 0x441   : > { %s2184_s12 = smov 128   ;;  %s2185_s21 = smov 8  }
 0x442   : > { %1964 = dma.vmem_to_hbm [thread:$0]  (%p2279_p5), %s3065_s29, 2048, %s3063_s11, %s3074_s17, %s2184_s12, %s2184_s12, %s2185_s21  }
 0x443 PF: > { %p1970_p13 = scmp.ge.s32.totalorder %s2181_s16, 2  ;;  %s1725_s25 = sand.u32 1, %s2169_s13  }
 0x444   : > { %s1726_s18 = scalar_lea.sflag [#allocation3], %s1725_s25 }
 0x445   : > { %p1967_p0 = pnand %p1970_p13, %p2283_p6 }
 0x447   : > { %p1968_p1 = pneg %p1967_p0 }
 0x449   : > { %2164 = dma.done.wait (%p1968_p1), %s1726_s18, 2048  }
 0x44a   : > { %2166 = vsyncadd (%p1968_p1), %s1726_s18, 4294965248  ;;  %p20_p2 = scmp.ge.s32.totalorder %s2266_s19, 6   ;;  %s3160_s13 = smov %s2173_s14 }
 0x44b   : > { %s3161_s14 = smov %s2177_s15  ;;  %s3162_s15 = smov %s2277_s22 }
 0x44c   : > { %s3163_s16 = smov %s2266_s19  ;;  %22 = sbr.rel (!%p20_p2) target bundleno = 3 (0x3), region = 98 }
 0x451   :  { %1731 = vsyncpa [#allocation3], 1 }
 0x452   :  { %1733 = vsyncpa [#allocation3 + $0x1], 1 }

// kernel: basic_layer_forward.10
= control target key start
LH: loop header
LB: loop body
LE: loop exit
PB: predicated region body
PF: predicated region fallthrough
CT: control target
= control target key end

     0   :  { %s4792_s12 = smov 0   ;;  %s6428_s0 = inlined_call_operand.vmem [shape: bf16[16,32,96], index: 0, kind: input, shape index: {}]   ;;  %s6429_s1 = inlined_call_operand.vmem [shape: f32[4,32,32], index: 1, kind: input, shape index: {}]   ;;  %s6430_s2 = inlined_call_operand.vmem [shape: f32[8,32,32], index: 2, kind: input, shape index: {}]   ;;  %s6431_s3 = inlined_call_operand.vmem [shape: bf16[16,32,32], index: 3, kind: output, shape index: {}]  }
   0x1 LB: > { %s4798_s13 = sadd.s32 4294967295, %s4756_s12   ;;  %p3774_p0 = scmp.ge.s32.totalorder %s4756_s12, 1  ;;  %s4756_s12 = sphi %s4792_s12, %s13_s12  }
   0x2   : > { %p199_p1 = scmp.lt.s32.totalorder %s4756_s12, 5 }
   0x4   : > { %p200_p2 = pnand %p3774_p0, %p199_p1 }
   0x6   : > { %203 = sbr.rel (%p200_p2) target bundleno = 2719 (0xa9f), region = 32 }
   0xb   : > { %s3775_s14 = sshll.u32 %s4798_s13, 2  ;;  %s4758_s19 = smov 96   ;;  %vm351_vm0 = vcmask 64512   ;;  %v4890_v25 = vld [vmem:[%s6429_s1 + $0x10] sm:$0xff]  ;;  %v4895_v28 = vld [vmem:[%s6429_s1] sm:$0xff]  ;;  %vm686_vm1 = vcmask 261120  }
   0xc   : > { %p244_p3 = scmp.lt.s32.totalorder %s3775_s14, 15  ;;  %s4759_s20 = smov 64   ;;  %v4911_v40 = vld [vmem:[%s6429_s1 + $0x8] sm:$0xff]  ;;  %v4919_v44 = vld [vmem:[%s6429_s1 + $0x18] sm:$0xff]  ;;  %vm3579_vm2 = vcmask 130048   ;;  %vm3596_vm3 = vcmask 195584  }
   0xd   : > { %s251_s21 = ssub.s32 0, %s4798_s13  ;;  %p250_p4 = scmp.lt.s32.totalorder %s4798_s13, 0  ;;  %vm3677_vm4 = vcmask 257024  }
   0xe   : > { %s6523_s14 = smov (!%p244_p3, %s3775_s14), 15  ;;  %s3778_s22 = smin.u32 %s4798_s13, %s251_s21 }
   0xf   : > { %s3877_s15 = sshll.u32 %s6523_s14, 4  ;;  %s253_s23 = sand.u32 1, %s3778_s22  }
  0x10   : > { %s4811_s18 = scalar_lea.vmem %s6428_s0, %s3877_s15  ;;  %s254_s24 = ssub.s32 0, %s253_s23 }
  0x11   : > { %v4814_v0 = vld [vmem:[%s4811_s18 + $0x8] sm:$0xff]   ;;  %v4817_v1 = vld [vmem:[%s4811_s18 + $0x18] sm:$0xff]   ;;  %v4821_v2 = vld [vmem:[%s4811_s18] sm:$0xff]   ;;  %s6525_s24 = smov (!%p250_p4, %s254_s24), %s253_s23  ;;  %s4760_s13 = smov 88  }
  0x12   : > { %349 = vrot.lane.b32.xlu0 %v4814_v0, %s4758_s19  ;;  %v4824_v3 = vld [vmem:[%s4811_s18 + $0x10] sm:$0xff]   ;;  %347 = vrot.lane.b32.xlu1 %v4821_v2, %s4758_s19  ;;  %v4833_v4 = vld [vmem:[%s4811_s18 + $0x28] sm:$0xff]   ;;  %p3780_p5 = scmp.lt.s32.totalorder %s6525_s24, 0  ;;  %s260_s25 = sadd.s32 2, %s6525_s24 }
  0x13   : > { %4028 = vmatprep.mubr.msk.bf16.mxu0 %vm351_vm0, %v4821_v2  ;;  %4036 = vmatprep.mubr.msk.bf16.mxu1 %vm351_vm0, %v4824_v3  ;;  %v4837_v5 = vld [vmem:[%s4811_s18 + $0x38] sm:$0xff]   ;;  %v4841_v6 = vld [vmem:[%s4811_s18 + $0x20] sm:$0xff]   ;;  %v4845_v7 = vld [vmem:[%s4811_s18 + $0x30] sm:$0xff]   ;;  %s4761_s16 = smov 120   ;;  %s4762_s17 = smov 56  }
  0x14   : > { %s6527_s25 = smov (!%p3780_p5, %s260_s25), %s6525_s24  ;;  %s4764_s28 = smov 112  }
  0x15   : > { %s3781_s26 = sshll.u32 %s6527_s25, 2  ;;  %s4765_s29 = smov 48  }
  0x16   : > { %425 = vrot.lane.b32.xlu0 %v4817_v1, %s4758_s19  ;;  %423 = vrot.lane.b32.xlu1 %v4824_v3, %s4758_s19  ;;  %p263_p6 = scmp.lt.s32.totalorder %s3781_s26, 7  ;;  %s4769_s25 = smov 8  }
  0x17   : > { %s6329_s4 = scalar_lea.vmem %s6431_s3, %s3877_s15 }
  0x18   : > { %s6529_s26 = smov (!%p263_p6, %s3781_s26), 7 }
  0x19   : > { %s3878_s27 = sshll.u32 %s6529_s26, 5  ;;  %s4770_s26 = smov 16  }
  0x1a   : > { %500 = vrot.lane.b32.xlu0 %v4833_v4, %s4758_s19  ;;  %575 = vrot.lane.b32.xlu1 %v4837_v5, %s4758_s19  ;;  %s4885_s30 = scalar_lea.vmem %s6430_s2, %s3878_s27  ;;  %s4763_s27 = smov 80  }
  0x1b   : > { %v4898_v30 = vld [vmem:[%s4885_s30 + $0x10] sm:$0xff]  ;;  %v4906_v38 = vld [vmem:[%s4885_s30] sm:$0xff]  ;;  %v4936_v55 = vld [vmem:[%s4885_s30 + $0x8] sm:$0xff] }
  0x1c   : > { %v4914_v43 = vld [vmem:[%s4885_s30 + $0x30] sm:$0xff]  ;;  %v4928_v51 = vld [vmem:[%s4885_s30 + $0x20] sm:$0xff]  ;;  %v4947_v62 = vld [vmem:[%s4885_s30 + $0x18] sm:$0xff] }
  0x1e   : > { %498 = vrot.lane.b32.xlu0 %v4841_v6, %s4758_s19  ;;  %573 = vrot.lane.b32.xlu1 %v4845_v7, %s4758_s19 }
  0x22   : > { %873 = vrot.lane.b32.xlu1 %v4814_v0, %s4759_s20 }
  0x84   : > { %v350_v8 = vpop.permute.xlu0 %349  ;;  %v348_v10 = vpop.permute.xlu1 %347 }
  0x85   : > { %4280 = vmatprep.subr.msk.bf16.mxu0 %vm351_vm0, %v350_v8  ;;  %v362_v9 = vsel %vm351_vm0, %v350_v8, 0  ;;  %v359_v14 = vsel %vm351_vm0, %v348_v10, 0 }
  0x86   : > { %4025 = vmatpush3.bf16.xpose.msra.mxu0 %v362_v9 }
  0x87   : > { %4281 = vmatprep.subr.msk.bf16.mxu0 %vm351_vm0, %v348_v10 }
  0x88   : > { %v426_v11 = vpop.permute.xlu0 %425  ;;  %v424_v13 = vpop.permute.xlu1 %423 }
  0x89   : > { %4282 = vmatprep.subr.msk.bf16.mxu1 %vm351_vm0, %v426_v11  ;;  %v437_v12 = vsel %vm351_vm0, %v426_v11, 0  ;;  %v434_v16 = vsel %vm351_vm0, %v424_v13, 0 }
  0x8a   : > { %4033 = vmatpush3.bf16.xpose.msra.mxu1 %v437_v12  ;;  %v4959_v12 = vld [vmem:[%s4885_s30 + $0x38] sm:$0xff] }
  0x8b   : > { %4283 = vmatprep.subr.msk.bf16.mxu1 %vm351_vm0, %v424_v13 }
  0x8c   : > { %v501_v15 = vpop.permute.xlu0 %500  ;;  %v576_v17 = vpop.permute.xlu1 %575 }
  0x8d   : > { %v512_v18 = vsel %vm351_vm0, %v501_v15, 0  ;;  %v587_v20 = vsel %vm351_vm0, %v576_v17, 0 }
  0x8e   : > { %4027 = vmatpush3.bf16.xpose.msra.mxu0 %v359_v14 }
  0x8f   : > { %4284 = vmatprep.subr.msk.bf16.mxu0 %vm351_vm0, %v501_v15 }
  0x90   : > { %v499_v19 = vpop.permute.xlu0 %498  ;;  %v574_v21 = vpop.permute.xlu1 %573 }
  0x91   : > { %v509_v22 = vsel %vm351_vm0, %v499_v19, 0  ;;  %v584_v23 = vsel %vm351_vm0, %v574_v21, 0 }
  0x92   : > { %4035 = vmatpush3.bf16.xpose.msra.mxu1 %v434_v16 }
  0x93   : > { %4286 = vmatprep.subr.msk.bf16.mxu1 %vm351_vm0, %v576_v17 }
  0x94   : > { %v874_v24 = vpop.permute.xlu1 %873 }
  0x95   : > { %4029 = vmatmul.mubr.msk.bf16.vlgmr.msra.gmra.mxu0 %vm351_vm0, %v4814_v0 }
  0x96   : > { %4041 = vmatpush3.bf16.xpose.msra.mxu0 %v512_v18  ;;  %4044 = vmatprep.mubr.msk.bf16.mxu0 %vm351_vm0, %v4841_v6 }
  0x97   : > { %4285 = vmatprep.subr.msk.bf16.mxu0 %vm351_vm0, %v499_v19 }
  0x99   : > { %4037 = vmatmul.mubr.msk.bf16.vlgmr.msra.gmra.mxu1 %vm351_vm0, %v4817_v1 }
  0x9a   : > { %4049 = vmatpush3.bf16.xpose.msra.mxu1 %v587_v20  ;;  %4052 = vmatprep.mubr.msk.bf16.mxu1 %vm351_vm0, %v4845_v7  ;;  %v4970_v20 = vld [vmem:[%s4885_s30 + $0x50] sm:$0xff] }
  0x9b   : > { %4287 = vmatprep.subr.msk.bf16.mxu1 %vm351_vm0, %v574_v21 }
  0x9e   : > { %4043 = vmatpush3.bf16.xpose.msra.mxu0 %v509_v22  ;;  %v4974_v22 = vld [vmem:[%s4885_s30 + $0x28] sm:$0xff] }
  0x9f   : > { %4056 = vmatprep.subr.bf16.mxu0 %v874_v24 }
  0xa2   : > { %4051 = vmatpush3.bf16.xpose.msra.mxu1 %v584_v23 }
  0xa5   : > { %4045 = vmatmul.mubr.msk.bf16.vlgmr.msra.gmra.mxu0 %vm351_vm0, %v4833_v4 }
  0xa6   : > { %4057 = vmatpush3.bf16.msra.mxu0 %v874_v24 }
  0xa9   : > { %4053 = vmatmul.mubr.msk.bf16.vlgmr.msra.gmra.mxu1 %vm351_vm0, %v4837_v5 }
 0x155   : > { %v4030_v26 = vpop.f32.mrf.mxu0 }
 0x156   : > { %v640_v27 = vmul.f32 0.35355338, %v4030_v26 }
 0x157   : > { %v398_v29 = vpop.f32.mrf.mxu0 }
 0x158   : > { %v656_v31 = vadd.f32 %v640_v27, %v4890_v25  ;;  %v638_v32 = vmul.f32 0.35355338, %v398_v29 }
 0x159   : > { %v4031_v33 = vpop.f32.mrf.mxu0  ;;  %v4038_v34 = vpop.f32.mrf.mxu1 }
 0x15a   : > { %v654_v35 = vadd.f32 %v638_v32, %v4895_v28  ;;  %v644_v36 = vmul.f32 0.35355338, %v4038_v34  ;;  %v4903_v37 = vadd.f32 %v656_v31, %v4898_v30  ;;  %v641_v39 = vmul.f32 0.35355338, %v4031_v33 }
 0x15b   : > { %v401_v41 = vpop.f32.mrf.mxu0  ;;  %v473_v42 = vpop.f32.mrf.mxu1 }
 0x15c   : > { %v660_v45 = vadd.f32 %v644_v36, %v4890_v25  ;;  %v639_v46 = vmul.f32 0.35355338, %v401_v41  ;;  %v642_v47 = vmul.f32 0.35355338, %v473_v42  ;;  %v693_v49 = vsel %vm686_vm1, %v4903_v37, -inf  ;;  %v4990_v42 = vld [vmem:[%s4885_s30 + $0x58] sm:$0xff] }
 0x15d   : > { %v4039_v48 = vpop.f32.mrf.mxu1  ;;  %v4925_v50 = vadd.f32 %v654_v35, %v4906_v38  ;;  %694 = vmax.xlane.f32.xlu1 %v693_v49  ;;  %v657_v56 = vadd.f32 %v641_v39, %v4919_v44  ;;  %v4985_v35 = vld [vmem:[%s4885_s30 + $0x70] sm:$0xff] }
 0x15e   : > { %v655_v52 = vadd.f32 %v639_v46, %v4911_v40  ;;  %v658_v53 = vadd.f32 %v642_v47, %v4895_v28  ;;  %v4933_v54 = vadd.f32 %v660_v45, %v4914_v43  ;;  %v645_v57 = vmul.f32 0.35355338, %v4039_v48 }
 0x15f   : > { %v687_v58 = vsel %vm686_vm1, %v4925_v50, -inf  ;;  %v476_v59 = vpop.f32.mrf.mxu1  ;;  %v4956_v11 = vadd.f32 %v657_v56, %v4947_v62 }
 0x160   : > { %688 = vmax.xlane.f32.xlu0 %v687_v58  ;;  %v705_v60 = vsel %vm686_vm1, %v4933_v54, -inf  ;;  %v4944_v61 = vadd.f32 %v658_v53, %v4928_v51  ;;  %v4950_v63 = vadd.f32 %v655_v52, %v4936_v55  ;;  %v661_v9 = vadd.f32 %v645_v57, %v4919_v44  ;;  %v4999_v53 = vld [vmem:[%s4885_s30 + $0x40] sm:$0xff]  ;;  %v5007_v58 = vld [vmem:[%s4885_s30 + $0x78] sm:$0xff] }
 0x161   : > { %706 = vmax.xlane.f32.xlu1 %v705_v60  ;;  %v643_v10 = vmul.f32 0.35355338, %v476_v59  ;;  %v696_v17 = vsel %vm686_vm1, %v4956_v11, -inf }
 0x162   : > { %v699_v8 = vsel %vm686_vm1, %v4944_v61, -inf  ;;  %v690_v13 = vsel %vm686_vm1, %v4950_v63, -inf  ;;  %v4967_v19 = vadd.f32 %v661_v9, %v4959_v12 }
 0x163   : > { %v659_v16 = vadd.f32 %v643_v10, %v4911_v40 }
 0x164   : > { %700 = vmax.xlane.f32.xlu0 %v699_v8  ;;  %v708_v33 = vsel %vm686_vm1, %v4967_v19, -inf }
 0x165   : > { %v4046_v14 = vpop.f32.mrf.mxu0  ;;  %691 = vmax.xlane.f32.xlu1 %v690_v13  ;;  %v4982_v34 = vadd.f32 %v659_v16, %v4974_v22 }
 0x166   : > { %v648_v15 = vmul.f32 0.35355338, %v4046_v14 }
 0x167   : > { %v548_v18 = vpop.f32.mrf.mxu0  ;;  %v702_v56 = vsel %vm686_vm1, %v4982_v34, -inf }
 0x168   : > { %v664_v21 = vadd.f32 %v648_v15, %v4890_v25  ;;  %697 = vmax.xlane.f32.xlu0 %v696_v17  ;;  %v646_v23 = vmul.f32 0.35355338, %v548_v18  ;;  %v5022_v15 = vld [vmem:[%s4885_s30 + $0x60] sm:$0xff]  ;;  %v5026_v17 = vld [vmem:[%s4885_s30 + $0x48] sm:$0xff] }
 0x169   : > { %v4047_v24 = vpop.f32.mrf.mxu0  ;;  %v4054_v26 = vpop.f32.mrf.mxu1 }
 0x16a   : > { %v649_v27 = vmul.f32 0.35355338, %v4047_v24  ;;  %v652_v29 = vmul.f32 0.35355338, %v4054_v26  ;;  %v4977_v31 = vadd.f32 %v664_v21, %v4970_v20  ;;  %v662_v45 = vadd.f32 %v646_v23, %v4895_v28  ;;  %v5040_v26 = vld [vmem:[%s4885_s30 + $0x68] sm:$0xff] }
 0x16b   : > { %v623_v32 = vpop.f32.mrf.mxu1  ;;  %v551_v41 = vpop.f32.mrf.mxu0 }
 0x16c   : > { %v665_v36 = vadd.f32 %v649_v27, %v4919_v44  ;;  %v668_v39 = vadd.f32 %v652_v29, %v4890_v25  ;;  %709 = vmax.xlane.f32.xlu0 %v708_v33  ;;  %v650_v46 = vmul.f32 0.35355338, %v623_v32  ;;  %v717_v48 = vsel %vm686_vm1, %v4977_v31, -inf }
 0x16d   : > { %v4055_v47 = vpop.f32.mrf.mxu1  ;;  %718 = vmax.xlane.f32.xlu1 %v717_v48  ;;  %v647_v25 = vmul.f32 0.35355338, %v551_v41  ;;  %v5016_v13 = vadd.f32 %v662_v45, %v4999_v53 }
 0x16e   : > { %v653_v49 = vmul.f32 0.35355338, %v4055_v47  ;;  %v4996_v52 = vadd.f32 %v668_v39, %v4985_v35  ;;  %v5004_v57 = vadd.f32 %v665_v36, %v4990_v42  ;;  %v666_v9 = vadd.f32 %v650_v46, %v4895_v28 }
 0x16f   : > { %v626_v60 = vpop.f32.mrf.mxu1  ;;  %v711_v28 = vsel %vm686_vm1, %v5016_v13, -inf }
 0x170   : > { %v669_v59 = vadd.f32 %v653_v49, %v4919_v44  ;;  %703 = vmax.xlane.f32.xlu0 %v702_v56  ;;  %v729_v8 = vsel %vm686_vm1, %v4996_v52, -inf  ;;  %v720_v10 = vsel %vm686_vm1, %v5004_v57, -inf  ;;  %v663_v44 = vadd.f32 %v647_v25, %v4911_v40 }
 0x171   : > { %730 = vmax.xlane.f32.xlu1 %v729_v8  ;;  %v651_v16 = vmul.f32 0.35355338, %v626_v60  ;;  %v5033_v21 = vadd.f32 %v666_v9, %v5022_v15 }
 0x172   : > { %v5019_v14 = vadd.f32 %v669_v59, %v5007_v58  ;;  %v5037_v24 = vadd.f32 %v663_v44, %v5026_v17 }
 0x173   : > { %v667_v23 = vadd.f32 %v651_v16, %v4911_v40  ;;  %v723_v27 = vsel %vm686_vm1, %v5033_v21, -inf }
 0x174   : > { %721 = vmax.xlane.f32.xlu0 %v720_v10  ;;  %v732_v18 = vsel %vm686_vm1, %v5019_v14, -inf  ;;  %v714_v29 = vsel %vm686_vm1, %v5037_v24, -inf }
 0x175   : > { %712 = vmax.xlane.f32.xlu1 %v711_v28  ;;  %v5047_v32 = vadd.f32 %v667_v23, %v5040_v26 }
 0x177   : > { %v726_v40 = vsel %vm686_vm1, %v5047_v32, -inf }
 0x178   : > { %733 = vmax.xlane.f32.xlu0 %v732_v18 }
 0x179   : > { %724 = vmax.xlane.f32.xlu1 %v723_v27 }
 0x17c   : > { %715 = vmax.xlane.f32.xlu0 %v714_v29 }
 0x180   : > { %727 = vmax.xlane.f32.xlu0 %v726_v40 }
 0x18a   : > { %871 = vrot.lane.b32.xlu1 %v4821_v2, %s4759_s20 }
 0x18e   : > { %932 = vrot.lane.b32.xlu1 %v4824_v3, %s4759_s20 }
 0x192   : > { %1056 = vrot.lane.b32.xlu1 %v4837_v5, %s4759_s20 }
 0x196   : > { %934 = vrot.lane.b32.xlu0 %v4817_v1, %s4759_s20  ;;  %1054 = vrot.lane.b32.xlu1 %v4845_v7, %s4759_s20 }
 0x19a   : > { %995 = vrot.lane.b32.xlu0 %v4833_v4, %s4759_s20 }
 0x19e   : > { %993 = vrot.lane.b32.xlu0 %v4841_v6, %s4759_s20 }
 0x1e6   : > { %v695_v33 = vpop.xlane.xlu1 %694 }
 0x1e7   : > { %v737_v36 = vsub.f32 %v4903_v37, %v695_v33 }
 0x1e9   : > { %v689_v39 = vpop.xlane.xlu0 %688  ;;  %v755_v41 = vmul.f32 1.442695, %v737_v36 }
 0x1ea   : > { %v735_v45 = vsub.f32 %v4925_v50, %v689_v39  ;;  %v707_v46 = vpop.xlane.xlu1 %706 }
 0x1eb   : > { %4462 = vpow2.f32 %v755_v41  ;;  %v741_v47 = vsub.f32 %v4933_v54, %v707_v46 }
 0x1ec   : > { %v751_v49 = vmul.f32 1.442695, %v735_v45 }
 0x1ed   : > { %v701_v48 = vpop.xlane.xlu0 %700  ;;  %v763_v25 = vmul.f32 1.442695, %v741_v47 }
 0x1ee   : > { %v739_v56 = vsub.f32 %v4944_v61, %v701_v48  ;;  %v692_v59 = vpop.xlane.xlu1 %691 }
 0x1ef   : > { %4464 = vpow2.f32 %v763_v25  ;;  %v736_v9 = vsub.f32 %v4950_v63, %v692_v59 }
 0x1f0   : > { %v759_v60 = vmul.f32 1.442695, %v739_v56  ;;  %4466 = vpow2.f32 %v751_v49 }
 0x1f1   : > { %v698_v8 = vpop.xlane.xlu0 %697  ;;  %v753_v44 = vmul.f32 1.442695, %v736_v9 }
 0x1f2   : > { %v738_v37 = vsub.f32 %v4956_v11, %v698_v8  ;;  %4468 = vpow2.f32 %v759_v60 }
 0x1f4   : > { %v757_v10 = vmul.f32 1.442695, %v738_v37 }
 0x1f5   : > { %v710_v50 = vpop.xlane.xlu0 %709 }
 0x1f6   : > { %4470 = vpow2.f32 %v757_v10  ;;  %v742_v54 = vsub.f32 %v4967_v19, %v710_v50  ;;  %v719_v16 = vpop.xlane.xlu1 %718 }
 0x1f7   : > { %v745_v61 = vsub.f32 %v4977_v31, %v719_v16 }
 0x1f8   : > { %v765_v28 = vmul.f32 1.442695, %v742_v54  ;;  %v5073_v18 = vpop.eup %4462 }
 0x1f9   : > { %v704_v23 = vpop.xlane.xlu0 %703  ;;  %v771_v27 = vmul.f32 1.442695, %v745_v61  ;;  %v789_v63 = vsel %vm686_vm1, %v5073_v18, 0.0 }
 0x1fa   : > { %4472 = vpow2.f32 %v765_v28  ;;  %v740_v11 = vsub.f32 %v4982_v34, %v704_v23  ;;  %v731_v29 = vpop.xlane.xlu1 %730  ;;  %790 = vadd.xlane.f32.xlu1 %v789_v63 }
 0x1fb   : > { %4474 = vpow2.f32 %v753_v44  ;;  %v749_v40 = vsub.f32 %v4996_v52, %v731_v29 }
 0x1fc   : > { %4476 = vpow2.f32 %v771_v27  ;;  %v761_v19 = vmul.f32 1.442695, %v740_v11  ;;  %v5079_v33 = vpop.eup %4464 }
 0x1fd   : > { %v722_v31 = vpop.xlane.xlu0 %721  ;;  %v779_v36 = vmul.f32 1.442695, %v749_v40  ;;  %v801_v41 = vsel %vm686_vm1, %v5079_v33, 0.0  ;;  %v5084_v34 = vpop.eup %4466 }
 0x1fe   : > { %v746_v39 = vsub.f32 %v5004_v57, %v722_v31  ;;  %4478 = vpow2.f32 %v761_v19  ;;  %802 = vadd.xlane.f32.xlu1 %v801_v41  ;;  %v713_v45 = vpop.xlane.xlu1 %712  ;;  %v783_v57 = vsel %vm686_vm1, %v5084_v34, 0.0 }
 0x1ff   : > { %4480 = vpow2.f32 %v779_v36  ;;  %v743_v47 = vsub.f32 %v5016_v13, %v713_v45  ;;  %v5087_v52 = vpop.eup %4468 }
 0x200   : > { %v773_v46 = vmul.f32 1.442695, %v746_v39  ;;  %v795_v10 = vsel %vm686_vm1, %v5087_v52, 0.0 }
 0x201   : > { %v734_v48 = vpop.xlane.xlu0 %733  ;;  %v767_v49 = vmul.f32 1.442695, %v743_v47 }
 0x202   : > { %v750_v25 = vsub.f32 %v5019_v14, %v734_v48  ;;  %4482 = vpow2.f32 %v773_v46  ;;  %784 = vadd.xlane.f32.xlu1 %v783_v57  ;;  %v725_v59 = vpop.xlane.xlu1 %724 }
 0x203   : > { %v5092_v56 = vpop.eup %4470  ;;  %4484 = vpow2.f32 %v767_v49  ;;  %v747_v8 = vsub.f32 %v5033_v21, %v725_v59 }
 0x204   : > { %v781_v60 = vmul.f32 1.442695, %v750_v25  ;;  %v792_v13 = vsel %vm686_vm1, %v5092_v56, 0.0 }
 0x205   : > { %793 = vadd.xlane.f32.xlu0 %v792_v13  ;;  %v716_v37 = vpop.xlane.xlu0 %715  ;;  %v775_v9 = vmul.f32 1.442695, %v747_v8 }
 0x206   : > { %v744_v14 = vsub.f32 %v5037_v24, %v716_v37  ;;  %4486 = vpow2.f32 %v781_v60  ;;  %796 = vadd.xlane.f32.xlu1 %v795_v10  ;;  %v872_v54 = vpop.permute.xlu1 %871 }
 0x207   : > { %v5100_v50 = vpop.eup %4472  ;;  %4488 = vpow2.f32 %v775_v9  ;;  %4058 = vmatprep.subr.bf16.mxu0 %v872_v54 }
 0x208   : > { %v5102_v44 = vpop.eup %4474  ;;  %v769_v21 = vmul.f32 1.442695, %v744_v14  ;;  %v804_v16 = vsel %vm686_vm1, %v5100_v50, 0.0  ;;  %4059 = vmatpush3.bf16.msra.mxu0 %v872_v54 }
 0x209   : > { %v5106_v28 = vpop.eup %4476  ;;  %805 = vadd.xlane.f32.xlu0 %v804_v16  ;;  %v728_v24 = vpop.xlane.xlu0 %727  ;;  %v786_v29 = vsel %vm686_vm1, %v5102_v44, 0.0 }
 0x20a   : > { %v748_v61 = vsub.f32 %v5047_v32, %v728_v24  ;;  %v813_v23 = vsel %vm686_vm1, %v5106_v28, 0.0  ;;  %v933_v27 = vpop.permute.xlu1 %932  ;;  %4490 = vpow2.f32 %v769_v21 }
 0x20b   : > { %814 = vadd.xlane.f32.xlu1 %v813_v23  ;;  %v5111_v11 = vpop.eup %4478 }
 0x20c   : > { %v777_v63 = vmul.f32 1.442695, %v748_v61  ;;  %v5115_v19 = vpop.eup %4480  ;;  %v798_v36 = vsel %vm686_vm1, %v5111_v11, 0.0 }
 0x20d   : > { %787 = vadd.xlane.f32.xlu0 %v786_v29  ;;  %v935_v40 = vpop.permute.xlu0 %934  ;;  %v825_v31 = vsel %vm686_vm1, %v5115_v19, 0.0 }
 0x20e   : > { %4064 = vmatprep.subr.bf16.mxu1 %v935_v40  ;;  %4492 = vpow2.f32 %v777_v63  ;;  %v5125_v41 = vpop.permute.xlu1 %1056 }
 0x20f   : > { %826 = vadd.xlane.f32.xlu1 %v825_v31  ;;  %4065 = vmatpush3.bf16.msra.mxu1 %v935_v40  ;;  %v5119_v32 = vpop.eup %4482 }
 0x210   : > { %4066 = vmatprep.subr.bf16.mxu1 %v933_v27  ;;  %v5123_v39 = vpop.eup %4484  ;;  %v816_v48 = vsel %vm686_vm1, %v5119_v32, 0.0 }
 0x211   : > { %799 = vadd.xlane.f32.xlu0 %v798_v36  ;;  %v5127_v45 = vpop.permute.xlu0 %995  ;;  %v807_v46 = vsel %vm686_vm1, %v5123_v39, 0.0 }
 0x212   : > { %4072 = vmatprep.subr.bf16.mxu0 %v5127_v45 }
 0x213   : > { %808 = vadd.xlane.f32.xlu1 %v807_v46  ;;  %4067 = vmatpush3.bf16.msra.mxu1 %v933_v27  ;;  %v5132_v47 = vpop.eup %4486 }
 0x214   : > { %4080 = vmatprep.subr.bf16.mxu1 %v5125_v41  ;;  %v5137_v49 = vpop.eup %4488  ;;  %v828_v57 = vsel %vm686_vm1, %v5132_v47, 0.0 }
 0x215   : > { %817 = vadd.xlane.f32.xlu0 %v816_v48  ;;  %v819_v25 = vsel %vm686_vm1, %v5137_v49, 0.0  ;;  %v994_v9 = vpop.permute.xlu0 %993 }
 0x217   : > { %820 = vadd.xlane.f32.xlu1 %v819_v25  ;;  %v5143_v59 = vpop.eup %4490 }
 0x218   : > { %v810_v60 = vsel %vm686_vm1, %v5143_v59, 0.0 }
 0x219   : > { %829 = vadd.xlane.f32.xlu0 %v828_v57 }
 0x21b   : > { %v5147_v8 = vpop.eup %4492 }
 0x21c   : > { %v822_v13 = vsel %vm686_vm1, %v5147_v8, 0.0 }
 0x21d   : > { %811 = vadd.xlane.f32.xlu0 %v810_v60 }
 0x221   : > { %823 = vadd.xlane.f32.xlu0 %v822_v13 }
 0x228   : > { %1190 = vrot.lane.b32.xlu1 %v4817_v1, %s4760_s13 }
 0x22c   : > { %1188 = vrot.lane.b32.xlu1 %v4824_v3, %s4760_s13 }
 0x230   : > { %1184 = vrot.lane.b32.xlu1 %v4824_v3, %s4761_s16 }
 0x234   : > { %1328 = vrot.lane.b32.xlu1 %v4837_v5, %s4760_s13 }
 0x237   : > { %1121 = vrot.lane.b32.xlu0 %v4814_v0, %s4760_s13 }
 0x238   : > { %1186 = vrot.lane.b32.xlu1 %v4817_v1, %s4761_s16  ;;  %v5167_v1 = vpop.permute.xlu1 %1054 }
 0x23b   : > { %1119 = vrot.lane.b32.xlu0 %v4821_v2, %s4760_s13 }
 0x23c   : > { %1326 = vrot.lane.b32.xlu1 %v4845_v7, %s4760_s13 }
 0x23f   : > { %1115 = vrot.lane.b32.xlu0 %v4821_v2, %s4761_s16 }
 0x240   : > { %1322 = vrot.lane.b32.xlu1 %v4845_v7, %s4761_s16 }
 0x243   : > { %1259 = vrot.lane.b32.xlu0 %v4833_v4, %s4760_s13 }
 0x244   : > { %1324 = vrot.lane.b32.xlu1 %v4837_v5, %s4761_s16 }
 0x247   : > { %1117 = vrot.lane.b32.xlu0 %v4814_v0, %s4761_s16 }
 0x248   : > { %1625 = vrot.lane.b32.xlu1 %v4814_v0, %s4762_s17 }
 0x24b   : > { %1257 = vrot.lane.b32.xlu0 %v4841_v6, %s4760_s13  ;;  %s4767_s13 = smov 104  }
 0x24f   : > { %1253 = vrot.lane.b32.xlu0 %v4841_v6, %s4761_s16 }
 0x253   : > { %1255 = vrot.lane.b32.xlu0 %v4833_v4, %s4761_s16  ;;  %s4768_s16 = smov 40  }
 0x283   : > { %v791_v3 = vpop.xlane.xlu1 %790 }
 0x287   : > { %v803_v37 = vpop.xlane.xlu1 %802 }
 0x28b   : > { %v785_v2 = vpop.xlane.xlu1 %784 }
 0x28e   : > { %v794_v14 = vpop.xlane.xlu0 %793 }
 0x28f   : > { %v797_v7 = vpop.xlane.xlu1 %796  ;;  %4494 = vrcp.f32 %v794_v14 }
 0x290   : > { %4496 = vrcp.f32 %v785_v2 }
 0x291   : > { %4498 = vrcp.f32 %v791_v3 }
 0x292   : > { %v806_v10 = vpop.xlane.xlu0 %805 }
 0x294   : > { %v815_v54 = vpop.xlane.xlu1 %814 }
 0x296   : > { %v788_v5 = vpop.xlane.xlu0 %787 }
 0x297   : > { %4500 = vrcp.f32 %v788_v5 }
 0x298   : > { %4502 = vrcp.f32 %v806_v10  ;;  %v827_v6 = vpop.xlane.xlu1 %826 }
 0x299   : > { %4504 = vrcp.f32 %v797_v7 }
 0x29a   : > { %4506 = vrcp.f32 %v803_v37  ;;  %v800_v4 = vpop.xlane.xlu0 %799 }
 0x29b   : > { %4508 = vrcp.f32 %v800_v4 }
 0x29c   : > { %v809_v16 = vpop.xlane.xlu1 %808  ;;  %v4495_v24 = vpop.eup %4494 }
 0x29d   : > { %v4497_v61 = vpop.eup %4496  ;;  %v838_v29 = vmul.f32 %v4495_v24, %v5092_v56 }
 0x29e   : > { %v818_v21 = vpop.xlane.xlu0 %817  ;;  %v4499_v27 = vpop.eup %4498  ;;  %v832_v31 = vmul.f32 %v4497_v61, %v5084_v34 }
 0x29f   : > { %4510 = vrcp.f32 %v818_v21  ;;  %v836_v57 = vmul.f32 %v4499_v27, %v5073_v18 }
 0x2a0   : > { %4512 = vrcp.f32 %v809_v16  ;;  %v821_v48 = vpop.xlane.xlu1 %820 }
 0x2a1   : > { %4514 = vrcp.f32 %v815_v54  ;;  %v864_v37 = vpack.c.bf16 %v838_v29, %v836_v57 }
 0x2a2   : > { %v830_v23 = vpop.xlane.xlu0 %829 }
 0x2a4   : > { %v4501_v63 = vpop.eup %4500 }
 0x2a5   : > { %v4503_v40 = vpop.eup %4502  ;;  %v834_v36 = vmul.f32 %v4501_v63, %v5102_v44 }
 0x2a6   : > { %v4505_v46 = vpop.eup %4504  ;;  %v812_v25 = vpop.xlane.xlu0 %811  ;;  %v846_v56 = vmul.f32 %v4503_v40, %v5100_v50 }
 0x2a7   : > { %v4507_v60 = vpop.eup %4506  ;;  %4516 = vrcp.f32 %v812_v25  ;;  %v863_v13 = vpack.c.bf16 %v834_v36, %v832_v31  ;;  %v840_v34 = vmul.f32 %v4505_v46, %v5087_v52  ;;  %v1191_v50 = vpop.permute.xlu1 %1190 }
 0x2a8   : > { %v4509_v3 = vpop.eup %4508  ;;  %4518 = vrcp.f32 %v830_v23  ;;  %v844_v18 = vmul.f32 %v4507_v60, %v5079_v33 }
 0x2a9   : > { %4520 = vrcp.f32 %v821_v48  ;;  %4060 = vmatprep.mubr.msk.bf16.mxu0 %vm686_vm1, %v863_v13  ;;  %v842_v44 = vmul.f32 %v4509_v3, %v5111_v11 }
 0x2aa   : > { %4522 = vrcp.f32 %v827_v6  ;;  %4061 = vmatmul.mubr.msk.bf16.vlgmr.msra.gmra.mxu0 %vm686_vm1, %v864_v37  ;;  %v824_v2 = vpop.xlane.xlu0 %823  ;;  %v866_v7 = vpack.c.bf16 %v846_v56, %v844_v18 }
 0x2ab   : > { %4073 = vmatpush3.bf16.msra.mxu0 %v5127_v45  ;;  %4524 = vrcp.f32 %v824_v2  ;;  %v865_v14 = vpack.c.bf16 %v842_v44, %v840_v34  ;;  %v1189_v10 = vpop.permute.xlu1 %1188 }
 0x2ac   : > { %4074 = vmatprep.subr.bf16.mxu0 %v994_v9  ;;  %v4511_v33 = vpop.eup %4510  ;;  %v1199_v25 = vsel %vm351_vm0, %v1189_v10, 0 }
 0x2ad   : > { %4068 = vmatprep.mubr.msk.bf16.mxu1 %vm686_vm1, %v865_v14  ;;  %v4513_v11 = vpop.eup %4512  ;;  %v854_v6 = vmul.f32 %v4511_v33, %v5119_v32 }
 0x2ae   : > { %4069 = vmatmul.mubr.msk.bf16.vlgmr.msra.gmra.mxu1 %vm686_vm1, %v866_v7  ;;  %v1122_v52 = vpop.permute.xlu0 %1121  ;;  %v4515_v54 = vpop.eup %4514 }
 0x2af   : > { %4075 = vmatpush3.bf16.msra.mxu0 %v994_v9  ;;  %4081 = vmatpush3.bf16.msra.mxu1 %v5125_v41  ;;  %v848_v9 = vmul.f32 %v4513_v11, %v5123_v39  ;;  %v852_v16 = vmul.f32 %v4515_v54, %v5106_v28  ;;  %v1185_v32 = vpop.permute.xlu1 %1184 }
 0x2b0   : > { %4082 = vmatprep.subr.bf16.mxu1 %v5167_v1  ;;  %4288 = vmatprep.subr.msk.bf16.mxu0 %vm351_vm0, %v1122_v52 }
 0x2b1   : > { %v868_v63 = vpack.c.bf16 %v854_v6, %v852_v16 }
 0x2b2   : > { %v1120_v45 = vpop.permute.xlu0 %1119 }
 0x2b3   : > { %4083 = vmatpush3.bf16.msra.mxu1 %v5167_v1  ;;  %v1133_v1 = vsel %vm351_vm0, %v1122_v52, 0 }
 0x2b4   : > { %v4517_v5 = vpop.eup %4516  ;;  %4290 = vmatprep.subr.msk.bf16.mxu1 %vm351_vm0, %v1191_v50 }
 0x2b5   : > { %v4519_v4 = vpop.eup %4518  ;;  %v850_v41 = vmul.f32 %v4517_v5, %v5143_v59 }
 0x2b6   : > { %v4521_v21 = vpop.eup %4520  ;;  %v1116_v24 = vpop.permute.xlu0 %1115  ;;  %v862_v29 = vmul.f32 %v4519_v4, %v5132_v47  ;;  %v1202_v47 = vsel %vm351_vm0, %v1191_v50, 0 }
 0x2b7   : > { %v4523_v61 = vpop.eup %4522  ;;  %v867_v23 = vpack.c.bf16 %v850_v41, %v848_v9  ;;  %v856_v40 = vmul.f32 %v4521_v21, %v5137_v49  ;;  %v1329_v49 = vpop.permute.xlu1 %1328  ;;  %v311_v21 = vld [vmem:[%s6429_s1 + $0x30] sm:$0xff] }
 0x2b8   : > { %v4525_v27 = vpop.eup %4524  ;;  %v860_v28 = vmul.f32 %v4523_v61, %v5115_v19  ;;  %v1340_v3 = vsel %vm351_vm0, %v1329_v49, 0 }
 0x2b9   : > { %4076 = vmatprep.mubr.msk.bf16.mxu0 %vm686_vm1, %v867_v23  ;;  %v858_v39 = vmul.f32 %v4525_v27, %v5147_v8  ;;  %v1130_v8 = vsel %vm351_vm0, %v1120_v45, 0  ;;  %v5261_v23 = vld [vmem:[%s6429_s1 + $0x20] sm:$0xff] }
 0x2ba   : > { %4077 = vmatmul.mubr.msk.bf16.vlgmr.msra.gmra.mxu0 %vm686_vm1, %v868_v63  ;;  %v1260_v59 = vpop.permute.xlu0 %1259  ;;  %v870_v36 = vpack.c.bf16 %v862_v29, %v860_v28 }
 0x2bb   : > { %4089 = vmatpush3.bf16.xpose.msra.mxu0 %v1133_v1  ;;  %v869_v31 = vpack.c.bf16 %v858_v39, %v856_v40  ;;  %4092 = vmatprep.mubr.msk.bf16.mxu0 %vm351_vm0, %v1116_v24  ;;  %v1187_v46 = vpop.permute.xlu1 %1186  ;;  %v1271_v60 = vsel %vm351_vm0, %v1260_v59, 0 }
 0x2bc   : > { %4289 = vmatprep.subr.msk.bf16.mxu0 %vm351_vm0, %v1120_v45 }
 0x2bd   : > { %4084 = vmatprep.mubr.msk.bf16.mxu1 %vm686_vm1, %v869_v31  ;;  %v5270_v31 = vld [vmem:[%s6429_s1 + $0x28] sm:$0xff] }
 0x2be   : > { %4085 = vmatmul.mubr.msk.bf16.vlgmr.msra.gmra.mxu1 %vm686_vm1, %v870_v36  ;;  %v1118_v19 = vpop.permute.xlu0 %1117 }
 0x2bf   : > { %4097 = vmatpush3.bf16.xpose.msra.mxu1 %v1202_v47  ;;  %4100 = vmatprep.mubr.msk.bf16.mxu1 %vm351_vm0, %v1185_v32  ;;  %v1327_v57 = vpop.permute.xlu1 %1326 }
 0x2c0   : > { %4291 = vmatprep.subr.msk.bf16.mxu1 %vm351_vm0, %v1189_v10  ;;  %v1337_v34 = vsel %vm351_vm0, %v1327_v57, 0 }
 0x2c2   : > { %v1258_v48 = vpop.permute.xlu0 %1257 }
 0x2c3   : > { %4091 = vmatpush3.bf16.xpose.msra.mxu0 %v1130_v8  ;;  %v1323_v37 = vpop.permute.xlu1 %1322  ;;  %v1268_v56 = vsel %vm351_vm0, %v1258_v48, 0 }
 0x2c4   : > { %4292 = vmatprep.subr.msk.bf16.mxu0 %vm351_vm0, %v1260_v59 }
 0x2c6   : > { %v1254_v13 = vpop.permute.xlu0 %1253 }
 0x2c7   : > { %4099 = vmatpush3.bf16.xpose.msra.mxu1 %v1199_v25  ;;  %v1325_v2 = vpop.permute.xlu1 %1324 }
 0x2c8   : > { %4294 = vmatprep.subr.msk.bf16.mxu1 %vm351_vm0, %v1329_v49  ;;  %v312_v49 = vld [vmem:[%s6429_s1 + $0x38] sm:$0xff] }
 0x2ca   : > { %4093 = vmatmul.mubr.msk.bf16.vlgmr.msra.gmra.mxu0 %vm351_vm0, %v1118_v19  ;;  %v1256_v44 = vpop.permute.xlu0 %1255 }
 0x2cb   : > { %4105 = vmatpush3.bf16.xpose.msra.mxu0 %v1271_v60  ;;  %4108 = vmatprep.mubr.msk.bf16.mxu0 %vm351_vm0, %v1254_v13  ;;  %v1626_v18 = vpop.permute.xlu1 %1625 }
 0x2cc   : > { %4293 = vmatprep.subr.msk.bf16.mxu0 %vm351_vm0, %v1258_v48 }
 0x2ce   : > { %4101 = vmatmul.mubr.msk.bf16.vlgmr.msra.gmra.mxu1 %vm351_vm0, %v1187_v46 }
 0x2cf   : > { %4113 = vmatpush3.bf16.xpose.msra.mxu1 %v1340_v3  ;;  %4116 = vmatprep.mubr.msk.bf16.mxu1 %vm351_vm0, %v1323_v37 }
 0x2d0   : > { %4295 = vmatprep.subr.msk.bf16.mxu1 %vm351_vm0, %v1327_v57 }
 0x2d3   : > { %4107 = vmatpush3.bf16.xpose.msra.mxu0 %v1268_v56 }
 0x2d4   : > { %4120 = vmatprep.subr.bf16.mxu0 %v1626_v18 }
 0x2d7   : > { %4115 = vmatpush3.bf16.xpose.msra.mxu1 %v1337_v34 }
 0x2da   : > { %4109 = vmatmul.mubr.msk.bf16.vlgmr.msra.gmra.mxu0 %vm351_vm0, %v1256_v44 }
 0x2db   : > { %4121 = vmatpush3.bf16.msra.mxu0 %v1626_v18 }
 0x2de   : > { %4117 = vmatmul.mubr.msk.bf16.vlgmr.msra.gmra.mxu1 %vm351_vm0, %v1325_v2 }
 0x36a   : > { %v5223_v14 = vpop.f32.mrf.mxu0 }
 0x36b   : > { %6447 = vst [vmem:[#allocation2_spill] sm:$0xff] %v5223_v14  ;;  %v5743_v14 = vld [vmem:[%s4885_s30 + $0x60] sm:$0xff] }
 0x36c   : > { %v5225_v7 = vpop.f32.mrf.mxu0 }
 0x36d   : > { %6448 = vst [vmem:[#allocation3_spill] sm:$0xff] %v5225_v7 }
 0x36e   : > { %v5227_v50 = vpop.f32.mrf.mxu1  ;;  %v5229_v52 = vpop.f32.mrf.mxu0 }
 0x36f   : > { %6449 = vst [vmem:[#allocation4_spill] sm:$0xff] %v5227_v50  ;;  %6450 = vst [vmem:[#allocation5_spill] sm:$0xff] %v5229_v52  ;;  %v5706_v50 = vld [vmem:[%s4885_s30 + $0x70] sm:$0xff]  ;;  %v5760_v52 = vld [vmem:[%s4885_s30 + $0x68] sm:$0xff] }
 0x370   : > { %v5231_v33 = vpop.f32.mrf.mxu1  ;;  %v5233_v11 = vpop.f32.mrf.mxu0 }
 0x371   : > { %6451 = vst [vmem:[#allocation6_spill] sm:$0xff] %v5231_v33  ;;  %6452 = vst [vmem:[#allocation7_spill] sm:$0xff] %v5233_v11 }
 0x372   : > { %v5235_v45 = vpop.f32.mrf.mxu1 }
 0x373   : > { %6453 = vst [vmem:[#allocation8_spill] sm:$0xff] %v5235_v45 }
 0x374   : > { %v5239_v0 = vpop.f32.mrf.mxu1 }
 0x375   : > { %6455 = vst [vmem:[#allocation10_spill] sm:$0xff] %v5239_v0 }
 0x37a   : > { %v5237_v10 = vpop.f32.mrf.mxu0 }
 0x37b   : > { %6454 = vst [vmem:[#allocation9_spill] sm:$0xff] %v5237_v10  ;;  %v5687_v10 = vld [vmem:[%s4885_s30 + $0x50] sm:$0xff] }
 0x37c   : > { %v5241_v54 = vpop.f32.mrf.mxu0 }
 0x37d   : > { %6456 = vst [vmem:[#allocation11_spill] sm:$0xff] %v5241_v54  ;;  %v5680_v54 = vld [vmem:[%s4885_s30 + $0x38] sm:$0xff] }
 0x37e   : > { %v5243_v5 = vpop.f32.mrf.mxu1  ;;  %v5245_v6 = vpop.f32.mrf.mxu0 }
 0x37f   : > { %6457 = vst [vmem:[#allocation12_spill] sm:$0xff] %v5243_v5  ;;  %6458 = vst [vmem:[#allocation13_spill] sm:$0xff] %v5245_v6 }
 0x380   : > { %v5247_v4 = vpop.f32.mrf.mxu1  ;;  %v5249_v9 = vpop.f32.mrf.mxu0 }
 0x381   : > { %6459 = vst [vmem:[#allocation14_spill] sm:$0xff] %v5247_v4  ;;  %6460 = vst [vmem:[#allocation15_spill] sm:$0xff] %v5249_v9 }
 0x382   : > { %v5251_v41 = vpop.f32.mrf.mxu1 }
 0x383   : > { %6461 = vst [vmem:[#allocation16_spill] sm:$0xff] %v5251_v41 }
 0x384   : > { %v5256_v61 = vpop.f32.mrf.mxu1 }
 0x385   : > { %6462 = vst [vmem:[#allocation17_spill] sm:$0xff] %v5256_v61 }
 0x38a   : > { %v4094_v16 = vpop.f32.mrf.mxu0 }
 0x38b   : > { %v1393_v24 = vmul.f32 0.35355338, %v4094_v16 }
 0x38c   : > { %v1169_v27 = vpop.f32.mrf.mxu0 }
 0x38d   : > { %v1409_v63 = vadd.f32 %v1393_v24, %v311_v21  ;;  %v1391_v1 = vmul.f32 0.35355338, %v1169_v27 }
 0x38e   : > { %v4095_v29 = vpop.f32.mrf.mxu0  ;;  %v4102_v32 = vpop.f32.mrf.mxu1 }
 0x38f   : > { %v1407_v40 = vadd.f32 %v1391_v1, %v5261_v23  ;;  %v1397_v39 = vmul.f32 0.35355338, %v4102_v32  ;;  %v5265_v28 = vadd.f32 %v1409_v63, %v4898_v30  ;;  %v1394_v59 = vmul.f32 0.35355338, %v4095_v29 }
 0x390   : > { %v1172_v36 = vpop.f32.mrf.mxu0  ;;  %v1238_v47 = vpop.f32.mrf.mxu1 }
 0x391   : > { %v1413_v19 = vadd.f32 %v1397_v39, %v311_v21  ;;  %v1392_v8 = vmul.f32 0.35355338, %v1172_v36  ;;  %v1395_v46 = vmul.f32 0.35355338, %v1238_v47  ;;  %v1445_v30 = vsel %vm686_vm1, %v5265_v28, -inf }
 0x392   : > { %v4103_v48 = vpop.f32.mrf.mxu1  ;;  %v5278_v25 = vadd.f32 %v1407_v40, %v4906_v38  ;;  %1446 = vmax.xlane.f32.xlu1 %v1445_v30  ;;  %v1410_v3 = vadd.f32 %v1394_v59, %v312_v49 }
 0x393   : > { %v1408_v57 = vadd.f32 %v1392_v8, %v5270_v31  ;;  %v1411_v60 = vadd.f32 %v1395_v46, %v5261_v23  ;;  %v5283_v13 = vadd.f32 %v1413_v19, %v4914_v43  ;;  %v1398_v37 = vmul.f32 0.35355338, %v4103_v48 }
 0x394   : > { %v1439_v56 = vsel %vm686_vm1, %v5278_v25, -inf  ;;  %v1241_v34 = vpop.f32.mrf.mxu1  ;;  %v5298_v24 = vadd.f32 %v1410_v3, %v4947_v62 }
 0x395   : > { %1440 = vmax.xlane.f32.xlu0 %v1439_v56  ;;  %v1457_v44 = vsel %vm686_vm1, %v5283_v13, -inf  ;;  %v5290_v38 = vadd.f32 %v1411_v60, %v4928_v51  ;;  %v5293_v2 = vadd.f32 %v1408_v57, %v4936_v55  ;;  %v1414_v18 = vadd.f32 %v1398_v37, %v312_v49 }
 0x396   : > { %1458 = vmax.xlane.f32.xlu1 %v1457_v44  ;;  %v1396_v16 = vmul.f32 0.35355338, %v1241_v34  ;;  %v1448_v55 = vsel %vm686_vm1, %v5298_v24, -inf }
 0x397   : > { %v1451_v43 = vsel %vm686_vm1, %v5290_v38, -inf  ;;  %v1442_v27 = vsel %vm686_vm1, %v5293_v2, -inf  ;;  %v5306_v32 = vadd.f32 %v1414_v18, %v4959_v12 }
 0x398   : > { %v1412_v1 = vadd.f32 %v1396_v16, %v5270_v31 }
 0x399   : > { %1452 = vmax.xlane.f32.xlu0 %v1451_v43  ;;  %v1460_v46 = vsel %vm686_vm1, %v5306_v32, -inf }
 0x39a   : > { %v4110_v63 = vpop.f32.mrf.mxu0  ;;  %1443 = vmax.xlane.f32.xlu1 %v1442_v27  ;;  %v5314_v48 = vadd.f32 %v1412_v1, %v4974_v22 }
 0x39b   : > { %v1401_v51 = vmul.f32 0.35355338, %v4110_v63 }
 0x39c   : > { %v1307_v29 = vpop.f32.mrf.mxu0  ;;  %v1454_v22 = vsel %vm686_vm1, %v5314_v48, -inf }
 0x39d   : > { %v1417_v40 = vadd.f32 %v1401_v51, %v311_v21  ;;  %1449 = vmax.xlane.f32.xlu0 %v1448_v55  ;;  %v1399_v62 = vmul.f32 0.35355338, %v1307_v29 }
 0x39e   : > { %v4111_v39 = vpop.f32.mrf.mxu0  ;;  %v4118_v59 = vpop.f32.mrf.mxu1 }
 0x39f   : > { %v1402_v36 = vmul.f32 0.35355338, %v4111_v39  ;;  %v1405_v47 = vmul.f32 0.35355338, %v4118_v59  ;;  %v5309_v19 = vadd.f32 %v1417_v40, %v4970_v20  ;;  %v1415_v60 = vadd.f32 %v1399_v62, %v5261_v23  ;;  %v5365_v62 = vld [vmem:[%s4811_s18 + $0x10] sm:$0xff]   ;;  %v5370_v39 = vld [vmem:[%s4811_s18 + $0x38] sm:$0xff]  }
 0x3a0   : > { %v1376_v8 = vpop.f32.mrf.mxu1  ;;  %v1310_v57 = vpop.f32.mrf.mxu0  ;;  %v5380_v59 = vld [vmem:[%s4811_s18 + $0x30] sm:$0xff]  }
 0x3a1   : > { %v1418_v30 = vadd.f32 %v1402_v36, %v312_v49  ;;  %v1421_v12 = vadd.f32 %v1405_v47, %v311_v21  ;;  %1461 = vmax.xlane.f32.xlu0 %v1460_v46  ;;  %v1403_v3 = vmul.f32 0.35355338, %v1376_v8  ;;  %v1469_v56 = vsel %vm686_vm1, %v5309_v19, -inf  ;;  %v5385_v36 = vld [vmem:[%s4811_s18 + $0x28] sm:$0xff]   ;;  %v5390_v47 = vld [vmem:[%s4811_s18 + $0x20] sm:$0xff]  }
 0x3a2   : > { %v4119_v37 = vpop.f32.mrf.mxu1  ;;  %1470 = vmax.xlane.f32.xlu1 %v1469_v56  ;;  %v1400_v44 = vmul.f32 0.35355338, %v1310_v57 }
 0x3a3   : > { %v1406_v20 = vmul.f32 0.35355338, %v4119_v37  ;;  %v5320_v34 = vadd.f32 %v1421_v12, %v4985_v35  ;;  %v5325_v21 = vadd.f32 %v1418_v30, %v4990_v42  ;;  %v1419_v27 = vadd.f32 %v1403_v3, %v5261_v23 }
 0x3a4   : > { %v1379_v18 = vpop.f32.mrf.mxu1  ;;  %v5333_v35 = vadd.f32 %v1415_v60, %v4999_v53  ;;  %v1416_v42 = vadd.f32 %v1400_v44, %v5270_v31 }
 0x3a5   : > { %v1422_v43 = vadd.f32 %v1406_v20, %v312_v49  ;;  %1455 = vmax.xlane.f32.xlu0 %v1454_v22  ;;  %v1481_v16 = vsel %vm686_vm1, %v5320_v34, -inf  ;;  %v1472_v63 = vsel %vm686_vm1, %v5325_v21, -inf  ;;  %v1404_v49 = vmul.f32 0.35355338, %v1379_v18 }
 0x3a6   : > { %1482 = vmax.xlane.f32.xlu1 %v1481_v16  ;;  %v1463_v1 = vsel %vm686_vm1, %v5333_v35, -inf  ;;  %v5344_v55 = vadd.f32 %v1419_v27, %v5022_v15 }
 0x3a7   : > { %v5336_v51 = vadd.f32 %v1422_v43, %v5007_v58  ;;  %v1420_v53 = vadd.f32 %v1404_v49, %v5270_v31  ;;  %v5348_v58 = vadd.f32 %v1416_v42, %v5026_v17  ;;  %v5360_v17 = vld [vmem:[%s4811_s18] sm:$0xff]  }
 0x3a8   : > { %v1475_v29 = vsel %vm686_vm1, %v5344_v55, -inf }
 0x3a9   : > { %1473 = vmax.xlane.f32.xlu0 %v1472_v63  ;;  %v1484_v23 = vsel %vm686_vm1, %v5336_v51, -inf  ;;  %v1466_v40 = vsel %vm686_vm1, %v5348_v58, -inf  ;;  %v5355_v15 = vadd.f32 %v1420_v53, %v5040_v26  ;;  %v5375_v26 = vld [vmem:[%s4811_s18 + $0x18] sm:$0xff]  }
 0x3aa   : > { %1464 = vmax.xlane.f32.xlu1 %v1463_v1 }
 0x3ab   : > { %v1478_v31 = vsel %vm686_vm1, %v5355_v15, -inf }
 0x3ad   : > { %1485 = vmax.xlane.f32.xlu0 %v1484_v23 }
 0x3ae   : > { %1476 = vmax.xlane.f32.xlu1 %v1475_v29 }
 0x3b1   : > { %1467 = vmax.xlane.f32.xlu0 %v1466_v40 }
 0x3b5   : > { %1479 = vmax.xlane.f32.xlu0 %v1478_v31 }
 0x3bf   : > { %1623 = vrot.lane.b32.xlu1 %v5360_v17, %s4762_s17 }
 0x3c3   : > { %1684 = vrot.lane.b32.xlu1 %v5365_v62, %s4762_s17 }
 0x3c7   : > { %1808 = vrot.lane.b32.xlu1 %v5370_v39, %s4762_s17 }
 0x3cb   : > { %1686 = vrot.lane.b32.xlu0 %v5375_v26, %s4762_s17  ;;  %1806 = vrot.lane.b32.xlu1 %v5380_v59, %s4762_s17 }
 0x3cf   : > { %1747 = vrot.lane.b32.xlu0 %v5385_v36, %s4762_s17 }
 0x3d3   : > { %1745 = vrot.lane.b32.xlu0 %v5390_v47, %s4762_s17 }
 0x41b   : > { %v1447_v8 = vpop.xlane.xlu1 %1446 }
 0x41c   : > { %v1489_v46 = vsub.f32 %v5265_v28, %v1447_v8 }
 0x41e   : > { %v1441_v30 = vpop.xlane.xlu0 %1440  ;;  %v1507_v12 = vmul.f32 1.442695, %v1489_v46 }
 0x41f   : > { %v1487_v57 = vsub.f32 %v5278_v25, %v1441_v30  ;;  %v1459_v60 = vpop.xlane.xlu1 %1458 }
 0x420   : > { %4526 = vpow2.f32 %v1507_v12  ;;  %v1493_v3 = vsub.f32 %v5283_v13, %v1459_v60 }
 0x421   : > { %v1503_v56 = vmul.f32 1.442695, %v1487_v57 }
 0x422   : > { %v1453_v37 = vpop.xlane.xlu0 %1452  ;;  %v1515_v20 = vmul.f32 1.442695, %v1493_v3 }
 0x423   : > { %v1491_v44 = vsub.f32 %v5290_v38, %v1453_v37  ;;  %v1444_v22 = vpop.xlane.xlu1 %1443 }
 0x424   : > { %4528 = vpow2.f32 %v1515_v20  ;;  %v1488_v16 = vsub.f32 %v5293_v2, %v1444_v22 }
 0x425   : > { %v1511_v43 = vmul.f32 1.442695, %v1491_v44  ;;  %4530 = vpow2.f32 %v1503_v56 }
 0x426   : > { %v1450_v18 = vpop.xlane.xlu0 %1449  ;;  %v1505_v63 = vmul.f32 1.442695, %v1488_v16 }
 0x427   : > { %v1490_v28 = vsub.f32 %v5298_v24, %v1450_v18  ;;  %4532 = vpow2.f32 %v1511_v43 }
 0x429   : > { %v1509_v27 = vmul.f32 1.442695, %v1490_v28 }
 0x42a   : > { %v1462_v25 = vpop.xlane.xlu0 %1461 }
 0x42b   : > { %4534 = vpow2.f32 %v1509_v27  ;;  %v1494_v13 = vsub.f32 %v5306_v32, %v1462_v25  ;;  %v1471_v42 = vpop.xlane.xlu1 %1470 }
 0x42c   : > { %v1497_v38 = vsub.f32 %v5309_v19, %v1471_v42 }
 0x42d   : > { %v1517_v49 = vmul.f32 1.442695, %v1494_v13  ;;  %v5402_v1 = vpop.eup %4526 }
 0x42e   : > { %v1456_v23 = vpop.xlane.xlu0 %1455  ;;  %v1523_v53 = vmul.f32 1.442695, %v1497_v38  ;;  %v1541_v2 = vsel %vm686_vm1, %v5402_v1, 0.0 }
 0x42f   : > { %4536 = vpow2.f32 %v1517_v49  ;;  %v1492_v24 = vsub.f32 %v5314_v48, %v1456_v23  ;;  %v1483_v29 = vpop.xlane.xlu1 %1482  ;;  %1542 = vadd.xlane.f32.xlu1 %v1541_v2 }
 0x430   : > { %4538 = vpow2.f32 %v1505_v63  ;;  %v1501_v40 = vsub.f32 %v5320_v34, %v1483_v29 }
 0x431   : > { %4540 = vpow2.f32 %v1523_v53  ;;  %v1513_v32 = vmul.f32 1.442695, %v1492_v24  ;;  %v5408_v31 = vpop.eup %4528 }
 0x432   : > { %v1474_v19 = vpop.xlane.xlu0 %1473  ;;  %v1531_v8 = vmul.f32 1.442695, %v1501_v40  ;;  %v1553_v30 = vsel %vm686_vm1, %v5408_v31, 0.0  ;;  %v5413_v48 = vpop.eup %4530 }
 0x433   : > { %v1498_v46 = vsub.f32 %v5325_v21, %v1474_v19  ;;  %4542 = vpow2.f32 %v1513_v32  ;;  %1554 = vadd.xlane.f32.xlu1 %v1553_v30  ;;  %v1465_v12 = vpop.xlane.xlu1 %1464  ;;  %v1535_v21 = vsel %vm686_vm1, %v5413_v48, 0.0 }
 0x434   : > { %4544 = vpow2.f32 %v1531_v8  ;;  %v1495_v60 = vsub.f32 %v5333_v35, %v1465_v12  ;;  %v5416_v34 = vpop.eup %4532 }
 0x435   : > { %v1525_v57 = vmul.f32 1.442695, %v1498_v46  ;;  %v1547_v16 = vsel %vm686_vm1, %v5416_v34, 0.0 }
 0x436   : > { %v1486_v3 = vpop.xlane.xlu0 %1485  ;;  %v1519_v37 = vmul.f32 1.442695, %v1495_v60 }
 0x437   : > { %v1502_v56 = vsub.f32 %v5336_v51, %v1486_v3  ;;  %4546 = vpow2.f32 %v1525_v57  ;;  %v1477_v44 = vpop.xlane.xlu1 %1476  ;;  %1536 = vadd.xlane.f32.xlu1 %v1535_v21 }
 0x438   : > { %v5421_v20 = vpop.eup %4534  ;;  %4548 = vpow2.f32 %v1519_v37  ;;  %v1499_v43 = vsub.f32 %v5344_v55, %v1477_v44 }
 0x439   : > { %v1533_v22 = vmul.f32 1.442695, %v1502_v56  ;;  %v1544_v35 = vsel %vm686_vm1, %v5421_v20, 0.0 }
 0x43a   : > { %1545 = vadd.xlane.f32.xlu0 %v1544_v35  ;;  %v1468_v18 = vpop.xlane.xlu0 %1467  ;;  %v1527_v28 = vmul.f32 1.442695, %v1499_v43  ;;  %v5485_v35 = vld [vmem:[%s4811_s18 + $0x8] sm:$0xff]  }
 0x43b   : > { %v1496_v51 = vsub.f32 %v5348_v58, %v1468_v18  ;;  %4550 = vpow2.f32 %v1533_v22  ;;  %1548 = vadd.xlane.f32.xlu1 %v1547_v16  ;;  %v1624_v25 = vpop.permute.xlu1 %1623 }
 0x43c   : > { %v5429_v27 = vpop.eup %4536  ;;  %4552 = vpow2.f32 %v1527_v28  ;;  %4122 = vmatprep.subr.bf16.mxu0 %v1624_v25 }
 0x43d   : > { %v5431_v13 = vpop.eup %4538  ;;  %v1521_v55 = vmul.f32 1.442695, %v1496_v51  ;;  %v1556_v63 = vsel %vm686_vm1, %v5429_v27, 0.0  ;;  %4123 = vmatpush3.bf16.msra.mxu0 %v1624_v25 }
 0x43e   : > { %v5435_v42 = vpop.eup %4540  ;;  %1557 = vadd.xlane.f32.xlu0 %v1556_v63  ;;  %v1480_v58 = vpop.xlane.xlu0 %1479  ;;  %v1538_v2 = vsel %vm686_vm1, %v5431_v13, 0.0 }
 0x43f   : > { %v1500_v49 = vsub.f32 %v5355_v15, %v1480_v58  ;;  %v1565_v38 = vsel %vm686_vm1, %v5435_v42, 0.0  ;;  %v1685_v23 = vpop.permute.xlu1 %1684  ;;  %4554 = vpow2.f32 %v1521_v55 }
 0x440   : > { %1566 = vadd.xlane.f32.xlu1 %v1565_v38  ;;  %v5440_v53 = vpop.eup %4542 }
 0x441   : > { %v1529_v24 = vmul.f32 1.442695, %v1500_v49  ;;  %v5444_v29 = vpop.eup %4544  ;;  %v1550_v19 = vsel %vm686_vm1, %v5440_v53, 0.0 }
 0x442   : > { %1539 = vadd.xlane.f32.xlu0 %v1538_v2  ;;  %v1687_v32 = vpop.permute.xlu0 %1686  ;;  %v1577_v40 = vsel %vm686_vm1, %v5444_v29, 0.0 }
 0x443   : > { %4128 = vmatprep.subr.bf16.mxu1 %v1687_v32  ;;  %4556 = vpow2.f32 %v1529_v24  ;;  %v5454_v46 = vpop.permute.xlu1 %1808 }
 0x444   : > { %1578 = vadd.xlane.f32.xlu1 %v1577_v40  ;;  %4129 = vmatpush3.bf16.msra.mxu1 %v1687_v32  ;;  %v5448_v15 = vpop.eup %4546 }
 0x445   : > { %4130 = vmatprep.subr.bf16.mxu1 %v1685_v23  ;;  %v5452_v8 = vpop.eup %4548  ;;  %v1568_v60 = vsel %vm686_vm1, %v5448_v15, 0.0 }
 0x446   : > { %1551 = vadd.xlane.f32.xlu0 %v1550_v19  ;;  %v5456_v30 = vpop.permute.xlu0 %1747  ;;  %v1559_v12 = vsel %vm686_vm1, %v5452_v8, 0.0 }
 0x447   : > { %4136 = vmatprep.subr.bf16.mxu0 %v5456_v30  ;;  %v5499_v18 = vpop.permute.xlu1 %1806 }
 0x448   : > { %1560 = vadd.xlane.f32.xlu1 %v1559_v12  ;;  %4131 = vmatpush3.bf16.msra.mxu1 %v1685_v23  ;;  %v5461_v57 = vpop.eup %4550 }
 0x449   : > { %4144 = vmatprep.subr.bf16.mxu1 %v5454_v46  ;;  %v5466_v3 = vpop.eup %4552  ;;  %v1580_v56 = vsel %vm686_vm1, %v5461_v57, 0.0 }
 0x44a   : > { %1569 = vadd.xlane.f32.xlu0 %v1568_v60  ;;  %v1571_v37 = vsel %vm686_vm1, %v5466_v3, 0.0  ;;  %v1746_v16 = vpop.permute.xlu0 %1745 }
 0x44c   : > { %1572 = vadd.xlane.f32.xlu1 %v1571_v37  ;;  %v5472_v21 = vpop.eup %4554 }
 0x44d   : > { %v1562_v44 = vsel %vm686_vm1, %v5472_v21, 0.0 }
 0x44e   : > { %1581 = vadd.xlane.f32.xlu0 %v1580_v56 }
 0x450   : > { %v5476_v22 = vpop.eup %4556 }
 0x451   : > { %v1574_v43 = vsel %vm686_vm1, %v5476_v22, 0.0 }
 0x452   : > { %1563 = vadd.xlane.f32.xlu0 %v1562_v44 }
 0x456   : > { %1575 = vadd.xlane.f32.xlu0 %v1574_v43 }
 0x45d   : > { %1942 = vrot.lane.b32.xlu1 %v5375_v26, %s4763_s27 }
 0x461   : > { %1940 = vrot.lane.b32.xlu1 %v5365_v62, %s4763_s27 }
 0x465   : > { %1936 = vrot.lane.b32.xlu1 %v5365_v62, %s4764_s28 }
 0x469   : > { %2080 = vrot.lane.b32.xlu1 %v5370_v39, %s4763_s27 }
 0x46c   : > { %1873 = vrot.lane.b32.xlu0 %v5485_v35, %s4763_s27 }
 0x46d   : > { %1938 = vrot.lane.b32.xlu1 %v5375_v26, %s4764_s28 }
 0x470   : > { %1871 = vrot.lane.b32.xlu0 %v5360_v17, %s4763_s27 }
 0x471   : > { %2078 = vrot.lane.b32.xlu1 %v5380_v59, %s4763_s27 }
 0x474   : > { %1867 = vrot.lane.b32.xlu0 %v5360_v17, %s4764_s28 }
 0x475   : > { %2074 = vrot.lane.b32.xlu1 %v5380_v59, %s4764_s28 }
 0x478   : > { %2011 = vrot.lane.b32.xlu0 %v5385_v36, %s4763_s27 }
 0x479   : > { %2076 = vrot.lane.b32.xlu1 %v5370_v39, %s4764_s28 }
 0x47c   : > { %1869 = vrot.lane.b32.xlu0 %v5485_v35, %s4764_s28 }
 0x47d   : > { %2377 = vrot.lane.b32.xlu1 %v5485_v35, %s4765_s29 }
 0x480   : > { %2009 = vrot.lane.b32.xlu0 %v5390_v47, %s4763_s27  ;;  %s4771_s27 = smov 24  }
 0x484   : > { %2005 = vrot.lane.b32.xlu0 %v5390_v47, %s4764_s28 }
 0x488   : > { %2007 = vrot.lane.b32.xlu0 %v5385_v36, %s4764_s28 }
 0x4b8   : > { %v1543_v28 = vpop.xlane.xlu1 %1542 }
 0x4bc   : > { %v1555_v51 = vpop.xlane.xlu1 %1554 }
 0x4c0   : > { %v1537_v25 = vpop.xlane.xlu1 %1536 }
 0x4c3   : > { %v1546_v55 = vpop.xlane.xlu0 %1545 }
 0x4c4   : > { %v1549_v63 = vpop.xlane.xlu1 %1548  ;;  %4558 = vrcp.f32 %v1546_v55 }
 0x4c5   : > { %4560 = vrcp.f32 %v1537_v25 }
 0x4c6   : > { %4562 = vrcp.f32 %v1543_v28 }
 0x4c7   : > { %v1558_v58 = vpop.xlane.xlu0 %1557 }
 0x4c9   : > { %v1567_v49 = vpop.xlane.xlu1 %1566 }
 0x4cb   : > { %v1540_v38 = vpop.xlane.xlu0 %1539 }
 0x4cc   : > { %4564 = vrcp.f32 %v1540_v38 }
 0x4cd   : > { %4566 = vrcp.f32 %v1558_v58  ;;  %v1579_v23 = vpop.xlane.xlu1 %1578 }
 0x4ce   : > { %4568 = vrcp.f32 %v1549_v63 }
 0x4cf   : > { %4570 = vrcp.f32 %v1555_v51  ;;  %v1552_v24 = vpop.xlane.xlu0 %1551 }
 0x4d0   : > { %4572 = vrcp.f32 %v1552_v24 }
 0x4d1   : > { %v1561_v32 = vpop.xlane.xlu1 %1560  ;;  %v4559_v40 = vpop.eup %4558 }
 0x4d2   : > { %v4561_v19 = vpop.eup %4560  ;;  %v1590_v56 = vmul.f32 %v4559_v40, %v5421_v20 }
 0x4d3   : > { %v1570_v2 = vpop.xlane.xlu0 %1569  ;;  %v4563_v60 = vpop.eup %4562  ;;  %v1584_v43 = vmul.f32 %v4561_v19, %v5413_v48 }
 0x4d4   : > { %4574 = vrcp.f32 %v1570_v2  ;;  %v1588_v63 = vmul.f32 %v4563_v60, %v5402_v1 }
 0x4d5   : > { %4576 = vrcp.f32 %v1561_v32  ;;  %v1573_v25 = vpop.xlane.xlu1 %1572 }
 0x4d6   : > { %4578 = vrcp.f32 %v1567_v49  ;;  %v1616_v2 = vpack.c.bf16 %v1590_v56, %v1588_v63 }
 0x4d7   : > { %v1582_v12 = vpop.xlane.xlu0 %1581 }
 0x4d9   : > { %v4565_v37 = vpop.eup %4564 }
 0x4da   : > { %v4567_v44 = vpop.eup %4566  ;;  %v1586_v28 = vmul.f32 %v4565_v37, %v5431_v13 }
 0x4db   : > { %v4569_v51 = vpop.eup %4568  ;;  %v1564_v55 = vpop.xlane.xlu0 %1563  ;;  %v1598_v20 = vmul.f32 %v4567_v44, %v5429_v27 }
 0x4dc   : > { %v4571_v58 = vpop.eup %4570  ;;  %4580 = vrcp.f32 %v1564_v55  ;;  %v1615_v38 = vpack.c.bf16 %v1586_v28, %v1584_v43  ;;  %v1592_v48 = vmul.f32 %v4569_v51, %v5416_v34  ;;  %v1943_v27 = vpop.permute.xlu1 %1942 }
 0x4dd   : > { %v4573_v24 = vpop.eup %4572  ;;  %4582 = vrcp.f32 %v1582_v12  ;;  %v1596_v1 = vmul.f32 %v4571_v58, %v5408_v31 }
 0x4de   : > { %4584 = vrcp.f32 %v1573_v25  ;;  %4124 = vmatprep.mubr.msk.bf16.mxu0 %vm686_vm1, %v1615_v38  ;;  %v1594_v13 = vmul.f32 %v4573_v24, %v5440_v53 }
 0x4df   : > { %4586 = vrcp.f32 %v1579_v23  ;;  %4125 = vmatmul.mubr.msk.bf16.vlgmr.msra.gmra.mxu0 %vm686_vm1, %v1616_v2  ;;  %v1576_v49 = vpop.xlane.xlu0 %1575  ;;  %v1618_v40 = vpack.c.bf16 %v1598_v20, %v1596_v1 }
 0x4e0   : > { %4137 = vmatpush3.bf16.msra.mxu0 %v5456_v30  ;;  %4588 = vrcp.f32 %v1576_v49  ;;  %v1617_v32 = vpack.c.bf16 %v1594_v13, %v1592_v48  ;;  %v1941_v23 = vpop.permute.xlu1 %1940 }
 0x4e1   : > { %4138 = vmatprep.subr.bf16.mxu0 %v1746_v16  ;;  %v4575_v31 = vpop.eup %4574  ;;  %v1951_v48 = vsel %vm351_vm0, %v1941_v23, 0 }
 0x4e2   : > { %4132 = vmatprep.mubr.msk.bf16.mxu1 %vm686_vm1, %v1617_v32  ;;  %v4577_v53 = vpop.eup %4576  ;;  %v1606_v60 = vmul.f32 %v4575_v31, %v5448_v15 }
 0x4e3   : > { %4133 = vmatmul.mubr.msk.bf16.vlgmr.msra.gmra.mxu1 %vm686_vm1, %v1618_v40  ;;  %v1874_v34 = vpop.permute.xlu0 %1873  ;;  %v4579_v19 = vpop.eup %4578 }
 0x4e4   : > { %4139 = vmatpush3.bf16.msra.mxu0 %v1746_v16  ;;  %4145 = vmatpush3.bf16.msra.mxu1 %v5454_v46  ;;  %v1600_v16 = vmul.f32 %v4577_v53, %v5452_v8  ;;  %v1604_v44 = vmul.f32 %v4579_v19, %v5435_v42  ;;  %v1937_v15 = vpop.permute.xlu1 %1936 }
 0x4e5   : > { %4146 = vmatprep.subr.bf16.mxu1 %v5499_v18  ;;  %4296 = vmatprep.subr.msk.bf16.mxu0 %vm351_vm0, %v1874_v34 }
 0x4e6   : > { %v1620_v55 = vpack.c.bf16 %v1606_v60, %v1604_v44 }
 0x4e7   : > { %v1872_v30 = vpop.permute.xlu0 %1871 }
 0x4e8   : > { %4147 = vmatpush3.bf16.msra.mxu1 %v5499_v18  ;;  %v1885_v18 = vsel %vm351_vm0, %v1874_v34, 0 }
 0x4e9   : > { %v4581_v12 = vpop.eup %4580  ;;  %4298 = vmatprep.subr.msk.bf16.mxu1 %vm351_vm0, %v1943_v27 }
 0x4ea   : > { %v4583_v37 = vpop.eup %4582  ;;  %v1602_v46 = vmul.f32 %v4581_v12, %v5472_v21 }
 0x4eb   : > { %v4585_v56 = vpop.eup %4584  ;;  %v1868_v43 = vpop.permute.xlu0 %1867  ;;  %v1614_v63 = vmul.f32 %v4583_v37, %v5461_v57  ;;  %v1954_v57 = vsel %vm351_vm0, %v1943_v27, 0  ;;  %v5669_v37 = vld [vmem:[%s4885_s30 + $0x18] sm:$0xff] }
 0x4ec   : > { %v4587_v28 = vpop.eup %4586  ;;  %v1619_v51 = vpack.c.bf16 %v1602_v46, %v1600_v16  ;;  %v1608_v58 = vmul.f32 %v4585_v56, %v5466_v3  ;;  %v2081_v3 = vpop.permute.xlu1 %2080 }
 0x4ed   : > { %v4589_v25 = vpop.eup %4588  ;;  %v1612_v42 = vmul.f32 %v4587_v28, %v5444_v29  ;;  %v2092_v32 = vsel %vm351_vm0, %v2081_v3, 0 }
 0x4ee   : > { %4140 = vmatprep.mubr.msk.bf16.mxu0 %vm686_vm1, %v1619_v51  ;;  %v1610_v8 = vmul.f32 %v4589_v25, %v5476_v22  ;;  %v1882_v22 = vsel %vm351_vm0, %v1872_v30, 0 }
 0x4ef   : > { %4141 = vmatmul.mubr.msk.bf16.vlgmr.msra.gmra.mxu0 %vm686_vm1, %v1620_v55  ;;  %v2012_v21 = vpop.permute.xlu0 %2011  ;;  %v1622_v24 = vpack.c.bf16 %v1614_v63, %v1612_v42 }
 0x4f0   : > { %4153 = vmatpush3.bf16.xpose.msra.mxu0 %v1885_v18  ;;  %v1621_v38 = vpack.c.bf16 %v1610_v8, %v1608_v58  ;;  %4156 = vmatprep.mubr.msk.bf16.mxu0 %vm351_vm0, %v1868_v43  ;;  %v1939_v2 = vpop.permute.xlu1 %1938  ;;  %v2023_v49 = vsel %vm351_vm0, %v2012_v21, 0 }
 0x4f1   : > { %4297 = vmatprep.subr.msk.bf16.mxu0 %vm351_vm0, %v1872_v30 }
 0x4f2   : > { %4148 = vmatprep.mubr.msk.bf16.mxu1 %vm686_vm1, %v1621_v38  ;;  %v5643_v38 = vld [vmem:[%s4885_s30 + $0x30] sm:$0xff] }
 0x4f3   : > { %4149 = vmatmul.mubr.msk.bf16.vlgmr.msra.gmra.mxu1 %vm686_vm1, %v1622_v24  ;;  %v1870_v29 = vpop.permute.xlu0 %1869 }
 0x4f4   : > { %4161 = vmatpush3.bf16.xpose.msra.mxu1 %v1954_v57  ;;  %4164 = vmatprep.mubr.msk.bf16.mxu1 %vm351_vm0, %v1937_v15  ;;  %v2079_v13 = vpop.permute.xlu1 %2078  ;;  %v5635_v57 = vld [vmem:[%s4885_s30] sm:$0xff] }
 0x4f5   : > { %4299 = vmatprep.subr.msk.bf16.mxu1 %vm351_vm0, %v1941_v23  ;;  %v2089_v34 = vsel %vm351_vm0, %v2079_v13, 0 }
 0x4f7   : > { %v2010_v20 = vpop.permute.xlu0 %2009 }
 0x4f8   : > { %4155 = vmatpush3.bf16.xpose.msra.mxu0 %v1882_v22  ;;  %v2075_v40 = vpop.permute.xlu1 %2074  ;;  %v2020_v27 = vsel %vm351_vm0, %v2010_v20, 0 }
 0x4f9   : > { %4300 = vmatprep.subr.msk.bf16.mxu0 %vm351_vm0, %v2012_v21 }
 0x4fb   : > { %v2006_v1 = vpop.permute.xlu0 %2005 }
 0x4fc   : > { %4163 = vmatpush3.bf16.xpose.msra.mxu1 %v1951_v48  ;;  %v2077_v53 = vpop.permute.xlu1 %2076 }
 0x4fd   : > { %4302 = vmatprep.subr.msk.bf16.mxu1 %vm351_vm0, %v2081_v3  ;;  %v5606_v3 = vld [vmem:[%s6429_s1 + $0x50] sm:$0xff] }
 0x4ff   : > { %4157 = vmatmul.mubr.msk.bf16.vlgmr.msra.gmra.mxu0 %vm351_vm0, %v1870_v29  ;;  %v2008_v31 = vpop.permute.xlu0 %2007 }
 0x500   : > { %4169 = vmatpush3.bf16.xpose.msra.mxu0 %v2023_v49  ;;  %4172 = vmatprep.mubr.msk.bf16.mxu0 %vm351_vm0, %v2006_v1  ;;  %v2378_v30 = vpop.permute.xlu1 %2377 }
 0x501   : > { %4301 = vmatprep.subr.msk.bf16.mxu0 %vm351_vm0, %v2010_v20 }
 0x503   : > { %4165 = vmatmul.mubr.msk.bf16.vlgmr.msra.gmra.mxu1 %vm351_vm0, %v1939_v2  ;;  %v5611_v2 = vld [vmem:[%s6429_s1 + $0x40] sm:$0xff] }
 0x504   : > { %4177 = vmatpush3.bf16.xpose.msra.mxu1 %v2092_v32  ;;  %4180 = vmatprep.mubr.msk.bf16.mxu1 %vm351_vm0, %v2075_v40 }
 0x505   : > { %4303 = vmatprep.subr.msk.bf16.mxu1 %vm351_vm0, %v2079_v13 }
 0x508   : > { %4171 = vmatpush3.bf16.xpose.msra.mxu0 %v2020_v27  ;;  %v5616_v27 = vld [vmem:[%s4885_s30 + $0x10] sm:$0xff] }
 0x509   : > { %4184 = vmatprep.subr.bf16.mxu0 %v2378_v30 }
 0x50c   : > { %4179 = vmatpush3.bf16.xpose.msra.mxu1 %v2089_v34 }
 0x50f   : > { %4173 = vmatmul.mubr.msk.bf16.vlgmr.msra.gmra.mxu0 %vm351_vm0, %v2008_v31 }
 0x510   : > { %4185 = vmatpush3.bf16.msra.mxu0 %v2378_v30 }
 0x513   : > { %4181 = vmatmul.mubr.msk.bf16.vlgmr.msra.gmra.mxu1 %vm351_vm0, %v2077_v53  ;;  %v5624_v53 = vld [vmem:[%s6429_s1 + $0x48] sm:$0xff] }
 0x59f   : > { %v5555_v23 = vpop.f32.mrf.mxu0 }
 0x5a1   : > { %v5557_v19 = vpop.f32.mrf.mxu0 }
 0x5a2   : > { %6463 = vst [vmem:[#allocation18_spill] sm:$0xff] %v5557_v19 }
 0x5a3   : > { %v5559_v12 = vpop.f32.mrf.mxu0  ;;  %v5561_v60 = vpop.f32.mrf.mxu1 }
 0x5a4   : > { %6464 = vst [vmem:[#allocation19_spill] sm:$0xff] %v5561_v60 }
 0x5a5   : > { %v5565_v16 = vpop.f32.mrf.mxu0  ;;  %v5567_v46 = vpop.f32.mrf.mxu1 }
 0x5a6   : > { %6465 = vst [vmem:[#allocation20_spill] sm:$0xff] %v5565_v16  ;;  %6466 = vst [vmem:[#allocation21_spill] sm:$0xff] %v5567_v46 }
 0x5a7   : > { %v5571_v44 = vpop.f32.mrf.mxu1 }
 0x5a8   : > { %6467 = vst [vmem:[#allocation22_spill] sm:$0xff] %v5571_v44 }
 0x5a9   : > { %v5575_v28 = vpop.f32.mrf.mxu1 }
 0x5aa   : > { %6468 = vst [vmem:[#allocation23_spill] sm:$0xff] %v5575_v28 }
 0x5af   : > { %v5579_v25 = vpop.f32.mrf.mxu0 }
 0x5b0   : > { %6469 = vst [vmem:[#allocation24_spill] sm:$0xff] %v5579_v25 }
 0x5b1   : > { %v5581_v55 = vpop.f32.mrf.mxu0 }
 0x5b2   : > { %6470 = vst [vmem:[#allocation25_spill] sm:$0xff] %v5581_v55 }
 0x5b3   : > { %v5583_v18 = vpop.f32.mrf.mxu0  ;;  %v5585_v63 = vpop.f32.mrf.mxu1 }
 0x5b4   : > { %6471 = vst [vmem:[#allocation26_spill] sm:$0xff] %v5583_v18  ;;  %6472 = vst [vmem:[#allocation27_spill] sm:$0xff] %v5585_v63 }
 0x5b5   : > { %v5589_v58 = vpop.f32.mrf.mxu0  ;;  %v5591_v8 = vpop.f32.mrf.mxu1 }
 0x5b6   : > { %6473 = vst [vmem:[#allocation28_spill] sm:$0xff] %v5589_v58  ;;  %6474 = vst [vmem:[#allocation29_spill] sm:$0xff] %v5591_v8 }
 0x5b7   : > { %v5595_v21 = vpop.f32.mrf.mxu1 }
 0x5b8   : > { %6475 = vst [vmem:[#allocation30_spill] sm:$0xff] %v5595_v21 }
 0x5b9   : > { %v5599_v24 = vpop.f32.mrf.mxu1 }
 0x5ba   : > { %6476 = vst [vmem:[#allocation31_spill] sm:$0xff] %v5599_v24 }
 0x5bf   : > { %v4158_v29 = vpop.f32.mrf.mxu0 }
 0x5c0   : > { %v2145_v22 = vmul.f32 0.35355338, %v4158_v29 }
 0x5c1   : > { %v1921_v20 = vpop.f32.mrf.mxu0 }
 0x5c2   : > { %v2161_v48 = vadd.f32 %v2145_v22, %v5606_v3  ;;  %v2143_v13 = vmul.f32 0.35355338, %v1921_v20  ;;  %v5629_v22 = vld [vmem:[%s6429_s1 + $0x58] sm:$0xff] }
 0x5c3   : > { %v4159_v49 = vpop.f32.mrf.mxu0  ;;  %v4166_v1 = vpop.f32.mrf.mxu1 }
 0x5c4   : > { %v2159_v32 = vadd.f32 %v2143_v13, %v5611_v2  ;;  %v2149_v40 = vmul.f32 0.35355338, %v4166_v1  ;;  %v5619_v34 = vadd.f32 %v5616_v27, %v2161_v48  ;;  %v2146_v31 = vmul.f32 0.35355338, %v4159_v49 }
 0x5c5   : > { %v1924_v30 = vpop.f32.mrf.mxu0  ;;  %v1990_v29 = vpop.f32.mrf.mxu1 }
 0x5c6   : > { %v2165_v20 = vadd.f32 %v2149_v40, %v5606_v3  ;;  %v2144_v13 = vmul.f32 0.35355338, %v1924_v30  ;;  %v2147_v1 = vmul.f32 0.35355338, %v1990_v29  ;;  %v2197_v49 = vsel %vm686_vm1, %v5619_v34, -inf }
 0x5c7   : > { %v4167_v48 = vpop.f32.mrf.mxu1  ;;  %v5638_v42 = vadd.f32 %v5635_v57, %v2159_v32  ;;  %2198 = vmax.xlane.f32.xlu1 %v2197_v49  ;;  %v2162_v30 = vadd.f32 %v2146_v31, %v5629_v22  ;;  %v5660_v49 = vld [vmem:[%s4885_s30 + $0x8] sm:$0xff] }
 0x5c8   : > { %v2160_v51 = vadd.f32 %v2144_v13, %v5624_v53  ;;  %v2163_v56 = vadd.f32 %v2147_v1, %v5611_v2  ;;  %v5646_v40 = vadd.f32 %v5643_v38, %v2165_v20  ;;  %v2150_v29 = vmul.f32 0.35355338, %v4167_v48  ;;  %v5654_v13 = vld [vmem:[%s4885_s30 + $0x20] sm:$0xff] }
 0x5c9   : > { %v2191_v15 = vsel %vm686_vm1, %v5638_v42, -inf  ;;  %v1993_v43 = vpop.f32.mrf.mxu1  ;;  %v5672_v4 = vadd.f32 %v5669_v37, %v2162_v30 }
 0x5ca   : > { %2192 = vmax.xlane.f32.xlu0 %v2191_v15  ;;  %v2209_v32 = vsel %vm686_vm1, %v5646_v40, -inf  ;;  %v5657_v1 = vadd.f32 %v5654_v13, %v2163_v56  ;;  %v5663_v20 = vadd.f32 %v5660_v49, %v2160_v51  ;;  %v2166_v15 = vadd.f32 %v2150_v29, %v5629_v22 }
 0x5cb   : > { %2210 = vmax.xlane.f32.xlu1 %v2209_v32  ;;  %v2148_v48 = vmul.f32 0.35355338, %v1993_v43  ;;  %v2200_v29 = vsel %vm686_vm1, %v5672_v4, -inf }
 0x5cc   : > { %v2203_v31 = vsel %vm686_vm1, %v5657_v1, -inf  ;;  %v2194_v56 = vsel %vm686_vm1, %v5663_v20, -inf  ;;  %v5683_v30 = vadd.f32 %v5680_v54, %v2166_v15  ;;  %v5695_v15 = vld [vmem:[%s4885_s30 + $0x28] sm:$0xff] }
 0x5cd   : > { %v2164_v32 = vadd.f32 %v2148_v48, %v5624_v53 }
 0x5ce   : > { %2204 = vmax.xlane.f32.xlu0 %v2203_v31  ;;  %v2212_v33 = vsel %vm686_vm1, %v5683_v30, -inf }
 0x5cf   : > { %v4174_v61 = vpop.f32.mrf.mxu0  ;;  %2195 = vmax.xlane.f32.xlu1 %v2194_v56 }
 0x5d0   : > { %v2153_v51 = vmul.f32 0.35355338, %v4174_v61 }
 0x5d1   : > { %v2059_v43 = vpop.f32.mrf.mxu0 }
 0x5d2   : > { %v2169_v31 = vadd.f32 %v2153_v51, %v5606_v3  ;;  %2201 = vmax.xlane.f32.xlu0 %v2200_v29  ;;  %v2151_v9 = vmul.f32 0.35355338, %v2059_v43  ;;  %v5698_v51 = vadd.f32 %v5695_v15, %v2164_v32 }
 0x5d3   : > { %v4175_v5 = vpop.f32.mrf.mxu0  ;;  %v4182_v41 = vpop.f32.mrf.mxu1 }
 0x5d4   : > { %v2154_v56 = vmul.f32 0.35355338, %v4175_v5  ;;  %v2157_v61 = vmul.f32 0.35355338, %v4182_v41  ;;  %v5690_v48 = vadd.f32 %v5687_v10, %v2169_v31  ;;  %v2167_v43 = vadd.f32 %v2151_v9, %v5611_v2 }
 0x5d5   : > { %v2128_v6 = vpop.f32.mrf.mxu1  ;;  %v2062_v41 = vpop.f32.mrf.mxu0 }
 0x5d6   : > { %v2170_v29 = vadd.f32 %v2154_v56, %v5629_v22  ;;  %v2173_v5 = vadd.f32 %v2157_v61, %v5606_v3  ;;  %2213 = vmax.xlane.f32.xlu0 %v2212_v33  ;;  %v2155_v31 = vmul.f32 0.35355338, %v2128_v6  ;;  %v2221_v7 = vsel %vm686_vm1, %v5690_v48, -inf  ;;  %v5714_v3 = vld [vmem:[%s4885_s30 + $0x58] sm:$0xff] }
 0x5d7   : > { %v4183_v0 = vpop.f32.mrf.mxu1  ;;  %2222 = vmax.xlane.f32.xlu1 %v2221_v7  ;;  %v2152_v56 = vmul.f32 0.35355338, %v2062_v41  ;;  %v2206_v33 = vsel %vm686_vm1, %v5698_v51, -inf  ;;  %v5726_v41 = vld [vmem:[%s4885_s30 + $0x40] sm:$0xff] }
 0x5d8   : > { %v2158_v11 = vmul.f32 0.35355338, %v4183_v0  ;;  %v5709_v32 = vadd.f32 %v5706_v50, %v2173_v5  ;;  %v5717_v6 = vadd.f32 %v5714_v3, %v2170_v29  ;;  %v2171_v61 = vadd.f32 %v2155_v31, %v5611_v2  ;;  %v5732_v29 = vld [vmem:[%s4885_s30 + $0x78] sm:$0xff] }
 0x5d9   : > { %v2131_v0 = vpop.f32.mrf.mxu1  ;;  %v5729_v45 = vadd.f32 %v5726_v41, %v2167_v43 }
 0x5da   : > { %v2174_v9 = vadd.f32 %v2158_v11, %v5629_v22  ;;  %2207 = vmax.xlane.f32.xlu0 %v2206_v33  ;;  %v2233_v7 = vsel %vm686_vm1, %v5709_v32, -inf  ;;  %v2224_v5 = vsel %vm686_vm1, %v5717_v6, -inf  ;;  %v2168_v22 = vadd.f32 %v2152_v56, %v5624_v53 }
 0x5db   : > { %2234 = vmax.xlane.f32.xlu1 %v2233_v7  ;;  %v2156_v33 = vmul.f32 0.35355338, %v2131_v0  ;;  %v2215_v2 = vsel %vm686_vm1, %v5729_v45, -inf  ;;  %v5746_v43 = vadd.f32 %v5743_v14, %v2171_v61  ;;  %v5750_v7 = vld [vmem:[%s4885_s30 + $0x48] sm:$0xff]  ;;  %s4766_s30 = smov 72  }
 0x5dc   : > { %v5735_v11 = vadd.f32 %v5732_v29, %v2174_v9  ;;  %v5753_v56 = vadd.f32 %v5750_v7, %v2168_v22 }
 0x5dd   : > { %v2172_v9 = vadd.f32 %v2156_v33, %v5624_v53  ;;  %v2227_v0 = vsel %vm686_vm1, %v5746_v43, -inf }
 0x5de   : > { %2225 = vmax.xlane.f32.xlu0 %v2224_v5  ;;  %v2236_v31 = vsel %vm686_vm1, %v5735_v11, -inf  ;;  %v2218_v5 = vsel %vm686_vm1, %v5753_v56, -inf }
 0x5df   : > { %2216 = vmax.xlane.f32.xlu1 %v2215_v2  ;;  %v5763_v61 = vadd.f32 %v5760_v52, %v2172_v9 }
 0x5e1   : > { %v2230_v53 = vsel %vm686_vm1, %v5763_v61, -inf }
 0x5e2   : > { %2237 = vmax.xlane.f32.xlu0 %v2236_v31 }
 0x5e3   : > { %2228 = vmax.xlane.f32.xlu1 %v2227_v0 }
 0x5e6   : > { %2219 = vmax.xlane.f32.xlu0 %v2218_v5 }
 0x5ea   : > { %2231 = vmax.xlane.f32.xlu0 %v2230_v53 }
 0x5f4   : > { %2375 = vrot.lane.b32.xlu1 %v5360_v17, %s4765_s29 }
 0x5f8   : > { %2436 = vrot.lane.b32.xlu1 %v5365_v62, %s4765_s29 }
 0x5fc   : > { %2560 = vrot.lane.b32.xlu1 %v5370_v39, %s4765_s29 }
 0x600   : > { %2438 = vrot.lane.b32.xlu0 %v5375_v26, %s4765_s29  ;;  %2558 = vrot.lane.b32.xlu1 %v5380_v59, %s4765_s29 }
 0x604   : > { %2499 = vrot.lane.b32.xlu0 %v5385_v36, %s4765_s29 }
 0x608   : > { %2497 = vrot.lane.b32.xlu0 %v5390_v47, %s4765_s29 }
 0x650   : > { %v2199_v22 = vpop.xlane.xlu1 %2198 }
 0x651   : > { %v2241_v17 = vsub.f32 %v5619_v34, %v2199_v22 }
 0x653   : > { %v2193_v33 = vpop.xlane.xlu0 %2192  ;;  %v2259_v62 = vmul.f32 1.442695, %v2241_v17 }
 0x654   : > { %v2239_v2 = vsub.f32 %v5638_v42, %v2193_v33  ;;  %v2211_v39 = vpop.xlane.xlu1 %2210 }
 0x655   : > { %4590 = vpow2.f32 %v2259_v62  ;;  %v2245_v26 = vsub.f32 %v5646_v40, %v2211_v39 }
 0x656   : > { %v2255_v9 = vmul.f32 1.442695, %v2239_v2 }
 0x657   : > { %v2205_v31 = vpop.xlane.xlu0 %2204  ;;  %v2267_v59 = vmul.f32 1.442695, %v2245_v26 }
 0x658   : > { %v2243_v0 = vsub.f32 %v5657_v1, %v2205_v31  ;;  %v2196_v36 = vpop.xlane.xlu1 %2195 }
 0x659   : > { %4592 = vpow2.f32 %v2267_v59  ;;  %v2240_v53 = vsub.f32 %v5663_v20, %v2196_v36 }
 0x65a   : > { %v2263_v5 = vmul.f32 1.442695, %v2243_v0  ;;  %4594 = vpow2.f32 %v2255_v9 }
 0x65b   : > { %v2202_v47 = vpop.xlane.xlu0 %2201  ;;  %v2257_v17 = vmul.f32 1.442695, %v2240_v53 }
 0x65c   : > { %v2242_v34 = vsub.f32 %v5672_v4, %v2202_v47  ;;  %4596 = vpow2.f32 %v2263_v5 }
 0x65e   : > { %v2261_v22 = vmul.f32 1.442695, %v2242_v34 }
 0x65f   : > { %v2214_v42 = vpop.xlane.xlu0 %2213 }
 0x660   : > { %4598 = vpow2.f32 %v2261_v22  ;;  %v2246_v40 = vsub.f32 %v5683_v30, %v2214_v42  ;;  %v2223_v33 = vpop.xlane.xlu1 %2222 }
 0x661   : > { %v2249_v1 = vsub.f32 %v5690_v48, %v2223_v33 }
 0x662   : > { %v2269_v62 = vmul.f32 1.442695, %v2246_v40  ;;  %v5789_v2 = vpop.eup %4590 }
 0x663   : > { %v2208_v39 = vpop.xlane.xlu0 %2207  ;;  %v2275_v26 = vmul.f32 1.442695, %v2249_v1  ;;  %v2293_v20 = vsel %vm686_vm1, %v5789_v2, 0.0 }
 0x664   : > { %4600 = vpow2.f32 %v2269_v62  ;;  %v2244_v4 = vsub.f32 %v5698_v51, %v2208_v39  ;;  %v2235_v31 = vpop.xlane.xlu1 %2234  ;;  %2294 = vadd.xlane.f32.xlu1 %v2293_v20 }
 0x665   : > { %4602 = vpow2.f32 %v2257_v17  ;;  %v2253_v9 = vsub.f32 %v5709_v32, %v2235_v31 }
 0x666   : > { %4604 = vpow2.f32 %v2275_v26  ;;  %v2265_v30 = vmul.f32 1.442695, %v2244_v4  ;;  %v5795_v59 = vpop.eup %4592 }
 0x667   : > { %v2226_v48 = vpop.xlane.xlu0 %2225  ;;  %v2283_v0 = vmul.f32 1.442695, %v2253_v9  ;;  %v2305_v5 = vsel %vm686_vm1, %v5795_v59, 0.0  ;;  %v5800_v51 = vpop.eup %4594 }
 0x668   : > { %v2250_v36 = vsub.f32 %v5717_v6, %v2226_v48  ;;  %4606 = vpow2.f32 %v2265_v30  ;;  %2306 = vadd.xlane.f32.xlu1 %v2305_v5  ;;  %v2217_v47 = vpop.xlane.xlu1 %2216  ;;  %v2287_v6 = vsel %vm686_vm1, %v5800_v51, 0.0 }
 0x669   : > { %4608 = vpow2.f32 %v2283_v0  ;;  %v2247_v53 = vsub.f32 %v5729_v45, %v2217_v47  ;;  %v5803_v32 = vpop.eup %4596 }
 0x66a   : > { %v2277_v34 = vmul.f32 1.442695, %v2250_v36  ;;  %v2299_v4 = vsel %vm686_vm1, %v5803_v32, 0.0 }
 0x66b   : > { %v2238_v22 = vpop.xlane.xlu0 %2237  ;;  %v2271_v42 = vmul.f32 1.442695, %v2247_v53 }
 0x66c   : > { %v2254_v40 = vsub.f32 %v5735_v11, %v2238_v22  ;;  %4610 = vpow2.f32 %v2277_v34  ;;  %v2229_v33 = vpop.xlane.xlu1 %2228  ;;  %2288 = vadd.xlane.f32.xlu1 %v2287_v6 }
 0x66d   : > { %v5808_v17 = vpop.eup %4598  ;;  %4612 = vpow2.f32 %v2271_v42  ;;  %v2251_v1 = vsub.f32 %v5746_v43, %v2229_v33 }
 0x66e   : > { %v2285_v62 = vmul.f32 1.442695, %v2254_v40  ;;  %v2296_v45 = vsel %vm686_vm1, %v5808_v17, 0.0 }
 0x66f   : > { %2297 = vadd.xlane.f32.xlu0 %v2296_v45  ;;  %v2220_v39 = vpop.xlane.xlu0 %2219  ;;  %v2279_v26 = vmul.f32 1.442695, %v2251_v1 }
 0x670   : > { %v2248_v11 = vsub.f32 %v5753_v56, %v2220_v39  ;;  %4614 = vpow2.f32 %v2285_v62  ;;  %2300 = vadd.xlane.f32.xlu1 %v2299_v4  ;;  %v2376_v31 = vpop.permute.xlu1 %2375 }
 0x671   : > { %v5816_v20 = vpop.eup %4600  ;;  %4616 = vpow2.f32 %v2279_v26  ;;  %4186 = vmatprep.subr.bf16.mxu0 %v2376_v31 }
 0x672   : > { %v5818_v30 = vpop.eup %4602  ;;  %v2273_v43 = vmul.f32 1.442695, %v2248_v11  ;;  %v2308_v9 = vsel %vm686_vm1, %v5816_v20, 0.0  ;;  %4187 = vmatpush3.bf16.msra.mxu0 %v2376_v31 }
 0x673   : > { %v5822_v48 = vpop.eup %4604  ;;  %2309 = vadd.xlane.f32.xlu0 %v2308_v9  ;;  %v2232_v56 = vpop.xlane.xlu0 %2231  ;;  %v2290_v53 = vsel %vm686_vm1, %v5818_v30, 0.0 }
 0x674   : > { %v2252_v0 = vsub.f32 %v5763_v61, %v2232_v56  ;;  %v2317_v36 = vsel %vm686_vm1, %v5822_v48, 0.0  ;;  %v2437_v5 = vpop.permute.xlu1 %2436  ;;  %4618 = vpow2.f32 %v2273_v43 }
 0x675   : > { %2318 = vadd.xlane.f32.xlu1 %v2317_v36  ;;  %v5827_v47 = vpop.eup %4606  ;;  %v5868_v36 = vld [vmem:[%s4811_s18 + $0x18] sm:$0xff]  }
 0x676   : > { %v2281_v34 = vmul.f32 1.442695, %v2252_v0  ;;  %v5831_v22 = vpop.eup %4608  ;;  %v2302_v6 = vsel %vm686_vm1, %v5827_v47, 0.0 }
 0x677   : > { %2291 = vadd.xlane.f32.xlu0 %v2290_v53  ;;  %v2439_v42 = vpop.permute.xlu0 %2438  ;;  %v2329_v40 = vsel %vm686_vm1, %v5831_v22, 0.0  ;;  %v5883_v53 = vld [vmem:[%s4811_s18] sm:$0xff]  }
 0x678   : > { %4192 = vmatprep.subr.bf16.mxu1 %v2439_v42  ;;  %4620 = vpow2.f32 %v2281_v34  ;;  %v5841_v62 = vpop.permute.xlu1 %2560  ;;  %v5877_v34 = vld [vmem:[%s4811_s18 + $0x38] sm:$0xff]  }
 0x679   : > { %2330 = vadd.xlane.f32.xlu1 %v2329_v40  ;;  %4193 = vmatpush3.bf16.msra.mxu1 %v2439_v42  ;;  %v5835_v61 = vpop.eup %4610  ;;  %v5887_v42 = vld [vmem:[%s4811_s18 + $0x30] sm:$0xff]   ;;  %v5893_v40 = vld [vmem:[%s4811_s18 + $0x28] sm:$0xff]  }
 0x67a   : > { %4194 = vmatprep.subr.bf16.mxu1 %v2437_v5  ;;  %v5839_v33 = vpop.eup %4612  ;;  %v2320_v26 = vsel %vm686_vm1, %v5835_v61, 0.0 }
 0x67b   : > { %2303 = vadd.xlane.f32.xlu0 %v2302_v6  ;;  %v5843_v1 = vpop.permute.xlu0 %2499  ;;  %v2311_v45 = vsel %vm686_vm1, %v5839_v33, 0.0  ;;  %v5899_v6 = vld [vmem:[%s4811_s18 + $0x20] sm:$0xff]  }
 0x67c   : > { %4200 = vmatprep.subr.bf16.mxu0 %v5843_v1  ;;  %6477 = vst [vmem:[#allocation32_spill] sm:$0xff] %v5899_v6 }
 0x67d   : > { %2312 = vadd.xlane.f32.xlu1 %v2311_v45  ;;  %4195 = vmatpush3.bf16.msra.mxu1 %v2437_v5  ;;  %v5848_v39 = vpop.eup %4614  ;;  %v5872_v5 = vld [vmem:[%s4811_s18 + $0x10] sm:$0xff]   ;;  %v5904_v45 = vpop.permute.xlu1 %2558 }
 0x67e   : > { %4208 = vmatprep.subr.bf16.mxu1 %v5841_v62  ;;  %v5853_v11 = vpop.eup %4616  ;;  %v2332_v31 = vsel %vm686_vm1, %v5848_v39, 0.0 }
 0x67f   : > { %2321 = vadd.xlane.f32.xlu0 %v2320_v26  ;;  %v2323_v4 = vsel %vm686_vm1, %v5853_v11, 0.0 }
 0x681   : > { %2324 = vadd.xlane.f32.xlu1 %v2323_v4  ;;  %v5859_v43 = vpop.eup %4618 }
 0x682   : > { %v2314_v9 = vsel %vm686_vm1, %v5859_v43, 0.0 }
 0x683   : > { %2333 = vadd.xlane.f32.xlu0 %v2332_v31  ;;  %v2498_v31 = vpop.permute.xlu0 %2497 }
 0x685   : > { %v5863_v56 = vpop.eup %4620 }
 0x686   : > { %v2326_v0 = vsel %vm686_vm1, %v5863_v56, 0.0 }
 0x687   : > { %2315 = vadd.xlane.f32.xlu0 %v2314_v9 }
 0x68b   : > { %2327 = vadd.xlane.f32.xlu0 %v2326_v0 }
 0x692   : > { %2694 = vrot.lane.b32.xlu1 %v5868_v36, %s4766_s30 }
 0x696   : > { %2692 = vrot.lane.b32.xlu1 %v5872_v5, %s4766_s30 }
 0x69a   : > { %2688 = vrot.lane.b32.xlu1 %v5872_v5, %s4767_s13 }
 0x69e   : > { %2832 = vrot.lane.b32.xlu1 %v5877_v34, %s4766_s30 }
 0x6a1   : > { %2625 = vrot.lane.b32.xlu0 %v5485_v35, %s4766_s30 }
 0x6a2   : > { %2690 = vrot.lane.b32.xlu1 %v5868_v36, %s4767_s13 }
 0x6a5   : > { %2623 = vrot.lane.b32.xlu0 %v5883_v53, %s4766_s30 }
 0x6a6   : > { %2830 = vrot.lane.b32.xlu1 %v5887_v42, %s4766_s30 }
 0x6a9   : > { %2619 = vrot.lane.b32.xlu0 %v5883_v53, %s4767_s13 }
 0x6aa   : > { %2826 = vrot.lane.b32.xlu1 %v5887_v42, %s4767_s13 }
 0x6ad   : > { %2763 = vrot.lane.b32.xlu0 %v5893_v40, %s4766_s30 }
 0x6ae   : > { %2828 = vrot.lane.b32.xlu1 %v5877_v34, %s4767_s13 }
 0x6b1   : > { %2621 = vrot.lane.b32.xlu0 %v5485_v35, %s4767_s13 }
 0x6b5   : > { %2761 = vrot.lane.b32.xlu0 %v5899_v6, %s4766_s30 }
 0x6b9   : > { %2757 = vrot.lane.b32.xlu0 %v5899_v6, %s4767_s13 }
 0x6bd   : > { %2759 = vrot.lane.b32.xlu0 %v5893_v40, %s4767_s13 }
 0x6ed   : > { %v2295_v26 = vpop.xlane.xlu1 %2294 }
 0x6f1   : > { %v2307_v4 = vpop.xlane.xlu1 %2306 }
 0x6f5   : > { %v2289_v9 = vpop.xlane.xlu1 %2288 }
 0x6f8   : > { %v2298_v0 = vpop.xlane.xlu0 %2297 }
 0x6f9   : > { %v2301_v8 = vpop.xlane.xlu1 %2300  ;;  %4622 = vrcp.f32 %v2298_v0 }
 0x6fa   : > { %4624 = vrcp.f32 %v2289_v9 }
 0x6fb   : > { %4626 = vrcp.f32 %v2295_v26 }
 0x6fc   : > { %v2310_v24 = vpop.xlane.xlu0 %2309 }
 0x6fe   : > { %v2319_v55 = vpop.xlane.xlu1 %2318 }
 0x700   : > { %v2292_v35 = vpop.xlane.xlu0 %2291 }
 0x701   : > { %4628 = vrcp.f32 %v2292_v35 }
 0x702   : > { %4630 = vrcp.f32 %v2310_v24  ;;  %v2331_v58 = vpop.xlane.xlu1 %2330 }
 0x703   : > { %4632 = vrcp.f32 %v2301_v8 }
 0x704   : > { %4634 = vrcp.f32 %v2307_v4  ;;  %v2304_v46 = vpop.xlane.xlu0 %2303 }
 0x705   : > { %4636 = vrcp.f32 %v2304_v46 }
 0x706   : > { %v2313_v19 = vpop.xlane.xlu1 %2312  ;;  %v4623_v16 = vpop.eup %4622 }
 0x707   : > { %v4625_v63 = vpop.eup %4624  ;;  %v2342_v0 = vmul.f32 %v4623_v16, %v5808_v17 }
 0x708   : > { %v2322_v28 = vpop.xlane.xlu0 %2321  ;;  %v4627_v6 = vpop.eup %4626  ;;  %v2336_v26 = vmul.f32 %v4625_v63, %v5800_v51 }
 0x709   : > { %4638 = vrcp.f32 %v2322_v28  ;;  %v2340_v35 = vmul.f32 %v4627_v6, %v5789_v2 }
 0x70a   : > { %4640 = vrcp.f32 %v2313_v19  ;;  %v2325_v4 = vpop.xlane.xlu1 %2324 }
 0x70b   : > { %4642 = vrcp.f32 %v2319_v55  ;;  %v2368_v28 = vpack.c.bf16 %v2342_v0, %v2340_v35 }
 0x70c   : > { %v2334_v21 = vpop.xlane.xlu0 %2333 }
 0x70e   : > { %v4629_v25 = vpop.eup %4628  ;;  %v2695_v51 = vpop.permute.xlu1 %2694 }
 0x70f   : > { %v4631_v9 = vpop.eup %4630  ;;  %v2338_v8 = vmul.f32 %v4629_v25, %v5818_v30  ;;  %v2706_v35 = vsel %vm351_vm0, %v2695_v51, 0 }
 0x710   : > { %v4633_v24 = vpop.eup %4632  ;;  %v2316_v46 = vpop.xlane.xlu0 %2315  ;;  %v2350_v16 = vmul.f32 %v4631_v9, %v5816_v20 }
 0x711   : > { %v4635_v18 = vpop.eup %4634  ;;  %4644 = vrcp.f32 %v2316_v46  ;;  %v2367_v60 = vpack.c.bf16 %v2338_v8, %v2336_v26  ;;  %v2344_v19 = vmul.f32 %v4633_v24, %v5803_v32 }
 0x712   : > { %v4637_v44 = vpop.eup %4636  ;;  %4646 = vrcp.f32 %v2334_v21  ;;  %v2348_v63 = vmul.f32 %v4635_v18, %v5795_v59  ;;  %v2693_v59 = vpop.permute.xlu1 %2692 }
 0x713   : > { %4648 = vrcp.f32 %v2325_v4  ;;  %4188 = vmatprep.mubr.msk.bf16.mxu0 %vm686_vm1, %v2367_v60  ;;  %v2346_v25 = vmul.f32 %v4637_v44, %v5827_v47 }
 0x714   : > { %4650 = vrcp.f32 %v2331_v58  ;;  %4189 = vmatmul.mubr.msk.bf16.vlgmr.msra.gmra.mxu0 %vm686_vm1, %v2368_v28  ;;  %v2328_v55 = vpop.xlane.xlu0 %2327  ;;  %v2370_v2 = vpack.c.bf16 %v2350_v16, %v2348_v63 }
 0x715   : > { %4201 = vmatpush3.bf16.msra.mxu0 %v5843_v1  ;;  %4652 = vrcp.f32 %v2328_v55  ;;  %v2369_v21 = vpack.c.bf16 %v2346_v25, %v2344_v19  ;;  %v2703_v19 = vsel %vm351_vm0, %v2693_v59, 0 }
 0x716   : > { %4202 = vmatprep.subr.bf16.mxu0 %v2498_v31  ;;  %v4639_v44 = vpop.eup %4638 }
 0x717   : > { %4196 = vmatprep.mubr.msk.bf16.mxu1 %vm686_vm1, %v2369_v21  ;;  %v4641_v18 = vpop.eup %4640  ;;  %v2358_v20 = vmul.f32 %v4639_v44, %v5835_v61  ;;  %v2689_v61 = vpop.permute.xlu1 %2688 }
 0x718   : > { %4197 = vmatmul.mubr.msk.bf16.vlgmr.msra.gmra.mxu1 %vm686_vm1, %v2370_v2  ;;  %v2626_v60 = vpop.permute.xlu0 %2625  ;;  %v4643_v32 = vpop.eup %4642  ;;  %v2352_v47 = vmul.f32 %v4641_v18, %v5839_v33 }
 0x719   : > { %4203 = vmatpush3.bf16.msra.mxu0 %v2498_v31  ;;  %4209 = vmatpush3.bf16.msra.mxu1 %v5841_v62  ;;  %v2356_v6 = vmul.f32 %v4643_v32, %v5822_v48  ;;  %v2637_v8 = vsel %vm351_vm0, %v2626_v60, 0 }
 0x71a   : > { %4210 = vmatprep.subr.bf16.mxu1 %v5904_v45  ;;  %4304 = vmatprep.subr.msk.bf16.mxu0 %vm351_vm0, %v2626_v60 }
 0x71c   : > { %v2624_v58 = vpop.permute.xlu0 %2623 }
 0x71d   : > { %4211 = vmatpush3.bf16.msra.mxu1 %v5904_v45  ;;  %v2372_v45 = vpack.c.bf16 %v2358_v20, %v2356_v6 }
 0x71e   : > { %v4645_v17 = vpop.eup %4644  ;;  %4306 = vmatprep.subr.msk.bf16.mxu1 %vm351_vm0, %v2695_v51 }
 0x71f   : > { %v4647_v30 = vpop.eup %4646  ;;  %v2354_v62 = vmul.f32 %v4645_v17, %v5859_v43 }
 0x720   : > { %v4649_v1 = vpop.eup %4648  ;;  %v2620_v31 = vpop.permute.xlu0 %2619  ;;  %v2366_v24 = vmul.f32 %v4647_v30, %v5848_v39 }
 0x721   : > { %v4651_v0 = vpop.eup %4650  ;;  %v2371_v9 = vpack.c.bf16 %v2354_v62, %v2352_v47  ;;  %v2360_v4 = vmul.f32 %v4649_v1, %v5853_v11  ;;  %v2833_v11 = vpop.permute.xlu1 %2832 }
 0x722   : > { %v4653_v26 = vpop.eup %4652  ;;  %v2364_v48 = vmul.f32 %v4651_v0, %v5831_v22  ;;  %v2844_v21 = vsel %vm351_vm0, %v2833_v11, 0 }
 0x723   : > { %4204 = vmatprep.mubr.msk.bf16.mxu0 %vm686_vm1, %v2371_v9  ;;  %v2362_v33 = vmul.f32 %v4653_v26, %v5863_v56  ;;  %v2634_v56 = vsel %vm351_vm0, %v2624_v58, 0 }
 0x724   : > { %4205 = vmatmul.mubr.msk.bf16.vlgmr.msra.gmra.mxu0 %vm686_vm1, %v2372_v45  ;;  %v2764_v43 = vpop.permute.xlu0 %2763  ;;  %v2374_v39 = vpack.c.bf16 %v2366_v24, %v2364_v48 }
 0x725   : > { %4217 = vmatpush3.bf16.xpose.msra.mxu0 %v2637_v8  ;;  %v2373_v46 = vpack.c.bf16 %v2362_v33, %v2360_v4  ;;  %4220 = vmatprep.mubr.msk.bf16.mxu0 %vm351_vm0, %v2620_v31  ;;  %v2691_v28 = vpop.permute.xlu1 %2690  ;;  %v2775_v55 = vsel %vm351_vm0, %v2764_v43, 0 }
 0x726   : > { %4305 = vmatprep.subr.msk.bf16.mxu0 %vm351_vm0, %v2624_v58  ;;  %v4749_v58 = vld [vmem:[%s4811_s18 + $0x8] sm:$0xff]  }
 0x727   : > { %4212 = vmatprep.mubr.msk.bf16.mxu1 %vm686_vm1, %v2373_v46  ;;  %3129 = vrot.lane.b32.xlu1 %v4749_v58, %s4768_s16 }
 0x728   : > { %4213 = vmatmul.mubr.msk.bf16.vlgmr.msra.gmra.mxu1 %vm686_vm1, %v2374_v39  ;;  %v2622_v22 = vpop.permute.xlu0 %2621 }
 0x729   : > { %4225 = vmatpush3.bf16.xpose.msra.mxu1 %v2706_v35  ;;  %4228 = vmatprep.mubr.msk.bf16.mxu1 %vm351_vm0, %v2689_v61  ;;  %v2831_v25 = vpop.permute.xlu1 %2830 }
 0x72a   : > { %4307 = vmatprep.subr.msk.bf16.mxu1 %vm351_vm0, %v2693_v59  ;;  %v2841_v60 = vsel %vm351_vm0, %v2831_v25, 0 }
 0x72c   : > { %v2762_v16 = vpop.permute.xlu0 %2761 }
 0x72d   : > { %4219 = vmatpush3.bf16.xpose.msra.mxu0 %v2634_v56  ;;  %v2827_v2 = vpop.permute.xlu1 %2826  ;;  %v2772_v51 = vsel %vm351_vm0, %v2762_v16, 0 }
 0x72e   : > { %4308 = vmatprep.subr.msk.bf16.mxu0 %vm351_vm0, %v2764_v43 }
 0x730   : > { %v2758_v63 = vpop.permute.xlu0 %2757 }
 0x731   : > { %4227 = vmatpush3.bf16.xpose.msra.mxu1 %v2703_v19  ;;  %v2829_v18 = vpop.permute.xlu1 %2828 }
 0x732   : > { %4310 = vmatprep.subr.msk.bf16.mxu1 %vm351_vm0, %v2833_v11 }
 0x734   : > { %4221 = vmatmul.mubr.msk.bf16.vlgmr.msra.gmra.mxu0 %vm351_vm0, %v2622_v22  ;;  %v2760_v44 = vpop.permute.xlu0 %2759  ;;  %v319_v22 = vld [vmem:[%s6429_s1 + $0x70] sm:$0xff] }
 0x735   : > { %4233 = vmatpush3.bf16.xpose.msra.mxu0 %v2775_v55  ;;  %4236 = vmatprep.mubr.msk.bf16.mxu0 %vm351_vm0, %v2758_v63 }
 0x736   : > { %4309 = vmatprep.subr.msk.bf16.mxu0 %vm351_vm0, %v2762_v16  ;;  %v6014_v16 = vld [vmem:[%s6429_s1 + $0x60] sm:$0xff] }
 0x738   : > { %4229 = vmatmul.mubr.msk.bf16.vlgmr.msra.gmra.mxu1 %vm351_vm0, %v2691_v28 }
 0x739   : > { %4241 = vmatpush3.bf16.xpose.msra.mxu1 %v2844_v21  ;;  %4244 = vmatprep.mubr.msk.bf16.mxu1 %vm351_vm0, %v2827_v2 }
 0x73a   : > { %4311 = vmatprep.subr.msk.bf16.mxu1 %vm351_vm0, %v2831_v25 }
 0x73d   : > { %4235 = vmatpush3.bf16.xpose.msra.mxu0 %v2772_v51 }
 0x741   : > { %4243 = vmatpush3.bf16.xpose.msra.mxu1 %v2841_v60 }
 0x744   : > { %4237 = vmatmul.mubr.msk.bf16.vlgmr.msra.gmra.mxu0 %vm351_vm0, %v2760_v44 }
 0x748   : > { %4245 = vmatmul.mubr.msk.bf16.vlgmr.msra.gmra.mxu1 %vm351_vm0, %v2829_v18  ;;  %v6023_v18 = vld [vmem:[%s6429_s1 + $0x68] sm:$0xff] }
 0x799   : > { %v3130_v59 = vpop.permute.xlu1 %3129 }
 0x79a   : > { %4248 = vmatprep.subr.bf16.mxu0 %v3130_v59 }
 0x79b   : > { %4249 = vmatpush3.bf16.msra.mxu0 %v3130_v59 }
 0x7d4   : > { %v5960_v32 = vpop.f32.mrf.mxu0 }
 0x7d6   : > { %v5962_v17 = vpop.f32.mrf.mxu0 }
 0x7d8   : > { %v5964_v20 = vpop.f32.mrf.mxu0  ;;  %v5966_v30 = vpop.f32.mrf.mxu1 }
 0x7d9   : > { %v4379_v47 = vpack.i.bf16 %v5964_v20, %v5960_v32 }
 0x7da   : > { %v5970_v62 = vpop.f32.mrf.mxu0  ;;  %v5972_v1 = vpop.f32.mrf.mxu1 }
 0x7dc   : > { %v5976_v31 = vpop.f32.mrf.mxu1 }
 0x7dd   : > { %v4389_v0 = vpack.i.bf16 %v5976_v31, %v5966_v30  ;;  %v6502_v30 = vpack.i.bf16 %v5970_v62, %v5962_v17 }
 0x7de   : > { %v5980_v9 = vpop.f32.mrf.mxu1 }
 0x7e4   : > { %v5984_v8 = vpop.f32.mrf.mxu0 }
 0x7e6   : > { %v5986_v45 = vpop.f32.mrf.mxu0 }
 0x7e8   : > { %v5988_v24 = vpop.f32.mrf.mxu0  ;;  %v5990_v61 = vpop.f32.mrf.mxu1 }
 0x7e9   : > { %v4399_v4 = vpack.i.bf16 %v5988_v24, %v5984_v8 }
 0x7ea   : > { %v5994_v33 = vpop.f32.mrf.mxu0  ;;  %v5996_v48 = vpop.f32.mrf.mxu1 }
 0x7eb   : > { %v6504_v31 = vpack.i.bf16 %v5994_v33, %v5986_v45 }
 0x7ec   : > { %v6000_v46 = vpop.f32.mrf.mxu1 }
 0x7ed   : > { %v6501_v20 = vpack.i.bf16 %v6000_v46, %v5990_v61 }
 0x7ee   : > { %v6004_v39 = vpop.f32.mrf.mxu1 }
 0x7f4   : > { %v4222_v56 = vpop.f32.mrf.mxu0 }
 0x7f5   : > { %v2897_v28 = vmul.f32 0.35355338, %v4222_v56  ;;  %v320_v56 = vld [vmem:[%s6429_s1 + $0x78] sm:$0xff] }
 0x7f6   : > { %v2673_v19 = vpop.f32.mrf.mxu0 }
 0x7f7   : > { %v2913_v25 = vadd.f32 %v2897_v28, %v319_v22  ;;  %v2895_v55 = vmul.f32 0.35355338, %v2673_v19 }
 0x7f8   : > { %v4223_v63 = vpop.f32.mrf.mxu0  ;;  %v4230_v21 = vpop.f32.mrf.mxu1 }
 0x7f9   : > { %v2911_v2 = vadd.f32 %v2895_v55, %v6014_v16  ;;  %v2901_v51 = vmul.f32 0.35355338, %v4230_v21  ;;  %v6018_v60 = vadd.f32 %v5616_v27, %v2913_v25  ;;  %v2898_v44 = vmul.f32 0.35355338, %v4223_v63 }
 0x7fa   : > { %v2676_v58 = vpop.f32.mrf.mxu0  ;;  %v2742_v59 = vpop.f32.mrf.mxu1 }
 0x7fb   : > { %v2917_v28 = vadd.f32 %v2901_v51, %v319_v22  ;;  %v2896_v19 = vmul.f32 0.35355338, %v2676_v58  ;;  %v2899_v11 = vmul.f32 0.35355338, %v2742_v59  ;;  %v2949_v27 = vsel %vm686_vm1, %v6018_v60, -inf }
 0x7fc   : > { %v4231_v55 = vpop.f32.mrf.mxu1  ;;  %v6031_v25 = vadd.f32 %v5635_v57, %v2911_v2  ;;  %2950 = vmax.xlane.f32.xlu1 %v2949_v27  ;;  %v2914_v26 = vadd.f32 %v2898_v44, %v320_v56 }
 0x7fd   : > { %v2912_v63 = vadd.f32 %v2896_v19, %v6023_v18  ;;  %v2915_v21 = vadd.f32 %v2899_v11, %v6014_v16  ;;  %v6036_v43 = vadd.f32 %v5643_v38, %v2917_v28  ;;  %v2902_v6 = vmul.f32 0.35355338, %v4231_v55 }
 0x7fe   : > { %v2943_v51 = vsel %vm686_vm1, %v6031_v25, -inf  ;;  %v2745_v58 = vpop.f32.mrf.mxu1  ;;  %v6051_v28 = vadd.f32 %v5669_v37, %v2914_v26 }
 0x7ff   : > { %2944 = vmax.xlane.f32.xlu0 %v2943_v51  ;;  %v2961_v59 = vsel %vm686_vm1, %v6036_v43, -inf  ;;  %v6043_v57 = vadd.f32 %v5654_v13, %v2915_v21  ;;  %v6046_v2 = vadd.f32 %v5660_v49, %v2912_v63  ;;  %v2918_v11 = vadd.f32 %v2902_v6, %v320_v56 }
 0x800   : > { %2962 = vmax.xlane.f32.xlu1 %v2961_v59  ;;  %v2900_v44 = vmul.f32 0.35355338, %v2745_v58  ;;  %v2952_v49 = vsel %vm686_vm1, %v6051_v28, -inf }
 0x801   : > { %v2955_v38 = vsel %vm686_vm1, %v6043_v57, -inf  ;;  %v2946_v19 = vsel %vm686_vm1, %v6046_v2, -inf  ;;  %v6059_v21 = vadd.f32 %v5680_v54, %v2918_v11 }
 0x802   : > { %v2916_v27 = vadd.f32 %v2900_v44, %v6023_v18 }
 0x803   : > { %2956 = vmax.xlane.f32.xlu0 %v2955_v38  ;;  %v2964_v44 = vsel %vm686_vm1, %v6059_v21, -inf }
 0x804   : > { %v4238_v55 = vpop.f32.mrf.mxu0  ;;  %2947 = vmax.xlane.f32.xlu1 %v2946_v19 }
 0x805   : > { %v2905_v13 = vmul.f32 0.35355338, %v4238_v55  ;;  %v6067_v55 = vadd.f32 %v5695_v15, %v2916_v27 }
 0x806   : > { %v2811_v63 = vpop.f32.mrf.mxu0 }
 0x807   : > { %v2921_v6 = vadd.f32 %v2905_v13, %v319_v22  ;;  %2953 = vmax.xlane.f32.xlu0 %v2952_v49  ;;  %v2903_v37 = vmul.f32 0.35355338, %v2811_v63  ;;  %v2958_v15 = vsel %vm686_vm1, %v6067_v55, -inf }
 0x808   : > { %v4239_v26 = vpop.f32.mrf.mxu0  ;;  %v4246_v51 = vpop.f32.mrf.mxu1 }
 0x809   : > { %v2906_v58 = vmul.f32 0.35355338, %v4239_v26  ;;  %v2909_v59 = vmul.f32 0.35355338, %v4246_v51  ;;  %v6062_v38 = vadd.f32 %v5687_v10, %v2921_v6  ;;  %v2919_v13 = vadd.f32 %v2903_v37, %v6014_v16 }
 0x80a   : > { %v2880_v19 = vpop.f32.mrf.mxu1  ;;  %v2814_v11 = vpop.f32.mrf.mxu0 }
 0x80b   : > { %v2922_v35 = vadd.f32 %v2906_v58, %v320_v56  ;;  %v2925_v54 = vadd.f32 %v2909_v59, %v319_v22  ;;  %2965 = vmax.xlane.f32.xlu0 %v2964_v44  ;;  %v2907_v49 = vmul.f32 0.35355338, %v2880_v19  ;;  %v2973_v26 = vsel %vm686_vm1, %v6062_v38, -inf }
 0x80c   : > { %v4247_v63 = vpop.f32.mrf.mxu1  ;;  %2974 = vmax.xlane.f32.xlu1 %v2973_v26  ;;  %v2904_v51 = vmul.f32 0.35355338, %v2814_v11 }
 0x80d   : > { %v2910_v10 = vmul.f32 0.35355338, %v4247_v63  ;;  %v6073_v6 = vadd.f32 %v5706_v50, %v2925_v54  ;;  %v6078_v22 = vadd.f32 %v5714_v3, %v2922_v35  ;;  %v2923_v59 = vadd.f32 %v2907_v49, %v6014_v16 }
 0x80e   : > { %v2883_v58 = vpop.f32.mrf.mxu1  ;;  %v6086_v50 = vadd.f32 %v5726_v41, %v2919_v13  ;;  %v2920_v3 = vadd.f32 %v2904_v51, %v6023_v18 }
 0x80f   : > { %v2926_v27 = vadd.f32 %v2910_v10, %v320_v56  ;;  %2959 = vmax.xlane.f32.xlu0 %v2958_v15  ;;  %v2985_v37 = vsel %vm686_vm1, %v6073_v6, -inf  ;;  %v2976_v19 = vsel %vm686_vm1, %v6078_v22, -inf  ;;  %v2908_v35 = vmul.f32 0.35355338, %v2883_v58 }
 0x810   : > { %2986 = vmax.xlane.f32.xlu1 %v2985_v37  ;;  %v2967_v56 = vsel %vm686_vm1, %v6086_v50, -inf  ;;  %v6097_v54 = vadd.f32 %v5743_v14, %v2923_v59  ;;  %v6101_v11 = vadd.f32 %v5750_v7, %v2920_v3 }
 0x811   : > { %v6089_v44 = vadd.f32 %v5732_v29, %v2926_v27  ;;  %v2924_v41 = vadd.f32 %v2908_v35, %v6023_v18 }
 0x812   : > { %v2979_v29 = vsel %vm686_vm1, %v6097_v54, -inf  ;;  %v2970_v13 = vsel %vm686_vm1, %v6101_v11, -inf }
 0x813   : > { %2977 = vmax.xlane.f32.xlu0 %v2976_v19  ;;  %v2988_v16 = vsel %vm686_vm1, %v6089_v44, -inf  ;;  %v6108_v49 = vadd.f32 %v5760_v52, %v2924_v41 }
 0x814   : > { %2968 = vmax.xlane.f32.xlu1 %v2967_v56 }
 0x815   : > { %v2982_v14 = vsel %vm686_vm1, %v6108_v49, -inf }
 0x817   : > { %2989 = vmax.xlane.f32.xlu0 %v2988_v16 }
 0x818   : > { %2980 = vmax.xlane.f32.xlu1 %v2979_v29 }
 0x81b   : > { %2971 = vmax.xlane.f32.xlu0 %v2970_v13 }
 0x81f   : > { %2983 = vmax.xlane.f32.xlu0 %v2982_v14 }
 0x829   : > { %3127 = vrot.lane.b32.xlu1 %v5883_v53, %s4768_s16 }
 0x82d   : > { %3188 = vrot.lane.b32.xlu1 %v5872_v5, %s4768_s16 }
 0x831   : > { %3312 = vrot.lane.b32.xlu1 %v5877_v34, %s4768_s16 }
 0x835   : > { %3190 = vrot.lane.b32.xlu0 %v5868_v36, %s4768_s16 }
 0x839   : > { %3251 = vrot.lane.b32.xlu0 %v5893_v40, %s4768_s16 }
 0x885   : > { %v2951_v52 = vpop.xlane.xlu1 %2950 }
 0x886   : > { %v2993_v7 = vsub.f32 %v6018_v60, %v2951_v52 }
 0x888   : > { %v2945_v18 = vpop.xlane.xlu0 %2944  ;;  %v3011_v63 = vmul.f32 1.442695, %v2993_v7 }
 0x889   : > { %v2991_v26 = vsub.f32 %v6031_v25, %v2945_v18  ;;  %v2963_v53 = vpop.xlane.xlu1 %2962 }
 0x88a   : > { %4654 = vpow2.f32 %v3011_v63  ;;  %v2997_v5 = vsub.f32 %v6036_v43, %v2963_v53 }
 0x88b   : > { %v3007_v51 = vmul.f32 1.442695, %v2991_v26 }
 0x88c   : > { %v2957_v10 = vpop.xlane.xlu0 %2956  ;;  %v3019_v34 = vmul.f32 1.442695, %v2997_v5 }
 0x88d   : > { %v2995_v15 = vsub.f32 %v6043_v57, %v2957_v10  ;;  %v2948_v36 = vpop.xlane.xlu1 %2947 }
 0x88e   : > { %4656 = vpow2.f32 %v3019_v34  ;;  %v2992_v58 = vsub.f32 %v6046_v2, %v2948_v36 }
 0x88f   : > { %v3015_v27 = vmul.f32 1.442695, %v2995_v15  ;;  %4658 = vpow2.f32 %v3007_v51 }
 0x890   : > { %v2954_v40 = vpop.xlane.xlu0 %2953  ;;  %v3009_v59 = vmul.f32 1.442695, %v2992_v58 }
 0x891   : > { %v2994_v60 = vsub.f32 %v6051_v28, %v2954_v40  ;;  %4660 = vpow2.f32 %v3015_v27 }
 0x893   : > { %v3013_v37 = vmul.f32 1.442695, %v2994_v60 }
 0x894   : > { %v2966_v25 = vpop.xlane.xlu0 %2965 }
 0x895   : > { %4662 = vpow2.f32 %v3013_v37  ;;  %v2998_v43 = vsub.f32 %v6059_v21, %v2966_v25  ;;  %v2975_v19 = vpop.xlane.xlu1 %2974 }
 0x896   : > { %v3001_v57 = vsub.f32 %v6062_v38, %v2975_v19 }
 0x897   : > { %v3021_v3 = vmul.f32 1.442695, %v2998_v43  ;;  %v6130_v35 = vpop.eup %4654 }
 0x898   : > { %v2960_v56 = vpop.xlane.xlu0 %2959  ;;  %v3027_v16 = vmul.f32 1.442695, %v3001_v57  ;;  %v3045_v2 = vsel %vm686_vm1, %v6130_v35, 0.0 }
 0x899   : > { %4664 = vpow2.f32 %v3021_v3  ;;  %v2996_v28 = vsub.f32 %v6067_v55, %v2960_v56  ;;  %v2987_v41 = vpop.xlane.xlu1 %2986  ;;  %3046 = vadd.xlane.f32.xlu1 %v3045_v2 }
 0x89a   : > { %4666 = vpow2.f32 %v3009_v59  ;;  %v3005_v29 = vsub.f32 %v6073_v6, %v2987_v41 }
 0x89b   : > { %4668 = vpow2.f32 %v3027_v16  ;;  %v3017_v21 = vmul.f32 1.442695, %v2996_v28  ;;  %v6136_v13 = vpop.eup %4656 }
 0x89c   : > { %v2978_v38 = vpop.xlane.xlu0 %2977  ;;  %v3035_v14 = vmul.f32 1.442695, %v3005_v29  ;;  %v3057_v7 = vsel %vm686_vm1, %v6136_v13, 0.0  ;;  %v6141_v55 = vpop.eup %4658 }
 0x89d   : > { %v3002_v52 = vsub.f32 %v6078_v22, %v2978_v38  ;;  %4670 = vpow2.f32 %v3017_v21  ;;  %3058 = vadd.xlane.f32.xlu1 %v3057_v7  ;;  %v2969_v18 = vpop.xlane.xlu1 %2968  ;;  %v3039_v22 = vsel %vm686_vm1, %v6141_v55, 0.0 }
 0x89e   : > { %4672 = vpow2.f32 %v3035_v14  ;;  %v2999_v26 = vsub.f32 %v6086_v50, %v2969_v18  ;;  %v6144_v6 = vpop.eup %4660 }
 0x89f   : > { %v3029_v63 = vmul.f32 1.442695, %v3002_v52  ;;  %v3051_v60 = vsel %vm686_vm1, %v6144_v6, 0.0 }
 0x8a0   : > { %v2990_v53 = vpop.xlane.xlu0 %2989  ;;  %v3023_v5 = vmul.f32 1.442695, %v2999_v26 }
 0x8a1   : > { %v3006_v10 = vsub.f32 %v6089_v44, %v2990_v53  ;;  %4674 = vpow2.f32 %v3029_v63  ;;  %v2981_v34 = vpop.xlane.xlu1 %2980  ;;  %3040 = vadd.xlane.f32.xlu1 %v3039_v22 }
 0x8a2   : > { %v6149_v51 = vpop.eup %4662  ;;  %4676 = vpow2.f32 %v3023_v5  ;;  %v3003_v36 = vsub.f32 %v6097_v54, %v2981_v34 }
 0x8a3   : > { %v3037_v15 = vmul.f32 1.442695, %v3006_v10  ;;  %v3048_v50 = vsel %vm686_vm1, %v6149_v51, 0.0 }
 0x8a4   : > { %3049 = vadd.xlane.f32.xlu0 %v3048_v50  ;;  %v2972_v27 = vpop.xlane.xlu0 %2971  ;;  %v3031_v40 = vmul.f32 1.442695, %v3003_v36  ;;  %v6478_v36 = vpack.i.bf16 %v5559_v12, %v5555_v23  ;;  %v6479_v50 = vld [vmem:[#allocation22_spill] sm:$0xff]  ;;  %v6492_v23 = vld [vmem:[#allocation23_spill] sm:$0xff]  ;;  %v6493_v12 = vld [vmem:[#allocation21_spill] sm:$0xff] }
 0x8a5   : > { %v3000_v44 = vsub.f32 %v6101_v11, %v2972_v27  ;;  %4678 = vpow2.f32 %v3037_v15  ;;  %3052 = vadd.xlane.f32.xlu1 %v3051_v60  ;;  %v3128_v37 = vpop.permute.xlu1 %3127  ;;  %v6480_v27 = vld [vmem:[#allocation19_spill] sm:$0xff]  ;;  %v6483_v60 = vld [vmem:[#allocation24_spill] sm:$0xff] }
 0x8a6   : > { %v6157_v58 = vpop.eup %4664  ;;  %4680 = vpow2.f32 %v3031_v40  ;;  %4250 = vmatprep.subr.bf16.mxu0 %v3128_v37  ;;  %v6481_v40 = vpack.i.bf16 %v6479_v50, %v6480_v27 }
 0x8a7   : > { %v6159_v25 = vpop.eup %4666  ;;  %v3025_v54 = vmul.f32 1.442695, %v3000_v44  ;;  %v3060_v43 = vsel %vm686_vm1, %v6157_v58, 0.0  ;;  %4251 = vmatpush3.bf16.msra.mxu0 %v3128_v37  ;;  %v6482_v44 = vld [vmem:[#allocation26_spill] sm:$0xff] }
 0x8a8   : > { %v6163_v59 = vpop.eup %4668  ;;  %3061 = vadd.xlane.f32.xlu0 %v3060_v43  ;;  %v2984_v11 = vpop.xlane.xlu0 %2983  ;;  %v3042_v28 = vsel %vm686_vm1, %v6159_v25, 0.0  ;;  %v6484_v37 = vpack.i.bf16 %v6482_v44, %v6483_v60  ;;  %v6486_v43 = vld [vmem:[#allocation30_spill] sm:$0xff] }
 0x8a9   : > { %v3004_v19 = vsub.f32 %v6108_v49, %v2984_v11  ;;  %v3069_v3 = vsel %vm686_vm1, %v6163_v59, 0.0  ;;  %v3189_v57 = vpop.permute.xlu1 %3188  ;;  %4682 = vpow2.f32 %v3025_v54  ;;  %v6485_v54 = vld [vmem:[#allocation32_spill] sm:$0xff]  ;;  %v6487_v11 = vld [vmem:[#allocation27_spill] sm:$0xff] }
 0x8aa   : > { %3070 = vadd.xlane.f32.xlu1 %v3069_v3  ;;  %v6168_v56 = vpop.eup %4670  ;;  %v6490_v3 = vld [vmem:[#allocation18_spill] sm:$0xff] }
 0x8ab   : > { %v3033_v16 = vmul.f32 1.442695, %v3004_v19  ;;  %v6172_v2 = vpop.eup %4672  ;;  %v3054_v29 = vsel %vm686_vm1, %v6168_v56, 0.0  ;;  %v6488_v19 = vpack.i.bf16 %v6486_v43, %v6487_v11 }
 0x8ac   : > { %3043 = vadd.xlane.f32.xlu0 %v3042_v28  ;;  %v3191_v41 = vpop.permute.xlu0 %3190  ;;  %v3081_v21 = vsel %vm686_vm1, %v6172_v2, 0.0  ;;  %v6495_v28 = vld [vmem:[#allocation28_spill] sm:$0xff] }
 0x8ad   : > { %4256 = vmatprep.subr.bf16.mxu1 %v3191_v41  ;;  %4684 = vpow2.f32 %v3033_v16  ;;  %v6182_v14 = vpop.permute.xlu1 %3312  ;;  %v6494_v16 = vpack.i.bf16 %v6492_v23, %v6493_v12 }
 0x8ae   : > { %3082 = vadd.xlane.f32.xlu1 %v3081_v21  ;;  %4257 = vmatpush3.bf16.msra.mxu1 %v3191_v41  ;;  %v6176_v49 = vpop.eup %4674  ;;  %v6496_v41 = vld [vmem:[#allocation25_spill] sm:$0xff] }
 0x8af   : > { %4258 = vmatprep.subr.bf16.mxu1 %v3189_v57  ;;  %v6180_v38 = vpop.eup %4676  ;;  %v3072_v63 = vsel %vm686_vm1, %v6176_v49, 0.0  ;;  %v6497_v21 = vpack.i.bf16 %v6495_v28, %v6496_v41 }
 0x8b0   : > { %3055 = vadd.xlane.f32.xlu0 %v3054_v29  ;;  %v6184_v52 = vpop.permute.xlu0 %3251  ;;  %v3063_v7 = vsel %vm686_vm1, %v6180_v38, 0.0  ;;  %v6498_v29 = vld [vmem:[#allocation31_spill] sm:$0xff] }
 0x8b1   : > { %4264 = vmatprep.subr.bf16.mxu0 %v6184_v52 }
 0x8b2   : > { %3064 = vadd.xlane.f32.xlu1 %v3063_v7  ;;  %4259 = vmatpush3.bf16.msra.mxu1 %v3189_v57  ;;  %v6189_v18 = vpop.eup %4678  ;;  %v6499_v7 = vld [vmem:[#allocation29_spill] sm:$0xff] }
 0x8b3   : > { %4272 = vmatprep.subr.bf16.mxu1 %v6182_v14  ;;  %v6194_v26 = vpop.eup %4680  ;;  %v3084_v5 = vsel %vm686_vm1, %v6189_v18, 0.0  ;;  %v6500_v32 = vpack.i.bf16 %v6498_v29, %v6499_v7 }
 0x8b4   : > { %3073 = vadd.xlane.f32.xlu0 %v3072_v63  ;;  %v3075_v53 = vsel %vm686_vm1, %v6194_v26, 0.0 }
 0x8b6   : > { %3076 = vadd.xlane.f32.xlu1 %v3075_v53  ;;  %v6200_v10 = vpop.eup %4682 }
 0x8b7   : > { %v3066_v22 = vsel %vm686_vm1, %v6200_v10, 0.0 }
 0x8b8   : > { %3085 = vadd.xlane.f32.xlu0 %v3084_v5 }
 0x8ba   : > { %v6204_v34 = vpop.eup %4684 }
 0x8bb   : > { %v3078_v15 = vsel %vm686_vm1, %v6204_v34, 0.0 }
 0x8bc   : > { %3067 = vadd.xlane.f32.xlu0 %v3066_v22 }
 0x8c0   : > { %3079 = vadd.xlane.f32.xlu0 %v3078_v15 }
 0x8c7   : > { %3310 = vrot.lane.b32.xlu1 %v5887_v42, %s4768_s16  ;;  %v6489_v42 = vld [vmem:[#allocation20_spill] sm:$0xff] }
 0x8c8   : > { %v6491_v57 = vpack.i.bf16 %v6489_v42, %v6490_v3 }
 0x8cb   : > { %4340 = vrot.lane.b32.xlu1 %v6478_v36, %s4769_s25 }
 0x8cf   : > { %4350 = vrot.lane.b32.xlu1 %v6481_v40, %s4769_s25 }
 0x8d3   : > { %4360 = vrot.lane.b32.xlu1 %v6484_v37, %s4769_s25 }
 0x8d6   : > { %3249 = vrot.lane.b32.xlu0 %v6485_v54, %s4768_s16 }
 0x8d7   : > { %4370 = vrot.lane.b32.xlu1 %v6488_v19, %s4769_s25 }
 0x8da   : > { %4335 = vrot.lane.b32.xlu0 %v6491_v57, %s4769_s25 }
 0x8db   : > { %4380 = vrot.lane.b32.xlu1 %v4379_v47, %s4770_s26  ;;  %v6503_v47 = vpack.i.bf16 %v5980_v9, %v5972_v1 }
 0x8de   : > { %4345 = vrot.lane.b32.xlu0 %v6494_v16, %s4769_s25 }
 0x8df   : > { %4390 = vrot.lane.b32.xlu1 %v4389_v0, %s4770_s26  ;;  %v6505_v0 = vpack.i.bf16 %v6004_v39, %v5996_v48 }
 0x8e2   : > { %4355 = vrot.lane.b32.xlu0 %v6497_v21, %s4769_s25 }
 0x8e3   : > { %4400 = vrot.lane.b32.xlu1 %v4399_v4, %s4770_s26 }
 0x8e6   : > { %4365 = vrot.lane.b32.xlu0 %v6500_v32, %s4769_s25 }
 0x8e7   : > { %4410 = vrot.lane.b32.xlu1 %v6501_v20, %s4770_s26 }
 0x8ea   : > { %4375 = vrot.lane.b32.xlu0 %v6502_v30, %s4770_s26 }
 0x8ee   : > { %4385 = vrot.lane.b32.xlu0 %v6503_v47, %s4770_s26 }
 0x8f2   : > { %4395 = vrot.lane.b32.xlu0 %v6504_v31, %s4770_s26 }
 0x8f6   : > { %4405 = vrot.lane.b32.xlu0 %v6505_v0, %s4770_s26 }
 0x922   : > { %v3047_v8 = vpop.xlane.xlu1 %3046 }
 0x926   : > { %v3059_v24 = vpop.xlane.xlu1 %3058 }
 0x92a   : > { %v3041_v61 = vpop.xlane.xlu1 %3040 }
 0x92d   : > { %v3050_v4 = vpop.xlane.xlu0 %3049 }
 0x92e   : > { %v3053_v46 = vpop.xlane.xlu1 %3052  ;;  %4686 = vrcp.f32 %v3050_v4 }
 0x92f   : > { %4688 = vrcp.f32 %v3041_v61 }
 0x930   : > { %4690 = vrcp.f32 %v3047_v8 }
 0x931   : > { %v3062_v63 = vpop.xlane.xlu0 %3061 }
 0x933   : > { %v3071_v17 = vpop.xlane.xlu1 %3070 }
 0x935   : > { %v3044_v62 = vpop.xlane.xlu0 %3043 }
 0x936   : > { %4692 = vrcp.f32 %v3044_v62 }
 0x937   : > { %4694 = vrcp.f32 %v3062_v63  ;;  %v3083_v9 = vpop.xlane.xlu1 %3082 }
 0x938   : > { %4696 = vrcp.f32 %v3053_v46 }
 0x939   : > { %4698 = vrcp.f32 %v3059_v24  ;;  %v3056_v1 = vpop.xlane.xlu0 %3055 }
 0x93a   : > { %4700 = vrcp.f32 %v3056_v1 }
 0x93b   : > { %v4687_v33 = vpop.eup %4686  ;;  %v3065_v48 = vpop.xlane.xlu1 %3064  ;;  %4702 = vrcp.f32 %v3071_v17 }
 0x93c   : > { %v4689_v39 = vpop.eup %4688  ;;  %v3094_v15 = vmul.f32 %v4687_v33, %v6149_v51 }
 0x93d   : > { %v3074_v45 = vpop.xlane.xlu0 %3073  ;;  %v4691_v5 = vpop.eup %4690  ;;  %v3088_v50 = vmul.f32 %v4689_v39, %v6141_v55 }
 0x93e   : > { %4704 = vrcp.f32 %v3074_v45  ;;  %v3092_v60 = vmul.f32 %v4691_v5, %v6130_v35 }
 0x93f   : > { %4706 = vrcp.f32 %v3065_v48  ;;  %v3077_v54 = vpop.xlane.xlu1 %3076 }
 0x940   : > { %v3120_v19 = vpack.c.bf16 %v3094_v15, %v3092_v60 }
 0x941   : > { %v3086_v53 = vpop.xlane.xlu0 %3085 }
 0x943   : > { %v4693_v22 = vpop.eup %4692  ;;  %v3311_v23 = vpop.permute.xlu1 %3310 }
 0x944   : > { %v4695_v36 = vpop.eup %4694  ;;  %v3090_v27 = vmul.f32 %v4693_v22, %v6159_v25 }
 0x945   : > { %v4697_v40 = vpop.eup %4696  ;;  %v3068_v44 = vpop.xlane.xlu0 %3067  ;;  %v3102_v51 = vmul.f32 %v4695_v36, %v6157_v58 }
 0x946   : > { %v4699_v37 = vpop.eup %4698  ;;  %4708 = vrcp.f32 %v3068_v44  ;;  %v3119_v43 = vpack.c.bf16 %v3090_v27, %v3088_v50  ;;  %v3096_v55 = vmul.f32 %v4697_v40, %v6144_v6 }
 0x947   : > { %v4701_v11 = vpop.eup %4700  ;;  %4710 = vrcp.f32 %v3083_v9  ;;  %v3100_v42 = vmul.f32 %v4699_v37, %v6136_v13  ;;  %v4341_v36 = vpop.permute.xlu1 %4340 }
 0x948   : > { %4712 = vrcp.f32 %v3086_v53  ;;  %4252 = vmatprep.mubr.msk.bf16.mxu0 %vm686_vm1, %v3119_v43  ;;  %v3098_v25 = vmul.f32 %v4701_v11, %v6168_v56  ;;  %v4703_v6 = vpop.eup %4702 }
 0x949   : > { %4714 = vrcp.f32 %v3077_v54  ;;  %4253 = vmatmul.mubr.msk.bf16.vlgmr.msra.gmra.mxu0 %vm686_vm1, %v3120_v19  ;;  %v3080_v35 = vpop.xlane.xlu0 %3079  ;;  %v3122_v57 = vpack.c.bf16 %v3102_v51, %v3100_v42  ;;  %v3108_v7 = vmul.f32 %v4703_v6, %v6163_v59  ;;  %v4342_v42 = vunpack.i.l.bf16 %v4341_v36 }
 0x94a   : > { %4265 = vmatpush3.bf16.msra.mxu0 %v6184_v52  ;;  %4716 = vrcp.f32 %v3080_v35  ;;  %v3121_v3 = vpack.c.bf16 %v3098_v25, %v3096_v55  ;;  %v4343_v35 = vunpack.i.h.bf16 %v4341_v36 }
 0x94b   : > { %v4705_v56 = vpop.eup %4704  ;;  %v4351_v27 = vpop.permute.xlu1 %4350 }
 0x94c   : > { %4260 = vmatprep.mubr.msk.bf16.mxu1 %vm686_vm1, %v3121_v3  ;;  %v4707_v12 = vpop.eup %4706  ;;  %v3110_v16 = vmul.f32 %v4705_v56, %v6176_v49  ;;  %v4353_v3 = vunpack.i.h.bf16 %v4351_v27 }
 0x94d   : > { %4261 = vmatmul.mubr.msk.bf16.vlgmr.msra.gmra.mxu1 %vm686_vm1, %v3122_v57  ;;  %v3250_v58 = vpop.permute.xlu0 %3249  ;;  %v3104_v41 = vmul.f32 %v4707_v12, %v6180_v38  ;;  %v4352_v57 = vunpack.i.l.bf16 %v4351_v27 }
 0x94e   : > { %4273 = vmatpush3.bf16.msra.mxu1 %v6182_v14  ;;  %4266 = vmatprep.subr.bf16.mxu0 %v3250_v58  ;;  %v3124_v20 = vpack.c.bf16 %v3110_v16, %v3108_v7  ;;  %v6506_v16 = vld [vmem:[#allocation5_spill] sm:$0xff] }
 0x94f   : > { %4267 = vmatpush3.bf16.msra.mxu0 %v3250_v58  ;;  %4274 = vmatprep.subr.bf16.mxu1 %v3311_v23  ;;  %v6286_v44 = vpop.permute.xlu1 %4360 }
 0x951   : > { %v4336_v50 = vpop.permute.xlu0 %4335 }
 0x952   : > { %4275 = vmatpush3.bf16.msra.mxu1 %v3311_v23  ;;  %v4338_v58 = vunpack.i.h.bf16 %v4336_v50  ;;  %v4337_v23 = vunpack.i.l.bf16 %v4336_v50 }
 0x953   : > { %v4709_v13 = vpop.eup %4708  ;;  %v6290_v37 = vpop.permute.xlu1 %4370 }
 0x954   : > { %v4711_v52 = vpop.eup %4710  ;;  %v3106_v21 = vmul.f32 %v4709_v13, %v6200_v10 }
 0x955   : > { %v4713_v28 = vpop.eup %4712  ;;  %v3116_v49 = vmul.f32 %v4711_v52, %v6172_v2  ;;  %v4346_v40 = vpop.permute.xlu0 %4345 }
 0x956   : > { %v4715_v29 = vpop.eup %4714  ;;  %v3123_v32 = vpack.c.bf16 %v3106_v21, %v3104_v41  ;;  %v3118_v30 = vmul.f32 %v4713_v28, %v6189_v18  ;;  %v4348_v6 = vunpack.i.h.bf16 %v4346_v40  ;;  %v4347_v56 = vunpack.i.l.bf16 %v4346_v40  ;;  %v6507_v41 = vld [vmem:[#allocation2_spill] sm:$0xff] }
 0x957   : > { %v4717_v14 = vpop.eup %4716  ;;  %v3112_v47 = vmul.f32 %v4715_v29, %v6194_v26  ;;  %v4381_v43 = vpop.permute.xlu1 %4380  ;;  %v3566_v28 = vsel %vm351_vm0, %v6506_v16, %v4343_v35  ;;  %v3565_v21 = vsel %vm351_vm0, %v6507_v41, %v4342_v42  ;;  %v4363_v41 = vunpack.i.h.bf16 %v6286_v44 }
 0x958   : > { %4268 = vmatprep.mubr.msk.bf16.mxu0 %vm686_vm1, %v3123_v32  ;;  %v3114_v31 = vmul.f32 %v4717_v14, %v6204_v34  ;;  %v3126_v10 = vpack.c.bf16 %v3118_v30, %v3116_v49  ;;  %v4382_v12 = vunpack.i.l.bf16 %v4381_v43  ;;  %v4383_v52 = vunpack.i.h.bf16 %v4381_v43  ;;  %v6508_v32 = vld [vmem:[#allocation8_spill] sm:$0xff] }
 0x959   : > { %4269 = vmatmul.mubr.msk.bf16.vlgmr.msra.gmra.mxu0 %vm686_vm1, %v3124_v20  ;;  %v6288_v60 = vpop.permute.xlu0 %4355  ;;  %v3570_v20 = vsel %vm351_vm0, %v6508_v32, %v4353_v3  ;;  %v6509_v30 = vld [vmem:[#allocation4_spill] sm:$0xff] }
 0x95a   : > { %v3125_v38 = vpack.c.bf16 %v3114_v31, %v3112_v47  ;;  %v3569_v47 = vsel %vm351_vm0, %v6509_v30, %v4352_v57  ;;  %v6510_v31 = vld [vmem:[#allocation7_spill] sm:$0xff]  ;;  %v4358_v32 = vunpack.i.h.bf16 %v6288_v60 }
 0x95b   : > { %v4391_v19 = vpop.permute.xlu1 %4390  ;;  %v3564_v49 = vsel %vm351_vm0, %v6510_v31, %v4338_v58 }
 0x95c   : > { %4276 = vmatprep.mubr.msk.bf16.mxu1 %vm686_vm1, %v3125_v38  ;;  %v6511_v38 = vld [vmem:[#allocation3_spill] sm:$0xff] }
 0x95d   : > { %4277 = vmatmul.mubr.msk.bf16.vlgmr.msra.gmra.mxu1 %vm686_vm1, %v3126_v10  ;;  %v6292_v54 = vpop.permute.xlu0 %4365  ;;  %v3563_v10 = vsel %vm351_vm0, %v6511_v38, %v4337_v23  ;;  %v6514_v38 = vld [vmem:[#allocation13_spill] sm:$0xff] }
 0x95e   : > { %v4368_v30 = vunpack.i.h.bf16 %v6292_v54 }
 0x95f   : > { %v6296_v55 = vpop.permute.xlu1 %4400 }
 0x960   : > { %v4403_v31 = vunpack.i.h.bf16 %v6296_v55 }
 0x961   : > { %v4376_v11 = vpop.permute.xlu0 %4375 }
 0x962   : > { %v4378_v29 = vunpack.i.h.bf16 %v4376_v11  ;;  %v4377_v7 = vunpack.i.l.bf16 %v4376_v11 }
 0x963   : > { %v6300_v13 = vpop.permute.xlu1 %4410 }
 0x965   : > { %v6294_v51 = vpop.permute.xlu0 %4385 }
 0x969   : > { %v6298_v25 = vpop.permute.xlu0 %4395 }
 0x96d   : > { %v6306_v14 = vpop.permute.xlu0 %4405 }
 0xa09   : > { %v4254_v59 = vpop.f32.mrf.mxu0 }
 0xa0b   : > { %v3173_v0 = vpop.f32.mrf.mxu0 }
 0xa0d   : > { %v4255_v8 = vpop.f32.mrf.mxu0  ;;  %v4262_v18 = vpop.f32.mrf.mxu1 }
 0xa0e   : > { %v4414_v24 = vpack.i.bf16 %v4255_v8, %v4254_v59  ;;  %v6512_v59 = vld [vmem:[#allocation10_spill] sm:$0xff] }
 0xa0f   : > { %v3176_v61 = vpop.f32.mrf.mxu0  ;;  %v3234_v4 = vpop.f32.mrf.mxu1  ;;  %v6513_v8 = vld [vmem:[#allocation6_spill] sm:$0xff] }
 0xa10   : > { %v4424_v26 = vpack.i.bf16 %v3176_v61, %v3173_v0  ;;  %4415 = vrot.lane.b32.xlu1 %v4414_v24, %s4771_s27  ;;  %v3568_v0 = vsel %vm351_vm0, %v6512_v59, %v4348_v6  ;;  %v3582_v24 = vsel %vm3579_vm2, %v3565_v21, %v4382_v12  ;;  %v4362_v21 = vunpack.i.l.bf16 %v6286_v44  ;;  %v6515_v59 = vld [vmem:[#allocation9_spill] sm:$0xff] }
 0xa11   : > { %v4263_v34 = vpop.f32.mrf.mxu1  ;;  %v4402_v44 = vunpack.i.l.bf16 %v6296_v55  ;;  %v6519_v55 = vld [vmem:[#allocation11_spill] sm:$0xff] }
 0xa12   : > { %v4419_v46 = vpack.i.bf16 %v4263_v34, %v4262_v18  ;;  %4425 = vrot.lane.b32.xlu0 %v4424_v26, %s4771_s27  ;;  %v3567_v18 = vsel %vm351_vm0, %v6513_v8, %v4347_v56  ;;  %v4393_v26 = vunpack.i.h.bf16 %v4391_v19  ;;  %v6516_v8 = vld [vmem:[#allocation16_spill] sm:$0xff] }
 0xa13   : > { %v3237_v2 = vpop.f32.mrf.mxu1 }
 0xa14   : > { %v4429_v63 = vpack.i.bf16 %v3237_v2, %v3234_v4  ;;  %4420 = vrot.lane.b32.xlu1 %v4419_v46, %s4771_s27  ;;  %v3583_v4 = vsel %vm3579_vm2, %v3566_v28, %v4383_v52  ;;  %v4392_v2 = vunpack.i.l.bf16 %v4391_v19  ;;  %v3587_v43 = vsel %vm3579_vm2, %v3570_v20, %v4393_v26  ;;  %v6520_v26 = vld [vmem:[#allocation17_spill] sm:$0xff] }
 0xa15   : > { %v4357_v20 = vunpack.i.l.bf16 %v6288_v60 }
 0xa16   : > { %4430 = vrot.lane.b32.xlu0 %v4429_v63, %s4771_s27  ;;  %v3580_v63 = vsel %vm3579_vm2, %v3563_v10, %v4377_v7  ;;  %v3586_v40 = vsel %vm3579_vm2, %v3569_v47, %v4392_v2  ;;  %v4372_v7 = vunpack.i.l.bf16 %v6290_v37  ;;  %v4367_v47 = vunpack.i.l.bf16 %v6292_v54 }
 0xa17   : > { %v3574_v10 = vsel %vm351_vm0, %v6514_v38, %v4363_v41 }
 0xa19   : > { %v4270_v17 = vpop.f32.mrf.mxu0 }
 0xa1b   : > { %v3295_v62 = vpop.f32.mrf.mxu0 }
 0xa1d   : > { %v4271_v1 = vpop.f32.mrf.mxu0  ;;  %v4278_v9 = vpop.f32.mrf.mxu1 }
 0xa1e   : > { %v4434_v45 = vpack.i.bf16 %v4271_v1, %v4270_v17  ;;  %v3581_v17 = vsel %vm3579_vm2, %v3564_v49, %v4378_v29  ;;  %v4373_v29 = vunpack.i.h.bf16 %v6290_v37  ;;  %v4398_v49 = vunpack.i.h.bf16 %v6298_v25 }
 0xa1f   : > { %v3298_v33 = vpop.f32.mrf.mxu0  ;;  %v3356_v48 = vpop.f32.mrf.mxu1  ;;  %v4397_v37 = vunpack.i.l.bf16 %v6298_v25  ;;  %v3576_v25 = vsel %vm351_vm0, %v6520_v26, %v4368_v30 }
 0xa20   : > { %v4439_v39 = vpack.i.bf16 %v3298_v33, %v3295_v62  ;;  %4435 = vrot.lane.b32.xlu1 %v4434_v45, %s4771_s27  ;;  %v3578_v60 = vsel %vm351_vm0, %v6516_v8, %v4373_v29 }
 0xa21   : > { %v4279_v53 = vpop.f32.mrf.mxu1 }
 0xa22   : > { %v4449_v5 = vpack.i.bf16 %v4279_v53, %v4278_v9  ;;  %4440 = vrot.lane.b32.xlu0 %v4439_v39, %s4771_s27  ;;  %v4387_v39 = vunpack.i.l.bf16 %v6294_v51 }
 0xa23   : > { %v3359_v22 = vpop.f32.mrf.mxu1 }
 0xa24   : > { %v4444_v15 = vpack.i.bf16 %v3359_v22, %v3356_v48  ;;  %4450 = vrot.lane.b32.xlu1 %v4449_v5, %s4771_s27  ;;  %v4388_v48 = vunpack.i.h.bf16 %v6294_v51  ;;  %v3584_v58 = vsel %vm3579_vm2, %v3567_v18, %v4387_v39  ;;  %v6517_v18 = vld [vmem:[#allocation12_spill] sm:$0xff] }
 0xa25   : > { %v3577_v54 = vsel %vm351_vm0, %v6517_v18, %v4372_v7 }
 0xa26   : > { %4445 = vrot.lane.b32.xlu0 %v4444_v15, %s4771_s27  ;;  %v3585_v23 = vsel %vm3579_vm2, %v3568_v0, %v4388_v48  ;;  %v3573_v0 = vsel %vm351_vm0, %v6515_v59, %v4362_v21 }
 0xa82   : > { %v4416_v61 = vpop.permute.xlu1 %4415 }
 0xa83   : > { %v4418_v34 = vunpack.i.h.bf16 %v4416_v61  ;;  %v4417_v46 = vunpack.i.l.bf16 %v4416_v61 }
 0xa84   : > { %v4426_v62 = vpop.permute.xlu0 %4425 }
 0xa85   : > { %v3600_v1 = vsel %vm3596_vm3, %v3583_v4, %v4418_v34  ;;  %v3599_v9 = vsel %vm3596_vm3, %v3582_v24, %v4417_v46  ;;  %v4428_v45 = vunpack.i.h.bf16 %v4426_v62  ;;  %v4427_v33 = vunpack.i.l.bf16 %v4426_v62  ;;  %v6518_v24 = vld [vmem:[#allocation15_spill] sm:$0xff]  ;;  %v6521_v34 = vld [vmem:[#allocation14_spill] sm:$0xff] }
 0xa86   : > { %v3883_v53 = vpack.c.bf16 %v3600_v1, %v3600_v1  ;;  %v3882_v5 = vpack.c.bf16 %v3599_v9, %v3599_v9  ;;  %v4421_v22 = vpop.permute.xlu1 %4420  ;;  %v3572_v61 = vsel %vm351_vm0, %v6518_v24, %v4358_v32  ;;  %v3571_v4 = vsel %vm351_vm0, %v6519_v55, %v4357_v20 }
 0xa87   : > { %v3597_v15 = vsel %vm3596_vm3, %v3580_v63, %v4427_v33  ;;  %v3598_v36 = vsel %vm3596_vm3, %v3581_v17, %v4428_v45  ;;  %v4423_v50 = vunpack.i.h.bf16 %v4421_v22  ;;  %v4422_v27 = vunpack.i.l.bf16 %v4421_v22 }
 0xa88   : > { %3681 = vst.msk [vmem:[%s6329_s4 + $0xc] sm:$0xf] %vm3677_vm4, %v3883_v53  ;;  %3680 = vst.msk [vmem:[%s6329_s4 + $0x8] sm:$0xf] %vm3677_vm4, %v3882_v5  ;;  %v3880_v11 = vpack.c.bf16 %v3597_v15, %v3597_v15  ;;  %v3881_v19 = vpack.c.bf16 %v3598_v36, %v3598_v36  ;;  %v4431_v51 = vpop.permute.xlu0 %4430  ;;  %v3575_v46 = vsel %vm351_vm0, %v6521_v34, %v4367_v47  ;;  %v4413_v9 = vunpack.i.h.bf16 %v6300_v13 }
 0xa89   : > { %v3604_v35 = vsel %vm3596_vm3, %v3587_v43, %v4423_v50  ;;  %v3603_v42 = vsel %vm3596_vm3, %v3586_v40, %v4422_v27  ;;  %v4433_v3 = vunpack.i.h.bf16 %v4431_v51  ;;  %v4432_v57 = vunpack.i.l.bf16 %v4431_v51 }
 0xa8a   : > { %3678 = vst.msk [vmem:[%s6329_s4] sm:$0xf] %vm3677_vm4, %v3880_v11  ;;  %3679 = vst.msk [vmem:[%s6329_s4 + $0x4] sm:$0xf] %vm3677_vm4, %v3881_v19  ;;  %v3887_v6 = vpack.c.bf16 %v3604_v35, %v3604_v35  ;;  %v3886_v56 = vpack.c.bf16 %v3603_v42, %v3603_v42  ;;  %v3590_v63 = vsel %vm3579_vm2, %v3573_v0, %v4402_v44  ;;  %v4412_v45 = vunpack.i.l.bf16 %v6300_v13 }
 0xa8b   : > { %v3601_v12 = vsel %vm3596_vm3, %v3584_v58, %v4432_v57  ;;  %v3602_v52 = vsel %vm3596_vm3, %v3585_v23, %v4433_v3  ;;  %v3591_v17 = vsel %vm3579_vm2, %v3574_v10, %v4403_v31  ;;  %v3588_v33 = vsel %vm3579_vm2, %v3571_v4, %v4397_v37 }
 0xa8c   : > { %3685 = vst.msk [vmem:[%s6329_s4 + $0x1c] sm:$0xf] %vm3677_vm4, %v3887_v6  ;;  %3684 = vst.msk [vmem:[%s6329_s4 + $0x18] sm:$0xf] %vm3677_vm4, %v3886_v56  ;;  %v3884_v16 = vpack.c.bf16 %v3601_v12, %v3601_v12  ;;  %v3885_v28 = vpack.c.bf16 %v3602_v52, %v3602_v52  ;;  %v3589_v48 = vsel %vm3579_vm2, %v3572_v61, %v4398_v49  ;;  %v4408_v36 = vunpack.i.h.bf16 %v6306_v14 }
 0xa8d   : > { %v4407_v50 = vunpack.i.l.bf16 %v6306_v14  ;;  %v3594_v35 = vsel %vm3579_vm2, %v3577_v54, %v4412_v45  ;;  %v3595_v42 = vsel %vm3579_vm2, %v3578_v60, %v4413_v9 }
 0xa8e   : > { %3682 = vst.msk [vmem:[%s6329_s4 + $0x10] sm:$0xf] %vm3677_vm4, %v3884_v16  ;;  %3683 = vst.msk [vmem:[%s6329_s4 + $0x14] sm:$0xf] %vm3677_vm4, %v3885_v28  ;;  %v3593_v52 = vsel %vm3579_vm2, %v3576_v25, %v4408_v36 }
 0xa8f   : > { %v3592_v12 = vsel %vm3579_vm2, %v3575_v46, %v4407_v50 }
 0xa92   : > { %v4436_v2 = vpop.permute.xlu1 %4435 }
 0xa93   : > { %v4438_v62 = vunpack.i.h.bf16 %v4436_v2  ;;  %v4437_v1 = vunpack.i.l.bf16 %v4436_v2 }
 0xa94   : > { %v4441_v39 = vpop.permute.xlu0 %4440 }
 0xa95   : > { %v3608_v53 = vsel %vm3596_vm3, %v3591_v17, %v4438_v62  ;;  %v3607_v5 = vsel %vm3596_vm3, %v3590_v63, %v4437_v1  ;;  %v4443_v22 = vunpack.i.h.bf16 %v4441_v39  ;;  %v4442_v15 = vunpack.i.l.bf16 %v4441_v39 }
 0xa96   : > { %v3891_v27 = vpack.c.bf16 %v3608_v53, %v3608_v53  ;;  %v3890_v40 = vpack.c.bf16 %v3607_v5, %v3607_v5  ;;  %v4451_v13 = vpop.permute.xlu1 %4450 }
 0xa97   : > { %v3605_v43 = vsel %vm3596_vm3, %v3588_v33, %v4442_v15  ;;  %v3606_v11 = vsel %vm3596_vm3, %v3589_v48, %v4443_v22  ;;  %v4453_v19 = vunpack.i.h.bf16 %v4451_v13  ;;  %v4452_v51 = vunpack.i.l.bf16 %v4451_v13 }
 0xa98   : > { %3689 = vst.msk [vmem:[%s6329_s4 + $0x2c] sm:$0xf] %vm3677_vm4, %v3891_v27  ;;  %3688 = vst.msk [vmem:[%s6329_s4 + $0x28] sm:$0xf] %vm3677_vm4, %v3890_v40  ;;  %v3888_v14 = vpack.c.bf16 %v3605_v43, %v3605_v43  ;;  %v3889_v3 = vpack.c.bf16 %v3606_v11, %v3606_v11  ;;  %v4446_v57 = vpop.permute.xlu0 %4445 }
 0xa99   : > { %v3612_v58 = vsel %vm3596_vm3, %v3595_v42, %v4453_v19  ;;  %v3611_v23 = vsel %vm3596_vm3, %v3594_v35, %v4452_v51  ;;  %v4448_v6 = vunpack.i.h.bf16 %v4446_v57  ;;  %v4447_v56 = vunpack.i.l.bf16 %v4446_v57 }
 0xa9a   : > { %3686 = vst.msk [vmem:[%s6329_s4 + $0x20] sm:$0xf] %vm3677_vm4, %v3888_v14  ;;  %3687 = vst.msk [vmem:[%s6329_s4 + $0x24] sm:$0xf] %vm3677_vm4, %v3889_v3  ;;  %v3895_v16 = vpack.c.bf16 %v3612_v58, %v3612_v58  ;;  %v3894_v28 = vpack.c.bf16 %v3611_v23, %v3611_v23 }
 0xa9b   : > { %v3609_v41 = vsel %vm3596_vm3, %v3592_v12, %v4447_v56  ;;  %v3610_v21 = vsel %vm3596_vm3, %v3593_v52, %v4448_v6 }
 0xa9c   : > { %3693 = vst.msk [vmem:[%s6329_s4 + $0x3c] sm:$0xf] %vm3677_vm4, %v3895_v16  ;;  %3692 = vst.msk [vmem:[%s6329_s4 + $0x38] sm:$0xf] %vm3677_vm4, %v3894_v28  ;;  %v3892_v29 = vpack.c.bf16 %v3609_v41, %v3609_v41  ;;  %v3893_v7 = vpack.c.bf16 %v3610_v21, %v3610_v21 }
 0xa9e   : > { %3690 = vst.msk [vmem:[%s6329_s4 + $0x30] sm:$0xf] %vm3677_vm4, %v3892_v29  ;;  %3691 = vst.msk [vmem:[%s6329_s4 + $0x34] sm:$0xf] %vm3677_vm4, %v3893_v7 }
 0xa9f PF: > { %s13_s12 = sadd.s32 1, %s4756_s12  }
 0xaa0   : > { %p10_p7 = scmp.ge.s32.totalorder %s13_s12, 6  }
 0xaa2   :  { %12 = sbr.rel (!%p10_p7) target bundleno = 1 (0x1), region = 65 }

</bundles_post_ra>
